<compile_context>
chip_gen: v7x
topology: tpu7x:2x2x1
jax: 0.10.0
libtpu: 0.0.40
codegen_flags: <defaults>
</compile_context>

<pallas_src>
import functools
import math

import jax
import jax.numpy as jnp
from jax import lax
from jax.experimental import pallas as pl
from jax.experimental.pallas import tpu as pltpu

L1_WEIGHT = 0.1
EPS_L1 = 0.01
EPS_RENDER = 0.1
N_RANDOM = 3
N_SPECULAR = 6
N_SCENES = N_RANDOM + N_SPECULAR
PI = math.pi          # plain Python float: never captured as a traced constant
LANE = 128
NCH = 10              # normals(3) diffuse(3) roughness(1) specular(3)


# ----------------------------- Pallas kernel ------------------------------ #
def _mixed_loss_kernel(views_ref, lights_ref, intens_ref,
                       in_ref, tgt_ref, coords_ref, out_ref,
                       *, n_chunks, chunk):
    # Hoist the per-scene scalars (SMEM -> sregs) once per grid step.
    scenes = []
    for s in range(N_SCENES):
        scenes.append((views_ref[s, 0], views_ref[s, 1], views_ref[s, 2],
                       lights_ref[s, 0], lights_ref[s, 1], lights_ref[s, 2],
                       intens_ref[s, 0], intens_ref[s, 1], intens_ref[s, 2]))

    def prep(x):
        # Scene-invariant per-material quantities for one (chunk, 128) slab.
        nx, ny, nz = x[0], x[1], x[2]
        inv_n = lax.rsqrt(nx * nx + ny * ny + nz * nz + 1e-12)
        nx, ny, nz = nx * inv_n, ny * inv_n, nz * inv_n
        rough = x[6]
        alpha = rough * rough
        a2 = alpha * alpha
        k = jnp.maximum(alpha * 0.5, 1e-4)
        omk = 1.0 - k
        spec = (x[7], x[8], x[9])
        # PI-cancelled diffuse term: diffuse * (1 - spec)
        f_d = tuple(x[3 + c] * (1.0 - spec[c]) for c in range(3))
        return (nx, ny, nz, a2, k, omk, spec, f_d)

    def chunk_body(c, carry):
        acc_n, acc_d, acc_r, acc_s, acc_rd = carry
        r0 = pl.multiple_of(c * chunk, chunk)
        x = in_ref[:, pl.ds(r0, chunk), :].astype(jnp.float32)   # (10,chunk,128)
        y = tgt_ref[:, pl.ds(r0, chunk), :].astype(jnp.float32)
        cx = coords_ref[0, pl.ds(r0, chunk), :]
        cy = coords_ref[1, pl.ds(r0, chunk), :]

        # ---------------- SVBRDF L1 partial sums (log-ratio form) ----------- #
        acc_n = acc_n + jnp.sum(jnp.abs(x[0:3] - y[0:3]), axis=0)
        acc_d = acc_d + jnp.sum(jnp.abs(jnp.log(
            (jnp.maximum(x[3:6], 0.0) + EPS_L1) /
            (jnp.maximum(y[3:6], 0.0) + EPS_L1))), axis=0)
        # Roughness is replicated 3x in the SVBRDF packing; only one channel is
        # shipped and the x3 factor is folded into the wrapper's normalizer.
        acc_r = acc_r + jnp.abs(x[6] - y[6])
        acc_s = acc_s + jnp.sum(jnp.abs(jnp.log(
            (jnp.maximum(x[7:10], 0.0) + EPS_L1) /
            (jnp.maximum(y[7:10], 0.0) + EPS_L1))), axis=0)

        mat_i = prep(x)
        mat_t = prep(y)

        # ------------------------ 9-scene render loop ----------------------- #
        for (vx, vy, vz, lx, ly, lz, i0, i1, i2) in scenes:
            # Material plane sits at z = 0, so wiz / woz start from scalars.
            wix, wiy = lx - cx, ly - cy
            inv_wi = lax.rsqrt(wix * wix + wiy * wiy + lz * lz)
            inv_d2 = inv_wi * inv_wi                 # 1/d^2 without a divide
            wix, wiy, wiz = wix * inv_wi, wiy * inv_wi, lz * inv_wi

            wox, woy = vx - cx, vy - cy
            inv_wo = lax.rsqrt(wox * wox + woy * woy + vz * vz)
            wox, woy, woz = wox * inv_wo, woy * inv_wo, vz * inv_wo

            hx, hy, hz = wix + wox, wiy + woy, wiz + woz
            inv_h = lax.rsqrt(hx * hx + hy * hy + hz * hz + 1e-12)
            hx, hy, hz = hx * inv_h, hy * inv_h, hz * inv_h

            vdh = jnp.maximum(wox * hx + woy * hy + woz * hz, 0.001)
            omv = 1.0 - vdh
            pow5 = omv * omv
            pow5 = pow5 * pow5 * omv                 # (1 - v.h)^5, shared

            def geom_fall(mat):
                nx, ny, nz, a2, k, omk, _spec, _fd = mat
                ndh = jnp.maximum(nx * hx + ny * hy + nz * hz, 0.001)
                ndl = jnp.maximum(nx * wix + ny * wiy + nz * wiz, 0.001)
                ndv = jnp.maximum(nx * wox + ny * woy + nz * woz, 0.001)
                denom = jnp.maximum(ndh * ndh * (a2 - 1.0) + 1.0, 0.001)
                gl = ndl * omk + k
                gv = ndv * omk + k
                # The 4 divides (ggx_d, ggx_g x2, geom) + PI collapse to one.
                geom = a2 / (4.0 * denom * denom * gl * gv)
                falloff = ndl * inv_d2               # PI cancelled
                return geom, falloff

            geom_i, fall_i = geom_fall(mat_i)
            geom_t, fall_t = geom_fall(mat_t)
            spec_i, fd_i = mat_i[6], mat_i[7]
            spec_t, fd_t = mat_t[6], mat_t[7]

            for ch, inten in zip(range(3), (i0, i1, i2)):
                fr_i = spec_i[ch] + (1.0 - spec_i[ch]) * pow5
                fr_t = spec_t[ch] + (1.0 - spec_t[ch]) * pow5
                val_i = (fd_i[ch] + fr_i * geom_i) * fall_i
                val_t = (fd_t[ch] + fr_t * geom_t) * fall_t
                num = jnp.maximum(val_i * inten, 0.0) + EPS_RENDER
                den = jnp.maximum(val_t * inten, 0.0) + EPS_RENDER
                acc_rd = acc_rd + jnp.abs(jnp.log(num / den))  # 1 log instead of 2

        return (acc_n, acc_d, acc_r, acc_s, acc_rd)

    zero = jnp.zeros((chunk, LANE), jnp.float32)
    acc_n, acc_d, acc_r, acc_s, acc_rd = lax.fori_loop(
        0, n_chunks, chunk_body, (zero, zero, zero, zero, zero))

    # Per-tile lane-dense partials; the cross-lane reduction is done in the
    # wrapper (also gives a precision-friendly tree sum across tiles).
    out_ref[0] = acc_n
    out_ref[1] = acc_d
    out_ref[2] = acc_r
    out_ref[3] = acc_s
    out_ref[4] = acc_rd


# ------------------------------- wrapper ----------------------------------- #
def _round_up(x, m):
    return ((x + m - 1) // m) * m


def mixed_loss(svbrdf_in, svbrdf_tgt, views, lights, intensities, *,
               tile_r=256, map_dtype=jnp.float32):
    B, C, H, W = svbrdf_in.shape
    assert C == 12, "SVBRDF must have 12 channels (normals/diffuse/rough/spec)"
    P = B * H * W
    S = views.shape[0]

    # Chunk of sublane rows processed per inner-loop iteration (one vreg row
    # for f32, one packed row for 16-bit transport dtypes).
    chunk = 8 if jnp.dtype(map_dtype).itemsize == 4 else 16

    # Pixel rows of 128 lanes; tr rows per grid step (multiple of chunk).
    R = pl.cdiv(P, LANE)
    tr = min(_round_up(tile_r, chunk), _round_up(R, chunk))
    R_pad = _round_up(R, tr)
    P_pad = R_pad * LANE
    num_tiles = R_pad // tr
    n_chunks = tr // chunk

    def to_blocks(a):                 # NCHW(12) -> [10, R_pad, 128]
        # drop the two replicated roughness channels (keep channel 6 only)
        a = jnp.concatenate([a[:, :7], a[:, 9:]], axis=1)        # (B,10,H,W)
        a = jnp.transpose(a, (1, 0, 2, 3)).reshape(NCH, P).astype(map_dtype)
        a = jnp.pad(a, ((0, 0), (0, P_pad - P)))
        return a.reshape(NCH, R_pad, LANE)

    x = to_blocks(svbrdf_in)
    y = to_blocks(svbrdf_tgt)

    # Pixel-plane coordinates (material patch spans [-1, 1]^2; z == 0 dropped).
    xs = jnp.linspace(-1.0, 1.0, W, dtype=jnp.float32)
    ys = -jnp.linspace(-1.0, 1.0, H, dtype=jnp.float32)
    cx = jnp.broadcast_to(xs[None, None, :], (B, H, W))
    cy = jnp.broadcast_to(ys[None, :, None], (B, H, W))
    coords = jnp.stack([cx, cy], axis=0).reshape(2, P)
    coords = jnp.pad(coords, ((0, 0), (0, P_pad - P))).reshape(2, R_pad, LANE)

    kernel = functools.partial(_mixed_loss_kernel, n_chunks=n_chunks, chunk=chunk)

    partials = pl.pallas_call(
        kernel,
        out_shape=jax.ShapeDtypeStruct((num_tiles, 5, chunk, LANE), jnp.float32),
        grid=(num_tiles,),
        in_specs=[
            pl.BlockSpec(memory_space=pltpu.MemorySpace.SMEM),     # views
            pl.BlockSpec(memory_space=pltpu.MemorySpace.SMEM),     # lights
            pl.BlockSpec(memory_space=pltpu.MemorySpace.SMEM),     # intensities
            pl.BlockSpec((NCH, tr, LANE), lambda t: (0, t, 0)),    # input svbrdf
            pl.BlockSpec((NCH, tr, LANE), lambda t: (0, t, 0)),    # target svbrdf
            pl.BlockSpec((2, tr, LANE), lambda t: (0, t, 0)),      # pixel coords
        ],
        out_specs=pl.BlockSpec((None, 5, chunk, LANE), lambda t: (t, 0, 0, 0)),
        compiler_params=pltpu.CompilerParams(
            dimension_semantics=("parallel",)),                    # megacore on v7x
    )(views.astype(jnp.float32), lights.astype(jnp.float32),
      intensities.astype(jnp.float32), x, y, coords)

    # Tree-reduce the per-tile lane-dense partials (padding contributes 0).
    sums = jnp.sum(partials, axis=(0, 2, 3))                       # (5,)

    # SVBRDFL1Loss: four per-map means over (B,3,H,W); roughness uses a single
    # channel (replicated map) so its mean is sum/P.
    l1 = (sums[0] + sums[1] + sums[3]) / (3.0 * P) + sums[2] / P
    # RenderingLoss: mean over (B*S, 3, H, W).
    rendering = sums[4] / (S * 3.0 * P)
    return L1_WEIGHT * l1 + rendering


# ------------------ deterministic scene generation (glue) ------------------ #
def _normalized_random_direction(key, count, min_eps=0.001, max_eps=0.05):
    k1, k2 = jax.random.split(key)
    r1 = jax.random.uniform(k1, (count, 1), minval=min_eps, maxval=1.0 - max_eps)
    r2 = jax.random.uniform(k2, (count, 1))
    r = jnp.sqrt(r1)
    phi = 2.0 * jnp.pi * r2
    return jnp.concatenate(
        [r * jnp.cos(phi), r * jnp.sin(phi), jnp.sqrt(1.0 - r1)], axis=-1)


def generate_random_scenes(key, count):
    kv, kl = jax.random.split(key)
    views = _normalized_random_direction(kv, count, 0.001, 0.1) * 2.0
    lights = _normalized_random_direction(kl, count, 0.001, 0.1) * 2.0
    intensities = jnp.full((count, 3), 3.0, jnp.float32)
    return views, lights, intensities


def generate_specular_scenes(key, count):
    kd, ks, kv, kl = jax.random.split(key, 4)
    base = _normalized_random_direction(kd, count, 0.001, 0.1)
    shift = jnp.concatenate(
        [jax.random.uniform(ks, (count, 2), minval=-1.0, maxval=1.0),
         jnp.full((count, 1), 1e-4)], axis=-1)
    dist_view = jnp.exp(jax.random.normal(kv, (count, 1)) * 0.75 + 0.5)
    dist_light = jnp.exp(jax.random.normal(kl, (count, 1)) * 0.75 + 0.5)
    views = base * dist_view + shift
    lights = base * jnp.array([-1.0, -1.0, 1.0], jnp.float32) * dist_light + shift
    intensities = jnp.broadcast_to(3.0 * dist_light * dist_light, (count, 3))
    return views, lights, intensities.astype(jnp.float32)


# --------------------------------- main ------------------------------------ #
if __name__ == "__main__":
    key = jax.random.PRNGKey(0)
    k_in, k_tgt, k_rand, k_spec = jax.random.split(key, 4)

    B, C, H, W = 2, 12, 16, 16
    svbrdf_in = jax.random.uniform(k_in, (B, C, H, W), jnp.float32, 0.05, 0.95)
    svbrdf_tgt = jax.random.uniform(k_tgt, (B, C, H, W), jnp.float32, 0.05, 0.95)
    # Deschaintre SVBRDF packing replicates the roughness map across channels
    # 6..8; keep the example consistent with that convention.
    svbrdf_in = svbrdf_in.at[:, 7:9].set(svbrdf_in[:, 6:7])
    svbrdf_tgt = svbrdf_tgt.at[:, 7:9].set(svbrdf_tgt[:, 6:7])

    vr, lr, ir = generate_random_scenes(k_rand, N_RANDOM)
    vs, ls, isp = generate_specular_scenes(k_spec, N_SPECULAR)
    views = jnp.concatenate([vr, vs], axis=0)
    lights = jnp.concatenate([lr, ls], axis=0)
    intensities = jnp.concatenate([ir, isp], axis=0)

    loss = mixed_loss(svbrdf_in, svbrdf_tgt, views, lights, intensities)
    loss = jax.block_until_ready(loss)
    assert loss.shape == () and bool(jnp.isfinite(loss))
    print("KERNEL_OK")
</pallas_src>

<mosaic_0001>
module attributes {stable_mosaic.version = 11 : i64} {
  func.func @_mixed_loss_kernel(%arg0: i32, %arg1: memref<9x3xf32, #tpu.memory_space<smem>>, %arg2: memref<9x3xf32, #tpu.memory_space<smem>>, %arg3: memref<9x3xf32, #tpu.memory_space<smem>>, %arg4: memref<10x8x128xf32, #tpu.memory_space<vmem>>, %arg5: memref<10x8x128xf32, #tpu.memory_space<vmem>>, %arg6: memref<2x8x128xf32, #tpu.memory_space<vmem>>, %arg7: memref<1x5x8x128xf32, #tpu.memory_space<vmem>>) attributes {dimension_semantics = [#tpu.dimension_semantics<parallel>], iteration_bounds = array<i64: 1>, scalar_prefetch = 0 : i64, scratch_operands = 0 : i64, tpu.core_type = #tpu.core_type<tc>, window_params = [{transform_indices = @transform_0, window_bounds = array<i64: 9, 3>}, {transform_indices = @transform_1, window_bounds = array<i64: 9, 3>}, {transform_indices = @transform_2, window_bounds = array<i64: 9, 3>}, {transform_indices = @transform_3, window_bounds = array<i64: 10, 8, 128>}, {transform_indices = @transform_4, window_bounds = array<i64: 10, 8, 128>}, {transform_indices = @transform_5, window_bounds = array<i64: 2, 8, 128>}, {transform_indices = @transform_6, window_bounds = array<i64: 1, 5, 8, 128>}]} {
    %c0 = arith.constant 0 : index
    %c0_0 = arith.constant 0 : index
    %0 = memref.load %arg1[%c0, %c0_0] : memref<9x3xf32, #tpu.memory_space<smem>>
    %c0_1 = arith.constant 0 : index
    %c1 = arith.constant 1 : index
    %1 = memref.load %arg1[%c0_1, %c1] : memref<9x3xf32, #tpu.memory_space<smem>>
    %c0_2 = arith.constant 0 : index
    %c2 = arith.constant 2 : index
    %2 = memref.load %arg1[%c0_2, %c2] : memref<9x3xf32, #tpu.memory_space<smem>>
    %c0_3 = arith.constant 0 : index
    %c0_4 = arith.constant 0 : index
    %3 = memref.load %arg2[%c0_3, %c0_4] : memref<9x3xf32, #tpu.memory_space<smem>>
    %c0_5 = arith.constant 0 : index
    %c1_6 = arith.constant 1 : index
    %4 = memref.load %arg2[%c0_5, %c1_6] : memref<9x3xf32, #tpu.memory_space<smem>>
    %c0_7 = arith.constant 0 : index
    %c2_8 = arith.constant 2 : index
    %5 = memref.load %arg2[%c0_7, %c2_8] : memref<9x3xf32, #tpu.memory_space<smem>>
    %c0_9 = arith.constant 0 : index
    %c0_10 = arith.constant 0 : index
    %6 = memref.load %arg3[%c0_9, %c0_10] : memref<9x3xf32, #tpu.memory_space<smem>>
    %c0_11 = arith.constant 0 : index
    %c1_12 = arith.constant 1 : index
    %7 = memref.load %arg3[%c0_11, %c1_12] : memref<9x3xf32, #tpu.memory_space<smem>>
    %c0_13 = arith.constant 0 : index
    %c2_14 = arith.constant 2 : index
    %8 = memref.load %arg3[%c0_13, %c2_14] : memref<9x3xf32, #tpu.memory_space<smem>>
    %c1_15 = arith.constant 1 : index
    %c0_16 = arith.constant 0 : index
    %9 = memref.load %arg1[%c1_15, %c0_16] : memref<9x3xf32, #tpu.memory_space<smem>>
    %c1_17 = arith.constant 1 : index
    %c1_18 = arith.constant 1 : index
    %10 = memref.load %arg1[%c1_17, %c1_18] : memref<9x3xf32, #tpu.memory_space<smem>>
    %c1_19 = arith.constant 1 : index
    %c2_20 = arith.constant 2 : index
    %11 = memref.load %arg1[%c1_19, %c2_20] : memref<9x3xf32, #tpu.memory_space<smem>>
    %c1_21 = arith.constant 1 : index
    %c0_22 = arith.constant 0 : index
    %12 = memref.load %arg2[%c1_21, %c0_22] : memref<9x3xf32, #tpu.memory_space<smem>>
    %c1_23 = arith.constant 1 : index
    %c1_24 = arith.constant 1 : index
    %13 = memref.load %arg2[%c1_23, %c1_24] : memref<9x3xf32, #tpu.memory_space<smem>>
    %c1_25 = arith.constant 1 : index
    %c2_26 = arith.constant 2 : index
    %14 = memref.load %arg2[%c1_25, %c2_26] : memref<9x3xf32, #tpu.memory_space<smem>>
    %c1_27 = arith.constant 1 : index
    %c0_28 = arith.constant 0 : index
    %15 = memref.load %arg3[%c1_27, %c0_28] : memref<9x3xf32, #tpu.memory_space<smem>>
    %c1_29 = arith.constant 1 : index
    %c1_30 = arith.constant 1 : index
    %16 = memref.load %arg3[%c1_29, %c1_30] : memref<9x3xf32, #tpu.memory_space<smem>>
    %c1_31 = arith.constant 1 : index
    %c2_32 = arith.constant 2 : index
    %17 = memref.load %arg3[%c1_31, %c2_32] : memref<9x3xf32, #tpu.memory_space<smem>>
    %c2_33 = arith.constant 2 : index
    %c0_34 = arith.constant 0 : index
    %18 = memref.load %arg1[%c2_33, %c0_34] : memref<9x3xf32, #tpu.memory_space<smem>>
    %c2_35 = arith.constant 2 : index
    %c1_36 = arith.constant 1 : index
    %19 = memref.load %arg1[%c2_35, %c1_36] : memref<9x3xf32, #tpu.memory_space<smem>>
    %c2_37 = arith.constant 2 : index
    %c2_38 = arith.constant 2 : index
    %20 = memref.load %arg1[%c2_37, %c2_38] : memref<9x3xf32, #tpu.memory_space<smem>>
    %c2_39 = arith.constant 2 : index
    %c0_40 = arith.constant 0 : index
    %21 = memref.load %arg2[%c2_39, %c0_40] : memref<9x3xf32, #tpu.memory_space<smem>>
    %c2_41 = arith.constant 2 : index
    %c1_42 = arith.constant 1 : index
    %22 = memref.load %arg2[%c2_41, %c1_42] : memref<9x3xf32, #tpu.memory_space<smem>>
    %c2_43 = arith.constant 2 : index
    %c2_44 = arith.constant 2 : index
    %23 = memref.load %arg2[%c2_43, %c2_44] : memref<9x3xf32, #tpu.memory_space<smem>>
    %c2_45 = arith.constant 2 : index
    %c0_46 = arith.constant 0 : index
    %24 = memref.load %arg3[%c2_45, %c0_46] : memref<9x3xf32, #tpu.memory_space<smem>>
    %c2_47 = arith.constant 2 : index
    %c1_48 = arith.constant 1 : index
    %25 = memref.load %arg3[%c2_47, %c1_48] : memref<9x3xf32, #tpu.memory_space<smem>>
    %c2_49 = arith.constant 2 : index
    %c2_50 = arith.constant 2 : index
    %26 = memref.load %arg3[%c2_49, %c2_50] : memref<9x3xf32, #tpu.memory_space<smem>>
    %c3 = arith.constant 3 : index
    %c0_51 = arith.constant 0 : index
    %27 = memref.load %arg1[%c3, %c0_51] : memref<9x3xf32, #tpu.memory_space<smem>>
    %c3_52 = arith.constant 3 : index
    %c1_53 = arith.constant 1 : index
    %28 = memref.load %arg1[%c3_52, %c1_53] : memref<9x3xf32, #tpu.memory_space<smem>>
    %c3_54 = arith.constant 3 : index
    %c2_55 = arith.constant 2 : index
    %29 = memref.load %arg1[%c3_54, %c2_55] : memref<9x3xf32, #tpu.memory_space<smem>>
    %c3_56 = arith.constant 3 : index
    %c0_57 = arith.constant 0 : index
    %30 = memref.load %arg2[%c3_56, %c0_57] : memref<9x3xf32, #tpu.memory_space<smem>>
    %c3_58 = arith.constant 3 : index
    %c1_59 = arith.constant 1 : index
    %31 = memref.load %arg2[%c3_58, %c1_59] : memref<9x3xf32, #tpu.memory_space<smem>>
    %c3_60 = arith.constant 3 : index
    %c2_61 = arith.constant 2 : index
    %32 = memref.load %arg2[%c3_60, %c2_61] : memref<9x3xf32, #tpu.memory_space<smem>>
    %c3_62 = arith.constant 3 : index
    %c0_63 = arith.constant 0 : index
    %33 = memref.load %arg3[%c3_62, %c0_63] : memref<9x3xf32, #tpu.memory_space<smem>>
    %c3_64 = arith.constant 3 : index
    %c1_65 = arith.constant 1 : index
    %34 = memref.load %arg3[%c3_64, %c1_65] : memref<9x3xf32, #tpu.memory_space<smem>>
    %c3_66 = arith.constant 3 : index
    %c2_67 = arith.constant 2 : index
    %35 = memref.load %arg3[%c3_66, %c2_67] : memref<9x3xf32, #tpu.memory_space<smem>>
    %c4 = arith.constant 4 : index
    %c0_68 = arith.constant 0 : index
    %36 = memref.load %arg1[%c4, %c0_68] : memref<9x3xf32, #tpu.memory_space<smem>>
    %c4_69 = arith.constant 4 : index
    %c1_70 = arith.constant 1 : index
    %37 = memref.load %arg1[%c4_69, %c1_70] : memref<9x3xf32, #tpu.memory_space<smem>>
    %c4_71 = arith.constant 4 : index
    %c2_72 = arith.constant 2 : index
    %38 = memref.load %arg1[%c4_71, %c2_72] : memref<9x3xf32, #tpu.memory_space<smem>>
    %c4_73 = arith.constant 4 : index
    %c0_74 = arith.constant 0 : index
    %39 = memref.load %arg2[%c4_73, %c0_74] : memref<9x3xf32, #tpu.memory_space<smem>>
    %c4_75 = arith.constant 4 : index
    %c1_76 = arith.constant 1 : index
    %40 = memref.load %arg2[%c4_75, %c1_76] : memref<9x3xf32, #tpu.memory_space<smem>>
    %c4_77 = arith.constant 4 : index
    %c2_78 = arith.constant 2 : index
    %41 = memref.load %arg2[%c4_77, %c2_78] : memref<9x3xf32, #tpu.memory_space<smem>>
    %c4_79 = arith.constant 4 : index
    %c0_80 = arith.constant 0 : index
    %42 = memref.load %arg3[%c4_79, %c0_80] : memref<9x3xf32, #tpu.memory_space<smem>>
    %c4_81 = arith.constant 4 : index
    %c1_82 = arith.constant 1 : index
    %43 = memref.load %arg3[%c4_81, %c1_82] : memref<9x3xf32, #tpu.memory_space<smem>>
    %c4_83 = arith.constant 4 : index
    %c2_84 = arith.constant 2 : index
    %44 = memref.load %arg3[%c4_83, %c2_84] : memref<9x3xf32, #tpu.memory_space<smem>>
    %c5 = arith.constant 5 : index
    %c0_85 = arith.constant 0 : index
    %45 = memref.load %arg1[%c5, %c0_85] : memref<9x3xf32, #tpu.memory_space<smem>>
    %c5_86 = arith.constant 5 : index
    %c1_87 = arith.constant 1 : index
    %46 = memref.load %arg1[%c5_86, %c1_87] : memref<9x3xf32, #tpu.memory_space<smem>>
    %c5_88 = arith.constant 5 : index
    %c2_89 = arith.constant 2 : index
    %47 = memref.load %arg1[%c5_88, %c2_89] : memref<9x3xf32, #tpu.memory_space<smem>>
    %c5_90 = arith.constant 5 : index
    %c0_91 = arith.constant 0 : index
    %48 = memref.load %arg2[%c5_90, %c0_91] : memref<9x3xf32, #tpu.memory_space<smem>>
    %c5_92 = arith.constant 5 : index
    %c1_93 = arith.constant 1 : index
    %49 = memref.load %arg2[%c5_92, %c1_93] : memref<9x3xf32, #tpu.memory_space<smem>>
    %c5_94 = arith.constant 5 : index
    %c2_95 = arith.constant 2 : index
    %50 = memref.load %arg2[%c5_94, %c2_95] : memref<9x3xf32, #tpu.memory_space<smem>>
    %c5_96 = arith.constant 5 : index
    %c0_97 = arith.constant 0 : index
    %51 = memref.load %arg3[%c5_96, %c0_97] : memref<9x3xf32, #tpu.memory_space<smem>>
    %c5_98 = arith.constant 5 : index
    %c1_99 = arith.constant 1 : index
    %52 = memref.load %arg3[%c5_98, %c1_99] : memref<9x3xf32, #tpu.memory_space<smem>>
    %c5_100 = arith.constant 5 : index
    %c2_101 = arith.constant 2 : index
    %53 = memref.load %arg3[%c5_100, %c2_101] : memref<9x3xf32, #tpu.memory_space<smem>>
    %c6 = arith.constant 6 : index
    %c0_102 = arith.constant 0 : index
    %54 = memref.load %arg1[%c6, %c0_102] : memref<9x3xf32, #tpu.memory_space<smem>>
    %c6_103 = arith.constant 6 : index
    %c1_104 = arith.constant 1 : index
    %55 = memref.load %arg1[%c6_103, %c1_104] : memref<9x3xf32, #tpu.memory_space<smem>>
    %c6_105 = arith.constant 6 : index
    %c2_106 = arith.constant 2 : index
    %56 = memref.load %arg1[%c6_105, %c2_106] : memref<9x3xf32, #tpu.memory_space<smem>>
    %c6_107 = arith.constant 6 : index
    %c0_108 = arith.constant 0 : index
    %57 = memref.load %arg2[%c6_107, %c0_108] : memref<9x3xf32, #tpu.memory_space<smem>>
    %c6_109 = arith.constant 6 : index
    %c1_110 = arith.constant 1 : index
    %58 = memref.load %arg2[%c6_109, %c1_110] : memref<9x3xf32, #tpu.memory_space<smem>>
    %c6_111 = arith.constant 6 : index
    %c2_112 = arith.constant 2 : index
    %59 = memref.load %arg2[%c6_111, %c2_112] : memref<9x3xf32, #tpu.memory_space<smem>>
    %c6_113 = arith.constant 6 : index
    %c0_114 = arith.constant 0 : index
    %60 = memref.load %arg3[%c6_113, %c0_114] : memref<9x3xf32, #tpu.memory_space<smem>>
    %c6_115 = arith.constant 6 : index
    %c1_116 = arith.constant 1 : index
    %61 = memref.load %arg3[%c6_115, %c1_116] : memref<9x3xf32, #tpu.memory_space<smem>>
    %c6_117 = arith.constant 6 : index
    %c2_118 = arith.constant 2 : index
    %62 = memref.load %arg3[%c6_117, %c2_118] : memref<9x3xf32, #tpu.memory_space<smem>>
    %c7 = arith.constant 7 : index
    %c0_119 = arith.constant 0 : index
    %63 = memref.load %arg1[%c7, %c0_119] : memref<9x3xf32, #tpu.memory_space<smem>>
    %c7_120 = arith.constant 7 : index
    %c1_121 = arith.constant 1 : index
    %64 = memref.load %arg1[%c7_120, %c1_121] : memref<9x3xf32, #tpu.memory_space<smem>>
    %c7_122 = arith.constant 7 : index
    %c2_123 = arith.constant 2 : index
    %65 = memref.load %arg1[%c7_122, %c2_123] : memref<9x3xf32, #tpu.memory_space<smem>>
    %c7_124 = arith.constant 7 : index
    %c0_125 = arith.constant 0 : index
    %66 = memref.load %arg2[%c7_124, %c0_125] : memref<9x3xf32, #tpu.memory_space<smem>>
    %c7_126 = arith.constant 7 : index
    %c1_127 = arith.constant 1 : index
    %67 = memref.load %arg2[%c7_126, %c1_127] : memref<9x3xf32, #tpu.memory_space<smem>>
    %c7_128 = arith.constant 7 : index
    %c2_129 = arith.constant 2 : index
    %68 = memref.load %arg2[%c7_128, %c2_129] : memref<9x3xf32, #tpu.memory_space<smem>>
    %c7_130 = arith.constant 7 : index
    %c0_131 = arith.constant 0 : index
    %69 = memref.load %arg3[%c7_130, %c0_131] : memref<9x3xf32, #tpu.memory_space<smem>>
    %c7_132 = arith.constant 7 : index
    %c1_133 = arith.constant 1 : index
    %70 = memref.load %arg3[%c7_132, %c1_133] : memref<9x3xf32, #tpu.memory_space<smem>>
    %c7_134 = arith.constant 7 : index
    %c2_135 = arith.constant 2 : index
    %71 = memref.load %arg3[%c7_134, %c2_135] : memref<9x3xf32, #tpu.memory_space<smem>>
    %c8 = arith.constant 8 : index
    %c0_136 = arith.constant 0 : index
    %72 = memref.load %arg1[%c8, %c0_136] : memref<9x3xf32, #tpu.memory_space<smem>>
    %c8_137 = arith.constant 8 : index
    %c1_138 = arith.constant 1 : index
    %73 = memref.load %arg1[%c8_137, %c1_138] : memref<9x3xf32, #tpu.memory_space<smem>>
    %c8_139 = arith.constant 8 : index
    %c2_140 = arith.constant 2 : index
    %74 = memref.load %arg1[%c8_139, %c2_140] : memref<9x3xf32, #tpu.memory_space<smem>>
    %c8_141 = arith.constant 8 : index
    %c0_142 = arith.constant 0 : index
    %75 = memref.load %arg2[%c8_141, %c0_142] : memref<9x3xf32, #tpu.memory_space<smem>>
    %c8_143 = arith.constant 8 : index
    %c1_144 = arith.constant 1 : index
    %76 = memref.load %arg2[%c8_143, %c1_144] : memref<9x3xf32, #tpu.memory_space<smem>>
    %c8_145 = arith.constant 8 : index
    %c2_146 = arith.constant 2 : index
    %77 = memref.load %arg2[%c8_145, %c2_146] : memref<9x3xf32, #tpu.memory_space<smem>>
    %c8_147 = arith.constant 8 : index
    %c0_148 = arith.constant 0 : index
    %78 = memref.load %arg3[%c8_147, %c0_148] : memref<9x3xf32, #tpu.memory_space<smem>>
    %c8_149 = arith.constant 8 : index
    %c1_150 = arith.constant 1 : index
    %79 = memref.load %arg3[%c8_149, %c1_150] : memref<9x3xf32, #tpu.memory_space<smem>>
    %c8_151 = arith.constant 8 : index
    %c2_152 = arith.constant 2 : index
    %80 = memref.load %arg3[%c8_151, %c2_152] : memref<9x3xf32, #tpu.memory_space<smem>>
    %cst = arith.constant 0.000000e+00 : f32
    %81 = vector.broadcast %cst : f32 to vector<8x128xf32>
    %c0_i32 = arith.constant 0 : i32
    %c8_i32 = arith.constant 8 : i32
    %82 = arith.muli %c0_i32, %c8_i32 : i32
    %83 = tpu.assume_multiple %82, 8 : i32
    %c0_153 = arith.constant 0 : index
    %84 = arith.index_cast %83 : i32 to index
    %c0_154 = arith.constant 0 : index
    %85 = vector.load %arg4[%c0_153, %84, %c0_154] : memref<10x8x128xf32, #tpu.memory_space<vmem>>, vector<10x8x128xf32>
    %c0_155 = arith.constant 0 : index
    %86 = arith.index_cast %83 : i32 to index
    %c0_156 = arith.constant 0 : index
    %87 = vector.load %arg5[%c0_155, %86, %c0_156] : memref<10x8x128xf32, #tpu.memory_space<vmem>>, vector<10x8x128xf32>
    %c0_157 = arith.constant 0 : index
    %88 = arith.index_cast %83 : i32 to index
    %c0_158 = arith.constant 0 : index
    %89 = vector.load %arg6[%c0_157, %88, %c0_158] : memref<2x8x128xf32, #tpu.memory_space<vmem>>, vector<1x8x128xf32>
    %90 = vector.shape_cast %89 : vector<1x8x128xf32> to vector<8x128xf32>
    %c1_159 = arith.constant 1 : index
    %91 = arith.index_cast %83 : i32 to index
    %c0_160 = arith.constant 0 : index
    %92 = vector.load %arg6[%c1_159, %91, %c0_160] : memref<2x8x128xf32, #tpu.memory_space<vmem>>, vector<1x8x128xf32>
    %93 = vector.shape_cast %92 : vector<1x8x128xf32> to vector<8x128xf32>
    %94 = vector.extract_strided_slice %85 {offsets = [0, 0, 0], sizes = [3, 8, 128], strides = [1, 1, 1]} : vector<10x8x128xf32> to vector<3x8x128xf32>
    %95 = vector.extract_strided_slice %87 {offsets = [0, 0, 0], sizes = [3, 8, 128], strides = [1, 1, 1]} : vector<10x8x128xf32> to vector<3x8x128xf32>
    %96 = arith.subf %94, %95 : vector<3x8x128xf32>
    %97 = math.absf %96 : vector<3x8x128xf32>
    %cst_161 = arith.constant dense<0.000000e+00> : vector<8x128xf32>
    %98 = vector.multi_reduction <add>, %97, %cst_161 [0] : vector<3x8x128xf32> to vector<8x128xf32>
    %99 = arith.addf %81, %98 : vector<8x128xf32>
    %100 = vector.extract_strided_slice %85 {offsets = [3, 0, 0], sizes = [3, 8, 128], strides = [1, 1, 1]} : vector<10x8x128xf32> to vector<3x8x128xf32>
    %cst_162 = arith.constant 0.000000e+00 : f32
    %101 = vector.broadcast %cst_162 : f32 to vector<3x8x128xf32>
    %102 = arith.maximumf %100, %101 : vector<3x8x128xf32>
    %cst_163 = arith.constant 0.00999999977 : f32
    %103 = vector.broadcast %cst_163 : f32 to vector<3x8x128xf32>
    %104 = arith.addf %102, %103 : vector<3x8x128xf32>
    %105 = vector.extract_strided_slice %87 {offsets = [3, 0, 0], sizes = [3, 8, 128], strides = [1, 1, 1]} : vector<10x8x128xf32> to vector<3x8x128xf32>
    %cst_164 = arith.constant 0.000000e+00 : f32
    %106 = vector.broadcast %cst_164 : f32 to vector<3x8x128xf32>
    %107 = arith.maximumf %105, %106 : vector<3x8x128xf32>
    %cst_165 = arith.constant 0.00999999977 : f32
    %108 = vector.broadcast %cst_165 : f32 to vector<3x8x128xf32>
    %109 = arith.addf %107, %108 : vector<3x8x128xf32>
    %110 = arith.divf %104, %109 : vector<3x8x128xf32>
    %111 = math.log %110 : vector<3x8x128xf32>
    %112 = math.absf %111 : vector<3x8x128xf32>
    %cst_166 = arith.constant dense<0.000000e+00> : vector<8x128xf32>
    %113 = vector.multi_reduction <add>, %112, %cst_166 [0] : vector<3x8x128xf32> to vector<8x128xf32>
    %114 = arith.addf %81, %113 : vector<8x128xf32>
    %115 = vector.extract_strided_slice %85 {offsets = [6, 0, 0], sizes = [1, 8, 128], strides = [1, 1, 1]} : vector<10x8x128xf32> to vector<1x8x128xf32>
    %116 = vector.shape_cast %115 : vector<1x8x128xf32> to vector<8x128xf32>
    %117 = vector.extract_strided_slice %87 {offsets = [6, 0, 0], sizes = [1, 8, 128], strides = [1, 1, 1]} : vector<10x8x128xf32> to vector<1x8x128xf32>
    %118 = vector.shape_cast %117 : vector<1x8x128xf32> to vector<8x128xf32>
    %119 = arith.subf %116, %118 : vector<8x128xf32>
    %120 = math.absf %119 : vector<8x128xf32>
    %121 = arith.addf %81, %120 : vector<8x128xf32>
    %122 = vector.extract_strided_slice %85 {offsets = [7, 0, 0], sizes = [3, 8, 128], strides = [1, 1, 1]} : vector<10x8x128xf32> to vector<3x8x128xf32>
    %cst_167 = arith.constant 0.000000e+00 : f32
    %123 = vector.broadcast %cst_167 : f32 to vector<3x8x128xf32>
    %124 = arith.maximumf %122, %123 : vector<3x8x128xf32>
    %cst_168 = arith.constant 0.00999999977 : f32
    %125 = vector.broadcast %cst_168 : f32 to vector<3x8x128xf32>
    %126 = arith.addf %124, %125 : vector<3x8x128xf32>
    %127 = vector.extract_strided_slice %87 {offsets = [7, 0, 0], sizes = [3, 8, 128], strides = [1, 1, 1]} : vector<10x8x128xf32> to vector<3x8x128xf32>
    %cst_169 = arith.constant 0.000000e+00 : f32
    %128 = vector.broadcast %cst_169 : f32 to vector<3x8x128xf32>
    %129 = arith.maximumf %127, %128 : vector<3x8x128xf32>
    %cst_170 = arith.constant 0.00999999977 : f32
    %130 = vector.broadcast %cst_170 : f32 to vector<3x8x128xf32>
    %131 = arith.addf %129, %130 : vector<3x8x128xf32>
    %132 = arith.divf %126, %131 : vector<3x8x128xf32>
    %133 = math.log %132 : vector<3x8x128xf32>
    %134 = math.absf %133 : vector<3x8x128xf32>
    %cst_171 = arith.constant dense<0.000000e+00> : vector<8x128xf32>
    %135 = vector.multi_reduction <add>, %134, %cst_171 [0] : vector<3x8x128xf32> to vector<8x128xf32>
    %136 = arith.addf %81, %135 : vector<8x128xf32>
    %137 = vector.extract_strided_slice %85 {offsets = [0, 0, 0], sizes = [1, 8, 128], strides = [1, 1, 1]} : vector<10x8x128xf32> to vector<1x8x128xf32>
    %138 = vector.shape_cast %137 : vector<1x8x128xf32> to vector<8x128xf32>
    %139 = vector.extract_strided_slice %85 {offsets = [1, 0, 0], sizes = [1, 8, 128], strides = [1, 1, 1]} : vector<10x8x128xf32> to vector<1x8x128xf32>
    %140 = vector.shape_cast %139 : vector<1x8x128xf32> to vector<8x128xf32>
    %141 = vector.extract_strided_slice %85 {offsets = [2, 0, 0], sizes = [1, 8, 128], strides = [1, 1, 1]} : vector<10x8x128xf32> to vector<1x8x128xf32>
    %142 = vector.shape_cast %141 : vector<1x8x128xf32> to vector<8x128xf32>
    %143 = arith.mulf %138, %138 : vector<8x128xf32>
    %144 = arith.mulf %140, %140 : vector<8x128xf32>
    %145 = arith.addf %143, %144 : vector<8x128xf32>
    %146 = arith.mulf %142, %142 : vector<8x128xf32>
    %147 = arith.addf %145, %146 : vector<8x128xf32>
    %cst_172 = arith.constant 9.99999996E-13 : f32
    %148 = vector.broadcast %cst_172 : f32 to vector<8x128xf32>
    %149 = arith.addf %147, %148 : vector<8x128xf32>
    %150 = math.rsqrt %149 : vector<8x128xf32>
    %151 = arith.mulf %138, %150 : vector<8x128xf32>
    %152 = arith.mulf %140, %150 : vector<8x128xf32>
    %153 = arith.mulf %142, %150 : vector<8x128xf32>
    %154 = vector.extract_strided_slice %85 {offsets = [6, 0, 0], sizes = [1, 8, 128], strides = [1, 1, 1]} : vector<10x8x128xf32> to vector<1x8x128xf32>
    %155 = vector.shape_cast %154 : vector<1x8x128xf32> to vector<8x128xf32>
    %156 = arith.mulf %155, %155 : vector<8x128xf32>
    %157 = arith.mulf %156, %156 : vector<8x128xf32>
    %cst_173 = arith.constant 5.000000e-01 : f32
    %158 = vector.broadcast %cst_173 : f32 to vector<8x128xf32>
    %159 = arith.mulf %156, %158 : vector<8x128xf32>
    %cst_174 = arith.constant 9.99999974E-5 : f32
    %160 = vector.broadcast %cst_174 : f32 to vector<8x128xf32>
    %161 = arith.maximumf %159, %160 : vector<8x128xf32>
    %cst_175 = arith.constant 1.000000e+00 : f32
    %162 = vector.broadcast %cst_175 : f32 to vector<8x128xf32>
    %163 = arith.subf %162, %161 : vector<8x128xf32>
    %164 = vector.extract_strided_slice %85 {offsets = [7, 0, 0], sizes = [1, 8, 128], strides = [1, 1, 1]} : vector<10x8x128xf32> to vector<1x8x128xf32>
    %165 = vector.shape_cast %164 : vector<1x8x128xf32> to vector<8x128xf32>
    %166 = vector.extract_strided_slice %85 {offsets = [8, 0, 0], sizes = [1, 8, 128], strides = [1, 1, 1]} : vector<10x8x128xf32> to vector<1x8x128xf32>
    %167 = vector.shape_cast %166 : vector<1x8x128xf32> to vector<8x128xf32>
    %168 = vector.extract_strided_slice %85 {offsets = [9, 0, 0], sizes = [1, 8, 128], strides = [1, 1, 1]} : vector<10x8x128xf32> to vector<1x8x128xf32>
    %169 = vector.shape_cast %168 : vector<1x8x128xf32> to vector<8x128xf32>
    %170 = vector.extract_strided_slice %85 {offsets = [3, 0, 0], sizes = [1, 8, 128], strides = [1, 1, 1]} : vector<10x8x128xf32> to vector<1x8x128xf32>
    %171 = vector.shape_cast %170 : vector<1x8x128xf32> to vector<8x128xf32>
    %cst_176 = arith.constant 1.000000e+00 : f32
    %172 = vector.broadcast %cst_176 : f32 to vector<8x128xf32>
    %173 = arith.subf %172, %165 : vector<8x128xf32>
    %174 = arith.mulf %171, %173 : vector<8x128xf32>
    %175 = vector.extract_strided_slice %85 {offsets = [4, 0, 0], sizes = [1, 8, 128], strides = [1, 1, 1]} : vector<10x8x128xf32> to vector<1x8x128xf32>
    %176 = vector.shape_cast %175 : vector<1x8x128xf32> to vector<8x128xf32>
    %cst_177 = arith.constant 1.000000e+00 : f32
    %177 = vector.broadcast %cst_177 : f32 to vector<8x128xf32>
    %178 = arith.subf %177, %167 : vector<8x128xf32>
    %179 = arith.mulf %176, %178 : vector<8x128xf32>
    %180 = vector.extract_strided_slice %85 {offsets = [5, 0, 0], sizes = [1, 8, 128], strides = [1, 1, 1]} : vector<10x8x128xf32> to vector<1x8x128xf32>
    %181 = vector.shape_cast %180 : vector<1x8x128xf32> to vector<8x128xf32>
    %cst_178 = arith.constant 1.000000e+00 : f32
    %182 = vector.broadcast %cst_178 : f32 to vector<8x128xf32>
    %183 = arith.subf %182, %169 : vector<8x128xf32>
    %184 = arith.mulf %181, %183 : vector<8x128xf32>
    %185 = vector.extract_strided_slice %87 {offsets = [0, 0, 0], sizes = [1, 8, 128], strides = [1, 1, 1]} : vector<10x8x128xf32> to vector<1x8x128xf32>
    %186 = vector.shape_cast %185 : vector<1x8x128xf32> to vector<8x128xf32>
    %187 = vector.extract_strided_slice %87 {offsets = [1, 0, 0], sizes = [1, 8, 128], strides = [1, 1, 1]} : vector<10x8x128xf32> to vector<1x8x128xf32>
    %188 = vector.shape_cast %187 : vector<1x8x128xf32> to vector<8x128xf32>
    %189 = vector.extract_strided_slice %87 {offsets = [2, 0, 0], sizes = [1, 8, 128], strides = [1, 1, 1]} : vector<10x8x128xf32> to vector<1x8x128xf32>
    %190 = vector.shape_cast %189 : vector<1x8x128xf32> to vector<8x128xf32>
    %191 = arith.mulf %186, %186 : vector<8x128xf32>
    %192 = arith.mulf %188, %188 : vector<8x128xf32>
    %193 = arith.addf %191, %192 : vector<8x128xf32>
    %194 = arith.mulf %190, %190 : vector<8x128xf32>
    %195 = arith.addf %193, %194 : vector<8x128xf32>
    %cst_179 = arith.constant 9.99999996E-13 : f32
    %196 = vector.broadcast %cst_179 : f32 to vector<8x128xf32>
    %197 = arith.addf %195, %196 : vector<8x128xf32>
    %198 = math.rsqrt %197 : vector<8x128xf32>
    %199 = arith.mulf %186, %198 : vector<8x128xf32>
    %200 = arith.mulf %188, %198 : vector<8x128xf32>
    %201 = arith.mulf %190, %198 : vector<8x128xf32>
    %202 = vector.extract_strided_slice %87 {offsets = [6, 0, 0], sizes = [1, 8, 128], strides = [1, 1, 1]} : vector<10x8x128xf32> to vector<1x8x128xf32>
    %203 = vector.shape_cast %202 : vector<1x8x128xf32> to vector<8x128xf32>
    %204 = arith.mulf %203, %203 : vector<8x128xf32>
    %205 = arith.mulf %204, %204 : vector<8x128xf32>
    %cst_180 = arith.constant 5.000000e-01 : f32
    %206 = vector.broadcast %cst_180 : f32 to vector<8x128xf32>
    %207 = arith.mulf %204, %206 : vector<8x128xf32>
    %cst_181 = arith.constant 9.99999974E-5 : f32
    %208 = vector.broadcast %cst_181 : f32 to vector<8x128xf32>
    %209 = arith.maximumf %207, %208 : vector<8x128xf32>
    %cst_182 = arith.constant 1.000000e+00 : f32
    %210 = vector.broadcast %cst_182 : f32 to vector<8x128xf32>
    %211 = arith.subf %210, %209 : vector<8x128xf32>
    %212 = vector.extract_strided_slice %87 {offsets = [7, 0, 0], sizes = [1, 8, 128], strides = [1, 1, 1]} : vector<10x8x128xf32> to vector<1x8x128xf32>
    %213 = vector.shape_cast %212 : vector<1x8x128xf32> to vector<8x128xf32>
    %214 = vector.extract_strided_slice %87 {offsets = [8, 0, 0], sizes = [1, 8, 128], strides = [1, 1, 1]} : vector<10x8x128xf32> to vector<1x8x128xf32>
    %215 = vector.shape_cast %214 : vector<1x8x128xf32> to vector<8x128xf32>
    %216 = vector.extract_strided_slice %87 {offsets = [9, 0, 0], sizes = [1, 8, 128], strides = [1, 1, 1]} : vector<10x8x128xf32> to vector<1x8x128xf32>
    %217 = vector.shape_cast %216 : vector<1x8x128xf32> to vector<8x128xf32>
    %218 = vector.extract_strided_slice %87 {offsets = [3, 0, 0], sizes = [1, 8, 128], strides = [1, 1, 1]} : vector<10x8x128xf32> to vector<1x8x128xf32>
    %219 = vector.shape_cast %218 : vector<1x8x128xf32> to vector<8x128xf32>
    %cst_183 = arith.constant 1.000000e+00 : f32
    %220 = vector.broadcast %cst_183 : f32 to vector<8x128xf32>
    %221 = arith.subf %220, %213 : vector<8x128xf32>
    %222 = arith.mulf %219, %221 : vector<8x128xf32>
    %223 = vector.extract_strided_slice %87 {offsets = [4, 0, 0], sizes = [1, 8, 128], strides = [1, 1, 1]} : vector<10x8x128xf32> to vector<1x8x128xf32>
    %224 = vector.shape_cast %223 : vector<1x8x128xf32> to vector<8x128xf32>
    %cst_184 = arith.constant 1.000000e+00 : f32
    %225 = vector.broadcast %cst_184 : f32 to vector<8x128xf32>
    %226 = arith.subf %225, %215 : vector<8x128xf32>
    %227 = arith.mulf %224, %226 : vector<8x128xf32>
    %228 = vector.extract_strided_slice %87 {offsets = [5, 0, 0], sizes = [1, 8, 128], strides = [1, 1, 1]} : vector<10x8x128xf32> to vector<1x8x128xf32>
    %229 = vector.shape_cast %228 : vector<1x8x128xf32> to vector<8x128xf32>
    %cst_185 = arith.constant 1.000000e+00 : f32
    %230 = vector.broadcast %cst_185 : f32 to vector<8x128xf32>
    %231 = arith.subf %230, %217 : vector<8x128xf32>
    %232 = arith.mulf %229, %231 : vector<8x128xf32>
    %233 = vector.broadcast %3 : f32 to vector<8x128xf32>
    %234 = arith.subf %233, %90 : vector<8x128xf32>
    %235 = vector.broadcast %4 : f32 to vector<8x128xf32>
    %236 = arith.subf %235, %93 : vector<8x128xf32>
    %237 = arith.mulf %234, %234 : vector<8x128xf32>
    %238 = arith.mulf %236, %236 : vector<8x128xf32>
    %239 = arith.addf %237, %238 : vector<8x128xf32>
    %240 = arith.mulf %5, %5 : f32
    %241 = vector.broadcast %240 : f32 to vector<8x128xf32>
    %242 = arith.addf %239, %241 : vector<8x128xf32>
    %243 = math.rsqrt %242 : vector<8x128xf32>
    %244 = arith.mulf %243, %243 : vector<8x128xf32>
    %245 = arith.mulf %234, %243 : vector<8x128xf32>
    %246 = arith.mulf %236, %243 : vector<8x128xf32>
    %247 = vector.broadcast %5 : f32 to vector<8x128xf32>
    %248 = arith.mulf %247, %243 : vector<8x128xf32>
    %249 = vector.broadcast %0 : f32 to vector<8x128xf32>
    %250 = arith.subf %249, %90 : vector<8x128xf32>
    %251 = vector.broadcast %1 : f32 to vector<8x128xf32>
    %252 = arith.subf %251, %93 : vector<8x128xf32>
    %253 = arith.mulf %250, %250 : vector<8x128xf32>
    %254 = arith.mulf %252, %252 : vector<8x128xf32>
    %255 = arith.addf %253, %254 : vector<8x128xf32>
    %256 = arith.mulf %2, %2 : f32
    %257 = vector.broadcast %256 : f32 to vector<8x128xf32>
    %258 = arith.addf %255, %257 : vector<8x128xf32>
    %259 = math.rsqrt %258 : vector<8x128xf32>
    %260 = arith.mulf %250, %259 : vector<8x128xf32>
    %261 = arith.mulf %252, %259 : vector<8x128xf32>
    %262 = vector.broadcast %2 : f32 to vector<8x128xf32>
    %263 = arith.mulf %262, %259 : vector<8x128xf32>
    %264 = arith.addf %245, %260 : vector<8x128xf32>
    %265 = arith.addf %246, %261 : vector<8x128xf32>
    %266 = arith.addf %248, %263 : vector<8x128xf32>
    %267 = arith.mulf %264, %264 : vector<8x128xf32>
    %268 = arith.mulf %265, %265 : vector<8x128xf32>
    %269 = arith.addf %267, %268 : vector<8x128xf32>
    %270 = arith.mulf %266, %266 : vector<8x128xf32>
    %271 = arith.addf %269, %270 : vector<8x128xf32>
    %cst_186 = arith.constant 9.99999996E-13 : f32
    %272 = vector.broadcast %cst_186 : f32 to vector<8x128xf32>
    %273 = arith.addf %271, %272 : vector<8x128xf32>
    %274 = math.rsqrt %273 : vector<8x128xf32>
    %275 = arith.mulf %264, %274 : vector<8x128xf32>
    %276 = arith.mulf %265, %274 : vector<8x128xf32>
    %277 = arith.mulf %266, %274 : vector<8x128xf32>
    %278 = arith.mulf %260, %275 : vector<8x128xf32>
    %279 = arith.mulf %261, %276 : vector<8x128xf32>
    %280 = arith.addf %278, %279 : vector<8x128xf32>
    %281 = arith.mulf %263, %277 : vector<8x128xf32>
    %282 = arith.addf %280, %281 : vector<8x128xf32>
    %cst_187 = arith.constant 1.000000e-03 : f32
    %283 = vector.broadcast %cst_187 : f32 to vector<8x128xf32>
    %284 = arith.maximumf %282, %283 : vector<8x128xf32>
    %cst_188 = arith.constant 1.000000e+00 : f32
    %285 = vector.broadcast %cst_188 : f32 to vector<8x128xf32>
    %286 = arith.subf %285, %284 : vector<8x128xf32>
    %287 = arith.mulf %286, %286 : vector<8x128xf32>
    %288 = arith.mulf %287, %287 : vector<8x128xf32>
    %289 = arith.mulf %288, %286 : vector<8x128xf32>
    %290 = arith.mulf %151, %275 : vector<8x128xf32>
    %291 = arith.mulf %152, %276 : vector<8x128xf32>
    %292 = arith.addf %290, %291 : vector<8x128xf32>
    %293 = arith.mulf %153, %277 : vector<8x128xf32>
    %294 = arith.addf %292, %293 : vector<8x128xf32>
    %cst_189 = arith.constant 1.000000e-03 : f32
    %295 = vector.broadcast %cst_189 : f32 to vector<8x128xf32>
    %296 = arith.maximumf %294, %295 : vector<8x128xf32>
    %297 = arith.mulf %151, %245 : vector<8x128xf32>
    %298 = arith.mulf %152, %246 : vector<8x128xf32>
    %299 = arith.addf %297, %298 : vector<8x128xf32>
    %300 = arith.mulf %153, %248 : vector<8x128xf32>
    %301 = arith.addf %299, %300 : vector<8x128xf32>
    %cst_190 = arith.constant 1.000000e-03 : f32
    %302 = vector.broadcast %cst_190 : f32 to vector<8x128xf32>
    %303 = arith.maximumf %301, %302 : vector<8x128xf32>
    %304 = arith.mulf %151, %260 : vector<8x128xf32>
    %305 = arith.mulf %152, %261 : vector<8x128xf32>
    %306 = arith.addf %304, %305 : vector<8x128xf32>
    %307 = arith.mulf %153, %263 : vector<8x128xf32>
    %308 = arith.addf %306, %307 : vector<8x128xf32>
    %cst_191 = arith.constant 1.000000e-03 : f32
    %309 = vector.broadcast %cst_191 : f32 to vector<8x128xf32>
    %310 = arith.maximumf %308, %309 : vector<8x128xf32>
    %311 = arith.mulf %296, %296 : vector<8x128xf32>
    %cst_192 = arith.constant 1.000000e+00 : f32
    %312 = vector.broadcast %cst_192 : f32 to vector<8x128xf32>
    %313 = arith.subf %157, %312 : vector<8x128xf32>
    %314 = arith.mulf %311, %313 : vector<8x128xf32>
    %cst_193 = arith.constant 1.000000e+00 : f32
    %315 = vector.broadcast %cst_193 : f32 to vector<8x128xf32>
    %316 = arith.addf %314, %315 : vector<8x128xf32>
    %cst_194 = arith.constant 1.000000e-03 : f32
    %317 = vector.broadcast %cst_194 : f32 to vector<8x128xf32>
    %318 = arith.maximumf %316, %317 : vector<8x128xf32>
    %319 = arith.mulf %303, %163 : vector<8x128xf32>
    %320 = arith.addf %319, %161 : vector<8x128xf32>
    %321 = arith.mulf %310, %163 : vector<8x128xf32>
    %322 = arith.addf %321, %161 : vector<8x128xf32>
    %cst_195 = arith.constant 4.000000e+00 : f32
    %323 = vector.broadcast %cst_195 : f32 to vector<8x128xf32>
    %324 = arith.mulf %323, %318 : vector<8x128xf32>
    %325 = arith.mulf %324, %318 : vector<8x128xf32>
    %326 = arith.mulf %325, %320 : vector<8x128xf32>
    %327 = arith.mulf %326, %322 : vector<8x128xf32>
    %328 = arith.divf %157, %327 : vector<8x128xf32>
    %329 = arith.mulf %303, %244 : vector<8x128xf32>
    %330 = arith.mulf %199, %275 : vector<8x128xf32>
    %331 = arith.mulf %200, %276 : vector<8x128xf32>
    %332 = arith.addf %330, %331 : vector<8x128xf32>
    %333 = arith.mulf %201, %277 : vector<8x128xf32>
    %334 = arith.addf %332, %333 : vector<8x128xf32>
    %cst_196 = arith.constant 1.000000e-03 : f32
    %335 = vector.broadcast %cst_196 : f32 to vector<8x128xf32>
    %336 = arith.maximumf %334, %335 : vector<8x128xf32>
    %337 = arith.mulf %199, %245 : vector<8x128xf32>
    %338 = arith.mulf %200, %246 : vector<8x128xf32>
    %339 = arith.addf %337, %338 : vector<8x128xf32>
    %340 = arith.mulf %201, %248 : vector<8x128xf32>
    %341 = arith.addf %339, %340 : vector<8x128xf32>
    %cst_197 = arith.constant 1.000000e-03 : f32
    %342 = vector.broadcast %cst_197 : f32 to vector<8x128xf32>
    %343 = arith.maximumf %341, %342 : vector<8x128xf32>
    %344 = arith.mulf %199, %260 : vector<8x128xf32>
    %345 = arith.mulf %200, %261 : vector<8x128xf32>
    %346 = arith.addf %344, %345 : vector<8x128xf32>
    %347 = arith.mulf %201, %263 : vector<8x128xf32>
    %348 = arith.addf %346, %347 : vector<8x128xf32>
    %cst_198 = arith.constant 1.000000e-03 : f32
    %349 = vector.broadcast %cst_198 : f32 to vector<8x128xf32>
    %350 = arith.maximumf %348, %349 : vector<8x128xf32>
    %351 = arith.mulf %336, %336 : vector<8x128xf32>
    %cst_199 = arith.constant 1.000000e+00 : f32
    %352 = vector.broadcast %cst_199 : f32 to vector<8x128xf32>
    %353 = arith.subf %205, %352 : vector<8x128xf32>
    %354 = arith.mulf %351, %353 : vector<8x128xf32>
    %cst_200 = arith.constant 1.000000e+00 : f32
    %355 = vector.broadcast %cst_200 : f32 to vector<8x128xf32>
    %356 = arith.addf %354, %355 : vector<8x128xf32>
    %cst_201 = arith.constant 1.000000e-03 : f32
    %357 = vector.broadcast %cst_201 : f32 to vector<8x128xf32>
    %358 = arith.maximumf %356, %357 : vector<8x128xf32>
    %359 = arith.mulf %343, %211 : vector<8x128xf32>
    %360 = arith.addf %359, %209 : vector<8x128xf32>
    %361 = arith.mulf %350, %211 : vector<8x128xf32>
    %362 = arith.addf %361, %209 : vector<8x128xf32>
    %cst_202 = arith.constant 4.000000e+00 : f32
    %363 = vector.broadcast %cst_202 : f32 to vector<8x128xf32>
    %364 = arith.mulf %363, %358 : vector<8x128xf32>
    %365 = arith.mulf %364, %358 : vector<8x128xf32>
    %366 = arith.mulf %365, %360 : vector<8x128xf32>
    %367 = arith.mulf %366, %362 : vector<8x128xf32>
    %368 = arith.divf %205, %367 : vector<8x128xf32>
    %369 = arith.mulf %343, %244 : vector<8x128xf32>
    %cst_203 = arith.constant 1.000000e+00 : f32
    %370 = vector.broadcast %cst_203 : f32 to vector<8x128xf32>
    %371 = arith.subf %370, %165 : vector<8x128xf32>
    %372 = arith.mulf %371, %289 : vector<8x128xf32>
    %373 = arith.addf %165, %372 : vector<8x128xf32>
    %cst_204 = arith.constant 1.000000e+00 : f32
    %374 = vector.broadcast %cst_204 : f32 to vector<8x128xf32>
    %375 = arith.subf %374, %213 : vector<8x128xf32>
    %376 = arith.mulf %375, %289 : vector<8x128xf32>
    %377 = arith.addf %213, %376 : vector<8x128xf32>
    %378 = arith.mulf %373, %328 : vector<8x128xf32>
    %379 = arith.addf %174, %378 : vector<8x128xf32>
    %380 = arith.mulf %379, %329 : vector<8x128xf32>
    %381 = arith.mulf %377, %368 : vector<8x128xf32>
    %382 = arith.addf %222, %381 : vector<8x128xf32>
    %383 = arith.mulf %382, %369 : vector<8x128xf32>
    %384 = vector.broadcast %6 : f32 to vector<8x128xf32>
    %385 = arith.mulf %380, %384 : vector<8x128xf32>
    %cst_205 = arith.constant 0.000000e+00 : f32
    %386 = vector.broadcast %cst_205 : f32 to vector<8x128xf32>
    %387 = arith.maximumf %385, %386 : vector<8x128xf32>
    %cst_206 = arith.constant 1.000000e-01 : f32
    %388 = vector.broadcast %cst_206 : f32 to vector<8x128xf32>
    %389 = arith.addf %387, %388 : vector<8x128xf32>
    %390 = vector.broadcast %6 : f32 to vector<8x128xf32>
    %391 = arith.mulf %383, %390 : vector<8x128xf32>
    %cst_207 = arith.constant 0.000000e+00 : f32
    %392 = vector.broadcast %cst_207 : f32 to vector<8x128xf32>
    %393 = arith.maximumf %391, %392 : vector<8x128xf32>
    %cst_208 = arith.constant 1.000000e-01 : f32
    %394 = vector.broadcast %cst_208 : f32 to vector<8x128xf32>
    %395 = arith.addf %393, %394 : vector<8x128xf32>
    %396 = arith.divf %389, %395 : vector<8x128xf32>
    %397 = math.log %396 : vector<8x128xf32>
    %398 = math.absf %397 : vector<8x128xf32>
    %399 = arith.addf %81, %398 : vector<8x128xf32>
    %cst_209 = arith.constant 1.000000e+00 : f32
    %400 = vector.broadcast %cst_209 : f32 to vector<8x128xf32>
    %401 = arith.subf %400, %167 : vector<8x128xf32>
    %402 = arith.mulf %401, %289 : vector<8x128xf32>
    %403 = arith.addf %167, %402 : vector<8x128xf32>
    %cst_210 = arith.constant 1.000000e+00 : f32
    %404 = vector.broadcast %cst_210 : f32 to vector<8x128xf32>
    %405 = arith.subf %404, %215 : vector<8x128xf32>
    %406 = arith.mulf %405, %289 : vector<8x128xf32>
    %407 = arith.addf %215, %406 : vector<8x128xf32>
    %408 = arith.mulf %403, %328 : vector<8x128xf32>
    %409 = arith.addf %179, %408 : vector<8x128xf32>
    %410 = arith.mulf %409, %329 : vector<8x128xf32>
    %411 = arith.mulf %407, %368 : vector<8x128xf32>
    %412 = arith.addf %227, %411 : vector<8x128xf32>
    %413 = arith.mulf %412, %369 : vector<8x128xf32>
    %414 = vector.broadcast %7 : f32 to vector<8x128xf32>
    %415 = arith.mulf %410, %414 : vector<8x128xf32>
    %cst_211 = arith.constant 0.000000e+00 : f32
    %416 = vector.broadcast %cst_211 : f32 to vector<8x128xf32>
    %417 = arith.maximumf %415, %416 : vector<8x128xf32>
    %cst_212 = arith.constant 1.000000e-01 : f32
    %418 = vector.broadcast %cst_212 : f32 to vector<8x128xf32>
    %419 = arith.addf %417, %418 : vector<8x128xf32>
    %420 = vector.broadcast %7 : f32 to vector<8x128xf32>
    %421 = arith.mulf %413, %420 : vector<8x128xf32>
    %cst_213 = arith.constant 0.000000e+00 : f32
    %422 = vector.broadcast %cst_213 : f32 to vector<8x128xf32>
    %423 = arith.maximumf %421, %422 : vector<8x128xf32>
    %cst_214 = arith.constant 1.000000e-01 : f32
    %424 = vector.broadcast %cst_214 : f32 to vector<8x128xf32>
    %425 = arith.addf %423, %424 : vector<8x128xf32>
    %426 = arith.divf %419, %425 : vector<8x128xf32>
    %427 = math.log %426 : vector<8x128xf32>
    %428 = math.absf %427 : vector<8x128xf32>
    %429 = arith.addf %399, %428 : vector<8x128xf32>
    %cst_215 = arith.constant 1.000000e+00 : f32
    %430 = vector.broadcast %cst_215 : f32 to vector<8x128xf32>
    %431 = arith.subf %430, %169 : vector<8x128xf32>
    %432 = arith.mulf %431, %289 : vector<8x128xf32>
    %433 = arith.addf %169, %432 : vector<8x128xf32>
    %cst_216 = arith.constant 1.000000e+00 : f32
    %434 = vector.broadcast %cst_216 : f32 to vector<8x128xf32>
    %435 = arith.subf %434, %217 : vector<8x128xf32>
    %436 = arith.mulf %435, %289 : vector<8x128xf32>
    %437 = arith.addf %217, %436 : vector<8x128xf32>
    %438 = arith.mulf %433, %328 : vector<8x128xf32>
    %439 = arith.addf %184, %438 : vector<8x128xf32>
    %440 = arith.mulf %439, %329 : vector<8x128xf32>
    %441 = arith.mulf %437, %368 : vector<8x128xf32>
    %442 = arith.addf %232, %441 : vector<8x128xf32>
    %443 = arith.mulf %442, %369 : vector<8x128xf32>
    %444 = vector.broadcast %8 : f32 to vector<8x128xf32>
    %445 = arith.mulf %440, %444 : vector<8x128xf32>
    %cst_217 = arith.constant 0.000000e+00 : f32
    %446 = vector.broadcast %cst_217 : f32 to vector<8x128xf32>
    %447 = arith.maximumf %445, %446 : vector<8x128xf32>
    %cst_218 = arith.constant 1.000000e-01 : f32
    %448 = vector.broadcast %cst_218 : f32 to vector<8x128xf32>
    %449 = arith.addf %447, %448 : vector<8x128xf32>
    %450 = vector.broadcast %8 : f32 to vector<8x128xf32>
    %451 = arith.mulf %443, %450 : vector<8x128xf32>
    %cst_219 = arith.constant 0.000000e+00 : f32
    %452 = vector.broadcast %cst_219 : f32 to vector<8x128xf32>
    %453 = arith.maximumf %451, %452 : vector<8x128xf32>
    %cst_220 = arith.constant 1.000000e-01 : f32
    %454 = vector.broadcast %cst_220 : f32 to vector<8x128xf32>
    %455 = arith.addf %453, %454 : vector<8x128xf32>
    %456 = arith.divf %449, %455 : vector<8x128xf32>
    %457 = math.log %456 : vector<8x128xf32>
    %458 = math.absf %457 : vector<8x128xf32>
    %459 = arith.addf %429, %458 : vector<8x128xf32>
    %460 = vector.broadcast %12 : f32 to vector<8x128xf32>
    %461 = arith.subf %460, %90 : vector<8x128xf32>
    %462 = vector.broadcast %13 : f32 to vector<8x128xf32>
    %463 = arith.subf %462, %93 : vector<8x128xf32>
    %464 = arith.mulf %461, %461 : vector<8x128xf32>
    %465 = arith.mulf %463, %463 : vector<8x128xf32>
    %466 = arith.addf %464, %465 : vector<8x128xf32>
    %467 = arith.mulf %14, %14 : f32
    %468 = vector.broadcast %467 : f32 to vector<8x128xf32>
    %469 = arith.addf %466, %468 : vector<8x128xf32>
    %470 = math.rsqrt %469 : vector<8x128xf32>
    %471 = arith.mulf %470, %470 : vector<8x128xf32>
    %472 = arith.mulf %461, %470 : vector<8x128xf32>
    %473 = arith.mulf %463, %470 : vector<8x128xf32>
    %474 = vector.broadcast %14 : f32 to vector<8x128xf32>
    %475 = arith.mulf %474, %470 : vector<8x128xf32>
    %476 = vector.broadcast %9 : f32 to vector<8x128xf32>
    %477 = arith.subf %476, %90 : vector<8x128xf32>
    %478 = vector.broadcast %10 : f32 to vector<8x128xf32>
    %479 = arith.subf %478, %93 : vector<8x128xf32>
    %480 = arith.mulf %477, %477 : vector<8x128xf32>
    %481 = arith.mulf %479, %479 : vector<8x128xf32>
    %482 = arith.addf %480, %481 : vector<8x128xf32>
    %483 = arith.mulf %11, %11 : f32
    %484 = vector.broadcast %483 : f32 to vector<8x128xf32>
    %485 = arith.addf %482, %484 : vector<8x128xf32>
    %486 = math.rsqrt %485 : vector<8x128xf32>
    %487 = arith.mulf %477, %486 : vector<8x128xf32>
    %488 = arith.mulf %479, %486 : vector<8x128xf32>
    %489 = vector.broadcast %11 : f32 to vector<8x128xf32>
    %490 = arith.mulf %489, %486 : vector<8x128xf32>
    %491 = arith.addf %472, %487 : vector<8x128xf32>
    %492 = arith.addf %473, %488 : vector<8x128xf32>
    %493 = arith.addf %475, %490 : vector<8x128xf32>
    %494 = arith.mulf %491, %491 : vector<8x128xf32>
    %495 = arith.mulf %492, %492 : vector<8x128xf32>
    %496 = arith.addf %494, %495 : vector<8x128xf32>
    %497 = arith.mulf %493, %493 : vector<8x128xf32>
    %498 = arith.addf %496, %497 : vector<8x128xf32>
    %cst_221 = arith.constant 9.99999996E-13 : f32
    %499 = vector.broadcast %cst_221 : f32 to vector<8x128xf32>
    %500 = arith.addf %498, %499 : vector<8x128xf32>
    %501 = math.rsqrt %500 : vector<8x128xf32>
    %502 = arith.mulf %491, %501 : vector<8x128xf32>
    %503 = arith.mulf %492, %501 : vector<8x128xf32>
    %504 = arith.mulf %493, %501 : vector<8x128xf32>
    %505 = arith.mulf %487, %502 : vector<8x128xf32>
    %506 = arith.mulf %488, %503 : vector<8x128xf32>
    %507 = arith.addf %505, %506 : vector<8x128xf32>
    %508 = arith.mulf %490, %504 : vector<8x128xf32>
    %509 = arith.addf %507, %508 : vector<8x128xf32>
    %cst_222 = arith.constant 1.000000e-03 : f32
    %510 = vector.broadcast %cst_222 : f32 to vector<8x128xf32>
    %511 = arith.maximumf %509, %510 : vector<8x128xf32>
    %cst_223 = arith.constant 1.000000e+00 : f32
    %512 = vector.broadcast %cst_223 : f32 to vector<8x128xf32>
    %513 = arith.subf %512, %511 : vector<8x128xf32>
    %514 = arith.mulf %513, %513 : vector<8x128xf32>
    %515 = arith.mulf %514, %514 : vector<8x128xf32>
    %516 = arith.mulf %515, %513 : vector<8x128xf32>
    %517 = arith.mulf %151, %502 : vector<8x128xf32>
    %518 = arith.mulf %152, %503 : vector<8x128xf32>
    %519 = arith.addf %517, %518 : vector<8x128xf32>
    %520 = arith.mulf %153, %504 : vector<8x128xf32>
    %521 = arith.addf %519, %520 : vector<8x128xf32>
    %cst_224 = arith.constant 1.000000e-03 : f32
    %522 = vector.broadcast %cst_224 : f32 to vector<8x128xf32>
    %523 = arith.maximumf %521, %522 : vector<8x128xf32>
    %524 = arith.mulf %151, %472 : vector<8x128xf32>
    %525 = arith.mulf %152, %473 : vector<8x128xf32>
    %526 = arith.addf %524, %525 : vector<8x128xf32>
    %527 = arith.mulf %153, %475 : vector<8x128xf32>
    %528 = arith.addf %526, %527 : vector<8x128xf32>
    %cst_225 = arith.constant 1.000000e-03 : f32
    %529 = vector.broadcast %cst_225 : f32 to vector<8x128xf32>
    %530 = arith.maximumf %528, %529 : vector<8x128xf32>
    %531 = arith.mulf %151, %487 : vector<8x128xf32>
    %532 = arith.mulf %152, %488 : vector<8x128xf32>
    %533 = arith.addf %531, %532 : vector<8x128xf32>
    %534 = arith.mulf %153, %490 : vector<8x128xf32>
    %535 = arith.addf %533, %534 : vector<8x128xf32>
    %cst_226 = arith.constant 1.000000e-03 : f32
    %536 = vector.broadcast %cst_226 : f32 to vector<8x128xf32>
    %537 = arith.maximumf %535, %536 : vector<8x128xf32>
    %538 = arith.mulf %523, %523 : vector<8x128xf32>
    %cst_227 = arith.constant 1.000000e+00 : f32
    %539 = vector.broadcast %cst_227 : f32 to vector<8x128xf32>
    %540 = arith.subf %157, %539 : vector<8x128xf32>
    %541 = arith.mulf %538, %540 : vector<8x128xf32>
    %cst_228 = arith.constant 1.000000e+00 : f32
    %542 = vector.broadcast %cst_228 : f32 to vector<8x128xf32>
    %543 = arith.addf %541, %542 : vector<8x128xf32>
    %cst_229 = arith.constant 1.000000e-03 : f32
    %544 = vector.broadcast %cst_229 : f32 to vector<8x128xf32>
    %545 = arith.maximumf %543, %544 : vector<8x128xf32>
    %546 = arith.mulf %530, %163 : vector<8x128xf32>
    %547 = arith.addf %546, %161 : vector<8x128xf32>
    %548 = arith.mulf %537, %163 : vector<8x128xf32>
    %549 = arith.addf %548, %161 : vector<8x128xf32>
    %cst_230 = arith.constant 4.000000e+00 : f32
    %550 = vector.broadcast %cst_230 : f32 to vector<8x128xf32>
    %551 = arith.mulf %550, %545 : vector<8x128xf32>
    %552 = arith.mulf %551, %545 : vector<8x128xf32>
    %553 = arith.mulf %552, %547 : vector<8x128xf32>
    %554 = arith.mulf %553, %549 : vector<8x128xf32>
    %555 = arith.divf %157, %554 : vector<8x128xf32>
    %556 = arith.mulf %530, %471 : vector<8x128xf32>
    %557 = arith.mulf %199, %502 : vector<8x128xf32>
    %558 = arith.mulf %200, %503 : vector<8x128xf32>
    %559 = arith.addf %557, %558 : vector<8x128xf32>
    %560 = arith.mulf %201, %504 : vector<8x128xf32>
    %561 = arith.addf %559, %560 : vector<8x128xf32>
    %cst_231 = arith.constant 1.000000e-03 : f32
    %562 = vector.broadcast %cst_231 : f32 to vector<8x128xf32>
    %563 = arith.maximumf %561, %562 : vector<8x128xf32>
    %564 = arith.mulf %199, %472 : vector<8x128xf32>
    %565 = arith.mulf %200, %473 : vector<8x128xf32>
    %566 = arith.addf %564, %565 : vector<8x128xf32>
    %567 = arith.mulf %201, %475 : vector<8x128xf32>
    %568 = arith.addf %566, %567 : vector<8x128xf32>
    %cst_232 = arith.constant 1.000000e-03 : f32
    %569 = vector.broadcast %cst_232 : f32 to vector<8x128xf32>
    %570 = arith.maximumf %568, %569 : vector<8x128xf32>
    %571 = arith.mulf %199, %487 : vector<8x128xf32>
    %572 = arith.mulf %200, %488 : vector<8x128xf32>
    %573 = arith.addf %571, %572 : vector<8x128xf32>
    %574 = arith.mulf %201, %490 : vector<8x128xf32>
    %575 = arith.addf %573, %574 : vector<8x128xf32>
    %cst_233 = arith.constant 1.000000e-03 : f32
    %576 = vector.broadcast %cst_233 : f32 to vector<8x128xf32>
    %577 = arith.maximumf %575, %576 : vector<8x128xf32>
    %578 = arith.mulf %563, %563 : vector<8x128xf32>
    %cst_234 = arith.constant 1.000000e+00 : f32
    %579 = vector.broadcast %cst_234 : f32 to vector<8x128xf32>
    %580 = arith.subf %205, %579 : vector<8x128xf32>
    %581 = arith.mulf %578, %580 : vector<8x128xf32>
    %cst_235 = arith.constant 1.000000e+00 : f32
    %582 = vector.broadcast %cst_235 : f32 to vector<8x128xf32>
    %583 = arith.addf %581, %582 : vector<8x128xf32>
    %cst_236 = arith.constant 1.000000e-03 : f32
    %584 = vector.broadcast %cst_236 : f32 to vector<8x128xf32>
    %585 = arith.maximumf %583, %584 : vector<8x128xf32>
    %586 = arith.mulf %570, %211 : vector<8x128xf32>
    %587 = arith.addf %586, %209 : vector<8x128xf32>
    %588 = arith.mulf %577, %211 : vector<8x128xf32>
    %589 = arith.addf %588, %209 : vector<8x128xf32>
    %cst_237 = arith.constant 4.000000e+00 : f32
    %590 = vector.broadcast %cst_237 : f32 to vector<8x128xf32>
    %591 = arith.mulf %590, %585 : vector<8x128xf32>
    %592 = arith.mulf %591, %585 : vector<8x128xf32>
    %593 = arith.mulf %592, %587 : vector<8x128xf32>
    %594 = arith.mulf %593, %589 : vector<8x128xf32>
    %595 = arith.divf %205, %594 : vector<8x128xf32>
    %596 = arith.mulf %570, %471 : vector<8x128xf32>
    %cst_238 = arith.constant 1.000000e+00 : f32
    %597 = vector.broadcast %cst_238 : f32 to vector<8x128xf32>
    %598 = arith.subf %597, %165 : vector<8x128xf32>
    %599 = arith.mulf %598, %516 : vector<8x128xf32>
    %600 = arith.addf %165, %599 : vector<8x128xf32>
    %cst_239 = arith.constant 1.000000e+00 : f32
    %601 = vector.broadcast %cst_239 : f32 to vector<8x128xf32>
    %602 = arith.subf %601, %213 : vector<8x128xf32>
    %603 = arith.mulf %602, %516 : vector<8x128xf32>
    %604 = arith.addf %213, %603 : vector<8x128xf32>
    %605 = arith.mulf %600, %555 : vector<8x128xf32>
    %606 = arith.addf %174, %605 : vector<8x128xf32>
    %607 = arith.mulf %606, %556 : vector<8x128xf32>
    %608 = arith.mulf %604, %595 : vector<8x128xf32>
    %609 = arith.addf %222, %608 : vector<8x128xf32>
    %610 = arith.mulf %609, %596 : vector<8x128xf32>
    %611 = vector.broadcast %15 : f32 to vector<8x128xf32>
    %612 = arith.mulf %607, %611 : vector<8x128xf32>
    %cst_240 = arith.constant 0.000000e+00 : f32
    %613 = vector.broadcast %cst_240 : f32 to vector<8x128xf32>
    %614 = arith.maximumf %612, %613 : vector<8x128xf32>
    %cst_241 = arith.constant 1.000000e-01 : f32
    %615 = vector.broadcast %cst_241 : f32 to vector<8x128xf32>
    %616 = arith.addf %614, %615 : vector<8x128xf32>
    %617 = vector.broadcast %15 : f32 to vector<8x128xf32>
    %618 = arith.mulf %610, %617 : vector<8x128xf32>
    %cst_242 = arith.constant 0.000000e+00 : f32
    %619 = vector.broadcast %cst_242 : f32 to vector<8x128xf32>
    %620 = arith.maximumf %618, %619 : vector<8x128xf32>
    %cst_243 = arith.constant 1.000000e-01 : f32
    %621 = vector.broadcast %cst_243 : f32 to vector<8x128xf32>
    %622 = arith.addf %620, %621 : vector<8x128xf32>
    %623 = arith.divf %616, %622 : vector<8x128xf32>
    %624 = math.log %623 : vector<8x128xf32>
    %625 = math.absf %624 : vector<8x128xf32>
    %626 = arith.addf %459, %625 : vector<8x128xf32>
    %cst_244 = arith.constant 1.000000e+00 : f32
    %627 = vector.broadcast %cst_244 : f32 to vector<8x128xf32>
    %628 = arith.subf %627, %167 : vector<8x128xf32>
    %629 = arith.mulf %628, %516 : vector<8x128xf32>
    %630 = arith.addf %167, %629 : vector<8x128xf32>
    %cst_245 = arith.constant 1.000000e+00 : f32
    %631 = vector.broadcast %cst_245 : f32 to vector<8x128xf32>
    %632 = arith.subf %631, %215 : vector<8x128xf32>
    %633 = arith.mulf %632, %516 : vector<8x128xf32>
    %634 = arith.addf %215, %633 : vector<8x128xf32>
    %635 = arith.mulf %630, %555 : vector<8x128xf32>
    %636 = arith.addf %179, %635 : vector<8x128xf32>
    %637 = arith.mulf %636, %556 : vector<8x128xf32>
    %638 = arith.mulf %634, %595 : vector<8x128xf32>
    %639 = arith.addf %227, %638 : vector<8x128xf32>
    %640 = arith.mulf %639, %596 : vector<8x128xf32>
    %641 = vector.broadcast %16 : f32 to vector<8x128xf32>
    %642 = arith.mulf %637, %641 : vector<8x128xf32>
    %cst_246 = arith.constant 0.000000e+00 : f32
    %643 = vector.broadcast %cst_246 : f32 to vector<8x128xf32>
    %644 = arith.maximumf %642, %643 : vector<8x128xf32>
    %cst_247 = arith.constant 1.000000e-01 : f32
    %645 = vector.broadcast %cst_247 : f32 to vector<8x128xf32>
    %646 = arith.addf %644, %645 : vector<8x128xf32>
    %647 = vector.broadcast %16 : f32 to vector<8x128xf32>
    %648 = arith.mulf %640, %647 : vector<8x128xf32>
    %cst_248 = arith.constant 0.000000e+00 : f32
    %649 = vector.broadcast %cst_248 : f32 to vector<8x128xf32>
    %650 = arith.maximumf %648, %649 : vector<8x128xf32>
    %cst_249 = arith.constant 1.000000e-01 : f32
    %651 = vector.broadcast %cst_249 : f32 to vector<8x128xf32>
    %652 = arith.addf %650, %651 : vector<8x128xf32>
    %653 = arith.divf %646, %652 : vector<8x128xf32>
    %654 = math.log %653 : vector<8x128xf32>
    %655 = math.absf %654 : vector<8x128xf32>
    %656 = arith.addf %626, %655 : vector<8x128xf32>
    %cst_250 = arith.constant 1.000000e+00 : f32
    %657 = vector.broadcast %cst_250 : f32 to vector<8x128xf32>
    %658 = arith.subf %657, %169 : vector<8x128xf32>
    %659 = arith.mulf %658, %516 : vector<8x128xf32>
    %660 = arith.addf %169, %659 : vector<8x128xf32>
    %cst_251 = arith.constant 1.000000e+00 : f32
    %661 = vector.broadcast %cst_251 : f32 to vector<8x128xf32>
    %662 = arith.subf %661, %217 : vector<8x128xf32>
    %663 = arith.mulf %662, %516 : vector<8x128xf32>
    %664 = arith.addf %217, %663 : vector<8x128xf32>
    %665 = arith.mulf %660, %555 : vector<8x128xf32>
    %666 = arith.addf %184, %665 : vector<8x128xf32>
    %667 = arith.mulf %666, %556 : vector<8x128xf32>
    %668 = arith.mulf %664, %595 : vector<8x128xf32>
    %669 = arith.addf %232, %668 : vector<8x128xf32>
    %670 = arith.mulf %669, %596 : vector<8x128xf32>
    %671 = vector.broadcast %17 : f32 to vector<8x128xf32>
    %672 = arith.mulf %667, %671 : vector<8x128xf32>
    %cst_252 = arith.constant 0.000000e+00 : f32
    %673 = vector.broadcast %cst_252 : f32 to vector<8x128xf32>
    %674 = arith.maximumf %672, %673 : vector<8x128xf32>
    %cst_253 = arith.constant 1.000000e-01 : f32
    %675 = vector.broadcast %cst_253 : f32 to vector<8x128xf32>
    %676 = arith.addf %674, %675 : vector<8x128xf32>
    %677 = vector.broadcast %17 : f32 to vector<8x128xf32>
    %678 = arith.mulf %670, %677 : vector<8x128xf32>
    %cst_254 = arith.constant 0.000000e+00 : f32
    %679 = vector.broadcast %cst_254 : f32 to vector<8x128xf32>
    %680 = arith.maximumf %678, %679 : vector<8x128xf32>
    %cst_255 = arith.constant 1.000000e-01 : f32
    %681 = vector.broadcast %cst_255 : f32 to vector<8x128xf32>
    %682 = arith.addf %680, %681 : vector<8x128xf32>
    %683 = arith.divf %676, %682 : vector<8x128xf32>
    %684 = math.log %683 : vector<8x128xf32>
    %685 = math.absf %684 : vector<8x128xf32>
    %686 = arith.addf %656, %685 : vector<8x128xf32>
    %687 = vector.broadcast %21 : f32 to vector<8x128xf32>
    %688 = arith.subf %687, %90 : vector<8x128xf32>
    %689 = vector.broadcast %22 : f32 to vector<8x128xf32>
    %690 = arith.subf %689, %93 : vector<8x128xf32>
    %691 = arith.mulf %688, %688 : vector<8x128xf32>
    %692 = arith.mulf %690, %690 : vector<8x128xf32>
    %693 = arith.addf %691, %692 : vector<8x128xf32>
    %694 = arith.mulf %23, %23 : f32
    %695 = vector.broadcast %694 : f32 to vector<8x128xf32>
    %696 = arith.addf %693, %695 : vector<8x128xf32>
    %697 = math.rsqrt %696 : vector<8x128xf32>
    %698 = arith.mulf %697, %697 : vector<8x128xf32>
    %699 = arith.mulf %688, %697 : vector<8x128xf32>
    %700 = arith.mulf %690, %697 : vector<8x128xf32>
    %701 = vector.broadcast %23 : f32 to vector<8x128xf32>
    %702 = arith.mulf %701, %697 : vector<8x128xf32>
    %703 = vector.broadcast %18 : f32 to vector<8x128xf32>
    %704 = arith.subf %703, %90 : vector<8x128xf32>
    %705 = vector.broadcast %19 : f32 to vector<8x128xf32>
    %706 = arith.subf %705, %93 : vector<8x128xf32>
    %707 = arith.mulf %704, %704 : vector<8x128xf32>
    %708 = arith.mulf %706, %706 : vector<8x128xf32>
    %709 = arith.addf %707, %708 : vector<8x128xf32>
    %710 = arith.mulf %20, %20 : f32
    %711 = vector.broadcast %710 : f32 to vector<8x128xf32>
    %712 = arith.addf %709, %711 : vector<8x128xf32>
    %713 = math.rsqrt %712 : vector<8x128xf32>
    %714 = arith.mulf %704, %713 : vector<8x128xf32>
    %715 = arith.mulf %706, %713 : vector<8x128xf32>
    %716 = vector.broadcast %20 : f32 to vector<8x128xf32>
    %717 = arith.mulf %716, %713 : vector<8x128xf32>
    %718 = arith.addf %699, %714 : vector<8x128xf32>
    %719 = arith.addf %700, %715 : vector<8x128xf32>
    %720 = arith.addf %702, %717 : vector<8x128xf32>
    %721 = arith.mulf %718, %718 : vector<8x128xf32>
    %722 = arith.mulf %719, %719 : vector<8x128xf32>
    %723 = arith.addf %721, %722 : vector<8x128xf32>
    %724 = arith.mulf %720, %720 : vector<8x128xf32>
    %725 = arith.addf %723, %724 : vector<8x128xf32>
    %cst_256 = arith.constant 9.99999996E-13 : f32
    %726 = vector.broadcast %cst_256 : f32 to vector<8x128xf32>
    %727 = arith.addf %725, %726 : vector<8x128xf32>
    %728 = math.rsqrt %727 : vector<8x128xf32>
    %729 = arith.mulf %718, %728 : vector<8x128xf32>
    %730 = arith.mulf %719, %728 : vector<8x128xf32>
    %731 = arith.mulf %720, %728 : vector<8x128xf32>
    %732 = arith.mulf %714, %729 : vector<8x128xf32>
    %733 = arith.mulf %715, %730 : vector<8x128xf32>
    %734 = arith.addf %732, %733 : vector<8x128xf32>
    %735 = arith.mulf %717, %731 : vector<8x128xf32>
    %736 = arith.addf %734, %735 : vector<8x128xf32>
    %cst_257 = arith.constant 1.000000e-03 : f32
    %737 = vector.broadcast %cst_257 : f32 to vector<8x128xf32>
    %738 = arith.maximumf %736, %737 : vector<8x128xf32>
    %cst_258 = arith.constant 1.000000e+00 : f32
    %739 = vector.broadcast %cst_258 : f32 to vector<8x128xf32>
    %740 = arith.subf %739, %738 : vector<8x128xf32>
    %741 = arith.mulf %740, %740 : vector<8x128xf32>
    %742 = arith.mulf %741, %741 : vector<8x128xf32>
    %743 = arith.mulf %742, %740 : vector<8x128xf32>
    %744 = arith.mulf %151, %729 : vector<8x128xf32>
    %745 = arith.mulf %152, %730 : vector<8x128xf32>
    %746 = arith.addf %744, %745 : vector<8x128xf32>
    %747 = arith.mulf %153, %731 : vector<8x128xf32>
    %748 = arith.addf %746, %747 : vector<8x128xf32>
    %cst_259 = arith.constant 1.000000e-03 : f32
    %749 = vector.broadcast %cst_259 : f32 to vector<8x128xf32>
    %750 = arith.maximumf %748, %749 : vector<8x128xf32>
    %751 = arith.mulf %151, %699 : vector<8x128xf32>
    %752 = arith.mulf %152, %700 : vector<8x128xf32>
    %753 = arith.addf %751, %752 : vector<8x128xf32>
    %754 = arith.mulf %153, %702 : vector<8x128xf32>
    %755 = arith.addf %753, %754 : vector<8x128xf32>
    %cst_260 = arith.constant 1.000000e-03 : f32
    %756 = vector.broadcast %cst_260 : f32 to vector<8x128xf32>
    %757 = arith.maximumf %755, %756 : vector<8x128xf32>
    %758 = arith.mulf %151, %714 : vector<8x128xf32>
    %759 = arith.mulf %152, %715 : vector<8x128xf32>
    %760 = arith.addf %758, %759 : vector<8x128xf32>
    %761 = arith.mulf %153, %717 : vector<8x128xf32>
    %762 = arith.addf %760, %761 : vector<8x128xf32>
    %cst_261 = arith.constant 1.000000e-03 : f32
    %763 = vector.broadcast %cst_261 : f32 to vector<8x128xf32>
    %764 = arith.maximumf %762, %763 : vector<8x128xf32>
    %765 = arith.mulf %750, %750 : vector<8x128xf32>
    %cst_262 = arith.constant 1.000000e+00 : f32
    %766 = vector.broadcast %cst_262 : f32 to vector<8x128xf32>
    %767 = arith.subf %157, %766 : vector<8x128xf32>
    %768 = arith.mulf %765, %767 : vector<8x128xf32>
    %cst_263 = arith.constant 1.000000e+00 : f32
    %769 = vector.broadcast %cst_263 : f32 to vector<8x128xf32>
    %770 = arith.addf %768, %769 : vector<8x128xf32>
    %cst_264 = arith.constant 1.000000e-03 : f32
    %771 = vector.broadcast %cst_264 : f32 to vector<8x128xf32>
    %772 = arith.maximumf %770, %771 : vector<8x128xf32>
    %773 = arith.mulf %757, %163 : vector<8x128xf32>
    %774 = arith.addf %773, %161 : vector<8x128xf32>
    %775 = arith.mulf %764, %163 : vector<8x128xf32>
    %776 = arith.addf %775, %161 : vector<8x128xf32>
    %cst_265 = arith.constant 4.000000e+00 : f32
    %777 = vector.broadcast %cst_265 : f32 to vector<8x128xf32>
    %778 = arith.mulf %777, %772 : vector<8x128xf32>
    %779 = arith.mulf %778, %772 : vector<8x128xf32>
    %780 = arith.mulf %779, %774 : vector<8x128xf32>
    %781 = arith.mulf %780, %776 : vector<8x128xf32>
    %782 = arith.divf %157, %781 : vector<8x128xf32>
    %783 = arith.mulf %757, %698 : vector<8x128xf32>
    %784 = arith.mulf %199, %729 : vector<8x128xf32>
    %785 = arith.mulf %200, %730 : vector<8x128xf32>
    %786 = arith.addf %784, %785 : vector<8x128xf32>
    %787 = arith.mulf %201, %731 : vector<8x128xf32>
    %788 = arith.addf %786, %787 : vector<8x128xf32>
    %cst_266 = arith.constant 1.000000e-03 : f32
    %789 = vector.broadcast %cst_266 : f32 to vector<8x128xf32>
    %790 = arith.maximumf %788, %789 : vector<8x128xf32>
    %791 = arith.mulf %199, %699 : vector<8x128xf32>
    %792 = arith.mulf %200, %700 : vector<8x128xf32>
    %793 = arith.addf %791, %792 : vector<8x128xf32>
    %794 = arith.mulf %201, %702 : vector<8x128xf32>
    %795 = arith.addf %793, %794 : vector<8x128xf32>
    %cst_267 = arith.constant 1.000000e-03 : f32
    %796 = vector.broadcast %cst_267 : f32 to vector<8x128xf32>
    %797 = arith.maximumf %795, %796 : vector<8x128xf32>
    %798 = arith.mulf %199, %714 : vector<8x128xf32>
    %799 = arith.mulf %200, %715 : vector<8x128xf32>
    %800 = arith.addf %798, %799 : vector<8x128xf32>
    %801 = arith.mulf %201, %717 : vector<8x128xf32>
    %802 = arith.addf %800, %801 : vector<8x128xf32>
    %cst_268 = arith.constant 1.000000e-03 : f32
    %803 = vector.broadcast %cst_268 : f32 to vector<8x128xf32>
    %804 = arith.maximumf %802, %803 : vector<8x128xf32>
    %805 = arith.mulf %790, %790 : vector<8x128xf32>
    %cst_269 = arith.constant 1.000000e+00 : f32
    %806 = vector.broadcast %cst_269 : f32 to vector<8x128xf32>
    %807 = arith.subf %205, %806 : vector<8x128xf32>
    %808 = arith.mulf %805, %807 : vector<8x128xf32>
    %cst_270 = arith.constant 1.000000e+00 : f32
    %809 = vector.broadcast %cst_270 : f32 to vector<8x128xf32>
    %810 = arith.addf %808, %809 : vector<8x128xf32>
    %cst_271 = arith.constant 1.000000e-03 : f32
    %811 = vector.broadcast %cst_271 : f32 to vector<8x128xf32>
    %812 = arith.maximumf %810, %811 : vector<8x128xf32>
    %813 = arith.mulf %797, %211 : vector<8x128xf32>
    %814 = arith.addf %813, %209 : vector<8x128xf32>
    %815 = arith.mulf %804, %211 : vector<8x128xf32>
    %816 = arith.addf %815, %209 : vector<8x128xf32>
    %cst_272 = arith.constant 4.000000e+00 : f32
    %817 = vector.broadcast %cst_272 : f32 to vector<8x128xf32>
    %818 = arith.mulf %817, %812 : vector<8x128xf32>
    %819 = arith.mulf %818, %812 : vector<8x128xf32>
    %820 = arith.mulf %819, %814 : vector<8x128xf32>
    %821 = arith.mulf %820, %816 : vector<8x128xf32>
    %822 = arith.divf %205, %821 : vector<8x128xf32>
    %823 = arith.mulf %797, %698 : vector<8x128xf32>
    %cst_273 = arith.constant 1.000000e+00 : f32
    %824 = vector.broadcast %cst_273 : f32 to vector<8x128xf32>
    %825 = arith.subf %824, %165 : vector<8x128xf32>
    %826 = arith.mulf %825, %743 : vector<8x128xf32>
    %827 = arith.addf %165, %826 : vector<8x128xf32>
    %cst_274 = arith.constant 1.000000e+00 : f32
    %828 = vector.broadcast %cst_274 : f32 to vector<8x128xf32>
    %829 = arith.subf %828, %213 : vector<8x128xf32>
    %830 = arith.mulf %829, %743 : vector<8x128xf32>
    %831 = arith.addf %213, %830 : vector<8x128xf32>
    %832 = arith.mulf %827, %782 : vector<8x128xf32>
    %833 = arith.addf %174, %832 : vector<8x128xf32>
    %834 = arith.mulf %833, %783 : vector<8x128xf32>
    %835 = arith.mulf %831, %822 : vector<8x128xf32>
    %836 = arith.addf %222, %835 : vector<8x128xf32>
    %837 = arith.mulf %836, %823 : vector<8x128xf32>
    %838 = vector.broadcast %24 : f32 to vector<8x128xf32>
    %839 = arith.mulf %834, %838 : vector<8x128xf32>
    %cst_275 = arith.constant 0.000000e+00 : f32
    %840 = vector.broadcast %cst_275 : f32 to vector<8x128xf32>
    %841 = arith.maximumf %839, %840 : vector<8x128xf32>
    %cst_276 = arith.constant 1.000000e-01 : f32
    %842 = vector.broadcast %cst_276 : f32 to vector<8x128xf32>
    %843 = arith.addf %841, %842 : vector<8x128xf32>
    %844 = vector.broadcast %24 : f32 to vector<8x128xf32>
    %845 = arith.mulf %837, %844 : vector<8x128xf32>
    %cst_277 = arith.constant 0.000000e+00 : f32
    %846 = vector.broadcast %cst_277 : f32 to vector<8x128xf32>
    %847 = arith.maximumf %845, %846 : vector<8x128xf32>
    %cst_278 = arith.constant 1.000000e-01 : f32
    %848 = vector.broadcast %cst_278 : f32 to vector<8x128xf32>
    %849 = arith.addf %847, %848 : vector<8x128xf32>
    %850 = arith.divf %843, %849 : vector<8x128xf32>
    %851 = math.log %850 : vector<8x128xf32>
    %852 = math.absf %851 : vector<8x128xf32>
    %853 = arith.addf %686, %852 : vector<8x128xf32>
    %cst_279 = arith.constant 1.000000e+00 : f32
    %854 = vector.broadcast %cst_279 : f32 to vector<8x128xf32>
    %855 = arith.subf %854, %167 : vector<8x128xf32>
    %856 = arith.mulf %855, %743 : vector<8x128xf32>
    %857 = arith.addf %167, %856 : vector<8x128xf32>
    %cst_280 = arith.constant 1.000000e+00 : f32
    %858 = vector.broadcast %cst_280 : f32 to vector<8x128xf32>
    %859 = arith.subf %858, %215 : vector<8x128xf32>
    %860 = arith.mulf %859, %743 : vector<8x128xf32>
    %861 = arith.addf %215, %860 : vector<8x128xf32>
    %862 = arith.mulf %857, %782 : vector<8x128xf32>
    %863 = arith.addf %179, %862 : vector<8x128xf32>
    %864 = arith.mulf %863, %783 : vector<8x128xf32>
    %865 = arith.mulf %861, %822 : vector<8x128xf32>
    %866 = arith.addf %227, %865 : vector<8x128xf32>
    %867 = arith.mulf %866, %823 : vector<8x128xf32>
    %868 = vector.broadcast %25 : f32 to vector<8x128xf32>
    %869 = arith.mulf %864, %868 : vector<8x128xf32>
    %cst_281 = arith.constant 0.000000e+00 : f32
    %870 = vector.broadcast %cst_281 : f32 to vector<8x128xf32>
    %871 = arith.maximumf %869, %870 : vector<8x128xf32>
    %cst_282 = arith.constant 1.000000e-01 : f32
    %872 = vector.broadcast %cst_282 : f32 to vector<8x128xf32>
    %873 = arith.addf %871, %872 : vector<8x128xf32>
    %874 = vector.broadcast %25 : f32 to vector<8x128xf32>
    %875 = arith.mulf %867, %874 : vector<8x128xf32>
    %cst_283 = arith.constant 0.000000e+00 : f32
    %876 = vector.broadcast %cst_283 : f32 to vector<8x128xf32>
    %877 = arith.maximumf %875, %876 : vector<8x128xf32>
    %cst_284 = arith.constant 1.000000e-01 : f32
    %878 = vector.broadcast %cst_284 : f32 to vector<8x128xf32>
    %879 = arith.addf %877, %878 : vector<8x128xf32>
    %880 = arith.divf %873, %879 : vector<8x128xf32>
    %881 = math.log %880 : vector<8x128xf32>
    %882 = math.absf %881 : vector<8x128xf32>
    %883 = arith.addf %853, %882 : vector<8x128xf32>
    %cst_285 = arith.constant 1.000000e+00 : f32
    %884 = vector.broadcast %cst_285 : f32 to vector<8x128xf32>
    %885 = arith.subf %884, %169 : vector<8x128xf32>
    %886 = arith.mulf %885, %743 : vector<8x128xf32>
    %887 = arith.addf %169, %886 : vector<8x128xf32>
    %cst_286 = arith.constant 1.000000e+00 : f32
    %888 = vector.broadcast %cst_286 : f32 to vector<8x128xf32>
    %889 = arith.subf %888, %217 : vector<8x128xf32>
    %890 = arith.mulf %889, %743 : vector<8x128xf32>
    %891 = arith.addf %217, %890 : vector<8x128xf32>
    %892 = arith.mulf %887, %782 : vector<8x128xf32>
    %893 = arith.addf %184, %892 : vector<8x128xf32>
    %894 = arith.mulf %893, %783 : vector<8x128xf32>
    %895 = arith.mulf %891, %822 : vector<8x128xf32>
    %896 = arith.addf %232, %895 : vector<8x128xf32>
    %897 = arith.mulf %896, %823 : vector<8x128xf32>
    %898 = vector.broadcast %26 : f32 to vector<8x128xf32>
    %899 = arith.mulf %894, %898 : vector<8x128xf32>
    %cst_287 = arith.constant 0.000000e+00 : f32
    %900 = vector.broadcast %cst_287 : f32 to vector<8x128xf32>
    %901 = arith.maximumf %899, %900 : vector<8x128xf32>
    %cst_288 = arith.constant 1.000000e-01 : f32
    %902 = vector.broadcast %cst_288 : f32 to vector<8x128xf32>
    %903 = arith.addf %901, %902 : vector<8x128xf32>
    %904 = vector.broadcast %26 : f32 to vector<8x128xf32>
    %905 = arith.mulf %897, %904 : vector<8x128xf32>
    %cst_289 = arith.constant 0.000000e+00 : f32
    %906 = vector.broadcast %cst_289 : f32 to vector<8x128xf32>
    %907 = arith.maximumf %905, %906 : vector<8x128xf32>
    %cst_290 = arith.constant 1.000000e-01 : f32
    %908 = vector.broadcast %cst_290 : f32 to vector<8x128xf32>
    %909 = arith.addf %907, %908 : vector<8x128xf32>
    %910 = arith.divf %903, %909 : vector<8x128xf32>
    %911 = math.log %910 : vector<8x128xf32>
    %912 = math.absf %911 : vector<8x128xf32>
    %913 = arith.addf %883, %912 : vector<8x128xf32>
    %914 = vector.broadcast %30 : f32 to vector<8x128xf32>
    %915 = arith.subf %914, %90 : vector<8x128xf32>
    %916 = vector.broadcast %31 : f32 to vector<8x128xf32>
    %917 = arith.subf %916, %93 : vector<8x128xf32>
    %918 = arith.mulf %915, %915 : vector<8x128xf32>
    %919 = arith.mulf %917, %917 : vector<8x128xf32>
    %920 = arith.addf %918, %919 : vector<8x128xf32>
    %921 = arith.mulf %32, %32 : f32
    %922 = vector.broadcast %921 : f32 to vector<8x128xf32>
    %923 = arith.addf %920, %922 : vector<8x128xf32>
    %924 = math.rsqrt %923 : vector<8x128xf32>
    %925 = arith.mulf %924, %924 : vector<8x128xf32>
    %926 = arith.mulf %915, %924 : vector<8x128xf32>
    %927 = arith.mulf %917, %924 : vector<8x128xf32>
    %928 = vector.broadcast %32 : f32 to vector<8x128xf32>
    %929 = arith.mulf %928, %924 : vector<8x128xf32>
    %930 = vector.broadcast %27 : f32 to vector<8x128xf32>
    %931 = arith.subf %930, %90 : vector<8x128xf32>
    %932 = vector.broadcast %28 : f32 to vector<8x128xf32>
    %933 = arith.subf %932, %93 : vector<8x128xf32>
    %934 = arith.mulf %931, %931 : vector<8x128xf32>
    %935 = arith.mulf %933, %933 : vector<8x128xf32>
    %936 = arith.addf %934, %935 : vector<8x128xf32>
    %937 = arith.mulf %29, %29 : f32
    %938 = vector.broadcast %937 : f32 to vector<8x128xf32>
    %939 = arith.addf %936, %938 : vector<8x128xf32>
    %940 = math.rsqrt %939 : vector<8x128xf32>
    %941 = arith.mulf %931, %940 : vector<8x128xf32>
    %942 = arith.mulf %933, %940 : vector<8x128xf32>
    %943 = vector.broadcast %29 : f32 to vector<8x128xf32>
    %944 = arith.mulf %943, %940 : vector<8x128xf32>
    %945 = arith.addf %926, %941 : vector<8x128xf32>
    %946 = arith.addf %927, %942 : vector<8x128xf32>
    %947 = arith.addf %929, %944 : vector<8x128xf32>
    %948 = arith.mulf %945, %945 : vector<8x128xf32>
    %949 = arith.mulf %946, %946 : vector<8x128xf32>
    %950 = arith.addf %948, %949 : vector<8x128xf32>
    %951 = arith.mulf %947, %947 : vector<8x128xf32>
    %952 = arith.addf %950, %951 : vector<8x128xf32>
    %cst_291 = arith.constant 9.99999996E-13 : f32
    %953 = vector.broadcast %cst_291 : f32 to vector<8x128xf32>
    %954 = arith.addf %952, %953 : vector<8x128xf32>
    %955 = math.rsqrt %954 : vector<8x128xf32>
    %956 = arith.mulf %945, %955 : vector<8x128xf32>
    %957 = arith.mulf %946, %955 : vector<8x128xf32>
    %958 = arith.mulf %947, %955 : vector<8x128xf32>
    %959 = arith.mulf %941, %956 : vector<8x128xf32>
    %960 = arith.mulf %942, %957 : vector<8x128xf32>
    %961 = arith.addf %959, %960 : vector<8x128xf32>
    %962 = arith.mulf %944, %958 : vector<8x128xf32>
    %963 = arith.addf %961, %962 : vector<8x128xf32>
    %cst_292 = arith.constant 1.000000e-03 : f32
    %964 = vector.broadcast %cst_292 : f32 to vector<8x128xf32>
    %965 = arith.maximumf %963, %964 : vector<8x128xf32>
    %cst_293 = arith.constant 1.000000e+00 : f32
    %966 = vector.broadcast %cst_293 : f32 to vector<8x128xf32>
    %967 = arith.subf %966, %965 : vector<8x128xf32>
    %968 = arith.mulf %967, %967 : vector<8x128xf32>
    %969 = arith.mulf %968, %968 : vector<8x128xf32>
    %970 = arith.mulf %969, %967 : vector<8x128xf32>
    %971 = arith.mulf %151, %956 : vector<8x128xf32>
    %972 = arith.mulf %152, %957 : vector<8x128xf32>
    %973 = arith.addf %971, %972 : vector<8x128xf32>
    %974 = arith.mulf %153, %958 : vector<8x128xf32>
    %975 = arith.addf %973, %974 : vector<8x128xf32>
    %cst_294 = arith.constant 1.000000e-03 : f32
    %976 = vector.broadcast %cst_294 : f32 to vector<8x128xf32>
    %977 = arith.maximumf %975, %976 : vector<8x128xf32>
    %978 = arith.mulf %151, %926 : vector<8x128xf32>
    %979 = arith.mulf %152, %927 : vector<8x128xf32>
    %980 = arith.addf %978, %979 : vector<8x128xf32>
    %981 = arith.mulf %153, %929 : vector<8x128xf32>
    %982 = arith.addf %980, %981 : vector<8x128xf32>
    %cst_295 = arith.constant 1.000000e-03 : f32
    %983 = vector.broadcast %cst_295 : f32 to vector<8x128xf32>
    %984 = arith.maximumf %982, %983 : vector<8x128xf32>
    %985 = arith.mulf %151, %941 : vector<8x128xf32>
    %986 = arith.mulf %152, %942 : vector<8x128xf32>
    %987 = arith.addf %985, %986 : vector<8x128xf32>
    %988 = arith.mulf %153, %944 : vector<8x128xf32>
    %989 = arith.addf %987, %988 : vector<8x128xf32>
    %cst_296 = arith.constant 1.000000e-03 : f32
    %990 = vector.broadcast %cst_296 : f32 to vector<8x128xf32>
    %991 = arith.maximumf %989, %990 : vector<8x128xf32>
    %992 = arith.mulf %977, %977 : vector<8x128xf32>
    %cst_297 = arith.constant 1.000000e+00 : f32
    %993 = vector.broadcast %cst_297 : f32 to vector<8x128xf32>
    %994 = arith.subf %157, %993 : vector<8x128xf32>
    %995 = arith.mulf %992, %994 : vector<8x128xf32>
    %cst_298 = arith.constant 1.000000e+00 : f32
    %996 = vector.broadcast %cst_298 : f32 to vector<8x128xf32>
    %997 = arith.addf %995, %996 : vector<8x128xf32>
    %cst_299 = arith.constant 1.000000e-03 : f32
    %998 = vector.broadcast %cst_299 : f32 to vector<8x128xf32>
    %999 = arith.maximumf %997, %998 : vector<8x128xf32>
    %1000 = arith.mulf %984, %163 : vector<8x128xf32>
    %1001 = arith.addf %1000, %161 : vector<8x128xf32>
    %1002 = arith.mulf %991, %163 : vector<8x128xf32>
    %1003 = arith.addf %1002, %161 : vector<8x128xf32>
    %cst_300 = arith.constant 4.000000e+00 : f32
    %1004 = vector.broadcast %cst_300 : f32 to vector<8x128xf32>
    %1005 = arith.mulf %1004, %999 : vector<8x128xf32>
    %1006 = arith.mulf %1005, %999 : vector<8x128xf32>
    %1007 = arith.mulf %1006, %1001 : vector<8x128xf32>
    %1008 = arith.mulf %1007, %1003 : vector<8x128xf32>
    %1009 = arith.divf %157, %1008 : vector<8x128xf32>
    %1010 = arith.mulf %984, %925 : vector<8x128xf32>
    %1011 = arith.mulf %199, %956 : vector<8x128xf32>
    %1012 = arith.mulf %200, %957 : vector<8x128xf32>
    %1013 = arith.addf %1011, %1012 : vector<8x128xf32>
    %1014 = arith.mulf %201, %958 : vector<8x128xf32>
    %1015 = arith.addf %1013, %1014 : vector<8x128xf32>
    %cst_301 = arith.constant 1.000000e-03 : f32
    %1016 = vector.broadcast %cst_301 : f32 to vector<8x128xf32>
    %1017 = arith.maximumf %1015, %1016 : vector<8x128xf32>
    %1018 = arith.mulf %199, %926 : vector<8x128xf32>
    %1019 = arith.mulf %200, %927 : vector<8x128xf32>
    %1020 = arith.addf %1018, %1019 : vector<8x128xf32>
    %1021 = arith.mulf %201, %929 : vector<8x128xf32>
    %1022 = arith.addf %1020, %1021 : vector<8x128xf32>
    %cst_302 = arith.constant 1.000000e-03 : f32
    %1023 = vector.broadcast %cst_302 : f32 to vector<8x128xf32>
    %1024 = arith.maximumf %1022, %1023 : vector<8x128xf32>
    %1025 = arith.mulf %199, %941 : vector<8x128xf32>
    %1026 = arith.mulf %200, %942 : vector<8x128xf32>
    %1027 = arith.addf %1025, %1026 : vector<8x128xf32>
    %1028 = arith.mulf %201, %944 : vector<8x128xf32>
    %1029 = arith.addf %1027, %1028 : vector<8x128xf32>
    %cst_303 = arith.constant 1.000000e-03 : f32
    %1030 = vector.broadcast %cst_303 : f32 to vector<8x128xf32>
    %1031 = arith.maximumf %1029, %1030 : vector<8x128xf32>
    %1032 = arith.mulf %1017, %1017 : vector<8x128xf32>
    %cst_304 = arith.constant 1.000000e+00 : f32
    %1033 = vector.broadcast %cst_304 : f32 to vector<8x128xf32>
    %1034 = arith.subf %205, %1033 : vector<8x128xf32>
    %1035 = arith.mulf %1032, %1034 : vector<8x128xf32>
    %cst_305 = arith.constant 1.000000e+00 : f32
    %1036 = vector.broadcast %cst_305 : f32 to vector<8x128xf32>
    %1037 = arith.addf %1035, %1036 : vector<8x128xf32>
    %cst_306 = arith.constant 1.000000e-03 : f32
    %1038 = vector.broadcast %cst_306 : f32 to vector<8x128xf32>
    %1039 = arith.maximumf %1037, %1038 : vector<8x128xf32>
    %1040 = arith.mulf %1024, %211 : vector<8x128xf32>
    %1041 = arith.addf %1040, %209 : vector<8x128xf32>
    %1042 = arith.mulf %1031, %211 : vector<8x128xf32>
    %1043 = arith.addf %1042, %209 : vector<8x128xf32>
    %cst_307 = arith.constant 4.000000e+00 : f32
    %1044 = vector.broadcast %cst_307 : f32 to vector<8x128xf32>
    %1045 = arith.mulf %1044, %1039 : vector<8x128xf32>
    %1046 = arith.mulf %1045, %1039 : vector<8x128xf32>
    %1047 = arith.mulf %1046, %1041 : vector<8x128xf32>
    %1048 = arith.mulf %1047, %1043 : vector<8x128xf32>
    %1049 = arith.divf %205, %1048 : vector<8x128xf32>
    %1050 = arith.mulf %1024, %925 : vector<8x128xf32>
    %cst_308 = arith.constant 1.000000e+00 : f32
    %1051 = vector.broadcast %cst_308 : f32 to vector<8x128xf32>
    %1052 = arith.subf %1051, %165 : vector<8x128xf32>
    %1053 = arith.mulf %1052, %970 : vector<8x128xf32>
    %1054 = arith.addf %165, %1053 : vector<8x128xf32>
    %cst_309 = arith.constant 1.000000e+00 : f32
    %1055 = vector.broadcast %cst_309 : f32 to vector<8x128xf32>
    %1056 = arith.subf %1055, %213 : vector<8x128xf32>
    %1057 = arith.mulf %1056, %970 : vector<8x128xf32>
    %1058 = arith.addf %213, %1057 : vector<8x128xf32>
    %1059 = arith.mulf %1054, %1009 : vector<8x128xf32>
    %1060 = arith.addf %174, %1059 : vector<8x128xf32>
    %1061 = arith.mulf %1060, %1010 : vector<8x128xf32>
    %1062 = arith.mulf %1058, %1049 : vector<8x128xf32>
    %1063 = arith.addf %222, %1062 : vector<8x128xf32>
    %1064 = arith.mulf %1063, %1050 : vector<8x128xf32>
    %1065 = vector.broadcast %33 : f32 to vector<8x128xf32>
    %1066 = arith.mulf %1061, %1065 : vector<8x128xf32>
    %cst_310 = arith.constant 0.000000e+00 : f32
    %1067 = vector.broadcast %cst_310 : f32 to vector<8x128xf32>
    %1068 = arith.maximumf %1066, %1067 : vector<8x128xf32>
    %cst_311 = arith.constant 1.000000e-01 : f32
    %1069 = vector.broadcast %cst_311 : f32 to vector<8x128xf32>
    %1070 = arith.addf %1068, %1069 : vector<8x128xf32>
    %1071 = vector.broadcast %33 : f32 to vector<8x128xf32>
    %1072 = arith.mulf %1064, %1071 : vector<8x128xf32>
    %cst_312 = arith.constant 0.000000e+00 : f32
    %1073 = vector.broadcast %cst_312 : f32 to vector<8x128xf32>
    %1074 = arith.maximumf %1072, %1073 : vector<8x128xf32>
    %cst_313 = arith.constant 1.000000e-01 : f32
    %1075 = vector.broadcast %cst_313 : f32 to vector<8x128xf32>
    %1076 = arith.addf %1074, %1075 : vector<8x128xf32>
    %1077 = arith.divf %1070, %1076 : vector<8x128xf32>
    %1078 = math.log %1077 : vector<8x128xf32>
    %1079 = math.absf %1078 : vector<8x128xf32>
    %1080 = arith.addf %913, %1079 : vector<8x128xf32>
    %cst_314 = arith.constant 1.000000e+00 : f32
    %1081 = vector.broadcast %cst_314 : f32 to vector<8x128xf32>
    %1082 = arith.subf %1081, %167 : vector<8x128xf32>
    %1083 = arith.mulf %1082, %970 : vector<8x128xf32>
    %1084 = arith.addf %167, %1083 : vector<8x128xf32>
    %cst_315 = arith.constant 1.000000e+00 : f32
    %1085 = vector.broadcast %cst_315 : f32 to vector<8x128xf32>
    %1086 = arith.subf %1085, %215 : vector<8x128xf32>
    %1087 = arith.mulf %1086, %970 : vector<8x128xf32>
    %1088 = arith.addf %215, %1087 : vector<8x128xf32>
    %1089 = arith.mulf %1084, %1009 : vector<8x128xf32>
    %1090 = arith.addf %179, %1089 : vector<8x128xf32>
    %1091 = arith.mulf %1090, %1010 : vector<8x128xf32>
    %1092 = arith.mulf %1088, %1049 : vector<8x128xf32>
    %1093 = arith.addf %227, %1092 : vector<8x128xf32>
    %1094 = arith.mulf %1093, %1050 : vector<8x128xf32>
    %1095 = vector.broadcast %34 : f32 to vector<8x128xf32>
    %1096 = arith.mulf %1091, %1095 : vector<8x128xf32>
    %cst_316 = arith.constant 0.000000e+00 : f32
    %1097 = vector.broadcast %cst_316 : f32 to vector<8x128xf32>
    %1098 = arith.maximumf %1096, %1097 : vector<8x128xf32>
    %cst_317 = arith.constant 1.000000e-01 : f32
    %1099 = vector.broadcast %cst_317 : f32 to vector<8x128xf32>
    %1100 = arith.addf %1098, %1099 : vector<8x128xf32>
    %1101 = vector.broadcast %34 : f32 to vector<8x128xf32>
    %1102 = arith.mulf %1094, %1101 : vector<8x128xf32>
    %cst_318 = arith.constant 0.000000e+00 : f32
    %1103 = vector.broadcast %cst_318 : f32 to vector<8x128xf32>
    %1104 = arith.maximumf %1102, %1103 : vector<8x128xf32>
    %cst_319 = arith.constant 1.000000e-01 : f32
    %1105 = vector.broadcast %cst_319 : f32 to vector<8x128xf32>
    %1106 = arith.addf %1104, %1105 : vector<8x128xf32>
    %1107 = arith.divf %1100, %1106 : vector<8x128xf32>
    %1108 = math.log %1107 : vector<8x128xf32>
    %1109 = math.absf %1108 : vector<8x128xf32>
    %1110 = arith.addf %1080, %1109 : vector<8x128xf32>
    %cst_320 = arith.constant 1.000000e+00 : f32
    %1111 = vector.broadcast %cst_320 : f32 to vector<8x128xf32>
    %1112 = arith.subf %1111, %169 : vector<8x128xf32>
    %1113 = arith.mulf %1112, %970 : vector<8x128xf32>
    %1114 = arith.addf %169, %1113 : vector<8x128xf32>
    %cst_321 = arith.constant 1.000000e+00 : f32
    %1115 = vector.broadcast %cst_321 : f32 to vector<8x128xf32>
    %1116 = arith.subf %1115, %217 : vector<8x128xf32>
    %1117 = arith.mulf %1116, %970 : vector<8x128xf32>
    %1118 = arith.addf %217, %1117 : vector<8x128xf32>
    %1119 = arith.mulf %1114, %1009 : vector<8x128xf32>
    %1120 = arith.addf %184, %1119 : vector<8x128xf32>
    %1121 = arith.mulf %1120, %1010 : vector<8x128xf32>
    %1122 = arith.mulf %1118, %1049 : vector<8x128xf32>
    %1123 = arith.addf %232, %1122 : vector<8x128xf32>
    %1124 = arith.mulf %1123, %1050 : vector<8x128xf32>
    %1125 = vector.broadcast %35 : f32 to vector<8x128xf32>
    %1126 = arith.mulf %1121, %1125 : vector<8x128xf32>
    %cst_322 = arith.constant 0.000000e+00 : f32
    %1127 = vector.broadcast %cst_322 : f32 to vector<8x128xf32>
    %1128 = arith.maximumf %1126, %1127 : vector<8x128xf32>
    %cst_323 = arith.constant 1.000000e-01 : f32
    %1129 = vector.broadcast %cst_323 : f32 to vector<8x128xf32>
    %1130 = arith.addf %1128, %1129 : vector<8x128xf32>
    %1131 = vector.broadcast %35 : f32 to vector<8x128xf32>
    %1132 = arith.mulf %1124, %1131 : vector<8x128xf32>
    %cst_324 = arith.constant 0.000000e+00 : f32
    %1133 = vector.broadcast %cst_324 : f32 to vector<8x128xf32>
    %1134 = arith.maximumf %1132, %1133 : vector<8x128xf32>
    %cst_325 = arith.constant 1.000000e-01 : f32
    %1135 = vector.broadcast %cst_325 : f32 to vector<8x128xf32>
    %1136 = arith.addf %1134, %1135 : vector<8x128xf32>
    %1137 = arith.divf %1130, %1136 : vector<8x128xf32>
    %1138 = math.log %1137 : vector<8x128xf32>
    %1139 = math.absf %1138 : vector<8x128xf32>
    %1140 = arith.addf %1110, %1139 : vector<8x128xf32>
    %1141 = vector.broadcast %39 : f32 to vector<8x128xf32>
    %1142 = arith.subf %1141, %90 : vector<8x128xf32>
    %1143 = vector.broadcast %40 : f32 to vector<8x128xf32>
    %1144 = arith.subf %1143, %93 : vector<8x128xf32>
    %1145 = arith.mulf %1142, %1142 : vector<8x128xf32>
    %1146 = arith.mulf %1144, %1144 : vector<8x128xf32>
    %1147 = arith.addf %1145, %1146 : vector<8x128xf32>
    %1148 = arith.mulf %41, %41 : f32
    %1149 = vector.broadcast %1148 : f32 to vector<8x128xf32>
    %1150 = arith.addf %1147, %1149 : vector<8x128xf32>
    %1151 = math.rsqrt %1150 : vector<8x128xf32>
    %1152 = arith.mulf %1151, %1151 : vector<8x128xf32>
    %1153 = arith.mulf %1142, %1151 : vector<8x128xf32>
    %1154 = arith.mulf %1144, %1151 : vector<8x128xf32>
    %1155 = vector.broadcast %41 : f32 to vector<8x128xf32>
    %1156 = arith.mulf %1155, %1151 : vector<8x128xf32>
    %1157 = vector.broadcast %36 : f32 to vector<8x128xf32>
    %1158 = arith.subf %1157, %90 : vector<8x128xf32>
    %1159 = vector.broadcast %37 : f32 to vector<8x128xf32>
    %1160 = arith.subf %1159, %93 : vector<8x128xf32>
    %1161 = arith.mulf %1158, %1158 : vector<8x128xf32>
    %1162 = arith.mulf %1160, %1160 : vector<8x128xf32>
    %1163 = arith.addf %1161, %1162 : vector<8x128xf32>
    %1164 = arith.mulf %38, %38 : f32
    %1165 = vector.broadcast %1164 : f32 to vector<8x128xf32>
    %1166 = arith.addf %1163, %1165 : vector<8x128xf32>
    %1167 = math.rsqrt %1166 : vector<8x128xf32>
    %1168 = arith.mulf %1158, %1167 : vector<8x128xf32>
    %1169 = arith.mulf %1160, %1167 : vector<8x128xf32>
    %1170 = vector.broadcast %38 : f32 to vector<8x128xf32>
    %1171 = arith.mulf %1170, %1167 : vector<8x128xf32>
    %1172 = arith.addf %1153, %1168 : vector<8x128xf32>
    %1173 = arith.addf %1154, %1169 : vector<8x128xf32>
    %1174 = arith.addf %1156, %1171 : vector<8x128xf32>
    %1175 = arith.mulf %1172, %1172 : vector<8x128xf32>
    %1176 = arith.mulf %1173, %1173 : vector<8x128xf32>
    %1177 = arith.addf %1175, %1176 : vector<8x128xf32>
    %1178 = arith.mulf %1174, %1174 : vector<8x128xf32>
    %1179 = arith.addf %1177, %1178 : vector<8x128xf32>
    %cst_326 = arith.constant 9.99999996E-13 : f32
    %1180 = vector.broadcast %cst_326 : f32 to vector<8x128xf32>
    %1181 = arith.addf %1179, %1180 : vector<8x128xf32>
    %1182 = math.rsqrt %1181 : vector<8x128xf32>
    %1183 = arith.mulf %1172, %1182 : vector<8x128xf32>
    %1184 = arith.mulf %1173, %1182 : vector<8x128xf32>
    %1185 = arith.mulf %1174, %1182 : vector<8x128xf32>
    %1186 = arith.mulf %1168, %1183 : vector<8x128xf32>
    %1187 = arith.mulf %1169, %1184 : vector<8x128xf32>
    %1188 = arith.addf %1186, %1187 : vector<8x128xf32>
    %1189 = arith.mulf %1171, %1185 : vector<8x128xf32>
    %1190 = arith.addf %1188, %1189 : vector<8x128xf32>
    %cst_327 = arith.constant 1.000000e-03 : f32
    %1191 = vector.broadcast %cst_327 : f32 to vector<8x128xf32>
    %1192 = arith.maximumf %1190, %1191 : vector<8x128xf32>
    %cst_328 = arith.constant 1.000000e+00 : f32
    %1193 = vector.broadcast %cst_328 : f32 to vector<8x128xf32>
    %1194 = arith.subf %1193, %1192 : vector<8x128xf32>
    %1195 = arith.mulf %1194, %1194 : vector<8x128xf32>
    %1196 = arith.mulf %1195, %1195 : vector<8x128xf32>
    %1197 = arith.mulf %1196, %1194 : vector<8x128xf32>
    %1198 = arith.mulf %151, %1183 : vector<8x128xf32>
    %1199 = arith.mulf %152, %1184 : vector<8x128xf32>
    %1200 = arith.addf %1198, %1199 : vector<8x128xf32>
    %1201 = arith.mulf %153, %1185 : vector<8x128xf32>
    %1202 = arith.addf %1200, %1201 : vector<8x128xf32>
    %cst_329 = arith.constant 1.000000e-03 : f32
    %1203 = vector.broadcast %cst_329 : f32 to vector<8x128xf32>
    %1204 = arith.maximumf %1202, %1203 : vector<8x128xf32>
    %1205 = arith.mulf %151, %1153 : vector<8x128xf32>
    %1206 = arith.mulf %152, %1154 : vector<8x128xf32>
    %1207 = arith.addf %1205, %1206 : vector<8x128xf32>
    %1208 = arith.mulf %153, %1156 : vector<8x128xf32>
    %1209 = arith.addf %1207, %1208 : vector<8x128xf32>
    %cst_330 = arith.constant 1.000000e-03 : f32
    %1210 = vector.broadcast %cst_330 : f32 to vector<8x128xf32>
    %1211 = arith.maximumf %1209, %1210 : vector<8x128xf32>
    %1212 = arith.mulf %151, %1168 : vector<8x128xf32>
    %1213 = arith.mulf %152, %1169 : vector<8x128xf32>
    %1214 = arith.addf %1212, %1213 : vector<8x128xf32>
    %1215 = arith.mulf %153, %1171 : vector<8x128xf32>
    %1216 = arith.addf %1214, %1215 : vector<8x128xf32>
    %cst_331 = arith.constant 1.000000e-03 : f32
    %1217 = vector.broadcast %cst_331 : f32 to vector<8x128xf32>
    %1218 = arith.maximumf %1216, %1217 : vector<8x128xf32>
    %1219 = arith.mulf %1204, %1204 : vector<8x128xf32>
    %cst_332 = arith.constant 1.000000e+00 : f32
    %1220 = vector.broadcast %cst_332 : f32 to vector<8x128xf32>
    %1221 = arith.subf %157, %1220 : vector<8x128xf32>
    %1222 = arith.mulf %1219, %1221 : vector<8x128xf32>
    %cst_333 = arith.constant 1.000000e+00 : f32
    %1223 = vector.broadcast %cst_333 : f32 to vector<8x128xf32>
    %1224 = arith.addf %1222, %1223 : vector<8x128xf32>
    %cst_334 = arith.constant 1.000000e-03 : f32
    %1225 = vector.broadcast %cst_334 : f32 to vector<8x128xf32>
    %1226 = arith.maximumf %1224, %1225 : vector<8x128xf32>
    %1227 = arith.mulf %1211, %163 : vector<8x128xf32>
    %1228 = arith.addf %1227, %161 : vector<8x128xf32>
    %1229 = arith.mulf %1218, %163 : vector<8x128xf32>
    %1230 = arith.addf %1229, %161 : vector<8x128xf32>
    %cst_335 = arith.constant 4.000000e+00 : f32
    %1231 = vector.broadcast %cst_335 : f32 to vector<8x128xf32>
    %1232 = arith.mulf %1231, %1226 : vector<8x128xf32>
    %1233 = arith.mulf %1232, %1226 : vector<8x128xf32>
    %1234 = arith.mulf %1233, %1228 : vector<8x128xf32>
    %1235 = arith.mulf %1234, %1230 : vector<8x128xf32>
    %1236 = arith.divf %157, %1235 : vector<8x128xf32>
    %1237 = arith.mulf %1211, %1152 : vector<8x128xf32>
    %1238 = arith.mulf %199, %1183 : vector<8x128xf32>
    %1239 = arith.mulf %200, %1184 : vector<8x128xf32>
    %1240 = arith.addf %1238, %1239 : vector<8x128xf32>
    %1241 = arith.mulf %201, %1185 : vector<8x128xf32>
    %1242 = arith.addf %1240, %1241 : vector<8x128xf32>
    %cst_336 = arith.constant 1.000000e-03 : f32
    %1243 = vector.broadcast %cst_336 : f32 to vector<8x128xf32>
    %1244 = arith.maximumf %1242, %1243 : vector<8x128xf32>
    %1245 = arith.mulf %199, %1153 : vector<8x128xf32>
    %1246 = arith.mulf %200, %1154 : vector<8x128xf32>
    %1247 = arith.addf %1245, %1246 : vector<8x128xf32>
    %1248 = arith.mulf %201, %1156 : vector<8x128xf32>
    %1249 = arith.addf %1247, %1248 : vector<8x128xf32>
    %cst_337 = arith.constant 1.000000e-03 : f32
    %1250 = vector.broadcast %cst_337 : f32 to vector<8x128xf32>
    %1251 = arith.maximumf %1249, %1250 : vector<8x128xf32>
    %1252 = arith.mulf %199, %1168 : vector<8x128xf32>
    %1253 = arith.mulf %200, %1169 : vector<8x128xf32>
    %1254 = arith.addf %1252, %1253 : vector<8x128xf32>
    %1255 = arith.mulf %201, %1171 : vector<8x128xf32>
    %1256 = arith.addf %1254, %1255 : vector<8x128xf32>
    %cst_338 = arith.constant 1.000000e-03 : f32
    %1257 = vector.broadcast %cst_338 : f32 to vector<8x128xf32>
    %1258 = arith.maximumf %1256, %1257 : vector<8x128xf32>
    %1259 = arith.mulf %1244, %1244 : vector<8x128xf32>
    %cst_339 = arith.constant 1.000000e+00 : f32
    %1260 = vector.broadcast %cst_339 : f32 to vector<8x128xf32>
    %1261 = arith.subf %205, %1260 : vector<8x128xf32>
    %1262 = arith.mulf %1259, %1261 : vector<8x128xf32>
    %cst_340 = arith.constant 1.000000e+00 : f32
    %1263 = vector.broadcast %cst_340 : f32 to vector<8x128xf32>
    %1264 = arith.addf %1262, %1263 : vector<8x128xf32>
    %cst_341 = arith.constant 1.000000e-03 : f32
    %1265 = vector.broadcast %cst_341 : f32 to vector<8x128xf32>
    %1266 = arith.maximumf %1264, %1265 : vector<8x128xf32>
    %1267 = arith.mulf %1251, %211 : vector<8x128xf32>
    %1268 = arith.addf %1267, %209 : vector<8x128xf32>
    %1269 = arith.mulf %1258, %211 : vector<8x128xf32>
    %1270 = arith.addf %1269, %209 : vector<8x128xf32>
    %cst_342 = arith.constant 4.000000e+00 : f32
    %1271 = vector.broadcast %cst_342 : f32 to vector<8x128xf32>
    %1272 = arith.mulf %1271, %1266 : vector<8x128xf32>
    %1273 = arith.mulf %1272, %1266 : vector<8x128xf32>
    %1274 = arith.mulf %1273, %1268 : vector<8x128xf32>
    %1275 = arith.mulf %1274, %1270 : vector<8x128xf32>
    %1276 = arith.divf %205, %1275 : vector<8x128xf32>
    %1277 = arith.mulf %1251, %1152 : vector<8x128xf32>
    %cst_343 = arith.constant 1.000000e+00 : f32
    %1278 = vector.broadcast %cst_343 : f32 to vector<8x128xf32>
    %1279 = arith.subf %1278, %165 : vector<8x128xf32>
    %1280 = arith.mulf %1279, %1197 : vector<8x128xf32>
    %1281 = arith.addf %165, %1280 : vector<8x128xf32>
    %cst_344 = arith.constant 1.000000e+00 : f32
    %1282 = vector.broadcast %cst_344 : f32 to vector<8x128xf32>
    %1283 = arith.subf %1282, %213 : vector<8x128xf32>
    %1284 = arith.mulf %1283, %1197 : vector<8x128xf32>
    %1285 = arith.addf %213, %1284 : vector<8x128xf32>
    %1286 = arith.mulf %1281, %1236 : vector<8x128xf32>
    %1287 = arith.addf %174, %1286 : vector<8x128xf32>
    %1288 = arith.mulf %1287, %1237 : vector<8x128xf32>
    %1289 = arith.mulf %1285, %1276 : vector<8x128xf32>
    %1290 = arith.addf %222, %1289 : vector<8x128xf32>
    %1291 = arith.mulf %1290, %1277 : vector<8x128xf32>
    %1292 = vector.broadcast %42 : f32 to vector<8x128xf32>
    %1293 = arith.mulf %1288, %1292 : vector<8x128xf32>
    %cst_345 = arith.constant 0.000000e+00 : f32
    %1294 = vector.broadcast %cst_345 : f32 to vector<8x128xf32>
    %1295 = arith.maximumf %1293, %1294 : vector<8x128xf32>
    %cst_346 = arith.constant 1.000000e-01 : f32
    %1296 = vector.broadcast %cst_346 : f32 to vector<8x128xf32>
    %1297 = arith.addf %1295, %1296 : vector<8x128xf32>
    %1298 = vector.broadcast %42 : f32 to vector<8x128xf32>
    %1299 = arith.mulf %1291, %1298 : vector<8x128xf32>
    %cst_347 = arith.constant 0.000000e+00 : f32
    %1300 = vector.broadcast %cst_347 : f32 to vector<8x128xf32>
    %1301 = arith.maximumf %1299, %1300 : vector<8x128xf32>
    %cst_348 = arith.constant 1.000000e-01 : f32
    %1302 = vector.broadcast %cst_348 : f32 to vector<8x128xf32>
    %1303 = arith.addf %1301, %1302 : vector<8x128xf32>
    %1304 = arith.divf %1297, %1303 : vector<8x128xf32>
    %1305 = math.log %1304 : vector<8x128xf32>
    %1306 = math.absf %1305 : vector<8x128xf32>
    %1307 = arith.addf %1140, %1306 : vector<8x128xf32>
    %cst_349 = arith.constant 1.000000e+00 : f32
    %1308 = vector.broadcast %cst_349 : f32 to vector<8x128xf32>
    %1309 = arith.subf %1308, %167 : vector<8x128xf32>
    %1310 = arith.mulf %1309, %1197 : vector<8x128xf32>
    %1311 = arith.addf %167, %1310 : vector<8x128xf32>
    %cst_350 = arith.constant 1.000000e+00 : f32
    %1312 = vector.broadcast %cst_350 : f32 to vector<8x128xf32>
    %1313 = arith.subf %1312, %215 : vector<8x128xf32>
    %1314 = arith.mulf %1313, %1197 : vector<8x128xf32>
    %1315 = arith.addf %215, %1314 : vector<8x128xf32>
    %1316 = arith.mulf %1311, %1236 : vector<8x128xf32>
    %1317 = arith.addf %179, %1316 : vector<8x128xf32>
    %1318 = arith.mulf %1317, %1237 : vector<8x128xf32>
    %1319 = arith.mulf %1315, %1276 : vector<8x128xf32>
    %1320 = arith.addf %227, %1319 : vector<8x128xf32>
    %1321 = arith.mulf %1320, %1277 : vector<8x128xf32>
    %1322 = vector.broadcast %43 : f32 to vector<8x128xf32>
    %1323 = arith.mulf %1318, %1322 : vector<8x128xf32>
    %cst_351 = arith.constant 0.000000e+00 : f32
    %1324 = vector.broadcast %cst_351 : f32 to vector<8x128xf32>
    %1325 = arith.maximumf %1323, %1324 : vector<8x128xf32>
    %cst_352 = arith.constant 1.000000e-01 : f32
    %1326 = vector.broadcast %cst_352 : f32 to vector<8x128xf32>
    %1327 = arith.addf %1325, %1326 : vector<8x128xf32>
    %1328 = vector.broadcast %43 : f32 to vector<8x128xf32>
    %1329 = arith.mulf %1321, %1328 : vector<8x128xf32>
    %cst_353 = arith.constant 0.000000e+00 : f32
    %1330 = vector.broadcast %cst_353 : f32 to vector<8x128xf32>
    %1331 = arith.maximumf %1329, %1330 : vector<8x128xf32>
    %cst_354 = arith.constant 1.000000e-01 : f32
    %1332 = vector.broadcast %cst_354 : f32 to vector<8x128xf32>
    %1333 = arith.addf %1331, %1332 : vector<8x128xf32>
    %1334 = arith.divf %1327, %1333 : vector<8x128xf32>
    %1335 = math.log %1334 : vector<8x128xf32>
    %1336 = math.absf %1335 : vector<8x128xf32>
    %1337 = arith.addf %1307, %1336 : vector<8x128xf32>
    %cst_355 = arith.constant 1.000000e+00 : f32
    %1338 = vector.broadcast %cst_355 : f32 to vector<8x128xf32>
    %1339 = arith.subf %1338, %169 : vector<8x128xf32>
    %1340 = arith.mulf %1339, %1197 : vector<8x128xf32>
    %1341 = arith.addf %169, %1340 : vector<8x128xf32>
    %cst_356 = arith.constant 1.000000e+00 : f32
    %1342 = vector.broadcast %cst_356 : f32 to vector<8x128xf32>
    %1343 = arith.subf %1342, %217 : vector<8x128xf32>
    %1344 = arith.mulf %1343, %1197 : vector<8x128xf32>
    %1345 = arith.addf %217, %1344 : vector<8x128xf32>
    %1346 = arith.mulf %1341, %1236 : vector<8x128xf32>
    %1347 = arith.addf %184, %1346 : vector<8x128xf32>
    %1348 = arith.mulf %1347, %1237 : vector<8x128xf32>
    %1349 = arith.mulf %1345, %1276 : vector<8x128xf32>
    %1350 = arith.addf %232, %1349 : vector<8x128xf32>
    %1351 = arith.mulf %1350, %1277 : vector<8x128xf32>
    %1352 = vector.broadcast %44 : f32 to vector<8x128xf32>
    %1353 = arith.mulf %1348, %1352 : vector<8x128xf32>
    %cst_357 = arith.constant 0.000000e+00 : f32
    %1354 = vector.broadcast %cst_357 : f32 to vector<8x128xf32>
    %1355 = arith.maximumf %1353, %1354 : vector<8x128xf32>
    %cst_358 = arith.constant 1.000000e-01 : f32
    %1356 = vector.broadcast %cst_358 : f32 to vector<8x128xf32>
    %1357 = arith.addf %1355, %1356 : vector<8x128xf32>
    %1358 = vector.broadcast %44 : f32 to vector<8x128xf32>
    %1359 = arith.mulf %1351, %1358 : vector<8x128xf32>
    %cst_359 = arith.constant 0.000000e+00 : f32
    %1360 = vector.broadcast %cst_359 : f32 to vector<8x128xf32>
    %1361 = arith.maximumf %1359, %1360 : vector<8x128xf32>
    %cst_360 = arith.constant 1.000000e-01 : f32
    %1362 = vector.broadcast %cst_360 : f32 to vector<8x128xf32>
    %1363 = arith.addf %1361, %1362 : vector<8x128xf32>
    %1364 = arith.divf %1357, %1363 : vector<8x128xf32>
    %1365 = math.log %1364 : vector<8x128xf32>
    %1366 = math.absf %1365 : vector<8x128xf32>
    %1367 = arith.addf %1337, %1366 : vector<8x128xf32>
    %1368 = vector.broadcast %48 : f32 to vector<8x128xf32>
    %1369 = arith.subf %1368, %90 : vector<8x128xf32>
    %1370 = vector.broadcast %49 : f32 to vector<8x128xf32>
    %1371 = arith.subf %1370, %93 : vector<8x128xf32>
    %1372 = arith.mulf %1369, %1369 : vector<8x128xf32>
    %1373 = arith.mulf %1371, %1371 : vector<8x128xf32>
    %1374 = arith.addf %1372, %1373 : vector<8x128xf32>
    %1375 = arith.mulf %50, %50 : f32
    %1376 = vector.broadcast %1375 : f32 to vector<8x128xf32>
    %1377 = arith.addf %1374, %1376 : vector<8x128xf32>
    %1378 = math.rsqrt %1377 : vector<8x128xf32>
    %1379 = arith.mulf %1378, %1378 : vector<8x128xf32>
    %1380 = arith.mulf %1369, %1378 : vector<8x128xf32>
    %1381 = arith.mulf %1371, %1378 : vector<8x128xf32>
    %1382 = vector.broadcast %50 : f32 to vector<8x128xf32>
    %1383 = arith.mulf %1382, %1378 : vector<8x128xf32>
    %1384 = vector.broadcast %45 : f32 to vector<8x128xf32>
    %1385 = arith.subf %1384, %90 : vector<8x128xf32>
    %1386 = vector.broadcast %46 : f32 to vector<8x128xf32>
    %1387 = arith.subf %1386, %93 : vector<8x128xf32>
    %1388 = arith.mulf %1385, %1385 : vector<8x128xf32>
    %1389 = arith.mulf %1387, %1387 : vector<8x128xf32>
    %1390 = arith.addf %1388, %1389 : vector<8x128xf32>
    %1391 = arith.mulf %47, %47 : f32
    %1392 = vector.broadcast %1391 : f32 to vector<8x128xf32>
    %1393 = arith.addf %1390, %1392 : vector<8x128xf32>
    %1394 = math.rsqrt %1393 : vector<8x128xf32>
    %1395 = arith.mulf %1385, %1394 : vector<8x128xf32>
    %1396 = arith.mulf %1387, %1394 : vector<8x128xf32>
    %1397 = vector.broadcast %47 : f32 to vector<8x128xf32>
    %1398 = arith.mulf %1397, %1394 : vector<8x128xf32>
    %1399 = arith.addf %1380, %1395 : vector<8x128xf32>
    %1400 = arith.addf %1381, %1396 : vector<8x128xf32>
    %1401 = arith.addf %1383, %1398 : vector<8x128xf32>
    %1402 = arith.mulf %1399, %1399 : vector<8x128xf32>
    %1403 = arith.mulf %1400, %1400 : vector<8x128xf32>
    %1404 = arith.addf %1402, %1403 : vector<8x128xf32>
    %1405 = arith.mulf %1401, %1401 : vector<8x128xf32>
    %1406 = arith.addf %1404, %1405 : vector<8x128xf32>
    %cst_361 = arith.constant 9.99999996E-13 : f32
    %1407 = vector.broadcast %cst_361 : f32 to vector<8x128xf32>
    %1408 = arith.addf %1406, %1407 : vector<8x128xf32>
    %1409 = math.rsqrt %1408 : vector<8x128xf32>
    %1410 = arith.mulf %1399, %1409 : vector<8x128xf32>
    %1411 = arith.mulf %1400, %1409 : vector<8x128xf32>
    %1412 = arith.mulf %1401, %1409 : vector<8x128xf32>
    %1413 = arith.mulf %1395, %1410 : vector<8x128xf32>
    %1414 = arith.mulf %1396, %1411 : vector<8x128xf32>
    %1415 = arith.addf %1413, %1414 : vector<8x128xf32>
    %1416 = arith.mulf %1398, %1412 : vector<8x128xf32>
    %1417 = arith.addf %1415, %1416 : vector<8x128xf32>
    %cst_362 = arith.constant 1.000000e-03 : f32
    %1418 = vector.broadcast %cst_362 : f32 to vector<8x128xf32>
    %1419 = arith.maximumf %1417, %1418 : vector<8x128xf32>
    %cst_363 = arith.constant 1.000000e+00 : f32
    %1420 = vector.broadcast %cst_363 : f32 to vector<8x128xf32>
    %1421 = arith.subf %1420, %1419 : vector<8x128xf32>
    %1422 = arith.mulf %1421, %1421 : vector<8x128xf32>
    %1423 = arith.mulf %1422, %1422 : vector<8x128xf32>
    %1424 = arith.mulf %1423, %1421 : vector<8x128xf32>
    %1425 = arith.mulf %151, %1410 : vector<8x128xf32>
    %1426 = arith.mulf %152, %1411 : vector<8x128xf32>
    %1427 = arith.addf %1425, %1426 : vector<8x128xf32>
    %1428 = arith.mulf %153, %1412 : vector<8x128xf32>
    %1429 = arith.addf %1427, %1428 : vector<8x128xf32>
    %cst_364 = arith.constant 1.000000e-03 : f32
    %1430 = vector.broadcast %cst_364 : f32 to vector<8x128xf32>
    %1431 = arith.maximumf %1429, %1430 : vector<8x128xf32>
    %1432 = arith.mulf %151, %1380 : vector<8x128xf32>
    %1433 = arith.mulf %152, %1381 : vector<8x128xf32>
    %1434 = arith.addf %1432, %1433 : vector<8x128xf32>
    %1435 = arith.mulf %153, %1383 : vector<8x128xf32>
    %1436 = arith.addf %1434, %1435 : vector<8x128xf32>
    %cst_365 = arith.constant 1.000000e-03 : f32
    %1437 = vector.broadcast %cst_365 : f32 to vector<8x128xf32>
    %1438 = arith.maximumf %1436, %1437 : vector<8x128xf32>
    %1439 = arith.mulf %151, %1395 : vector<8x128xf32>
    %1440 = arith.mulf %152, %1396 : vector<8x128xf32>
    %1441 = arith.addf %1439, %1440 : vector<8x128xf32>
    %1442 = arith.mulf %153, %1398 : vector<8x128xf32>
    %1443 = arith.addf %1441, %1442 : vector<8x128xf32>
    %cst_366 = arith.constant 1.000000e-03 : f32
    %1444 = vector.broadcast %cst_366 : f32 to vector<8x128xf32>
    %1445 = arith.maximumf %1443, %1444 : vector<8x128xf32>
    %1446 = arith.mulf %1431, %1431 : vector<8x128xf32>
    %cst_367 = arith.constant 1.000000e+00 : f32
    %1447 = vector.broadcast %cst_367 : f32 to vector<8x128xf32>
    %1448 = arith.subf %157, %1447 : vector<8x128xf32>
    %1449 = arith.mulf %1446, %1448 : vector<8x128xf32>
    %cst_368 = arith.constant 1.000000e+00 : f32
    %1450 = vector.broadcast %cst_368 : f32 to vector<8x128xf32>
    %1451 = arith.addf %1449, %1450 : vector<8x128xf32>
    %cst_369 = arith.constant 1.000000e-03 : f32
    %1452 = vector.broadcast %cst_369 : f32 to vector<8x128xf32>
    %1453 = arith.maximumf %1451, %1452 : vector<8x128xf32>
    %1454 = arith.mulf %1438, %163 : vector<8x128xf32>
    %1455 = arith.addf %1454, %161 : vector<8x128xf32>
    %1456 = arith.mulf %1445, %163 : vector<8x128xf32>
    %1457 = arith.addf %1456, %161 : vector<8x128xf32>
    %cst_370 = arith.constant 4.000000e+00 : f32
    %1458 = vector.broadcast %cst_370 : f32 to vector<8x128xf32>
    %1459 = arith.mulf %1458, %1453 : vector<8x128xf32>
    %1460 = arith.mulf %1459, %1453 : vector<8x128xf32>
    %1461 = arith.mulf %1460, %1455 : vector<8x128xf32>
    %1462 = arith.mulf %1461, %1457 : vector<8x128xf32>
    %1463 = arith.divf %157, %1462 : vector<8x128xf32>
    %1464 = arith.mulf %1438, %1379 : vector<8x128xf32>
    %1465 = arith.mulf %199, %1410 : vector<8x128xf32>
    %1466 = arith.mulf %200, %1411 : vector<8x128xf32>
    %1467 = arith.addf %1465, %1466 : vector<8x128xf32>
    %1468 = arith.mulf %201, %1412 : vector<8x128xf32>
    %1469 = arith.addf %1467, %1468 : vector<8x128xf32>
    %cst_371 = arith.constant 1.000000e-03 : f32
    %1470 = vector.broadcast %cst_371 : f32 to vector<8x128xf32>
    %1471 = arith.maximumf %1469, %1470 : vector<8x128xf32>
    %1472 = arith.mulf %199, %1380 : vector<8x128xf32>
    %1473 = arith.mulf %200, %1381 : vector<8x128xf32>
    %1474 = arith.addf %1472, %1473 : vector<8x128xf32>
    %1475 = arith.mulf %201, %1383 : vector<8x128xf32>
    %1476 = arith.addf %1474, %1475 : vector<8x128xf32>
    %cst_372 = arith.constant 1.000000e-03 : f32
    %1477 = vector.broadcast %cst_372 : f32 to vector<8x128xf32>
    %1478 = arith.maximumf %1476, %1477 : vector<8x128xf32>
    %1479 = arith.mulf %199, %1395 : vector<8x128xf32>
    %1480 = arith.mulf %200, %1396 : vector<8x128xf32>
    %1481 = arith.addf %1479, %1480 : vector<8x128xf32>
    %1482 = arith.mulf %201, %1398 : vector<8x128xf32>
    %1483 = arith.addf %1481, %1482 : vector<8x128xf32>
    %cst_373 = arith.constant 1.000000e-03 : f32
    %1484 = vector.broadcast %cst_373 : f32 to vector<8x128xf32>
    %1485 = arith.maximumf %1483, %1484 : vector<8x128xf32>
    %1486 = arith.mulf %1471, %1471 : vector<8x128xf32>
    %cst_374 = arith.constant 1.000000e+00 : f32
    %1487 = vector.broadcast %cst_374 : f32 to vector<8x128xf32>
    %1488 = arith.subf %205, %1487 : vector<8x128xf32>
    %1489 = arith.mulf %1486, %1488 : vector<8x128xf32>
    %cst_375 = arith.constant 1.000000e+00 : f32
    %1490 = vector.broadcast %cst_375 : f32 to vector<8x128xf32>
    %1491 = arith.addf %1489, %1490 : vector<8x128xf32>
    %cst_376 = arith.constant 1.000000e-03 : f32
    %1492 = vector.broadcast %cst_376 : f32 to vector<8x128xf32>
    %1493 = arith.maximumf %1491, %1492 : vector<8x128xf32>
    %1494 = arith.mulf %1478, %211 : vector<8x128xf32>
    %1495 = arith.addf %1494, %209 : vector<8x128xf32>
    %1496 = arith.mulf %1485, %211 : vector<8x128xf32>
    %1497 = arith.addf %1496, %209 : vector<8x128xf32>
    %cst_377 = arith.constant 4.000000e+00 : f32
    %1498 = vector.broadcast %cst_377 : f32 to vector<8x128xf32>
    %1499 = arith.mulf %1498, %1493 : vector<8x128xf32>
    %1500 = arith.mulf %1499, %1493 : vector<8x128xf32>
    %1501 = arith.mulf %1500, %1495 : vector<8x128xf32>
    %1502 = arith.mulf %1501, %1497 : vector<8x128xf32>
    %1503 = arith.divf %205, %1502 : vector<8x128xf32>
    %1504 = arith.mulf %1478, %1379 : vector<8x128xf32>
    %cst_378 = arith.constant 1.000000e+00 : f32
    %1505 = vector.broadcast %cst_378 : f32 to vector<8x128xf32>
    %1506 = arith.subf %1505, %165 : vector<8x128xf32>
    %1507 = arith.mulf %1506, %1424 : vector<8x128xf32>
    %1508 = arith.addf %165, %1507 : vector<8x128xf32>
    %cst_379 = arith.constant 1.000000e+00 : f32
    %1509 = vector.broadcast %cst_379 : f32 to vector<8x128xf32>
    %1510 = arith.subf %1509, %213 : vector<8x128xf32>
    %1511 = arith.mulf %1510, %1424 : vector<8x128xf32>
    %1512 = arith.addf %213, %1511 : vector<8x128xf32>
    %1513 = arith.mulf %1508, %1463 : vector<8x128xf32>
    %1514 = arith.addf %174, %1513 : vector<8x128xf32>
    %1515 = arith.mulf %1514, %1464 : vector<8x128xf32>
    %1516 = arith.mulf %1512, %1503 : vector<8x128xf32>
    %1517 = arith.addf %222, %1516 : vector<8x128xf32>
    %1518 = arith.mulf %1517, %1504 : vector<8x128xf32>
    %1519 = vector.broadcast %51 : f32 to vector<8x128xf32>
    %1520 = arith.mulf %1515, %1519 : vector<8x128xf32>
    %cst_380 = arith.constant 0.000000e+00 : f32
    %1521 = vector.broadcast %cst_380 : f32 to vector<8x128xf32>
    %1522 = arith.maximumf %1520, %1521 : vector<8x128xf32>
    %cst_381 = arith.constant 1.000000e-01 : f32
    %1523 = vector.broadcast %cst_381 : f32 to vector<8x128xf32>
    %1524 = arith.addf %1522, %1523 : vector<8x128xf32>
    %1525 = vector.broadcast %51 : f32 to vector<8x128xf32>
    %1526 = arith.mulf %1518, %1525 : vector<8x128xf32>
    %cst_382 = arith.constant 0.000000e+00 : f32
    %1527 = vector.broadcast %cst_382 : f32 to vector<8x128xf32>
    %1528 = arith.maximumf %1526, %1527 : vector<8x128xf32>
    %cst_383 = arith.constant 1.000000e-01 : f32
    %1529 = vector.broadcast %cst_383 : f32 to vector<8x128xf32>
    %1530 = arith.addf %1528, %1529 : vector<8x128xf32>
    %1531 = arith.divf %1524, %1530 : vector<8x128xf32>
    %1532 = math.log %1531 : vector<8x128xf32>
    %1533 = math.absf %1532 : vector<8x128xf32>
    %1534 = arith.addf %1367, %1533 : vector<8x128xf32>
    %cst_384 = arith.constant 1.000000e+00 : f32
    %1535 = vector.broadcast %cst_384 : f32 to vector<8x128xf32>
    %1536 = arith.subf %1535, %167 : vector<8x128xf32>
    %1537 = arith.mulf %1536, %1424 : vector<8x128xf32>
    %1538 = arith.addf %167, %1537 : vector<8x128xf32>
    %cst_385 = arith.constant 1.000000e+00 : f32
    %1539 = vector.broadcast %cst_385 : f32 to vector<8x128xf32>
    %1540 = arith.subf %1539, %215 : vector<8x128xf32>
    %1541 = arith.mulf %1540, %1424 : vector<8x128xf32>
    %1542 = arith.addf %215, %1541 : vector<8x128xf32>
    %1543 = arith.mulf %1538, %1463 : vector<8x128xf32>
    %1544 = arith.addf %179, %1543 : vector<8x128xf32>
    %1545 = arith.mulf %1544, %1464 : vector<8x128xf32>
    %1546 = arith.mulf %1542, %1503 : vector<8x128xf32>
    %1547 = arith.addf %227, %1546 : vector<8x128xf32>
    %1548 = arith.mulf %1547, %1504 : vector<8x128xf32>
    %1549 = vector.broadcast %52 : f32 to vector<8x128xf32>
    %1550 = arith.mulf %1545, %1549 : vector<8x128xf32>
    %cst_386 = arith.constant 0.000000e+00 : f32
    %1551 = vector.broadcast %cst_386 : f32 to vector<8x128xf32>
    %1552 = arith.maximumf %1550, %1551 : vector<8x128xf32>
    %cst_387 = arith.constant 1.000000e-01 : f32
    %1553 = vector.broadcast %cst_387 : f32 to vector<8x128xf32>
    %1554 = arith.addf %1552, %1553 : vector<8x128xf32>
    %1555 = vector.broadcast %52 : f32 to vector<8x128xf32>
    %1556 = arith.mulf %1548, %1555 : vector<8x128xf32>
    %cst_388 = arith.constant 0.000000e+00 : f32
    %1557 = vector.broadcast %cst_388 : f32 to vector<8x128xf32>
    %1558 = arith.maximumf %1556, %1557 : vector<8x128xf32>
    %cst_389 = arith.constant 1.000000e-01 : f32
    %1559 = vector.broadcast %cst_389 : f32 to vector<8x128xf32>
    %1560 = arith.addf %1558, %1559 : vector<8x128xf32>
    %1561 = arith.divf %1554, %1560 : vector<8x128xf32>
    %1562 = math.log %1561 : vector<8x128xf32>
    %1563 = math.absf %1562 : vector<8x128xf32>
    %1564 = arith.addf %1534, %1563 : vector<8x128xf32>
    %cst_390 = arith.constant 1.000000e+00 : f32
    %1565 = vector.broadcast %cst_390 : f32 to vector<8x128xf32>
    %1566 = arith.subf %1565, %169 : vector<8x128xf32>
    %1567 = arith.mulf %1566, %1424 : vector<8x128xf32>
    %1568 = arith.addf %169, %1567 : vector<8x128xf32>
    %cst_391 = arith.constant 1.000000e+00 : f32
    %1569 = vector.broadcast %cst_391 : f32 to vector<8x128xf32>
    %1570 = arith.subf %1569, %217 : vector<8x128xf32>
    %1571 = arith.mulf %1570, %1424 : vector<8x128xf32>
    %1572 = arith.addf %217, %1571 : vector<8x128xf32>
    %1573 = arith.mulf %1568, %1463 : vector<8x128xf32>
    %1574 = arith.addf %184, %1573 : vector<8x128xf32>
    %1575 = arith.mulf %1574, %1464 : vector<8x128xf32>
    %1576 = arith.mulf %1572, %1503 : vector<8x128xf32>
    %1577 = arith.addf %232, %1576 : vector<8x128xf32>
    %1578 = arith.mulf %1577, %1504 : vector<8x128xf32>
    %1579 = vector.broadcast %53 : f32 to vector<8x128xf32>
    %1580 = arith.mulf %1575, %1579 : vector<8x128xf32>
    %cst_392 = arith.constant 0.000000e+00 : f32
    %1581 = vector.broadcast %cst_392 : f32 to vector<8x128xf32>
    %1582 = arith.maximumf %1580, %1581 : vector<8x128xf32>
    %cst_393 = arith.constant 1.000000e-01 : f32
    %1583 = vector.broadcast %cst_393 : f32 to vector<8x128xf32>
    %1584 = arith.addf %1582, %1583 : vector<8x128xf32>
    %1585 = vector.broadcast %53 : f32 to vector<8x128xf32>
    %1586 = arith.mulf %1578, %1585 : vector<8x128xf32>
    %cst_394 = arith.constant 0.000000e+00 : f32
    %1587 = vector.broadcast %cst_394 : f32 to vector<8x128xf32>
    %1588 = arith.maximumf %1586, %1587 : vector<8x128xf32>
    %cst_395 = arith.constant 1.000000e-01 : f32
    %1589 = vector.broadcast %cst_395 : f32 to vector<8x128xf32>
    %1590 = arith.addf %1588, %1589 : vector<8x128xf32>
    %1591 = arith.divf %1584, %1590 : vector<8x128xf32>
    %1592 = math.log %1591 : vector<8x128xf32>
    %1593 = math.absf %1592 : vector<8x128xf32>
    %1594 = arith.addf %1564, %1593 : vector<8x128xf32>
    %1595 = vector.broadcast %57 : f32 to vector<8x128xf32>
    %1596 = arith.subf %1595, %90 : vector<8x128xf32>
    %1597 = vector.broadcast %58 : f32 to vector<8x128xf32>
    %1598 = arith.subf %1597, %93 : vector<8x128xf32>
    %1599 = arith.mulf %1596, %1596 : vector<8x128xf32>
    %1600 = arith.mulf %1598, %1598 : vector<8x128xf32>
    %1601 = arith.addf %1599, %1600 : vector<8x128xf32>
    %1602 = arith.mulf %59, %59 : f32
    %1603 = vector.broadcast %1602 : f32 to vector<8x128xf32>
    %1604 = arith.addf %1601, %1603 : vector<8x128xf32>
    %1605 = math.rsqrt %1604 : vector<8x128xf32>
    %1606 = arith.mulf %1605, %1605 : vector<8x128xf32>
    %1607 = arith.mulf %1596, %1605 : vector<8x128xf32>
    %1608 = arith.mulf %1598, %1605 : vector<8x128xf32>
    %1609 = vector.broadcast %59 : f32 to vector<8x128xf32>
    %1610 = arith.mulf %1609, %1605 : vector<8x128xf32>
    %1611 = vector.broadcast %54 : f32 to vector<8x128xf32>
    %1612 = arith.subf %1611, %90 : vector<8x128xf32>
    %1613 = vector.broadcast %55 : f32 to vector<8x128xf32>
    %1614 = arith.subf %1613, %93 : vector<8x128xf32>
    %1615 = arith.mulf %1612, %1612 : vector<8x128xf32>
    %1616 = arith.mulf %1614, %1614 : vector<8x128xf32>
    %1617 = arith.addf %1615, %1616 : vector<8x128xf32>
    %1618 = arith.mulf %56, %56 : f32
    %1619 = vector.broadcast %1618 : f32 to vector<8x128xf32>
    %1620 = arith.addf %1617, %1619 : vector<8x128xf32>
    %1621 = math.rsqrt %1620 : vector<8x128xf32>
    %1622 = arith.mulf %1612, %1621 : vector<8x128xf32>
    %1623 = arith.mulf %1614, %1621 : vector<8x128xf32>
    %1624 = vector.broadcast %56 : f32 to vector<8x128xf32>
    %1625 = arith.mulf %1624, %1621 : vector<8x128xf32>
    %1626 = arith.addf %1607, %1622 : vector<8x128xf32>
    %1627 = arith.addf %1608, %1623 : vector<8x128xf32>
    %1628 = arith.addf %1610, %1625 : vector<8x128xf32>
    %1629 = arith.mulf %1626, %1626 : vector<8x128xf32>
    %1630 = arith.mulf %1627, %1627 : vector<8x128xf32>
    %1631 = arith.addf %1629, %1630 : vector<8x128xf32>
    %1632 = arith.mulf %1628, %1628 : vector<8x128xf32>
    %1633 = arith.addf %1631, %1632 : vector<8x128xf32>
    %cst_396 = arith.constant 9.99999996E-13 : f32
    %1634 = vector.broadcast %cst_396 : f32 to vector<8x128xf32>
    %1635 = arith.addf %1633, %1634 : vector<8x128xf32>
    %1636 = math.rsqrt %1635 : vector<8x128xf32>
    %1637 = arith.mulf %1626, %1636 : vector<8x128xf32>
    %1638 = arith.mulf %1627, %1636 : vector<8x128xf32>
    %1639 = arith.mulf %1628, %1636 : vector<8x128xf32>
    %1640 = arith.mulf %1622, %1637 : vector<8x128xf32>
    %1641 = arith.mulf %1623, %1638 : vector<8x128xf32>
    %1642 = arith.addf %1640, %1641 : vector<8x128xf32>
    %1643 = arith.mulf %1625, %1639 : vector<8x128xf32>
    %1644 = arith.addf %1642, %1643 : vector<8x128xf32>
    %cst_397 = arith.constant 1.000000e-03 : f32
    %1645 = vector.broadcast %cst_397 : f32 to vector<8x128xf32>
    %1646 = arith.maximumf %1644, %1645 : vector<8x128xf32>
    %cst_398 = arith.constant 1.000000e+00 : f32
    %1647 = vector.broadcast %cst_398 : f32 to vector<8x128xf32>
    %1648 = arith.subf %1647, %1646 : vector<8x128xf32>
    %1649 = arith.mulf %1648, %1648 : vector<8x128xf32>
    %1650 = arith.mulf %1649, %1649 : vector<8x128xf32>
    %1651 = arith.mulf %1650, %1648 : vector<8x128xf32>
    %1652 = arith.mulf %151, %1637 : vector<8x128xf32>
    %1653 = arith.mulf %152, %1638 : vector<8x128xf32>
    %1654 = arith.addf %1652, %1653 : vector<8x128xf32>
    %1655 = arith.mulf %153, %1639 : vector<8x128xf32>
    %1656 = arith.addf %1654, %1655 : vector<8x128xf32>
    %cst_399 = arith.constant 1.000000e-03 : f32
    %1657 = vector.broadcast %cst_399 : f32 to vector<8x128xf32>
    %1658 = arith.maximumf %1656, %1657 : vector<8x128xf32>
    %1659 = arith.mulf %151, %1607 : vector<8x128xf32>
    %1660 = arith.mulf %152, %1608 : vector<8x128xf32>
    %1661 = arith.addf %1659, %1660 : vector<8x128xf32>
    %1662 = arith.mulf %153, %1610 : vector<8x128xf32>
    %1663 = arith.addf %1661, %1662 : vector<8x128xf32>
    %cst_400 = arith.constant 1.000000e-03 : f32
    %1664 = vector.broadcast %cst_400 : f32 to vector<8x128xf32>
    %1665 = arith.maximumf %1663, %1664 : vector<8x128xf32>
    %1666 = arith.mulf %151, %1622 : vector<8x128xf32>
    %1667 = arith.mulf %152, %1623 : vector<8x128xf32>
    %1668 = arith.addf %1666, %1667 : vector<8x128xf32>
    %1669 = arith.mulf %153, %1625 : vector<8x128xf32>
    %1670 = arith.addf %1668, %1669 : vector<8x128xf32>
    %cst_401 = arith.constant 1.000000e-03 : f32
    %1671 = vector.broadcast %cst_401 : f32 to vector<8x128xf32>
    %1672 = arith.maximumf %1670, %1671 : vector<8x128xf32>
    %1673 = arith.mulf %1658, %1658 : vector<8x128xf32>
    %cst_402 = arith.constant 1.000000e+00 : f32
    %1674 = vector.broadcast %cst_402 : f32 to vector<8x128xf32>
    %1675 = arith.subf %157, %1674 : vector<8x128xf32>
    %1676 = arith.mulf %1673, %1675 : vector<8x128xf32>
    %cst_403 = arith.constant 1.000000e+00 : f32
    %1677 = vector.broadcast %cst_403 : f32 to vector<8x128xf32>
    %1678 = arith.addf %1676, %1677 : vector<8x128xf32>
    %cst_404 = arith.constant 1.000000e-03 : f32
    %1679 = vector.broadcast %cst_404 : f32 to vector<8x128xf32>
    %1680 = arith.maximumf %1678, %1679 : vector<8x128xf32>
    %1681 = arith.mulf %1665, %163 : vector<8x128xf32>
    %1682 = arith.addf %1681, %161 : vector<8x128xf32>
    %1683 = arith.mulf %1672, %163 : vector<8x128xf32>
    %1684 = arith.addf %1683, %161 : vector<8x128xf32>
    %cst_405 = arith.constant 4.000000e+00 : f32
    %1685 = vector.broadcast %cst_405 : f32 to vector<8x128xf32>
    %1686 = arith.mulf %1685, %1680 : vector<8x128xf32>
    %1687 = arith.mulf %1686, %1680 : vector<8x128xf32>
    %1688 = arith.mulf %1687, %1682 : vector<8x128xf32>
    %1689 = arith.mulf %1688, %1684 : vector<8x128xf32>
    %1690 = arith.divf %157, %1689 : vector<8x128xf32>
    %1691 = arith.mulf %1665, %1606 : vector<8x128xf32>
    %1692 = arith.mulf %199, %1637 : vector<8x128xf32>
    %1693 = arith.mulf %200, %1638 : vector<8x128xf32>
    %1694 = arith.addf %1692, %1693 : vector<8x128xf32>
    %1695 = arith.mulf %201, %1639 : vector<8x128xf32>
    %1696 = arith.addf %1694, %1695 : vector<8x128xf32>
    %cst_406 = arith.constant 1.000000e-03 : f32
    %1697 = vector.broadcast %cst_406 : f32 to vector<8x128xf32>
    %1698 = arith.maximumf %1696, %1697 : vector<8x128xf32>
    %1699 = arith.mulf %199, %1607 : vector<8x128xf32>
    %1700 = arith.mulf %200, %1608 : vector<8x128xf32>
    %1701 = arith.addf %1699, %1700 : vector<8x128xf32>
    %1702 = arith.mulf %201, %1610 : vector<8x128xf32>
    %1703 = arith.addf %1701, %1702 : vector<8x128xf32>
    %cst_407 = arith.constant 1.000000e-03 : f32
    %1704 = vector.broadcast %cst_407 : f32 to vector<8x128xf32>
    %1705 = arith.maximumf %1703, %1704 : vector<8x128xf32>
    %1706 = arith.mulf %199, %1622 : vector<8x128xf32>
    %1707 = arith.mulf %200, %1623 : vector<8x128xf32>
    %1708 = arith.addf %1706, %1707 : vector<8x128xf32>
    %1709 = arith.mulf %201, %1625 : vector<8x128xf32>
    %1710 = arith.addf %1708, %1709 : vector<8x128xf32>
    %cst_408 = arith.constant 1.000000e-03 : f32
    %1711 = vector.broadcast %cst_408 : f32 to vector<8x128xf32>
    %1712 = arith.maximumf %1710, %1711 : vector<8x128xf32>
    %1713 = arith.mulf %1698, %1698 : vector<8x128xf32>
    %cst_409 = arith.constant 1.000000e+00 : f32
    %1714 = vector.broadcast %cst_409 : f32 to vector<8x128xf32>
    %1715 = arith.subf %205, %1714 : vector<8x128xf32>
    %1716 = arith.mulf %1713, %1715 : vector<8x128xf32>
    %cst_410 = arith.constant 1.000000e+00 : f32
    %1717 = vector.broadcast %cst_410 : f32 to vector<8x128xf32>
    %1718 = arith.addf %1716, %1717 : vector<8x128xf32>
    %cst_411 = arith.constant 1.000000e-03 : f32
    %1719 = vector.broadcast %cst_411 : f32 to vector<8x128xf32>
    %1720 = arith.maximumf %1718, %1719 : vector<8x128xf32>
    %1721 = arith.mulf %1705, %211 : vector<8x128xf32>
    %1722 = arith.addf %1721, %209 : vector<8x128xf32>
    %1723 = arith.mulf %1712, %211 : vector<8x128xf32>
    %1724 = arith.addf %1723, %209 : vector<8x128xf32>
    %cst_412 = arith.constant 4.000000e+00 : f32
    %1725 = vector.broadcast %cst_412 : f32 to vector<8x128xf32>
    %1726 = arith.mulf %1725, %1720 : vector<8x128xf32>
    %1727 = arith.mulf %1726, %1720 : vector<8x128xf32>
    %1728 = arith.mulf %1727, %1722 : vector<8x128xf32>
    %1729 = arith.mulf %1728, %1724 : vector<8x128xf32>
    %1730 = arith.divf %205, %1729 : vector<8x128xf32>
    %1731 = arith.mulf %1705, %1606 : vector<8x128xf32>
    %cst_413 = arith.constant 1.000000e+00 : f32
    %1732 = vector.broadcast %cst_413 : f32 to vector<8x128xf32>
    %1733 = arith.subf %1732, %165 : vector<8x128xf32>
    %1734 = arith.mulf %1733, %1651 : vector<8x128xf32>
    %1735 = arith.addf %165, %1734 : vector<8x128xf32>
    %cst_414 = arith.constant 1.000000e+00 : f32
    %1736 = vector.broadcast %cst_414 : f32 to vector<8x128xf32>
    %1737 = arith.subf %1736, %213 : vector<8x128xf32>
    %1738 = arith.mulf %1737, %1651 : vector<8x128xf32>
    %1739 = arith.addf %213, %1738 : vector<8x128xf32>
    %1740 = arith.mulf %1735, %1690 : vector<8x128xf32>
    %1741 = arith.addf %174, %1740 : vector<8x128xf32>
    %1742 = arith.mulf %1741, %1691 : vector<8x128xf32>
    %1743 = arith.mulf %1739, %1730 : vector<8x128xf32>
    %1744 = arith.addf %222, %1743 : vector<8x128xf32>
    %1745 = arith.mulf %1744, %1731 : vector<8x128xf32>
    %1746 = vector.broadcast %60 : f32 to vector<8x128xf32>
    %1747 = arith.mulf %1742, %1746 : vector<8x128xf32>
    %cst_415 = arith.constant 0.000000e+00 : f32
    %1748 = vector.broadcast %cst_415 : f32 to vector<8x128xf32>
    %1749 = arith.maximumf %1747, %1748 : vector<8x128xf32>
    %cst_416 = arith.constant 1.000000e-01 : f32
    %1750 = vector.broadcast %cst_416 : f32 to vector<8x128xf32>
    %1751 = arith.addf %1749, %1750 : vector<8x128xf32>
    %1752 = vector.broadcast %60 : f32 to vector<8x128xf32>
    %1753 = arith.mulf %1745, %1752 : vector<8x128xf32>
    %cst_417 = arith.constant 0.000000e+00 : f32
    %1754 = vector.broadcast %cst_417 : f32 to vector<8x128xf32>
    %1755 = arith.maximumf %1753, %1754 : vector<8x128xf32>
    %cst_418 = arith.constant 1.000000e-01 : f32
    %1756 = vector.broadcast %cst_418 : f32 to vector<8x128xf32>
    %1757 = arith.addf %1755, %1756 : vector<8x128xf32>
    %1758 = arith.divf %1751, %1757 : vector<8x128xf32>
    %1759 = math.log %1758 : vector<8x128xf32>
    %1760 = math.absf %1759 : vector<8x128xf32>
    %1761 = arith.addf %1594, %1760 : vector<8x128xf32>
    %cst_419 = arith.constant 1.000000e+00 : f32
    %1762 = vector.broadcast %cst_419 : f32 to vector<8x128xf32>
    %1763 = arith.subf %1762, %167 : vector<8x128xf32>
    %1764 = arith.mulf %1763, %1651 : vector<8x128xf32>
    %1765 = arith.addf %167, %1764 : vector<8x128xf32>
    %cst_420 = arith.constant 1.000000e+00 : f32
    %1766 = vector.broadcast %cst_420 : f32 to vector<8x128xf32>
    %1767 = arith.subf %1766, %215 : vector<8x128xf32>
    %1768 = arith.mulf %1767, %1651 : vector<8x128xf32>
    %1769 = arith.addf %215, %1768 : vector<8x128xf32>
    %1770 = arith.mulf %1765, %1690 : vector<8x128xf32>
    %1771 = arith.addf %179, %1770 : vector<8x128xf32>
    %1772 = arith.mulf %1771, %1691 : vector<8x128xf32>
    %1773 = arith.mulf %1769, %1730 : vector<8x128xf32>
    %1774 = arith.addf %227, %1773 : vector<8x128xf32>
    %1775 = arith.mulf %1774, %1731 : vector<8x128xf32>
    %1776 = vector.broadcast %61 : f32 to vector<8x128xf32>
    %1777 = arith.mulf %1772, %1776 : vector<8x128xf32>
    %cst_421 = arith.constant 0.000000e+00 : f32
    %1778 = vector.broadcast %cst_421 : f32 to vector<8x128xf32>
    %1779 = arith.maximumf %1777, %1778 : vector<8x128xf32>
    %cst_422 = arith.constant 1.000000e-01 : f32
    %1780 = vector.broadcast %cst_422 : f32 to vector<8x128xf32>
    %1781 = arith.addf %1779, %1780 : vector<8x128xf32>
    %1782 = vector.broadcast %61 : f32 to vector<8x128xf32>
    %1783 = arith.mulf %1775, %1782 : vector<8x128xf32>
    %cst_423 = arith.constant 0.000000e+00 : f32
    %1784 = vector.broadcast %cst_423 : f32 to vector<8x128xf32>
    %1785 = arith.maximumf %1783, %1784 : vector<8x128xf32>
    %cst_424 = arith.constant 1.000000e-01 : f32
    %1786 = vector.broadcast %cst_424 : f32 to vector<8x128xf32>
    %1787 = arith.addf %1785, %1786 : vector<8x128xf32>
    %1788 = arith.divf %1781, %1787 : vector<8x128xf32>
    %1789 = math.log %1788 : vector<8x128xf32>
    %1790 = math.absf %1789 : vector<8x128xf32>
    %1791 = arith.addf %1761, %1790 : vector<8x128xf32>
    %cst_425 = arith.constant 1.000000e+00 : f32
    %1792 = vector.broadcast %cst_425 : f32 to vector<8x128xf32>
    %1793 = arith.subf %1792, %169 : vector<8x128xf32>
    %1794 = arith.mulf %1793, %1651 : vector<8x128xf32>
    %1795 = arith.addf %169, %1794 : vector<8x128xf32>
    %cst_426 = arith.constant 1.000000e+00 : f32
    %1796 = vector.broadcast %cst_426 : f32 to vector<8x128xf32>
    %1797 = arith.subf %1796, %217 : vector<8x128xf32>
    %1798 = arith.mulf %1797, %1651 : vector<8x128xf32>
    %1799 = arith.addf %217, %1798 : vector<8x128xf32>
    %1800 = arith.mulf %1795, %1690 : vector<8x128xf32>
    %1801 = arith.addf %184, %1800 : vector<8x128xf32>
    %1802 = arith.mulf %1801, %1691 : vector<8x128xf32>
    %1803 = arith.mulf %1799, %1730 : vector<8x128xf32>
    %1804 = arith.addf %232, %1803 : vector<8x128xf32>
    %1805 = arith.mulf %1804, %1731 : vector<8x128xf32>
    %1806 = vector.broadcast %62 : f32 to vector<8x128xf32>
    %1807 = arith.mulf %1802, %1806 : vector<8x128xf32>
    %cst_427 = arith.constant 0.000000e+00 : f32
    %1808 = vector.broadcast %cst_427 : f32 to vector<8x128xf32>
    %1809 = arith.maximumf %1807, %1808 : vector<8x128xf32>
    %cst_428 = arith.constant 1.000000e-01 : f32
    %1810 = vector.broadcast %cst_428 : f32 to vector<8x128xf32>
    %1811 = arith.addf %1809, %1810 : vector<8x128xf32>
    %1812 = vector.broadcast %62 : f32 to vector<8x128xf32>
    %1813 = arith.mulf %1805, %1812 : vector<8x128xf32>
    %cst_429 = arith.constant 0.000000e+00 : f32
    %1814 = vector.broadcast %cst_429 : f32 to vector<8x128xf32>
    %1815 = arith.maximumf %1813, %1814 : vector<8x128xf32>
    %cst_430 = arith.constant 1.000000e-01 : f32
    %1816 = vector.broadcast %cst_430 : f32 to vector<8x128xf32>
    %1817 = arith.addf %1815, %1816 : vector<8x128xf32>
    %1818 = arith.divf %1811, %1817 : vector<8x128xf32>
    %1819 = math.log %1818 : vector<8x128xf32>
    %1820 = math.absf %1819 : vector<8x128xf32>
    %1821 = arith.addf %1791, %1820 : vector<8x128xf32>
    %1822 = vector.broadcast %66 : f32 to vector<8x128xf32>
    %1823 = arith.subf %1822, %90 : vector<8x128xf32>
    %1824 = vector.broadcast %67 : f32 to vector<8x128xf32>
    %1825 = arith.subf %1824, %93 : vector<8x128xf32>
    %1826 = arith.mulf %1823, %1823 : vector<8x128xf32>
    %1827 = arith.mulf %1825, %1825 : vector<8x128xf32>
    %1828 = arith.addf %1826, %1827 : vector<8x128xf32>
    %1829 = arith.mulf %68, %68 : f32
    %1830 = vector.broadcast %1829 : f32 to vector<8x128xf32>
    %1831 = arith.addf %1828, %1830 : vector<8x128xf32>
    %1832 = math.rsqrt %1831 : vector<8x128xf32>
    %1833 = arith.mulf %1832, %1832 : vector<8x128xf32>
    %1834 = arith.mulf %1823, %1832 : vector<8x128xf32>
    %1835 = arith.mulf %1825, %1832 : vector<8x128xf32>
    %1836 = vector.broadcast %68 : f32 to vector<8x128xf32>
    %1837 = arith.mulf %1836, %1832 : vector<8x128xf32>
    %1838 = vector.broadcast %63 : f32 to vector<8x128xf32>
    %1839 = arith.subf %1838, %90 : vector<8x128xf32>
    %1840 = vector.broadcast %64 : f32 to vector<8x128xf32>
    %1841 = arith.subf %1840, %93 : vector<8x128xf32>
    %1842 = arith.mulf %1839, %1839 : vector<8x128xf32>
    %1843 = arith.mulf %1841, %1841 : vector<8x128xf32>
    %1844 = arith.addf %1842, %1843 : vector<8x128xf32>
    %1845 = arith.mulf %65, %65 : f32
    %1846 = vector.broadcast %1845 : f32 to vector<8x128xf32>
    %1847 = arith.addf %1844, %1846 : vector<8x128xf32>
    %1848 = math.rsqrt %1847 : vector<8x128xf32>
    %1849 = arith.mulf %1839, %1848 : vector<8x128xf32>
    %1850 = arith.mulf %1841, %1848 : vector<8x128xf32>
    %1851 = vector.broadcast %65 : f32 to vector<8x128xf32>
    %1852 = arith.mulf %1851, %1848 : vector<8x128xf32>
    %1853 = arith.addf %1834, %1849 : vector<8x128xf32>
    %1854 = arith.addf %1835, %1850 : vector<8x128xf32>
    %1855 = arith.addf %1837, %1852 : vector<8x128xf32>
    %1856 = arith.mulf %1853, %1853 : vector<8x128xf32>
    %1857 = arith.mulf %1854, %1854 : vector<8x128xf32>
    %1858 = arith.addf %1856, %1857 : vector<8x128xf32>
    %1859 = arith.mulf %1855, %1855 : vector<8x128xf32>
    %1860 = arith.addf %1858, %1859 : vector<8x128xf32>
    %cst_431 = arith.constant 9.99999996E-13 : f32
    %1861 = vector.broadcast %cst_431 : f32 to vector<8x128xf32>
    %1862 = arith.addf %1860, %1861 : vector<8x128xf32>
    %1863 = math.rsqrt %1862 : vector<8x128xf32>
    %1864 = arith.mulf %1853, %1863 : vector<8x128xf32>
    %1865 = arith.mulf %1854, %1863 : vector<8x128xf32>
    %1866 = arith.mulf %1855, %1863 : vector<8x128xf32>
    %1867 = arith.mulf %1849, %1864 : vector<8x128xf32>
    %1868 = arith.mulf %1850, %1865 : vector<8x128xf32>
    %1869 = arith.addf %1867, %1868 : vector<8x128xf32>
    %1870 = arith.mulf %1852, %1866 : vector<8x128xf32>
    %1871 = arith.addf %1869, %1870 : vector<8x128xf32>
    %cst_432 = arith.constant 1.000000e-03 : f32
    %1872 = vector.broadcast %cst_432 : f32 to vector<8x128xf32>
    %1873 = arith.maximumf %1871, %1872 : vector<8x128xf32>
    %cst_433 = arith.constant 1.000000e+00 : f32
    %1874 = vector.broadcast %cst_433 : f32 to vector<8x128xf32>
    %1875 = arith.subf %1874, %1873 : vector<8x128xf32>
    %1876 = arith.mulf %1875, %1875 : vector<8x128xf32>
    %1877 = arith.mulf %1876, %1876 : vector<8x128xf32>
    %1878 = arith.mulf %1877, %1875 : vector<8x128xf32>
    %1879 = arith.mulf %151, %1864 : vector<8x128xf32>
    %1880 = arith.mulf %152, %1865 : vector<8x128xf32>
    %1881 = arith.addf %1879, %1880 : vector<8x128xf32>
    %1882 = arith.mulf %153, %1866 : vector<8x128xf32>
    %1883 = arith.addf %1881, %1882 : vector<8x128xf32>
    %cst_434 = arith.constant 1.000000e-03 : f32
    %1884 = vector.broadcast %cst_434 : f32 to vector<8x128xf32>
    %1885 = arith.maximumf %1883, %1884 : vector<8x128xf32>
    %1886 = arith.mulf %151, %1834 : vector<8x128xf32>
    %1887 = arith.mulf %152, %1835 : vector<8x128xf32>
    %1888 = arith.addf %1886, %1887 : vector<8x128xf32>
    %1889 = arith.mulf %153, %1837 : vector<8x128xf32>
    %1890 = arith.addf %1888, %1889 : vector<8x128xf32>
    %cst_435 = arith.constant 1.000000e-03 : f32
    %1891 = vector.broadcast %cst_435 : f32 to vector<8x128xf32>
    %1892 = arith.maximumf %1890, %1891 : vector<8x128xf32>
    %1893 = arith.mulf %151, %1849 : vector<8x128xf32>
    %1894 = arith.mulf %152, %1850 : vector<8x128xf32>
    %1895 = arith.addf %1893, %1894 : vector<8x128xf32>
    %1896 = arith.mulf %153, %1852 : vector<8x128xf32>
    %1897 = arith.addf %1895, %1896 : vector<8x128xf32>
    %cst_436 = arith.constant 1.000000e-03 : f32
    %1898 = vector.broadcast %cst_436 : f32 to vector<8x128xf32>
    %1899 = arith.maximumf %1897, %1898 : vector<8x128xf32>
    %1900 = arith.mulf %1885, %1885 : vector<8x128xf32>
    %cst_437 = arith.constant 1.000000e+00 : f32
    %1901 = vector.broadcast %cst_437 : f32 to vector<8x128xf32>
    %1902 = arith.subf %157, %1901 : vector<8x128xf32>
    %1903 = arith.mulf %1900, %1902 : vector<8x128xf32>
    %cst_438 = arith.constant 1.000000e+00 : f32
    %1904 = vector.broadcast %cst_438 : f32 to vector<8x128xf32>
    %1905 = arith.addf %1903, %1904 : vector<8x128xf32>
    %cst_439 = arith.constant 1.000000e-03 : f32
    %1906 = vector.broadcast %cst_439 : f32 to vector<8x128xf32>
    %1907 = arith.maximumf %1905, %1906 : vector<8x128xf32>
    %1908 = arith.mulf %1892, %163 : vector<8x128xf32>
    %1909 = arith.addf %1908, %161 : vector<8x128xf32>
    %1910 = arith.mulf %1899, %163 : vector<8x128xf32>
    %1911 = arith.addf %1910, %161 : vector<8x128xf32>
    %cst_440 = arith.constant 4.000000e+00 : f32
    %1912 = vector.broadcast %cst_440 : f32 to vector<8x128xf32>
    %1913 = arith.mulf %1912, %1907 : vector<8x128xf32>
    %1914 = arith.mulf %1913, %1907 : vector<8x128xf32>
    %1915 = arith.mulf %1914, %1909 : vector<8x128xf32>
    %1916 = arith.mulf %1915, %1911 : vector<8x128xf32>
    %1917 = arith.divf %157, %1916 : vector<8x128xf32>
    %1918 = arith.mulf %1892, %1833 : vector<8x128xf32>
    %1919 = arith.mulf %199, %1864 : vector<8x128xf32>
    %1920 = arith.mulf %200, %1865 : vector<8x128xf32>
    %1921 = arith.addf %1919, %1920 : vector<8x128xf32>
    %1922 = arith.mulf %201, %1866 : vector<8x128xf32>
    %1923 = arith.addf %1921, %1922 : vector<8x128xf32>
    %cst_441 = arith.constant 1.000000e-03 : f32
    %1924 = vector.broadcast %cst_441 : f32 to vector<8x128xf32>
    %1925 = arith.maximumf %1923, %1924 : vector<8x128xf32>
    %1926 = arith.mulf %199, %1834 : vector<8x128xf32>
    %1927 = arith.mulf %200, %1835 : vector<8x128xf32>
    %1928 = arith.addf %1926, %1927 : vector<8x128xf32>
    %1929 = arith.mulf %201, %1837 : vector<8x128xf32>
    %1930 = arith.addf %1928, %1929 : vector<8x128xf32>
    %cst_442 = arith.constant 1.000000e-03 : f32
    %1931 = vector.broadcast %cst_442 : f32 to vector<8x128xf32>
    %1932 = arith.maximumf %1930, %1931 : vector<8x128xf32>
    %1933 = arith.mulf %199, %1849 : vector<8x128xf32>
    %1934 = arith.mulf %200, %1850 : vector<8x128xf32>
    %1935 = arith.addf %1933, %1934 : vector<8x128xf32>
    %1936 = arith.mulf %201, %1852 : vector<8x128xf32>
    %1937 = arith.addf %1935, %1936 : vector<8x128xf32>
    %cst_443 = arith.constant 1.000000e-03 : f32
    %1938 = vector.broadcast %cst_443 : f32 to vector<8x128xf32>
    %1939 = arith.maximumf %1937, %1938 : vector<8x128xf32>
    %1940 = arith.mulf %1925, %1925 : vector<8x128xf32>
    %cst_444 = arith.constant 1.000000e+00 : f32
    %1941 = vector.broadcast %cst_444 : f32 to vector<8x128xf32>
    %1942 = arith.subf %205, %1941 : vector<8x128xf32>
    %1943 = arith.mulf %1940, %1942 : vector<8x128xf32>
    %cst_445 = arith.constant 1.000000e+00 : f32
    %1944 = vector.broadcast %cst_445 : f32 to vector<8x128xf32>
    %1945 = arith.addf %1943, %1944 : vector<8x128xf32>
    %cst_446 = arith.constant 1.000000e-03 : f32
    %1946 = vector.broadcast %cst_446 : f32 to vector<8x128xf32>
    %1947 = arith.maximumf %1945, %1946 : vector<8x128xf32>
    %1948 = arith.mulf %1932, %211 : vector<8x128xf32>
    %1949 = arith.addf %1948, %209 : vector<8x128xf32>
    %1950 = arith.mulf %1939, %211 : vector<8x128xf32>
    %1951 = arith.addf %1950, %209 : vector<8x128xf32>
    %cst_447 = arith.constant 4.000000e+00 : f32
    %1952 = vector.broadcast %cst_447 : f32 to vector<8x128xf32>
    %1953 = arith.mulf %1952, %1947 : vector<8x128xf32>
    %1954 = arith.mulf %1953, %1947 : vector<8x128xf32>
    %1955 = arith.mulf %1954, %1949 : vector<8x128xf32>
    %1956 = arith.mulf %1955, %1951 : vector<8x128xf32>
    %1957 = arith.divf %205, %1956 : vector<8x128xf32>
    %1958 = arith.mulf %1932, %1833 : vector<8x128xf32>
    %cst_448 = arith.constant 1.000000e+00 : f32
    %1959 = vector.broadcast %cst_448 : f32 to vector<8x128xf32>
    %1960 = arith.subf %1959, %165 : vector<8x128xf32>
    %1961 = arith.mulf %1960, %1878 : vector<8x128xf32>
    %1962 = arith.addf %165, %1961 : vector<8x128xf32>
    %cst_449 = arith.constant 1.000000e+00 : f32
    %1963 = vector.broadcast %cst_449 : f32 to vector<8x128xf32>
    %1964 = arith.subf %1963, %213 : vector<8x128xf32>
    %1965 = arith.mulf %1964, %1878 : vector<8x128xf32>
    %1966 = arith.addf %213, %1965 : vector<8x128xf32>
    %1967 = arith.mulf %1962, %1917 : vector<8x128xf32>
    %1968 = arith.addf %174, %1967 : vector<8x128xf32>
    %1969 = arith.mulf %1968, %1918 : vector<8x128xf32>
    %1970 = arith.mulf %1966, %1957 : vector<8x128xf32>
    %1971 = arith.addf %222, %1970 : vector<8x128xf32>
    %1972 = arith.mulf %1971, %1958 : vector<8x128xf32>
    %1973 = vector.broadcast %69 : f32 to vector<8x128xf32>
    %1974 = arith.mulf %1969, %1973 : vector<8x128xf32>
    %cst_450 = arith.constant 0.000000e+00 : f32
    %1975 = vector.broadcast %cst_450 : f32 to vector<8x128xf32>
    %1976 = arith.maximumf %1974, %1975 : vector<8x128xf32>
    %cst_451 = arith.constant 1.000000e-01 : f32
    %1977 = vector.broadcast %cst_451 : f32 to vector<8x128xf32>
    %1978 = arith.addf %1976, %1977 : vector<8x128xf32>
    %1979 = vector.broadcast %69 : f32 to vector<8x128xf32>
    %1980 = arith.mulf %1972, %1979 : vector<8x128xf32>
    %cst_452 = arith.constant 0.000000e+00 : f32
    %1981 = vector.broadcast %cst_452 : f32 to vector<8x128xf32>
    %1982 = arith.maximumf %1980, %1981 : vector<8x128xf32>
    %cst_453 = arith.constant 1.000000e-01 : f32
    %1983 = vector.broadcast %cst_453 : f32 to vector<8x128xf32>
    %1984 = arith.addf %1982, %1983 : vector<8x128xf32>
    %1985 = arith.divf %1978, %1984 : vector<8x128xf32>
    %1986 = math.log %1985 : vector<8x128xf32>
    %1987 = math.absf %1986 : vector<8x128xf32>
    %1988 = arith.addf %1821, %1987 : vector<8x128xf32>
    %cst_454 = arith.constant 1.000000e+00 : f32
    %1989 = vector.broadcast %cst_454 : f32 to vector<8x128xf32>
    %1990 = arith.subf %1989, %167 : vector<8x128xf32>
    %1991 = arith.mulf %1990, %1878 : vector<8x128xf32>
    %1992 = arith.addf %167, %1991 : vector<8x128xf32>
    %cst_455 = arith.constant 1.000000e+00 : f32
    %1993 = vector.broadcast %cst_455 : f32 to vector<8x128xf32>
    %1994 = arith.subf %1993, %215 : vector<8x128xf32>
    %1995 = arith.mulf %1994, %1878 : vector<8x128xf32>
    %1996 = arith.addf %215, %1995 : vector<8x128xf32>
    %1997 = arith.mulf %1992, %1917 : vector<8x128xf32>
    %1998 = arith.addf %179, %1997 : vector<8x128xf32>
    %1999 = arith.mulf %1998, %1918 : vector<8x128xf32>
    %2000 = arith.mulf %1996, %1957 : vector<8x128xf32>
    %2001 = arith.addf %227, %2000 : vector<8x128xf32>
    %2002 = arith.mulf %2001, %1958 : vector<8x128xf32>
    %2003 = vector.broadcast %70 : f32 to vector<8x128xf32>
    %2004 = arith.mulf %1999, %2003 : vector<8x128xf32>
    %cst_456 = arith.constant 0.000000e+00 : f32
    %2005 = vector.broadcast %cst_456 : f32 to vector<8x128xf32>
    %2006 = arith.maximumf %2004, %2005 : vector<8x128xf32>
    %cst_457 = arith.constant 1.000000e-01 : f32
    %2007 = vector.broadcast %cst_457 : f32 to vector<8x128xf32>
    %2008 = arith.addf %2006, %2007 : vector<8x128xf32>
    %2009 = vector.broadcast %70 : f32 to vector<8x128xf32>
    %2010 = arith.mulf %2002, %2009 : vector<8x128xf32>
    %cst_458 = arith.constant 0.000000e+00 : f32
    %2011 = vector.broadcast %cst_458 : f32 to vector<8x128xf32>
    %2012 = arith.maximumf %2010, %2011 : vector<8x128xf32>
    %cst_459 = arith.constant 1.000000e-01 : f32
    %2013 = vector.broadcast %cst_459 : f32 to vector<8x128xf32>
    %2014 = arith.addf %2012, %2013 : vector<8x128xf32>
    %2015 = arith.divf %2008, %2014 : vector<8x128xf32>
    %2016 = math.log %2015 : vector<8x128xf32>
    %2017 = math.absf %2016 : vector<8x128xf32>
    %2018 = arith.addf %1988, %2017 : vector<8x128xf32>
    %cst_460 = arith.constant 1.000000e+00 : f32
    %2019 = vector.broadcast %cst_460 : f32 to vector<8x128xf32>
    %2020 = arith.subf %2019, %169 : vector<8x128xf32>
    %2021 = arith.mulf %2020, %1878 : vector<8x128xf32>
    %2022 = arith.addf %169, %2021 : vector<8x128xf32>
    %cst_461 = arith.constant 1.000000e+00 : f32
    %2023 = vector.broadcast %cst_461 : f32 to vector<8x128xf32>
    %2024 = arith.subf %2023, %217 : vector<8x128xf32>
    %2025 = arith.mulf %2024, %1878 : vector<8x128xf32>
    %2026 = arith.addf %217, %2025 : vector<8x128xf32>
    %2027 = arith.mulf %2022, %1917 : vector<8x128xf32>
    %2028 = arith.addf %184, %2027 : vector<8x128xf32>
    %2029 = arith.mulf %2028, %1918 : vector<8x128xf32>
    %2030 = arith.mulf %2026, %1957 : vector<8x128xf32>
    %2031 = arith.addf %232, %2030 : vector<8x128xf32>
    %2032 = arith.mulf %2031, %1958 : vector<8x128xf32>
    %2033 = vector.broadcast %71 : f32 to vector<8x128xf32>
    %2034 = arith.mulf %2029, %2033 : vector<8x128xf32>
    %cst_462 = arith.constant 0.000000e+00 : f32
    %2035 = vector.broadcast %cst_462 : f32 to vector<8x128xf32>
    %2036 = arith.maximumf %2034, %2035 : vector<8x128xf32>
    %cst_463 = arith.constant 1.000000e-01 : f32
    %2037 = vector.broadcast %cst_463 : f32 to vector<8x128xf32>
    %2038 = arith.addf %2036, %2037 : vector<8x128xf32>
    %2039 = vector.broadcast %71 : f32 to vector<8x128xf32>
    %2040 = arith.mulf %2032, %2039 : vector<8x128xf32>
    %cst_464 = arith.constant 0.000000e+00 : f32
    %2041 = vector.broadcast %cst_464 : f32 to vector<8x128xf32>
    %2042 = arith.maximumf %2040, %2041 : vector<8x128xf32>
    %cst_465 = arith.constant 1.000000e-01 : f32
    %2043 = vector.broadcast %cst_465 : f32 to vector<8x128xf32>
    %2044 = arith.addf %2042, %2043 : vector<8x128xf32>
    %2045 = arith.divf %2038, %2044 : vector<8x128xf32>
    %2046 = math.log %2045 : vector<8x128xf32>
    %2047 = math.absf %2046 : vector<8x128xf32>
    %2048 = arith.addf %2018, %2047 : vector<8x128xf32>
    %2049 = vector.broadcast %75 : f32 to vector<8x128xf32>
    %2050 = arith.subf %2049, %90 : vector<8x128xf32>
    %2051 = vector.broadcast %76 : f32 to vector<8x128xf32>
    %2052 = arith.subf %2051, %93 : vector<8x128xf32>
    %2053 = arith.mulf %2050, %2050 : vector<8x128xf32>
    %2054 = arith.mulf %2052, %2052 : vector<8x128xf32>
    %2055 = arith.addf %2053, %2054 : vector<8x128xf32>
    %2056 = arith.mulf %77, %77 : f32
    %2057 = vector.broadcast %2056 : f32 to vector<8x128xf32>
    %2058 = arith.addf %2055, %2057 : vector<8x128xf32>
    %2059 = math.rsqrt %2058 : vector<8x128xf32>
    %2060 = arith.mulf %2059, %2059 : vector<8x128xf32>
    %2061 = arith.mulf %2050, %2059 : vector<8x128xf32>
    %2062 = arith.mulf %2052, %2059 : vector<8x128xf32>
    %2063 = vector.broadcast %77 : f32 to vector<8x128xf32>
    %2064 = arith.mulf %2063, %2059 : vector<8x128xf32>
    %2065 = vector.broadcast %72 : f32 to vector<8x128xf32>
    %2066 = arith.subf %2065, %90 : vector<8x128xf32>
    %2067 = vector.broadcast %73 : f32 to vector<8x128xf32>
    %2068 = arith.subf %2067, %93 : vector<8x128xf32>
    %2069 = arith.mulf %2066, %2066 : vector<8x128xf32>
    %2070 = arith.mulf %2068, %2068 : vector<8x128xf32>
    %2071 = arith.addf %2069, %2070 : vector<8x128xf32>
    %2072 = arith.mulf %74, %74 : f32
    %2073 = vector.broadcast %2072 : f32 to vector<8x128xf32>
    %2074 = arith.addf %2071, %2073 : vector<8x128xf32>
    %2075 = math.rsqrt %2074 : vector<8x128xf32>
    %2076 = arith.mulf %2066, %2075 : vector<8x128xf32>
    %2077 = arith.mulf %2068, %2075 : vector<8x128xf32>
    %2078 = vector.broadcast %74 : f32 to vector<8x128xf32>
    %2079 = arith.mulf %2078, %2075 : vector<8x128xf32>
    %2080 = arith.addf %2061, %2076 : vector<8x128xf32>
    %2081 = arith.addf %2062, %2077 : vector<8x128xf32>
    %2082 = arith.addf %2064, %2079 : vector<8x128xf32>
    %2083 = arith.mulf %2080, %2080 : vector<8x128xf32>
    %2084 = arith.mulf %2081, %2081 : vector<8x128xf32>
    %2085 = arith.addf %2083, %2084 : vector<8x128xf32>
    %2086 = arith.mulf %2082, %2082 : vector<8x128xf32>
    %2087 = arith.addf %2085, %2086 : vector<8x128xf32>
    %cst_466 = arith.constant 9.99999996E-13 : f32
    %2088 = vector.broadcast %cst_466 : f32 to vector<8x128xf32>
    %2089 = arith.addf %2087, %2088 : vector<8x128xf32>
    %2090 = math.rsqrt %2089 : vector<8x128xf32>
    %2091 = arith.mulf %2080, %2090 : vector<8x128xf32>
    %2092 = arith.mulf %2081, %2090 : vector<8x128xf32>
    %2093 = arith.mulf %2082, %2090 : vector<8x128xf32>
    %2094 = arith.mulf %2076, %2091 : vector<8x128xf32>
    %2095 = arith.mulf %2077, %2092 : vector<8x128xf32>
    %2096 = arith.addf %2094, %2095 : vector<8x128xf32>
    %2097 = arith.mulf %2079, %2093 : vector<8x128xf32>
    %2098 = arith.addf %2096, %2097 : vector<8x128xf32>
    %cst_467 = arith.constant 1.000000e-03 : f32
    %2099 = vector.broadcast %cst_467 : f32 to vector<8x128xf32>
    %2100 = arith.maximumf %2098, %2099 : vector<8x128xf32>
    %cst_468 = arith.constant 1.000000e+00 : f32
    %2101 = vector.broadcast %cst_468 : f32 to vector<8x128xf32>
    %2102 = arith.subf %2101, %2100 : vector<8x128xf32>
    %2103 = arith.mulf %2102, %2102 : vector<8x128xf32>
    %2104 = arith.mulf %2103, %2103 : vector<8x128xf32>
    %2105 = arith.mulf %2104, %2102 : vector<8x128xf32>
    %2106 = arith.mulf %151, %2091 : vector<8x128xf32>
    %2107 = arith.mulf %152, %2092 : vector<8x128xf32>
    %2108 = arith.addf %2106, %2107 : vector<8x128xf32>
    %2109 = arith.mulf %153, %2093 : vector<8x128xf32>
    %2110 = arith.addf %2108, %2109 : vector<8x128xf32>
    %cst_469 = arith.constant 1.000000e-03 : f32
    %2111 = vector.broadcast %cst_469 : f32 to vector<8x128xf32>
    %2112 = arith.maximumf %2110, %2111 : vector<8x128xf32>
    %2113 = arith.mulf %151, %2061 : vector<8x128xf32>
    %2114 = arith.mulf %152, %2062 : vector<8x128xf32>
    %2115 = arith.addf %2113, %2114 : vector<8x128xf32>
    %2116 = arith.mulf %153, %2064 : vector<8x128xf32>
    %2117 = arith.addf %2115, %2116 : vector<8x128xf32>
    %cst_470 = arith.constant 1.000000e-03 : f32
    %2118 = vector.broadcast %cst_470 : f32 to vector<8x128xf32>
    %2119 = arith.maximumf %2117, %2118 : vector<8x128xf32>
    %2120 = arith.mulf %151, %2076 : vector<8x128xf32>
    %2121 = arith.mulf %152, %2077 : vector<8x128xf32>
    %2122 = arith.addf %2120, %2121 : vector<8x128xf32>
    %2123 = arith.mulf %153, %2079 : vector<8x128xf32>
    %2124 = arith.addf %2122, %2123 : vector<8x128xf32>
    %cst_471 = arith.constant 1.000000e-03 : f32
    %2125 = vector.broadcast %cst_471 : f32 to vector<8x128xf32>
    %2126 = arith.maximumf %2124, %2125 : vector<8x128xf32>
    %2127 = arith.mulf %2112, %2112 : vector<8x128xf32>
    %cst_472 = arith.constant 1.000000e+00 : f32
    %2128 = vector.broadcast %cst_472 : f32 to vector<8x128xf32>
    %2129 = arith.subf %157, %2128 : vector<8x128xf32>
    %2130 = arith.mulf %2127, %2129 : vector<8x128xf32>
    %cst_473 = arith.constant 1.000000e+00 : f32
    %2131 = vector.broadcast %cst_473 : f32 to vector<8x128xf32>
    %2132 = arith.addf %2130, %2131 : vector<8x128xf32>
    %cst_474 = arith.constant 1.000000e-03 : f32
    %2133 = vector.broadcast %cst_474 : f32 to vector<8x128xf32>
    %2134 = arith.maximumf %2132, %2133 : vector<8x128xf32>
    %2135 = arith.mulf %2119, %163 : vector<8x128xf32>
    %2136 = arith.addf %2135, %161 : vector<8x128xf32>
    %2137 = arith.mulf %2126, %163 : vector<8x128xf32>
    %2138 = arith.addf %2137, %161 : vector<8x128xf32>
    %cst_475 = arith.constant 4.000000e+00 : f32
    %2139 = vector.broadcast %cst_475 : f32 to vector<8x128xf32>
    %2140 = arith.mulf %2139, %2134 : vector<8x128xf32>
    %2141 = arith.mulf %2140, %2134 : vector<8x128xf32>
    %2142 = arith.mulf %2141, %2136 : vector<8x128xf32>
    %2143 = arith.mulf %2142, %2138 : vector<8x128xf32>
    %2144 = arith.divf %157, %2143 : vector<8x128xf32>
    %2145 = arith.mulf %2119, %2060 : vector<8x128xf32>
    %2146 = arith.mulf %199, %2091 : vector<8x128xf32>
    %2147 = arith.mulf %200, %2092 : vector<8x128xf32>
    %2148 = arith.addf %2146, %2147 : vector<8x128xf32>
    %2149 = arith.mulf %201, %2093 : vector<8x128xf32>
    %2150 = arith.addf %2148, %2149 : vector<8x128xf32>
    %cst_476 = arith.constant 1.000000e-03 : f32
    %2151 = vector.broadcast %cst_476 : f32 to vector<8x128xf32>
    %2152 = arith.maximumf %2150, %2151 : vector<8x128xf32>
    %2153 = arith.mulf %199, %2061 : vector<8x128xf32>
    %2154 = arith.mulf %200, %2062 : vector<8x128xf32>
    %2155 = arith.addf %2153, %2154 : vector<8x128xf32>
    %2156 = arith.mulf %201, %2064 : vector<8x128xf32>
    %2157 = arith.addf %2155, %2156 : vector<8x128xf32>
    %cst_477 = arith.constant 1.000000e-03 : f32
    %2158 = vector.broadcast %cst_477 : f32 to vector<8x128xf32>
    %2159 = arith.maximumf %2157, %2158 : vector<8x128xf32>
    %2160 = arith.mulf %199, %2076 : vector<8x128xf32>
    %2161 = arith.mulf %200, %2077 : vector<8x128xf32>
    %2162 = arith.addf %2160, %2161 : vector<8x128xf32>
    %2163 = arith.mulf %201, %2079 : vector<8x128xf32>
    %2164 = arith.addf %2162, %2163 : vector<8x128xf32>
    %cst_478 = arith.constant 1.000000e-03 : f32
    %2165 = vector.broadcast %cst_478 : f32 to vector<8x128xf32>
    %2166 = arith.maximumf %2164, %2165 : vector<8x128xf32>
    %2167 = arith.mulf %2152, %2152 : vector<8x128xf32>
    %cst_479 = arith.constant 1.000000e+00 : f32
    %2168 = vector.broadcast %cst_479 : f32 to vector<8x128xf32>
    %2169 = arith.subf %205, %2168 : vector<8x128xf32>
    %2170 = arith.mulf %2167, %2169 : vector<8x128xf32>
    %cst_480 = arith.constant 1.000000e+00 : f32
    %2171 = vector.broadcast %cst_480 : f32 to vector<8x128xf32>
    %2172 = arith.addf %2170, %2171 : vector<8x128xf32>
    %cst_481 = arith.constant 1.000000e-03 : f32
    %2173 = vector.broadcast %cst_481 : f32 to vector<8x128xf32>
    %2174 = arith.maximumf %2172, %2173 : vector<8x128xf32>
    %2175 = arith.mulf %2159, %211 : vector<8x128xf32>
    %2176 = arith.addf %2175, %209 : vector<8x128xf32>
    %2177 = arith.mulf %2166, %211 : vector<8x128xf32>
    %2178 = arith.addf %2177, %209 : vector<8x128xf32>
    %cst_482 = arith.constant 4.000000e+00 : f32
    %2179 = vector.broadcast %cst_482 : f32 to vector<8x128xf32>
    %2180 = arith.mulf %2179, %2174 : vector<8x128xf32>
    %2181 = arith.mulf %2180, %2174 : vector<8x128xf32>
    %2182 = arith.mulf %2181, %2176 : vector<8x128xf32>
    %2183 = arith.mulf %2182, %2178 : vector<8x128xf32>
    %2184 = arith.divf %205, %2183 : vector<8x128xf32>
    %2185 = arith.mulf %2159, %2060 : vector<8x128xf32>
    %cst_483 = arith.constant 1.000000e+00 : f32
    %2186 = vector.broadcast %cst_483 : f32 to vector<8x128xf32>
    %2187 = arith.subf %2186, %165 : vector<8x128xf32>
    %2188 = arith.mulf %2187, %2105 : vector<8x128xf32>
    %2189 = arith.addf %165, %2188 : vector<8x128xf32>
    %cst_484 = arith.constant 1.000000e+00 : f32
    %2190 = vector.broadcast %cst_484 : f32 to vector<8x128xf32>
    %2191 = arith.subf %2190, %213 : vector<8x128xf32>
    %2192 = arith.mulf %2191, %2105 : vector<8x128xf32>
    %2193 = arith.addf %213, %2192 : vector<8x128xf32>
    %2194 = arith.mulf %2189, %2144 : vector<8x128xf32>
    %2195 = arith.addf %174, %2194 : vector<8x128xf32>
    %2196 = arith.mulf %2195, %2145 : vector<8x128xf32>
    %2197 = arith.mulf %2193, %2184 : vector<8x128xf32>
    %2198 = arith.addf %222, %2197 : vector<8x128xf32>
    %2199 = arith.mulf %2198, %2185 : vector<8x128xf32>
    %2200 = vector.broadcast %78 : f32 to vector<8x128xf32>
    %2201 = arith.mulf %2196, %2200 : vector<8x128xf32>
    %cst_485 = arith.constant 0.000000e+00 : f32
    %2202 = vector.broadcast %cst_485 : f32 to vector<8x128xf32>
    %2203 = arith.maximumf %2201, %2202 : vector<8x128xf32>
    %cst_486 = arith.constant 1.000000e-01 : f32
    %2204 = vector.broadcast %cst_486 : f32 to vector<8x128xf32>
    %2205 = arith.addf %2203, %2204 : vector<8x128xf32>
    %2206 = vector.broadcast %78 : f32 to vector<8x128xf32>
    %2207 = arith.mulf %2199, %2206 : vector<8x128xf32>
    %cst_487 = arith.constant 0.000000e+00 : f32
    %2208 = vector.broadcast %cst_487 : f32 to vector<8x128xf32>
    %2209 = arith.maximumf %2207, %2208 : vector<8x128xf32>
    %cst_488 = arith.constant 1.000000e-01 : f32
    %2210 = vector.broadcast %cst_488 : f32 to vector<8x128xf32>
    %2211 = arith.addf %2209, %2210 : vector<8x128xf32>
    %2212 = arith.divf %2205, %2211 : vector<8x128xf32>
    %2213 = math.log %2212 : vector<8x128xf32>
    %2214 = math.absf %2213 : vector<8x128xf32>
    %2215 = arith.addf %2048, %2214 : vector<8x128xf32>
    %cst_489 = arith.constant 1.000000e+00 : f32
    %2216 = vector.broadcast %cst_489 : f32 to vector<8x128xf32>
    %2217 = arith.subf %2216, %167 : vector<8x128xf32>
    %2218 = arith.mulf %2217, %2105 : vector<8x128xf32>
    %2219 = arith.addf %167, %2218 : vector<8x128xf32>
    %cst_490 = arith.constant 1.000000e+00 : f32
    %2220 = vector.broadcast %cst_490 : f32 to vector<8x128xf32>
    %2221 = arith.subf %2220, %215 : vector<8x128xf32>
    %2222 = arith.mulf %2221, %2105 : vector<8x128xf32>
    %2223 = arith.addf %215, %2222 : vector<8x128xf32>
    %2224 = arith.mulf %2219, %2144 : vector<8x128xf32>
    %2225 = arith.addf %179, %2224 : vector<8x128xf32>
    %2226 = arith.mulf %2225, %2145 : vector<8x128xf32>
    %2227 = arith.mulf %2223, %2184 : vector<8x128xf32>
    %2228 = arith.addf %227, %2227 : vector<8x128xf32>
    %2229 = arith.mulf %2228, %2185 : vector<8x128xf32>
    %2230 = vector.broadcast %79 : f32 to vector<8x128xf32>
    %2231 = arith.mulf %2226, %2230 : vector<8x128xf32>
    %cst_491 = arith.constant 0.000000e+00 : f32
    %2232 = vector.broadcast %cst_491 : f32 to vector<8x128xf32>
    %2233 = arith.maximumf %2231, %2232 : vector<8x128xf32>
    %cst_492 = arith.constant 1.000000e-01 : f32
    %2234 = vector.broadcast %cst_492 : f32 to vector<8x128xf32>
    %2235 = arith.addf %2233, %2234 : vector<8x128xf32>
    %2236 = vector.broadcast %79 : f32 to vector<8x128xf32>
    %2237 = arith.mulf %2229, %2236 : vector<8x128xf32>
    %cst_493 = arith.constant 0.000000e+00 : f32
    %2238 = vector.broadcast %cst_493 : f32 to vector<8x128xf32>
    %2239 = arith.maximumf %2237, %2238 : vector<8x128xf32>
    %cst_494 = arith.constant 1.000000e-01 : f32
    %2240 = vector.broadcast %cst_494 : f32 to vector<8x128xf32>
    %2241 = arith.addf %2239, %2240 : vector<8x128xf32>
    %2242 = arith.divf %2235, %2241 : vector<8x128xf32>
    %2243 = math.log %2242 : vector<8x128xf32>
    %2244 = math.absf %2243 : vector<8x128xf32>
    %2245 = arith.addf %2215, %2244 : vector<8x128xf32>
    %cst_495 = arith.constant 1.000000e+00 : f32
    %2246 = vector.broadcast %cst_495 : f32 to vector<8x128xf32>
    %2247 = arith.subf %2246, %169 : vector<8x128xf32>
    %2248 = arith.mulf %2247, %2105 : vector<8x128xf32>
    %2249 = arith.addf %169, %2248 : vector<8x128xf32>
    %cst_496 = arith.constant 1.000000e+00 : f32
    %2250 = vector.broadcast %cst_496 : f32 to vector<8x128xf32>
    %2251 = arith.subf %2250, %217 : vector<8x128xf32>
    %2252 = arith.mulf %2251, %2105 : vector<8x128xf32>
    %2253 = arith.addf %217, %2252 : vector<8x128xf32>
    %2254 = arith.mulf %2249, %2144 : vector<8x128xf32>
    %2255 = arith.addf %184, %2254 : vector<8x128xf32>
    %2256 = arith.mulf %2255, %2145 : vector<8x128xf32>
    %2257 = arith.mulf %2253, %2184 : vector<8x128xf32>
    %2258 = arith.addf %232, %2257 : vector<8x128xf32>
    %2259 = arith.mulf %2258, %2185 : vector<8x128xf32>
    %2260 = vector.broadcast %80 : f32 to vector<8x128xf32>
    %2261 = arith.mulf %2256, %2260 : vector<8x128xf32>
    %cst_497 = arith.constant 0.000000e+00 : f32
    %2262 = vector.broadcast %cst_497 : f32 to vector<8x128xf32>
    %2263 = arith.maximumf %2261, %2262 : vector<8x128xf32>
    %cst_498 = arith.constant 1.000000e-01 : f32
    %2264 = vector.broadcast %cst_498 : f32 to vector<8x128xf32>
    %2265 = arith.addf %2263, %2264 : vector<8x128xf32>
    %2266 = vector.broadcast %80 : f32 to vector<8x128xf32>
    %2267 = arith.mulf %2259, %2266 : vector<8x128xf32>
    %cst_499 = arith.constant 0.000000e+00 : f32
    %2268 = vector.broadcast %cst_499 : f32 to vector<8x128xf32>
    %2269 = arith.maximumf %2267, %2268 : vector<8x128xf32>
    %cst_500 = arith.constant 1.000000e-01 : f32
    %2270 = vector.broadcast %cst_500 : f32 to vector<8x128xf32>
    %2271 = arith.addf %2269, %2270 : vector<8x128xf32>
    %2272 = arith.divf %2265, %2271 : vector<8x128xf32>
    %2273 = math.log %2272 : vector<8x128xf32>
    %2274 = math.absf %2273 : vector<8x128xf32>
    %2275 = arith.addf %2245, %2274 : vector<8x128xf32>
    %c1_i32 = arith.constant 1 : i32
    %c0_501 = arith.constant 0 : index
    %c0_502 = arith.constant 0 : index
    %c0_503 = arith.constant 0 : index
    %c0_504 = arith.constant 0 : index
    %2276 = vector.load %arg7[%c0_501, %c0_502, %c0_503, %c0_504] : memref<1x5x8x128xf32, #tpu.memory_space<vmem>>, vector<1x1x8x128xf32>
    %2277 = vector.shape_cast %2276 : vector<1x1x8x128xf32> to vector<8x128xf32>
    %2278 = vector.shape_cast %99 : vector<8x128xf32> to vector<1x1x8x128xf32>
    tpu.vector_store %arg7[%c0_501, %c0_502, %c0_503, %c0_504], %2278 {strides = array<i32>} : memref<1x5x8x128xf32, #tpu.memory_space<vmem>>, vector<1x1x8x128xf32>,
    %c0_505 = arith.constant 0 : index
    %c1_506 = arith.constant 1 : index
    %c0_507 = arith.constant 0 : index
    %c0_508 = arith.constant 0 : index
    %2279 = vector.load %arg7[%c0_505, %c1_506, %c0_507, %c0_508] : memref<1x5x8x128xf32, #tpu.memory_space<vmem>>, vector<1x1x8x128xf32>
    %2280 = vector.shape_cast %2279 : vector<1x1x8x128xf32> to vector<8x128xf32>
    %2281 = vector.shape_cast %114 : vector<8x128xf32> to vector<1x1x8x128xf32>
    tpu.vector_store %arg7[%c0_505, %c1_506, %c0_507, %c0_508], %2281 {strides = array<i32>} : memref<1x5x8x128xf32, #tpu.memory_space<vmem>>, vector<1x1x8x128xf32>,
    %c0_509 = arith.constant 0 : index
    %c2_510 = arith.constant 2 : index
    %c0_511 = arith.constant 0 : index
    %c0_512 = arith.constant 0 : index
    %2282 = vector.load %arg7[%c0_509, %c2_510, %c0_511, %c0_512] : memref<1x5x8x128xf32, #tpu.memory_space<vmem>>, vector<1x1x8x128xf32>
    %2283 = vector.shape_cast %2282 : vector<1x1x8x128xf32> to vector<8x128xf32>
    %2284 = vector.shape_cast %121 : vector<8x128xf32> to vector<1x1x8x128xf32>
    tpu.vector_store %arg7[%c0_509, %c2_510, %c0_511, %c0_512], %2284 {strides = array<i32>} : memref<1x5x8x128xf32, #tpu.memory_space<vmem>>, vector<1x1x8x128xf32>,
    %c0_513 = arith.constant 0 : index
    %c3_514 = arith.constant 3 : index
    %c0_515 = arith.constant 0 : index
    %c0_516 = arith.constant 0 : index
    %2285 = vector.load %arg7[%c0_513, %c3_514, %c0_515, %c0_516] : memref<1x5x8x128xf32, #tpu.memory_space<vmem>>, vector<1x1x8x128xf32>
    %2286 = vector.shape_cast %2285 : vector<1x1x8x128xf32> to vector<8x128xf32>
    %2287 = vector.shape_cast %136 : vector<8x128xf32> to vector<1x1x8x128xf32>
    tpu.vector_store %arg7[%c0_513, %c3_514, %c0_515, %c0_516], %2287 {strides = array<i32>} : memref<1x5x8x128xf32, #tpu.memory_space<vmem>>, vector<1x1x8x128xf32>,
    %c0_517 = arith.constant 0 : index
    %c4_518 = arith.constant 4 : index
    %c0_519 = arith.constant 0 : index
    %c0_520 = arith.constant 0 : index
    %2288 = vector.load %arg7[%c0_517, %c4_518, %c0_519, %c0_520] : memref<1x5x8x128xf32, #tpu.memory_space<vmem>>, vector<1x1x8x128xf32>
    %2289 = vector.shape_cast %2288 : vector<1x1x8x128xf32> to vector<8x128xf32>
    %2290 = vector.shape_cast %2275 : vector<8x128xf32> to vector<1x1x8x128xf32>
    tpu.vector_store %arg7[%c0_517, %c4_518, %c0_519, %c0_520], %2290 {strides = array<i32>} : memref<1x5x8x128xf32, #tpu.memory_space<vmem>>, vector<1x1x8x128xf32>,
    return
  }
  func.func @transform_0(%arg0: i32) -> (i32, i32) {
    %c0_i32 = arith.constant 0 : i32
    %c0_i32_0 = arith.constant 0 : i32
    %c0_i32_1 = arith.constant 0 : i32
    return %c0_i32, %c0_i32_0 : i32, i32
  }
  func.func @transform_1(%arg0: i32) -> (i32, i32) {
    %c0_i32 = arith.constant 0 : i32
    %c0_i32_0 = arith.constant 0 : i32
    %c0_i32_1 = arith.constant 0 : i32
    return %c0_i32, %c0_i32_0 : i32, i32
  }
  func.func @transform_2(%arg0: i32) -> (i32, i32) {
    %c0_i32 = arith.constant 0 : i32
    %c0_i32_0 = arith.constant 0 : i32
    %c0_i32_1 = arith.constant 0 : i32
    return %c0_i32, %c0_i32_0 : i32, i32
  }
  func.func @transform_3(%arg0: i32) -> (i32, i32, i32) {
    %c0_i32 = arith.constant 0 : i32
    %c0_i32_0 = arith.constant 0 : i32
    %c0_i32_1 = arith.constant 0 : i32
    return %c0_i32, %arg0, %c0_i32_0 : i32, i32, i32
  }
  func.func @transform_4(%arg0: i32) -> (i32, i32, i32) {
    %c0_i32 = arith.constant 0 : i32
    %c0_i32_0 = arith.constant 0 : i32
    %c0_i32_1 = arith.constant 0 : i32
    return %c0_i32, %arg0, %c0_i32_0 : i32, i32, i32
  }
  func.func @transform_5(%arg0: i32) -> (i32, i32, i32) {
    %c0_i32 = arith.constant 0 : i32
    %c0_i32_0 = arith.constant 0 : i32
    %c0_i32_1 = arith.constant 0 : i32
    return %c0_i32, %arg0, %c0_i32_0 : i32, i32, i32
  }
  func.func @transform_6(%arg0: i32) -> (i32, i32, i32, i32) {
    %c0_i32 = arith.constant 0 : i32
    %c0_i32_0 = arith.constant 0 : i32
    %c0_i32_1 = arith.constant 0 : i32
    %c0_i32_2 = arith.constant 0 : i32
    return %arg0, %c0_i32, %c0_i32_0, %c0_i32_1 : i32, i32, i32, i32
  }
}

</mosaic_0001>

<bundles_post_ra>
// kernel: tpu_custom_call.1
= control target key start
LH: loop header
LB: loop body
LE: loop exit
PB: predicated region body
PF: predicated region fallthrough
CT: control target
= control target key end

     0   :  { %11 = vsyncpa [#allocation5], 0  ;;  %s4712_s0 = inlined_call_operand.vmem [shape: f32[9,3], index: 0, kind: input, shape index: {}]   ;;  %s4713_s1 = inlined_call_operand.vmem [shape: f32[9,3], index: 1, kind: input, shape index: {}]   ;;  %s4714_s2 = inlined_call_operand.vmem [shape: f32[9,3], index: 2, kind: input, shape index: {}]   ;;  %s4715_s3 = inlined_call_operand.hbm [shape: f32[10,8,128], index: 3, kind: input, shape index: {}]   ;;  %s4716_s4 = inlined_call_operand.hbm [shape: f32[10,8,128], index: 4, kind: input, shape index: {}]   ;;  %s4717_s5 = inlined_call_operand.vmem [shape: f32[2,8,128], index: 5, kind: input, shape index: {}]   ;;  %s4718_s6 = inlined_call_operand.hbm [shape: f32[1,5,8,128], index: 6, kind: output, shape index: {}]  }
   0x1   :  { %12 = vsyncpa [#allocation7], 0 }
   0x2   :  { %13 = vsyncpa [#allocation3], 0 }
   0x3   :  { %14 = vsyncpa [#allocation11], 0 }
   0x4   :  { %15 = vsyncpa [#allocation4], 0  ;;  %s33_s23 = sshll.u32 %s4713_s1, 4  ;;  %s21_s26 = sshll.u32 %s4712_s0, 4  ;;  %s34_s23 = int_to_ptr.vmem [resolvable:$true] %s33_s23  ;;  %s22_s26 = int_to_ptr.vmem [resolvable:$true] %s21_s26 }
   0x5   :  { %s2380_s27 = scalar_lea.vmem %s34_s23, 256  ;;  %p2385_p1 = scmp.lt.s32.totalorder %s34_s23, %s34_s23 }
   0x6   :  { %p2381_p0 = scmp.ne.s32.totalorder %s34_s23, %s2380_s27  ;;  %p2386_p2 = scmp.lt.s32.totalorder %s2380_s27, %s2380_s27 }
   0x8   :  { %p2387_p3 = por %p2386_p2, %p2385_p1 }
   0xa   :  { %p2388_p4 = pnand %p2387_p3, %p2381_p0 }
   0xc   :  { %2391 = shalt.err (!%p2388_p4)
}
   0xd   :  { %s2492_s28 = smov [#allocation6]   ;;  %s2493_s29 = smov 128  }
   0xe   :  { %s2494_s30 = smov 8   ;;  %s2392_s1 = scalar_lea.vmem %s22_s26, 256 }
   0xf   :  { %39 = dma.vmem_to_smem %s34_s23, 256, %s2492_s28, [#allocation7], %s2493_s29, %s2493_s29, %s2494_s30  }
  0x10   :  { %p2393_p5 = scmp.ne.s32.totalorder %s22_s26, %s2392_s1  ;;  %p2397_p6 = scmp.lt.s32.totalorder %s22_s26, %s22_s26 }
  0x11   :  { %p2398_p7 = scmp.lt.s32.totalorder %s2392_s1, %s2392_s1 }
  0x13   :  { %p2399_p8 = por %p2398_p7, %p2397_p6 }
  0x15   :  { %p2400_p9 = pnand %p2399_p8, %p2393_p5 }
  0x17   :  { %2403 = shalt.err (!%p2400_p9)
}
  0x18   :  { %s2495_s0 = smov [#allocation2]   ;;  %s45_s9 = sshll.u32 %s4714_s2, 4  ;;  %s46_s9 = int_to_ptr.vmem [resolvable:$true] %s45_s9 }
  0x19   :  { %27 = dma.vmem_to_smem %s22_s26, 256, %s2495_s0, [#allocation5], %s2493_s29, %s2493_s29, %s2494_s30  }
  0x1a   :  { %s2404_s10 = scalar_lea.vmem %s46_s9, 256  ;;  %p2409_p11 = scmp.lt.s32.totalorder %s46_s9, %s46_s9 }
  0x1b   :  { %p2405_p10 = scmp.ne.s32.totalorder %s46_s9, %s2404_s10  ;;  %p2410_p12 = scmp.lt.s32.totalorder %s2404_s10, %s2404_s10 }
  0x1d   :  { %p2411_p13 = por %p2410_p12, %p2409_p11 }
  0x1f   :  { %p2412_p0 = pnand %p2411_p13, %p2405_p10 }
  0x21   :  { %2415 = shalt.err (!%p2412_p0)
}
  0x22   :  { %s2496_s11 = smov [#allocation8]   ;;  %s2497_s12 = smov [#allocation9]  }
  0x23   :  { %51 = dma.vmem_to_smem %s46_s9, 256, %s2496_s11, [#allocation7], %s2493_s29, %s2493_s29, %s2494_s30  }
  0x24   :  { %s57_s13 = sshll.u32 %s2497_s12, 4  ;;  %s2498_s14 = smov [#allocation10]   ;;  %s58_s13 = int_to_ptr.vmem [resolvable:$true] %s57_s13 }
  0x25   :  { %s69_s15 = sshll.u32 %s2498_s14, 4  ;;  %s2416_s17 = scalar_lea.hbm %s4715_s3, 1280  ;;  %s70_s15 = int_to_ptr.vmem [resolvable:$true] %s69_s15 }
  0x26   :  { %p2417_p1 = scmp.ne.s32.totalorder %s4715_s3, %s2416_s17  ;;  %p2420_p2 = scmp.lt.u32.totalorder %s2416_s17, %s4715_s3 }
  0x28   :  { %p2422_p3 = pnand %p2420_p2, %p2417_p1 }
  0x2a   :  { %2425 = shalt.err (!%p2422_p3)
}
  0x2b   :  { %s2426_s22 = scalar_lea.vmem %s58_s13, 1280  ;;  %p2431_p5 = scmp.lt.s32.totalorder %s58_s13, %s58_s13 }
  0x2c   :  { %p2427_p4 = scmp.ne.s32.totalorder %s58_s13, %s2426_s22  ;;  %p2432_p6 = scmp.lt.s32.totalorder %s2426_s22, %s2426_s22 }
  0x2e   :  { %p2433_p7 = por %p2432_p6, %p2431_p5 }
  0x30   :  { %p2434_p8 = pnand %p2433_p7, %p2427_p4 }
  0x32   :  { %2437 = shalt.err (!%p2434_p8)
}
  0x33   :  { %63 = dma.hbm_to_vmem [thread:$0]  %s4715_s3, 1280, %s58_s13, [#allocation3], %s2493_s29, %s2493_s29, %s2494_s30  }
  0x34   :  { %s2438_s27 = scalar_lea.hbm %s4716_s4, 1280 }
  0x35   :  { %p2439_p9 = scmp.ne.s32.totalorder %s4716_s4, %s2438_s27  ;;  %p2442_p10 = scmp.lt.u32.totalorder %s2438_s27, %s4716_s4 }
  0x37   :  { %p2444_p11 = pnand %p2442_p10, %p2439_p9 }
  0x39   :  { %2447 = shalt.err (!%p2444_p11)
}
  0x3a   :  { %s2448_s8 = scalar_lea.vmem %s70_s15, 1280  ;;  %p2453_p13 = scmp.lt.s32.totalorder %s70_s15, %s70_s15 }
  0x3b   :  { %p2449_p12 = scmp.ne.s32.totalorder %s70_s15, %s2448_s8  ;;  %p2454_p0 = scmp.lt.s32.totalorder %s2448_s8, %s2448_s8 }
  0x3d   :  { %p2455_p1 = por %p2454_p0, %p2453_p13 }
  0x3f   :  { %p2456_p2 = pnand %p2455_p1, %p2449_p12 }
  0x41   :  { %2459 = shalt.err (!%p2456_p2)
}
  0x42   :  { %75 = dma.hbm_to_vmem [thread:$0]  %s4716_s4, 1280, %s70_s15, [#allocation11], %s2493_s29, %s2493_s29, %s2494_s30  }
  0x43   :  { %2482 = dma.done.wait [#allocation5], 256  }
  0x44   :  { %2483 = vsyncadd [#allocation5], 4294967040 }
  0x45   :  { %2484 = dma.done.wait [#allocation7], 512  }
  0x46   :  { %2485 = vsyncadd [#allocation7], 4294966784 }
  0x47   :  { %2486 = dma.done.wait [#allocation3], 1280  }
  0x48   :  { %2487 = vsyncadd [#allocation3], 4294966016 }
  0x49   :  { %2488 = dma.done.wait [#allocation11], 1280  }
  0x4a   :  { %2489 = vsyncadd [#allocation11], 4294966016 }
  0x4b   :  { %93 = sfence }
  0x4c   :  { %v2583_v0 = vld [vmem:[#allocation9] sm:$0xff]  ;;  %v2585_v1 = vld [vmem:[#allocation9 + $0x8] sm:$0xff]  ;;  %v2587_v2 = vld [vmem:[#allocation9 + $0x10] sm:$0xff]  ;;  %s2595_s4 = sld [smem:[#allocation6]]  ;;  %s2597_s10 = sld [smem:[#allocation6 + $0x1]] }
  0x4d   :  { %v271_v3 = vmul.f32 %v2583_v0, %v2583_v0  ;;  %v272_v4 = vmul.f32 %v2585_v1, %v2585_v1  ;;  %v274_v5 = vmul.f32 %v2587_v2, %v2587_v2  ;;  %s2599_s11 = sld [smem:[#allocation2]]  ;;  %v2601_v7 = vld [vmem:[#allocation10] sm:$0xff]  ;;  %v2603_v8 = vld [vmem:[#allocation10 + $0x8] sm:$0xff]  ;;  %s2607_s12 = sld [smem:[#allocation2 + $0x1]]  ;;  %v2611_v11 = vld [vmem:[#allocation10 + $0x10] sm:$0xff] }
  0x4e   :  { %v2609_v10 = vld [vmem:[#allocation9 + $0x30] sm:$0xff]  ;;  %v292_v12 = vmul.f32 %v2601_v7, %v2601_v7  ;;  %s2615_s13 = sld [smem:[#allocation2 + $0x2]]  ;;  %v199_v13 = vsub.f32 %v2583_v0, %v2601_v7  ;;  %v293_v14 = vmul.f32 %v2603_v8, %v2603_v8  ;;  %v295_v15 = vmul.f32 %v2611_v11, %v2611_v11  ;;  %s2625_s15 = sld [smem:[#allocation8]]  ;;  %v2653_v24 = vld [vmem:[#allocation10 + $0x30] sm:$0xff]  ;;  %v2658_v25 = vld [vmem:[%s4717_s5 + $0x8] sm:$0xff] }
  0x4f   :  { %v273_v6 = vadd.f32 %v272_v4, %v271_v3  ;;  %s2617_s14 = sld [smem:[#allocation6 + $0x2]]  ;;  %s2627_s16 = sld [smem:[#allocation8 + $0x1]]  ;;  %v200_v16 = vsub.f32 %v2585_v1, %v2603_v8  ;;  %v201_v17 = vsub.f32 %v2587_v2, %v2611_v11  ;;  %v2639_v18 = vmul.f32 %v2609_v10, %v2609_v10  ;;  %v2648_v20 = vld [vmem:[%s4717_s5] sm:$0xff]  ;;  %v2673_v35 = vld [vmem:[#allocation10 + $0x18] sm:$0xff]  ;;  %v2694_v44 = vld [vmem:[#allocation9 + $0x18] sm:$0xff] }
  0x50   :  { %s2631_s2 = sld [smem:[#allocation6 + $0x80]]  ;;  %s2633_s17 = sld [smem:[#allocation6 + $0x81]]  ;;  %v294_v19 = vadd.f32 %v293_v14, %v292_v12  ;;  %v202_v21 = vand.u32 2147483647, %v199_v13  ;;  %v238_v36 = vsub.f32 %v2609_v10, %v2653_v24  ;;  %v2679_v37 = vmul.f32 %v2653_v24, %v2653_v24  ;;  %v2696_v45 = vld [vmem:[#allocation9 + $0x20] sm:$0xff]  ;;  %v2706_v50 = vld [vmem:[#allocation10 + $0x20] sm:$0xff] }
  0x51   :  { %v2605_v9 = vadd.f32 %v274_v5, %v273_v6  ;;  %s2641_s18 = sld [smem:[#allocation2 + $0x80]]  ;;  %s2643_s19 = sld [smem:[#allocation2 + $0x81]]  ;;  %v203_v26 = vand.u32 2147483647, %v200_v16  ;;  %v204_v28 = vand.u32 2147483647, %v201_v17  ;;  %v2663_v29 = vmul.f32 %v2639_v18, %v2639_v18 }
  0x52   :  { %v2650_v22 = vadd.f32 %v295_v15, %v294_v19  ;;  %v313_v23 = vstv %s2595_s4  ;;  %v315_v27 = vstv %s2597_s10  ;;  %s2671_s24 = sld [smem:[#allocation8 + $0x2]]  ;;  %v214_v41 = vmax.f32 %v2673_v35, 0.0  ;;  %s2704_s27 = sld [smem:[#allocation8 + $0x80]]  ;;  %v2708_v51 = vld [vmem:[#allocation10 + $0x28] sm:$0xff]  ;;  %v2738_v3 = vld [vmem:[#allocation9 + $0x28] sm:$0xff] }
  0x53   :  { %4814 = vst [vmem:[#allocation18_spill] sm:$0xff] %v2663_v29  ;;  %v329_v30 = vstv %s2599_s11  ;;  %v205_v31 = vadd.f32 %v203_v26, %v202_v21  ;;  %v2667_v32 = vsub.f32 %v313_v23, %v2648_v20  ;;  %v331_v34 = vstv %s2607_s12  ;;  %s2690_s25 = sld [smem:[#allocation2 + $0x82]]  ;;  %s2715_s28 = sld [smem:[#allocation8 + $0x81]]  ;;  %v2766_v24 = vld [vmem:[#allocation10 + $0x38] sm:$0xff] }
  0x54   :  { %v2682_v38 = vsub.f32 %v315_v27, %v2658_v25  ;;  %v2687_v42 = vsub.f32 %v329_v30, %v2648_v20  ;;  %s2692_s26 = sld [smem:[#allocation6 + $0x82]]  ;;  %v2699_v46 = vsub.f32 %v331_v34, %v2658_v25  ;;  %v208_v52 = vmax.f32 %v2694_v44, 0.0  ;;  %s2717_s1 = sld [smem:[#allocation6 + $0x100]] }
  0x55   :  { %v206_v40 = vadd.f32 %v205_v31, %v204_v28  ;;  %v209_v53 = vmax.f32 %v2696_v45, 0.0  ;;  %v317_v54 = vmul.f32 %v2667_v32, %v2667_v32  ;;  %v215_v56 = vmax.f32 %v2706_v50, 0.0  ;;  %s2724_s0 = sld [smem:[#allocation8 + $0x82]]  ;;  %s2726_s7 = sld [smem:[#allocation6 + $0x101]]  ;;  %v2776_v31 = vld [vmem:[#allocation9 + $0x38] sm:$0xff] }
  0x56   :  { %v504_v48 = vstv %s2631_s2  ;;  %v506_v49 = vstv %s2633_s17  ;;  %v216_v57 = vmax.f32 %v2708_v51, 0.0  ;;  %v318_v58 = vmul.f32 %v2682_v38, %v2682_v38  ;;  %s2736_s8 = sld [smem:[#allocation2 + $0x100]]  ;;  %s2748_s3 = sld [smem:[#allocation2 + $0x101]] }
  0x57   :  { %v520_v55 = vstv %s2641_s18  ;;  %2016 = vst [vmem:[#allocation12] sm:$0xff] %v206_v40  ;;  %v522_v59 = vstv %s2643_s19  ;;  %v217_v60 = vadd.f32 0.01, %v214_v41  ;;  %v333_v61 = vmul.f32 %v2687_v42, %v2687_v42  ;;  %s2755_s9 = sld [smem:[#allocation6 + $0x180]]  ;;  %s2758_s4 = sld [smem:[#allocation6 + $0x181]] }
  0x58   :  { %v2731_v62 = vsub.f32 %v504_v48, %v2648_v20  ;;  %v2734_v63 = vsub.f32 %v506_v49, %v2658_v25  ;;  %v218_v4 = vadd.f32 0.01, %v215_v56  ;;  %v334_v5 = vmul.f32 %v2699_v46, %v2699_v46  ;;  %s2774_s10 = sld [smem:[#allocation6 + $0x102]]  ;;  %v2781_v48 = vld [vmem:[#allocation9 + $0x40] sm:$0xff]  ;;  %v2789_v56 = vld [vmem:[#allocation10 + $0x40] sm:$0xff]  ;;  %s2803_s11 = sld [smem:[#allocation2 + $0x180]] }
  0x59   :  { %v2743_v6 = vsub.f32 %v520_v55, %v2648_v20  ;;  %v2746_v10 = vsub.f32 %v522_v59, %v2658_v25  ;;  %v210_v12 = vmax.f32 %v2738_v3, 0.0  ;;  %v219_v13 = vadd.f32 0.01, %v216_v57  ;;  %4816 = vst [vmem:[#allocation20_spill] sm:$0xff] %v2781_v48  ;;  %v2787_v55 = vld [vmem:[#allocation9 + $0x48] sm:$0xff]  ;;  %4818 = vst [vmem:[#allocation22_spill] sm:$0xff] %v2789_v56  ;;  %s320_s17 = smul.f32 %s2617_s14, %s2617_s14 }
  0x5a   :  { %2135 = vrcp.f32 %v217_v60  ;;  %v2753_v14 = vmul.f32 %v2679_v37, %v2679_v37  ;;  %v211_v15 = vadd.f32 0.01, %v208_v52  ;;  %v239_v16 = vand.u32 2147483647, %v238_v36  ;;  %4817 = vst [vmem:[#allocation21_spill] sm:$0xff] %v2787_v55  ;;  %v2791_v57 = vld [vmem:[#allocation10 + $0x48] sm:$0xff]  ;;  %s336_s19 = smul.f32 %s2615_s13, %s2615_s13 }
  0x5b   :  { %2137 = vrcp.f32 %v218_v4  ;;  %v2760_v19 = vadd.f32 %v318_v58, %v317_v54  ;;  %v508_v21 = vmul.f32 %v2731_v62, %v2731_v62  ;;  %v509_v23 = vmul.f32 %v2734_v63, %v2734_v63  ;;  %4819 = vst [vmem:[#allocation23_spill] sm:$0xff] %v2791_v57  ;;  %s2805_s12 = sld [smem:[#allocation2 + $0x181]]  ;;  %s2824_s2 = sld [smem:[#allocation2 + $0x102]] }
  0x5c   :  { %4815 = vst [vmem:[#allocation19_spill] sm:$0xff] %v2753_v14  ;;  %2139 = vrcp.f32 %v219_v13  ;;  %v212_v26 = vadd.f32 0.01, %v209_v53  ;;  %v2768_v27 = vadd.f32 %v334_v5, %v333_v61  ;;  %v524_v28 = vmul.f32 %v2743_v6, %v2743_v6  ;;  %2020 = vst [vmem:[#allocation12 + $0x10] sm:$0xff] %v239_v16  ;;  %s2862_s18 = sld [smem:[#allocation6 + $0x182]]  ;;  %s511_s21 = smul.f32 %s2692_s26, %s2692_s26 }
  0x5d   :  { %v525_v30 = vmul.f32 %v2746_v10, %v2746_v10  ;;  %v213_v34 = vadd.f32 0.01, %v210_v12  ;;  %v247_v36 = vmax.f32 %v2766_v24, 0.0  ;;  %v241_v49 = vmax.f32 %v2776_v31, 0.0  ;;  %s2876_s20 = sld [smem:[#allocation2 + $0x182]]  ;;  %s527_s22 = smul.f32 %s2690_s25, %s2690_s25 }
  0x5e   :  { %v693_v54 = vstv %s2717_s1  ;;  %v242_v58 = vmax.f32 %v2781_v48, 0.0  ;;  %v2794_v59 = vadd.f32 %v509_v23, %v508_v21  ;;  %v695_v61 = vstv %s2726_s7  ;;  %s2914_s23 = sld [smem:[#allocation6 + $0x200]]  ;;  %s700_s1 = smul.f32 %s2774_s10, %s2774_s10 }
  0x5f   :  { %v243_v4 = vmax.f32 %v2787_v55, 0.0  ;;  %v248_v5 = vmax.f32 %v2789_v56, 0.0  ;;  %v249_v12 = vmax.f32 %v2791_v57, 0.0  ;;  %v2801_v13 = vadd.f32 %v525_v30, %v524_v28 }
  0x60   :  { %v250_v16 = vadd.f32 0.01, %v247_v36  ;;  %v2808_v21 = vsub.f32 %v693_v54, %v2648_v20  ;;  %v709_v23 = vstv %s2736_s8  ;;  %v711_v60 = vstv %s2748_s3 }
  0x61   :  { %v244_v53 = vadd.f32 0.01, %v241_v49  ;;  %v251_v52 = vadd.f32 0.01, %v248_v5  ;;  %v2813_v17 = vsub.f32 %v695_v61, %v2658_v25  ;;  %v882_v47 = vstv %s2755_s9  ;;  %s716_s7 = smul.f32 %s2824_s2, %s2824_s2  ;;  %s2943_s9 = sld [smem:[#allocation6 + $0x201]] }
  0x62   :  { %v252_v41 = vadd.f32 0.01, %v249_v12  ;;  %2141 = vrcp.f32 %v250_v16  ;;  %v884_v30 = vstv %s2758_s4  ;;  %v2819_v36 = vsub.f32 %v709_v23, %v2648_v20  ;;  %s889_s8 = smul.f32 %s2862_s18, %s2862_s18  ;;  %s3593_s4 = sld [smem:[#allocation6 + $0x280]] }
  0x63   :  { %2143 = vrcp.f32 %v251_v52  ;;  %v2822_v54 = vsub.f32 %v711_v60, %v2658_v25  ;;  %v276_v5 = vadd.f32 1e-12, %v2605_v9  ;;  %v2828_v12 = vsub.f32 %v882_v47, %v2648_v20  ;;  %s905_s3 = smul.f32 %s2876_s20, %s2876_s20 }
  0x64   :  { %v2136_v43 = vpop.eup %2135  ;;  %2145 = vrcp.f32 %v252_v41  ;;  %v2832_v52 = vsub.f32 %v884_v30, %v2658_v25  ;;  %v245_v60 = vadd.f32 0.01, %v242_v58  ;;  %v698_v9 = vmul.f32 %v2813_v17, %v2813_v17 }
  0x65   :  { %v2138_v40 = vpop.eup %2137  ;;  %v221_v39 = vmul.f32 %v2136_v43, %v211_v15  ;;  %4820 = vst [vmem:[#allocation24_spill] sm:$0xff] %v2828_v12  ;;  %v283_v15 = vmul.f32 0.5, %v2639_v18  ;;  %v297_v47 = vadd.f32 1e-12, %v2650_v22  ;;  %v714_v18 = vmul.f32 %v2822_v54, %v2822_v54 }
  0x66   :  { %v2140_v49 = vpop.eup %2139  ;;  %v223_v61 = vmul.f32 %v2138_v40, %v212_v26  ;;  %4821 = vst [vmem:[#allocation25_spill] sm:$0xff] %v2832_v52  ;;  %v697_v26 = vmul.f32 %v2808_v21, %v2808_v21  ;;  %v898_v40 = vstv %s2803_s11  ;;  %v900_v41 = vstv %s2805_s12  ;;  %s3597_s11 = sld [smem:[#allocation6 + $0x282]]  ;;  %s3603_s12 = sld [smem:[#allocation6 + $0x281]] }
  0x67   :  { %v225_v43 = vmul.f32 %v2140_v49, %v213_v34  ;;  %2147 = vlog2.f32 %v221_v39  ;;  %v713_v39 = vmul.f32 %v2819_v36, %v2819_v36  ;;  %v886_v34 = vmul.f32 %v2828_v12, %v2828_v12 }
  0x68   :  { %2149 = vlog2.f32 %v223_v61  ;;  %v2847_v58 = vmax.f32 %v283_v15, 0.0001  ;;  %v2850_v16 = vsub.f32 1.0, %v2776_v31  ;;  %v887_v22 = vmul.f32 %v2832_v52, %v2832_v52 }
  0x69   :  { %2151 = vlog2.f32 %v225_v43  ;;  %v246_v23 = vadd.f32 0.01, %v243_v4  ;;  %v2855_v30 = vsub.f32 1.0, %v2781_v48  ;;  %v2859_v49 = vadd.f32 %v698_v9, %v697_v26 }
  0x6a   :  { %2153 = vrsqrt.f32 %v276_v5  ;;  %4822 = vst [vmem:[#allocation26_spill] sm:$0xff] %v2850_v16  ;;  %v2866_v5 = vmul.f32 %v2850_v16, %v2694_v44  ;;  %v2869_v43 = vsub.f32 1.0, %v2787_v55  ;;  %v304_v4 = vmul.f32 0.5, %v2679_v37 }
  0x6b   :  { %2155 = vrsqrt.f32 %v297_v47  ;;  %4823 = vst [vmem:[#allocation27_spill] sm:$0xff] %v2855_v30  ;;  %v2874_v15 = vadd.f32 %v714_v18, %v713_v39  ;;  %v2880_v26 = vmul.f32 %v2855_v30, %v2696_v45  ;;  %v321_v9 = vstv %s320_s17 }
  0x6c   :  { %4824 = vst [vmem:[#allocation28_spill] sm:$0xff] %v2866_v5  ;;  %4825 = vst [vmem:[#allocation29_spill] sm:$0xff] %v2869_v43  ;;  %v2142_v47 = vpop.eup %2141  ;;  %v2883_v44 = vsub.f32 %v898_v40, %v2648_v20  ;;  %v2886_v61 = vsub.f32 %v900_v41, %v2658_v25  ;;  %v2889_v39 = vsub.f32 1.0, %v2847_v58  ;;  %v2893_v18 = vmul.f32 %v2869_v43, %v2738_v3 }
  0x6d   :  { %4826 = vst [vmem:[#allocation30_spill] sm:$0xff] %v2880_v26  ;;  %v2144_v37 = vpop.eup %2143  ;;  %v254_v28 = vmul.f32 %v2142_v47, %v244_v53  ;;  %v2897_v45 = vadd.f32 %v887_v22, %v886_v34  ;;  %v2900_v40 = vsub.f32 1.0, %v2766_v24  ;;  %v322_v41 = vadd.f32 %v321_v9, %v2760_v19 }
  0x6e   :  { %4827 = vst [vmem:[#allocation31_spill] sm:$0xff] %v2883_v44  ;;  %4828 = vst [vmem:[#allocation32_spill] sm:$0xff] %v2886_v61  ;;  %v2146_v33 = vpop.eup %2145  ;;  %v256_v52 = vmul.f32 %v2144_v37, %v245_v60  ;;  %v337_v12 = vstv %s336_s19  ;;  %v2905_v3 = vmax.f32 %v304_v4, 0.0001  ;;  %v902_v60 = vmul.f32 %v2883_v44, %v2883_v44  ;;  %s3978_s19 = sld [smem:[#allocation2 + $0x381]] }
  0x6f   :  { %4829 = vst [vmem:[#allocation33_spill] sm:$0xff] %v2889_v39  ;;  %4830 = vst [vmem:[#allocation34_spill] sm:$0xff] %v2893_v18  ;;  %v258_v47 = vmul.f32 %v2146_v33, %v246_v23  ;;  %2157 = vlog2.f32 %v254_v28  ;;  %v2908_v18 = vsub.f32 1.0, %v2789_v56  ;;  %v903_v19 = vmul.f32 %v2886_v61, %v2886_v61 }
  0x70   :  { %4831 = vst [vmem:[#allocation35_spill] sm:$0xff] %v2900_v40  ;;  %4832 = vst [vmem:[#allocation36_spill] sm:$0xff] %v2905_v3  ;;  %2159 = vlog2.f32 %v256_v52  ;;  %v338_v28 = vadd.f32 %v337_v12, %v2768_v27  ;;  %v512_v23 = vstv %s511_s21  ;;  %v4848_v55 = vstv %s2692_s26  ;;  %s3576_s26 = sld [smem:[#allocation2 + $0x201]] }
  0x71   :  { %v2148_v53 = vpop.eup %2147  ;;  %4833 = vst [vmem:[#allocation37_spill] sm:$0xff] %v2908_v18  ;;  %2161 = vlog2.f32 %v258_v47 }
  0x72   :  { %v2150_v34 = vpop.eup %2149  ;;  %v227_v22 = vmul.f32 0.6931472, %v2148_v53  ;;  %2163 = vrsqrt.f32 %v322_v41  ;;  %v528_v53 = vstv %s527_s22  ;;  %s1267_s22 = smul.f32 %s3597_s11, %s3597_s11 }
  0x73   :  { %v2152_v9 = vpop.eup %2151  ;;  %v229_v33 = vmul.f32 0.6931472, %v2150_v34  ;;  %2165 = vrsqrt.f32 %v338_v28  ;;  %v904_v28 = vadd.f32 %v903_v19, %v902_v60 }
  0x74   :  { %v2154_v4 = vpop.eup %2153  ;;  %v231_v52 = vmul.f32 0.6931472, %v2152_v9  ;;  %v232_v37 = vand.u32 2147483647, %v227_v22  ;;  %v2948_v9 = vmul.f32 %v2900_v40, %v2673_v35 }
  0x75   :  { %v2156_v61 = vpop.eup %2155  ;;  %v233_v44 = vand.u32 2147483647, %v229_v33  ;;  %v2922_v26 = vmul.f32 %v2154_v4, %v2583_v0  ;;  %v2925_v47 = vmul.f32 %v2154_v4, %v2585_v1  ;;  %v2928_v27 = vmul.f32 %v2154_v4, %v2587_v2 }
  0x76   :  { %v234_v12 = vand.u32 2147483647, %v231_v52  ;;  %v2933_v41 = vmul.f32 %v2156_v61, %v2601_v7  ;;  %v2936_v34 = vmul.f32 %v2156_v61, %v2603_v8  ;;  %v2939_v22 = vmul.f32 %v2156_v61, %v2611_v11  ;;  %4836 = vst [vmem:[#allocation40_spill] sm:$0xff] %v2948_v9 }
  0x77   :  { %4834 = vst [vmem:[#allocation38_spill] sm:$0xff] %v2922_v26  ;;  %4835 = vst [vmem:[#allocation39_spill] sm:$0xff] %v2925_v47  ;;  %v235_v0 = vadd.f32 %v233_v44, %v232_v37  ;;  %v513_v1 = vadd.f32 %v512_v23, %v2794_v59  ;;  %v701_v2 = vstv %s700_s1  ;;  %v2951_v7 = vsub.f32 1.0, %v2791_v57  ;;  %s3657_s1 = sld [smem:[#allocation2 + $0x282]] }
  0x78   :  { %v2954_v8 = vadd.f32 -1.0, %v2663_v29  ;;  %v529_v33 = vadd.f32 %v528_v53, %v2801_v13  ;;  %v717_v44 = vstv %s716_s7  ;;  %v2960_v59 = vmul.f32 %v2908_v18, %v2706_v50 }
  0x79   :  { %4837 = vst [vmem:[#allocation41_spill] sm:$0xff] %v2951_v7  ;;  %v236_v61 = vadd.f32 %v235_v0, %v234_v12  ;;  %v702_v35 = vadd.f32 %v701_v2, %v2859_v49  ;;  %v890_v23 = vstv %s889_s8  ;;  %v906_v4 = vstv %s905_s3  ;;  %v2158_v52 = vpop.eup %2157  ;;  %s3775_s8 = sld [smem:[#allocation8 + $0x200]] }
  0x7a   :  { %4838 = vst [vmem:[#allocation42_spill] sm:$0xff] %v2954_v8  ;;  %4839 = vst [vmem:[#allocation43_spill] sm:$0xff] %v2960_v59  ;;  %v2964_v37 = vsub.f32 1.0, %v2905_v3  ;;  %v2967_v11 = vadd.f32 -1.0, %v2753_v14  ;;  %2167 = vrsqrt.f32 %v513_v1  ;;  %v1071_v13 = vstv %s2914_s23  ;;  %v2160_v53 = vpop.eup %2159  ;;  %s3655_s23 = sld [smem:[#allocation2 + $0x281]]  ;;  %s3789_s3 = sld [smem:[#allocation6 + $0x300]] }
  0x7b   :  { %2018 = vst [vmem:[#allocation12 + $0x8] sm:$0xff] %v236_v61  ;;  %v260_v60 = vmul.f32 0.6931472, %v2158_v52  ;;  %v2972_v50 = vmul.f32 %v2951_v7, %v2708_v51  ;;  %v718_v49 = vadd.f32 %v717_v44, %v2874_v15  ;;  %v2162_v12 = vpop.eup %2161  ;;  %v262_v0 = vmul.f32 0.6931472, %v2160_v53 }
  0x7c   :  { %4840 = vst [vmem:[#allocation44_spill] sm:$0xff] %v2964_v37  ;;  %4841 = vst [vmem:[#allocation45_spill] sm:$0xff] %v2967_v11  ;;  %2169 = vrsqrt.f32 %v529_v33  ;;  %v2977_v2 = vadd.f32 %v890_v23, %v2897_v45  ;;  %v2979_v1 = vadd.f32 %v906_v4, %v904_v28  ;;  %v2164_v61 = vpop.eup %2163  ;;  %v264_v59 = vmul.f32 0.6931472, %v2162_v12 }
  0x7d   :  { %4842 = vst [vmem:[#allocation46_spill] sm:$0xff] %v2972_v50  ;;  %v265_v52 = vand.u32 2147483647, %v260_v60  ;;  %2171 = vrsqrt.f32 %v702_v35  ;;  %v2982_v51 = vsub.f32 %v1071_v13, %v2648_v20  ;;  %v266_v50 = vand.u32 2147483647, %v262_v0  ;;  %v2166_v28 = vpop.eup %2165  ;;  %s1283_s7 = smul.f32 %s3657_s1, %s3657_s1 }
  0x7e   :  { %v325_v15 = vmul.f32 %v2164_v61, %v2667_v32  ;;  %v326_v44 = vmul.f32 %v2164_v61, %v2682_v38  ;;  %v1073_v53 = vstv %s2943_s9  ;;  %v267_v33 = vand.u32 2147483647, %v264_v59  ;;  %s3795_s9 = sld [smem:[#allocation6 + $0x301]] }
  0x7f   :  { %4843 = vst [vmem:[#allocation47_spill] sm:$0xff] %v2982_v51  ;;  %v324_v19 = vmul.f32 %v2164_v61, %v2164_v61  ;;  %v4844_v45 = vstv %s2617_s14  ;;  %2173 = vrsqrt.f32 %v718_v49  ;;  %v268_v4 = vadd.f32 %v266_v50, %v265_v52  ;;  %s3485_s14 = sld [smem:[#allocation8 + $0x100]] }
  0x80   :  { %v328_v23 = vmul.f32 %v2164_v61, %v4844_v45  ;;  %v373_v60 = vmul.f32 %v325_v15, %v2922_v26  ;;  %v374_v35 = vmul.f32 %v326_v44, %v2925_v47  ;;  %v407_v20 = vmul.f32 %v325_v15, %v2933_v41 }
  0x81   :  { %v2993_v13 = vmul.f32 %v2166_v28, %v2687_v42  ;;  %v2996_v32 = vmul.f32 %v2166_v28, %v2699_v46  ;;  %v4845_v38 = vstv %s2615_s13  ;;  %v269_v49 = vadd.f32 %v268_v4, %v267_v33  ;;  %s3470_s13 = sld [smem:[#allocation6 + $0x202]] }
  0x82   :  { %v3000_v59 = vmul.f32 %v2166_v28, %v4845_v38  ;;  %v376_v12 = vmul.f32 %v328_v23, %v2928_v27  ;;  %v375_v0 = vadd.f32 %v374_v35, %v373_v60  ;;  %v408_v50 = vmul.f32 %v326_v44, %v2936_v34 }
  0x83   :  { %v410_v61 = vmul.f32 %v328_v23, %v2939_v22  ;;  %v3006_v52 = vadd.f32 %v2993_v13, %v325_v15  ;;  %v3009_v42 = vadd.f32 %v2996_v32, %v326_v44  ;;  %v379_v45 = vmul.f32 %v2993_v13, %v2922_v26  ;;  %2022 = vst [vmem:[#allocation12 + $0x18] sm:$0xff] %v269_v49 }
  0x84   :  { %v3012_v46 = vadd.f32 %v3000_v59, %v328_v23  ;;  %v3016_v28 = vpop.eup %2167  ;;  %v377_v33 = vadd.f32 %v376_v12, %v375_v0  ;;  %v380_v4 = vmul.f32 %v2996_v32, %v2925_v47  ;;  %v382_v60 = vmul.f32 %v3000_v59, %v2928_v27 }
  0x85   :  { %v409_v15 = vadd.f32 %v408_v50, %v407_v20  ;;  %v347_v44 = vmul.f32 %v3006_v52, %v3006_v52  ;;  %v348_v23 = vmul.f32 %v3009_v42, %v3009_v42  ;;  %v413_v38 = vmul.f32 %v2993_v13, %v2933_v41 }
  0x86   :  { %v350_v35 = vmul.f32 %v3012_v46, %v3012_v46  ;;  %v2170_v12 = vpop.eup %2169  ;;  %v378_v0 = vmax.f32 %v377_v33, 0.001  ;;  %v381_v51 = vadd.f32 %v380_v4, %v379_v45  ;;  %v414_v20 = vmul.f32 %v2996_v32, %v2936_v34 }
  0x87   :  { %v411_v9 = vadd.f32 %v410_v61, %v409_v15  ;;  %v3032_v49 = vpop.eup %2171  ;;  %v349_v50 = vadd.f32 %v348_v23, %v347_v44  ;;  %v416_v5 = vmul.f32 %v3000_v59, %v2939_v22  ;;  %v516_v14 = vmul.f32 %v3016_v28, %v2731_v62 }
  0x88   :  { %v3039_v29 = vsub.f32 %v1073_v53, %v2658_v25  ;;  %v383_v57 = vadd.f32 %v382_v60, %v381_v51  ;;  %v390_v45 = vmul.f32 %v378_v0, %v2889_v39  ;;  %v3042_v33 = vmul.f32 %v378_v0, %v324_v19 }
  0x89   :  { %v412_v61 = vmax.f32 %v411_v9, 0.001  ;;  %v3044_v4 = vpop.eup %2173  ;;  %v351_v15 = vadd.f32 %v350_v35, %v349_v50  ;;  %v415_v44 = vadd.f32 %v414_v20, %v413_v38  ;;  %v517_v23 = vmul.f32 %v3016_v28, %v2734_v63 }
  0x8a   :  { %4846 = vst [vmem:[#allocation48_spill] sm:$0xff] %v3039_v29  ;;  %4847 = vst [vmem:[#allocation49_spill] sm:$0xff] %v3042_v33  ;;  %v519_v62 = vmul.f32 %v3016_v28, %v4848_v55  ;;  %v384_v56 = vmax.f32 %v383_v57, 0.001  ;;  %v3052_v25 = vadd.f32 %v390_v45, %v2847_v58  ;;  %v3058_v0 = vmul.f32 %v2170_v12, %v2743_v6 }
  0x8b   :  { %v424_v51 = vmul.f32 %v412_v61, %v2964_v37  ;;  %v3055_v53 = vmul.f32 %v412_v61, %v324_v19  ;;  %v352_v9 = vadd.f32 1e-12, %v351_v15  ;;  %v417_v60 = vadd.f32 %v416_v5, %v415_v44 }
  0x8c   :  { %4849 = vst [vmem:[#allocation50_spill] sm:$0xff] %v3052_v25  ;;  %v3061_v35 = vmul.f32 %v2170_v12, %v2746_v10  ;;  %v392_v63 = vmul.f32 %v384_v56, %v2889_v39  ;;  %v4852_v57 = vstv %s2690_s25  ;;  %v564_v20 = vmul.f32 %v516_v14, %v2922_v26  ;;  %s3567_s25 = sld [smem:[#allocation2 + $0x200]] }
  0x8d   :  { %4850 = vst [vmem:[#allocation51_spill] sm:$0xff] %v3055_v53  ;;  %v3065_v55 = vadd.f32 %v424_v51, %v2905_v3  ;;  %v3069_v38 = vmul.f32 %v2170_v12, %v4852_v57  ;;  %2175 = vrsqrt.f32 %v352_v9  ;;  %v418_v19 = vmax.f32 %v417_v60, 0.001 }
  0x8e   :  { %v3073_v5 = vadd.f32 %v3058_v0, %v516_v14  ;;  %v3076_v6 = vadd.f32 %v3061_v35, %v517_v23  ;;  %v3079_v10 = vadd.f32 %v392_v63, %v2847_v58  ;;  %v565_v50 = vmul.f32 %v517_v23, %v2925_v47 }
  0x8f   :  { %4851 = vst [vmem:[#allocation52_spill] sm:$0xff] %v3065_v55  ;;  %v3082_v56 = vadd.f32 %v3069_v38, %v519_v62  ;;  %v567_v12 = vmul.f32 %v519_v62, %v2928_v27  ;;  %v426_v45 = vmul.f32 %v418_v19, %v2964_v37  ;;  %v570_v44 = vmul.f32 %v3058_v0, %v2922_v26 }
  0x90   :  { %4853 = vst [vmem:[#allocation53_spill] sm:$0xff] %v3079_v10  ;;  %v538_v61 = vmul.f32 %v3073_v5, %v3073_v5  ;;  %v539_v15 = vmul.f32 %v3076_v6, %v3076_v6  ;;  %v566_v9 = vadd.f32 %v565_v50, %v564_v20  ;;  %v571_v60 = vmul.f32 %v3061_v35, %v2925_v47 }
  0x91   :  { %v541_v51 = vmul.f32 %v3082_v56, %v3082_v56  ;;  %v573_v63 = vmul.f32 %v3069_v38, %v2928_v27  ;;  %v3100_v57 = vadd.f32 %v426_v45, %v2905_v3  ;;  %v597_v29 = vmul.f32 %v516_v14, %v2933_v41 }
  0x92   :  { %v540_v19 = vadd.f32 %v539_v15, %v538_v61  ;;  %v598_v53 = vmul.f32 %v517_v23, %v2936_v34  ;;  %v568_v33 = vadd.f32 %v567_v12, %v566_v9  ;;  %v572_v10 = vadd.f32 %v571_v60, %v570_v44 }
  0x93   :  { %v600_v55 = vmul.f32 %v519_v62, %v2939_v22  ;;  %v603_v20 = vmul.f32 %v3058_v0, %v2933_v41  ;;  %v604_v48 = vmul.f32 %v3061_v35, %v2936_v34  ;;  %v606_v45 = vmul.f32 %v3069_v38, %v2939_v22 }
  0x94   :  { %v542_v50 = vadd.f32 %v541_v51, %v540_v19  ;;  %v599_v25 = vadd.f32 %v598_v53, %v597_v29  ;;  %v515_v14 = vmul.f32 %v3016_v28, %v3016_v28  ;;  %v569_v23 = vmax.f32 %v568_v33, 0.001 }
  0x95   :  { %v574_v12 = vadd.f32 %v573_v63, %v572_v10  ;;  %v3115_v62 = vmul.f32 %v3032_v49, %v2808_v21  ;;  %v605_v44 = vadd.f32 %v604_v48, %v603_v20  ;;  %v3119_v29 = vmul.f32 %v3032_v49, %v2813_v17 }
  0x96   :  { %v543_v61 = vadd.f32 1e-12, %v542_v50  ;;  %v601_v15 = vadd.f32 %v600_v55, %v599_v25  ;;  %v580_v51 = vmul.f32 %v569_v23, %v2889_v39  ;;  %v3122_v9 = vmul.f32 %v569_v23, %v515_v14 }
  0x97   :  { %v575_v53 = vmax.f32 %v574_v12, 0.001  ;;  %v4855_v60 = vstv %s2774_s10  ;;  %v2176_v33 = vpop.eup %2175  ;;  %v607_v10 = vadd.f32 %v606_v45, %v605_v44  ;;  %v3131_v48 = vmul.f32 %v3044_v4, %v2819_v36  ;;  %s3595_s10 = sld [smem:[#allocation8 + $0x182]] }
  0x98   :  { %4854 = vst [vmem:[#allocation54_spill] sm:$0xff] %v3122_v9  ;;  %v3127_v28 = vmul.f32 %v3032_v49, %v4855_v60  ;;  %2177 = vrsqrt.f32 %v543_v61  ;;  %v602_v21 = vmax.f32 %v601_v15, 0.001  ;;  %v354_v17 = vmul.f32 %v2176_v33, %v3006_v52  ;;  %v4864_v9 = vld [vmem:[#allocation52_spill] sm:$0xff] }
  0x99   :  { %v355_v25 = vmul.f32 %v2176_v33, %v3009_v42  ;;  %v356_v55 = vmul.f32 %v2176_v33, %v3012_v46  ;;  %v3137_v63 = vadd.f32 %v580_v51, %v2847_v58  ;;  %v582_v19 = vmul.f32 %v575_v53, %v2889_v39 }
  0x9a   :  { %v608_v20 = vmax.f32 %v607_v10, 0.001  ;;  %v613_v50 = vmul.f32 %v602_v21, %v2964_v37  ;;  %v3141_v23 = vmul.f32 %v602_v21, %v515_v14  ;;  %v357_v45 = vmul.f32 %v354_v17, %v2993_v13 }
  0x9b   :  { %v358_v36 = vmul.f32 %v355_v25, %v2996_v32  ;;  %v360_v52 = vmul.f32 %v356_v55, %v3000_v59  ;;  %v367_v42 = vmul.f32 %v354_v17, %v2922_v26  ;;  %v368_v46 = vmul.f32 %v355_v25, %v2925_v47 }
  0x9c   :  { %4856 = vst [vmem:[#allocation55_spill] sm:$0xff] %v3141_v23  ;;  %v370_v12 = vmul.f32 %v356_v55, %v2928_v27  ;;  %v401_v61 = vmul.f32 %v354_v17, %v2933_v41  ;;  %v402_v15 = vmul.f32 %v355_v25, %v2936_v34  ;;  %v404_v14 = vmul.f32 %v356_v55, %v2939_v22 }
  0x9d   :  { %v359_v44 = vadd.f32 %v358_v36, %v357_v45  ;;  %v3153_v13 = vadd.f32 %v582_v19, %v2847_v58  ;;  %v3156_v32 = vadd.f32 %v613_v50, %v2905_v3  ;;  %v369_v59 = vadd.f32 %v368_v46, %v367_v42 }
  0x9e   :  { %v403_v53 = vadd.f32 %v402_v15, %v401_v61  ;;  %v615_v51 = vmul.f32 %v608_v20, %v2964_v37  ;;  %v3161_v60 = vmul.f32 %v3044_v4, %v2822_v54  ;;  %v4857_v21 = vstv %s2824_s2  ;;  %s3953_s2 = sld [smem:[#allocation8 + $0x301]] }
  0x9f   :  { %v361_v33 = vadd.f32 %v360_v52, %v359_v44  ;;  %v3166_v10 = vmul.f32 %v3044_v4, %v4857_v21  ;;  %v3170_v17 = vadd.f32 %v3131_v48, %v3115_v62  ;;  %2179 = vrsqrt.f32 %v2977_v2 }
  0xa0   :  { %v371_v25 = vadd.f32 %v370_v12, %v369_v59  ;;  %v405_v55 = vadd.f32 %v404_v14, %v403_v53  ;;  %v3174_v19 = vadd.f32 %v615_v51, %v2905_v3  ;;  %v3178_v54 = vadd.f32 %v3161_v60, %v3119_v29 }
  0xa1   :  { %v362_v20 = vmax.f32 %v361_v33, 0.001  ;;  %v3182_v4 = vadd.f32 %v3166_v10, %v3127_v28  ;;  %v727_v50 = vmul.f32 %v3170_v17, %v3170_v17  ;;  %2181 = vrsqrt.f32 %v2979_v1 }
  0xa2   :  { %4858 = vst [vmem:[#allocation56_spill] sm:$0xff] %v3174_v19  ;;  %v2178_v2 = vpop.eup %2177  ;;  %v372_v45 = vmax.f32 %v371_v25, 0.001  ;;  %v406_v36 = vmax.f32 %v405_v55, 0.001  ;;  %v3189_v52 = vmul.f32 %v3032_v49, %v3032_v49  ;;  %v728_v42 = vmul.f32 %v3178_v54, %v3178_v54 }
  0xa3   :  { %v363_v46 = vsub.f32 1.0, %v362_v20  ;;  %v545_v12 = vmul.f32 %v2178_v2, %v3073_v5  ;;  %v546_v61 = vmul.f32 %v2178_v2, %v3076_v6  ;;  %v547_v15 = vmul.f32 %v2178_v2, %v3082_v56 }
  0xa4   :  { %v385_v44 = vmul.f32 %v372_v45, %v372_v45  ;;  %v419_v14 = vmul.f32 %v406_v36, %v406_v36  ;;  %v729_v1 = vadd.f32 %v728_v42, %v727_v50  ;;  %v730_v59 = vmul.f32 %v3182_v4, %v3182_v4 }
  0xa5   :  { %v364_v53 = vmul.f32 %v363_v46, %v363_v46  ;;  %v548_v49 = vmul.f32 %v545_v12, %v3058_v0  ;;  %v549_v51 = vmul.f32 %v546_v61, %v3061_v35  ;;  %v551_v33 = vmul.f32 %v547_v15, %v3069_v38 }
  0xa6   :  { %v387_v21 = vmul.f32 %v2954_v8, %v385_v44  ;;  %v421_v5 = vmul.f32 %v2967_v11, %v419_v14  ;;  %v558_v6 = vmul.f32 %v545_v12, %v2922_v26  ;;  %v559_v56 = vmul.f32 %v546_v61, %v2925_v47 }
  0xa7   :  { %v365_v25 = vmul.f32 %v364_v53, %v364_v53  ;;  %v550_v55 = vadd.f32 %v549_v51, %v548_v49  ;;  %v561_v20 = vmul.f32 %v547_v15, %v2928_v27  ;;  %v591_v50 = vmul.f32 %v545_v12, %v2933_v41 }
  0xa8   :  { %v388_v2 = vadd.f32 1.0, %v387_v21  ;;  %v422_v0 = vadd.f32 1.0, %v421_v5  ;;  %v560_v45 = vadd.f32 %v559_v56, %v558_v6  ;;  %v592_v35 = vmul.f32 %v546_v61, %v2936_v34 }
  0xa9   :  { %v3208_v38 = vpop.eup %2179  ;;  %v366_v36 = vmul.f32 %v365_v25, %v363_v46  ;;  %v552_v42 = vadd.f32 %v551_v33, %v550_v55  ;;  %v594_v44 = vmul.f32 %v547_v15, %v2939_v22  ;;  %v753_v14 = vmul.f32 %v3115_v62, %v2922_v26 }
  0xaa   :  { %4859 = vst [vmem:[#allocation57_spill] sm:$0xff] %v3208_v38  ;;  %v389_v53 = vmax.f32 %v388_v2, 0.001  ;;  %v423_v49 = vmax.f32 %v422_v0, 0.001  ;;  %v562_v51 = vadd.f32 %v561_v20, %v560_v45  ;;  %v593_v3 = vadd.f32 %v592_v35, %v591_v50 }
  0xab   :  { %v3213_v37 = vpop.eup %2181  ;;  %v435_v12 = vmul.f32 %v366_v36, %v2850_v16  ;;  %v437_v21 = vmul.f32 %v366_v36, %v2900_v40  ;;  %v458_v61 = vmul.f32 %v366_v36, %v2855_v30  ;;  %v731_v5 = vadd.f32 %v730_v59, %v729_v1  ;;  %v4862_v59 = vld [vmem:[#allocation20_spill] sm:$0xff] }
  0xac   :  { %4860 = vst [vmem:[#allocation58_spill] sm:$0xff] %v3213_v37  ;;  %v394_v46 = vmul.f32 4.0, %v389_v53  ;;  %v428_v33 = vmul.f32 4.0, %v423_v49  ;;  %v754_v15 = vmul.f32 %v3119_v29, %v2925_v47  ;;  %v756_v6 = vmul.f32 %v3127_v28, %v2928_v27 }
  0xad   :  { %v3223_v56 = vadd.f32 %v435_v12, %v2776_v31  ;;  %v460_v25 = vmul.f32 %v366_v36, %v2908_v18  ;;  %v481_v55 = vmul.f32 %v366_v36, %v2869_v43  ;;  %v483_v20 = vmul.f32 %v366_v36, %v2951_v7  ;;  %v4863_v12 = vld [vmem:[#allocation50_spill] sm:$0xff] }
  0xae   :  { %v395_v50 = vmul.f32 %v394_v46, %v389_v53  ;;  %v429_v2 = vmul.f32 %v428_v33, %v423_v49  ;;  %v3229_v1 = vadd.f32 %v437_v21, %v2766_v24  ;;  %v3232_v0 = vadd.f32 %v458_v61, %v4862_v59  ;;  %v4865_v21 = vld [vmem:[#allocation53_spill] sm:$0xff] }
  0xaf   :  { %4861 = vst [vmem:[#allocation59_spill] sm:$0xff] %v3223_v56  ;;  %v553_v45 = vmax.f32 %v552_v42, 0.001  ;;  %v563_v35 = vmax.f32 %v562_v51, 0.001  ;;  %v595_v37 = vadd.f32 %v594_v44, %v593_v3  ;;  %v755_v56 = vadd.f32 %v754_v15, %v753_v14 }
  0xb0   :  { %v732_v38 = vadd.f32 1e-12, %v731_v5  ;;  %v396_v23 = vmul.f32 %v395_v50, %v4863_v12  ;;  %v430_v19 = vmul.f32 %v429_v2, %v4864_v9  ;;  %v759_v36 = vmul.f32 %v3131_v48, %v2922_v26  ;;  %v4867_v2 = vld [vmem:[#allocation22_spill] sm:$0xff] }
  0xb1   :  { %v554_v53 = vsub.f32 1.0, %v553_v45  ;;  %v576_v49 = vmul.f32 %v563_v35, %v563_v35  ;;  %v596_v46 = vmax.f32 %v595_v37, 0.001  ;;  %v757_v42 = vadd.f32 %v756_v6, %v755_v56 }
  0xb2   :  { %2183 = vrsqrt.f32 %v732_v38  ;;  %v397_v33 = vmul.f32 %v396_v23, %v4865_v21  ;;  %v431_v61 = vmul.f32 %v430_v19, %v3100_v57  ;;  %v760_v3 = vmul.f32 %v3161_v60, %v2925_v47 }
  0xb3   :  { %v555_v44 = vmul.f32 %v554_v53, %v554_v53  ;;  %v577_v51 = vmul.f32 %v2954_v8, %v576_v49  ;;  %v609_v9 = vmul.f32 %v596_v46, %v596_v46  ;;  %v762_v14 = vmul.f32 %v3166_v10, %v2928_v27  ;;  %v4869_v46 = vld [vmem:[#allocation23_spill] sm:$0xff] }
  0xb4   :  { %2185 = vrcp.f32 %v397_v33  ;;  %v758_v5 = vmax.f32 %v757_v42, 0.001  ;;  %v761_v15 = vadd.f32 %v760_v3, %v759_v36  ;;  %v786_v37 = vmul.f32 %v3115_v62, %v2933_v41  ;;  %v4868_v62 = vld [vmem:[#allocation21_spill] sm:$0xff] }
  0xb5   :  { %2187 = vrcp.f32 %v431_v61  ;;  %v556_v23 = vmul.f32 %v555_v44, %v555_v44  ;;  %v578_v57 = vadd.f32 1.0, %v577_v51  ;;  %v610_v19 = vmul.f32 %v2967_v11, %v609_v9 }
  0xb6   :  { %v763_v38 = vadd.f32 %v762_v14, %v761_v15  ;;  %v769_v6 = vmul.f32 %v758_v5, %v2889_v39  ;;  %v3250_v56 = vmul.f32 %v758_v5, %v3189_v52  ;;  %v787_v50 = vmul.f32 %v3119_v29, %v2936_v34 }
  0xb7   :  { %v461_v45 = vadd.f32 %v460_v25, %v4867_v2  ;;  %v557_v35 = vmul.f32 %v556_v23, %v554_v53  ;;  %v579_v12 = vmax.f32 %v578_v57, 0.001  ;;  %v611_v36 = vadd.f32 1.0, %v610_v19 }
  0xb8   :  { %4866 = vst [vmem:[#allocation20_spill] sm:$0xff] %v3250_v56  ;;  %v482_v49 = vadd.f32 %v481_v55, %v4868_v62  ;;  %v484_v21 = vadd.f32 %v483_v20, %v4869_v46  ;;  %v3258_v33 = vadd.f32 %v769_v6, %v2847_v58  ;;  %v788_v61 = vadd.f32 %v787_v50, %v786_v37  ;;  %v4877_v56 = vld [vmem:[#allocation40_spill] sm:$0xff] }
  0xb9   :  { %v584_v42 = vmul.f32 4.0, %v579_v12  ;;  %v612_v3 = vmax.f32 %v611_v36, 0.001  ;;  %v624_v44 = vmul.f32 %v557_v35, %v2850_v16  ;;  %v626_v51 = vmul.f32 %v557_v35, %v2900_v40  ;;  %v4870_v36 = vld [vmem:[#allocation18_spill] sm:$0xff] }
  0xba   :  { %v647_v29 = vmul.f32 %v557_v35, %v2855_v30  ;;  %v649_v25 = vmul.f32 %v557_v35, %v2908_v18  ;;  %v764_v53 = vmax.f32 %v763_v38, 0.001  ;;  %v789_v55 = vmul.f32 %v3127_v28, %v2939_v22 }
  0xbb   :  { %v585_v20 = vmul.f32 %v584_v42, %v579_v12  ;;  %v617_v14 = vmul.f32 4.0, %v612_v3  ;;  %v670_v5 = vmul.f32 %v557_v35, %v2869_v43  ;;  %v3269_v15 = vmul.f32 %v3131_v48, %v2933_v41 }
  0xbc   :  { %v2184_v9 = vpop.eup %2183  ;;  %v3272_v37 = vadd.f32 %v624_v44, %v2776_v31  ;;  %v3275_v23 = vadd.f32 %v626_v51, %v2766_v24  ;;  %v3278_v57 = vadd.f32 %v647_v29, %v4862_v59  ;;  %v672_v28 = vmul.f32 %v557_v35, %v2951_v7  ;;  %v4872_v29 = vld [vmem:[#allocation59_spill] sm:$0xff] }
  0xbd   :  { %v586_v19 = vmul.f32 %v585_v20, %v3137_v63  ;;  %v618_v38 = vmul.f32 %v617_v14, %v612_v3  ;;  %v3283_v6 = vadd.f32 %v649_v25, %v4867_v2  ;;  %v3286_v50 = vmul.f32 %v2184_v9, %v3170_v17  ;;  %v4874_v14 = vld [vmem:[#allocation28_spill] sm:$0xff] }
  0xbe   :  { %v2186_v12 = vpop.eup %2185  ;;  %v3289_v31 = vmul.f32 %v2184_v9, %v3178_v54  ;;  %v3292_v24 = vmul.f32 %v2184_v9, %v3182_v4  ;;  %v3295_v59 = vmul.f32 %v764_v53, %v2889_v39  ;;  %v3297_v35 = vadd.f32 %v789_v55, %v788_v61  ;;  %v4871_v54 = vld [vmem:[#allocation19_spill] sm:$0xff]  ;;  %v4873_v9 = vld [vmem:[#allocation56_spill] sm:$0xff] }
  0xbf   :  { %v2188_v63 = vpop.eup %2187  ;;  %v399_v42 = vmul.f32 %v2186_v12, %v4870_v36  ;;  %v587_v2 = vmul.f32 %v586_v19, %v3153_v13  ;;  %v619_v17 = vmul.f32 %v618_v38, %v3156_v32  ;;  %v737_v3 = vmul.f32 %v3286_v50, %v3131_v48  ;;  %v4875_v38 = vld [vmem:[#allocation30_spill] sm:$0xff] }
  0xc0   :  { %v433_v44 = vmul.f32 %v2188_v63, %v4871_v54  ;;  %v738_v4 = vmul.f32 %v3289_v31, %v3161_v60  ;;  %v740_v51 = vmul.f32 %v3292_v24, %v3166_v10  ;;  %v747_v61 = vmul.f32 %v3286_v50, %v2922_v26  ;;  %v4876_v63 = vld [vmem:[#allocation34_spill] sm:$0xff] }
  0xc1   :  { %v439_v25 = vmul.f32 %v4872_v29, %v399_v42  ;;  %v462_v13 = vmul.f32 %v3232_v0, %v399_v42  ;;  %v485_v53 = vmul.f32 %v482_v49, %v399_v42  ;;  %2189 = vrcp.f32 %v587_v2  ;;  %v4878_v49 = vld [vmem:[#allocation43_spill] sm:$0xff] }
  0xc2   :  { %v442_v32 = vmul.f32 %v3229_v1, %v433_v44  ;;  %v465_v48 = vmul.f32 %v461_v45, %v433_v44  ;;  %v488_v55 = vmul.f32 %v484_v21, %v433_v44  ;;  %v620_v20 = vmul.f32 %v619_v17, %v4873_v9  ;;  %v4879_v1 = vld [vmem:[#allocation46_spill] sm:$0xff]  ;;  %v4880_v21 = vld [vmem:[#allocation49_spill] sm:$0xff] }
  0xc3   :  { %v440_v19 = vadd.f32 %v439_v25, %v4874_v14  ;;  %v463_v12 = vadd.f32 %v462_v13, %v4875_v38  ;;  %v486_v39 = vadd.f32 %v485_v53, %v4876_v63  ;;  %v739_v29 = vadd.f32 %v738_v4, %v737_v3  ;;  %v4881_v13 = vld [vmem:[#allocation51_spill] sm:$0xff] }
  0xc4   :  { %v443_v0 = vadd.f32 %v442_v32, %v4877_v56  ;;  %v466_v42 = vadd.f32 %v465_v48, %v4878_v49  ;;  %v489_v45 = vadd.f32 %v488_v55, %v4879_v1  ;;  %2191 = vrcp.f32 %v620_v20 }
  0xc5   :  { %v441_v2 = vmul.f32 %v440_v19, %v4880_v21  ;;  %v464_v17 = vmul.f32 %v463_v12, %v4880_v21  ;;  %v487_v44 = vmul.f32 %v486_v39, %v4880_v21  ;;  %v741_v25 = vadd.f32 %v740_v51, %v739_v29 }
  0xc6   :  { %v444_v53 = vmul.f32 %v443_v0, %v4881_v13  ;;  %v467_v3 = vmul.f32 %v466_v42, %v4881_v13  ;;  %v490_v4 = vmul.f32 %v489_v45, %v4881_v13  ;;  %v748_v32 = vmul.f32 %v3289_v31, %v2925_v47 }
  0xc7   :  { %v4882_v48 = vstv %s2625_s15  ;;  %v4883_v9 = vstv %s2627_s16  ;;  %v4884_v26 = vstv %s2671_s24  ;;  %v742_v7 = vmax.f32 %v741_v25, 0.001  ;;  %s3491_s15 = sld [smem:[#allocation8 + $0x101]]  ;;  %s3498_s16 = sld [smem:[#allocation8 + $0x102]] }
  0xc8   :  { %v446_v55 = vmul.f32 %v4882_v48, %v441_v2  ;;  %v469_v20 = vmul.f32 %v4883_v9, %v464_v17  ;;  %v492_v19 = vmul.f32 %v4884_v26, %v487_v44  ;;  %v4885_v12 = vmov %v4882_v48  ;;  %s1078_s24 = smul.f32 %s3470_s13, %s3470_s13 }
  0xc9   :  { %v449_v18 = vmul.f32 %v4885_v12, %v444_v53  ;;  %v4886_v39 = vmov %v4883_v9  ;;  %v4887_v29 = vmov %v4884_v26  ;;  %v749_v21 = vadd.f32 %v748_v32, %v747_v61 }
  0xca   :  { %v472_v51 = vmul.f32 %v4886_v39, %v467_v3  ;;  %v495_v0 = vmul.f32 %v4887_v29, %v490_v4  ;;  %v447_v42 = vmax.f32 %v446_v55, 0.0  ;;  %v671_v45 = vadd.f32 %v670_v5, %v4868_v62 }
  0xcb   :  { %v673_v13 = vadd.f32 %v672_v28, %v4869_v46  ;;  %v743_v47 = vsub.f32 1.0, %v742_v7  ;;  %v450_v40 = vmax.f32 %v449_v18, 0.0  ;;  %v750_v26 = vmul.f32 %v3292_v24, %v2928_v27  ;;  %v2190_v17 = vpop.eup %2189 }
  0xcc   :  { %v473_v2 = vmax.f32 %v472_v51, 0.0  ;;  %v496_v48 = vmax.f32 %v495_v0, 0.0  ;;  %v470_v44 = vmax.f32 %v469_v20, 0.0  ;;  %v493_v25 = vmax.f32 %v492_v19, 0.0  ;;  %v4888_v0 = vld [vmem:[#allocation54_spill] sm:$0xff] }
  0xcd   :  { %v744_v53 = vmul.f32 %v743_v47, %v743_v47  ;;  %v3347_v3 = vmul.f32 %v3161_v60, %v2936_v34  ;;  %v451_v61 = vadd.f32 0.1, %v450_v40  ;;  %v589_v46 = vmul.f32 %v2190_v17, %v4870_v36 }
  0xce   :  { %v474_v4 = vadd.f32 0.1, %v473_v2  ;;  %v497_v62 = vadd.f32 0.1, %v496_v48  ;;  %v448_v7 = vadd.f32 0.1, %v447_v42  ;;  %v751_v5 = vadd.f32 %v750_v26, %v749_v21  ;;  %v2192_v32 = vpop.eup %2191 }
  0xcf   :  { %v745_v18 = vmul.f32 %v744_v53, %v744_v53  ;;  %v3352_v28 = vadd.f32 %v3295_v59, %v2847_v58  ;;  %2193 = vrcp.f32 %v451_v61  ;;  %v628_v55 = vmul.f32 %v3272_v37, %v589_v46 }
  0xd0   :  { %v651_v9 = vmul.f32 %v3278_v57, %v589_v46  ;;  %v674_v60 = vmul.f32 %v671_v45, %v589_v46  ;;  %2195 = vrcp.f32 %v474_v4  ;;  %v622_v40 = vmul.f32 %v2192_v32, %v4871_v54  ;;  %v4892_v46 = vld [vmem:[#allocation55_spill] sm:$0xff] }
  0xd1   :  { %v752_v20 = vmax.f32 %v751_v5, 0.001  ;;  %v780_v19 = vmul.f32 %v3286_v50, %v2933_v41  ;;  %2197 = vrcp.f32 %v497_v62  ;;  %v629_v12 = vadd.f32 %v628_v55, %v4874_v14 }
  0xd2   :  { %v652_v59 = vadd.f32 %v651_v9, %v4875_v38  ;;  %v675_v37 = vadd.f32 %v674_v60, %v4876_v63  ;;  %v631_v57 = vmul.f32 %v3275_v23, %v622_v40  ;;  %v654_v39 = vmul.f32 %v3283_v6, %v622_v40 }
  0xd3   :  { %v677_v51 = vmul.f32 %v673_v13, %v622_v40  ;;  %v765_v29 = vmul.f32 %v752_v20, %v752_v20  ;;  %v630_v21 = vmul.f32 %v629_v12, %v4888_v0  ;;  %v781_v45 = vmul.f32 %v3289_v31, %v2936_v34 }
  0xd4   :  { %v653_v50 = vmul.f32 %v652_v59, %v4888_v0  ;;  %v676_v42 = vmul.f32 %v675_v37, %v4888_v0  ;;  %v632_v2 = vadd.f32 %v631_v57, %v4877_v56  ;;  %v655_v48 = vadd.f32 %v654_v39, %v4878_v49 }
  0xd5   :  { %v678_v23 = vadd.f32 %v677_v51, %v4879_v1  ;;  %v766_v6 = vmul.f32 %v2954_v8, %v765_v29  ;;  %v4889_v13 = vstv %s2704_s27  ;;  %v4890_v17 = vstv %s2715_s28  ;;  %s3584_s27 = sld [smem:[#allocation8 + $0x180]]  ;;  %s3586_s28 = sld [smem:[#allocation2 + $0x202]] }
  0xd6   :  { %v635_v26 = vmul.f32 %v4889_v13, %v630_v21  ;;  %v658_v53 = vmul.f32 %v4890_v17, %v653_v50  ;;  %v4891_v61 = vstv %s2724_s0  ;;  %v782_v62 = vadd.f32 %v781_v45, %v780_v19  ;;  %s3591_s0 = sld [smem:[#allocation8 + $0x181]] }
  0xd7   :  { %v681_v4 = vmul.f32 %v4891_v61, %v676_v42  ;;  %v633_v31 = vmul.f32 %v632_v2, %v4892_v46  ;;  %v656_v5 = vmul.f32 %v655_v48, %v4892_v46  ;;  %v679_v32 = vmul.f32 %v678_v23, %v4892_v46  ;;  %v4896_v46 = vld [vmem:[#allocation44_spill] sm:$0xff] }
  0xd8   :  { %v767_v55 = vadd.f32 1.0, %v766_v6  ;;  %v471_v9 = vadd.f32 0.1, %v470_v44  ;;  %v494_v60 = vadd.f32 0.1, %v493_v25  ;;  %v3382_v40 = vmul.f32 %v745_v18, %v743_v47 }
  0xd9   :  { %v783_v20 = vmul.f32 %v3292_v24, %v2939_v22  ;;  %v4893_v12 = vmov %v4889_v13  ;;  %v4894_v37 = vmov %v4890_v17  ;;  %v4895_v39 = vmov %v4891_v61  ;;  %v2194_v29 = vpop.eup %2193 }
  0xda   :  { %v638_v59 = vmul.f32 %v4893_v12, %v633_v31  ;;  %v661_v57 = vmul.f32 %v4894_v37, %v656_v5  ;;  %v684_v19 = vmul.f32 %v4895_v39, %v679_v32  ;;  %v768_v51 = vmax.f32 %v767_v55, 0.001  ;;  %v2196_v45 = vpop.eup %2195 }
  0xdb   :  { %v636_v0 = vmax.f32 %v635_v26, 0.0  ;;  %v659_v21 = vmax.f32 %v658_v53, 0.0  ;;  %v682_v50 = vmax.f32 %v681_v4, 0.0  ;;  %v784_v42 = vadd.f32 %v783_v20, %v782_v62  ;;  %v2198_v2 = vpop.eup %2197  ;;  %s1094_s21 = smul.f32 %s3586_s28, %s3586_s28 }
  0xdc   :  { %v453_v44 = vmul.f32 %v2194_v29, %v448_v7  ;;  %v639_v25 = vmax.f32 %v638_v59, 0.0  ;;  %v662_v47 = vmax.f32 %v661_v57, 0.0  ;;  %v685_v18 = vmax.f32 %v684_v19, 0.0 }
  0xdd   :  { %v476_v48 = vmul.f32 %v2196_v45, %v471_v9  ;;  %v773_v24 = vmul.f32 4.0, %v768_v51  ;;  %v785_v23 = vmax.f32 %v784_v42, 0.001  ;;  %v791_v6 = vmax.f32 %v3297_v35, 0.001  ;;  %v3420_v42 = vld [vmem:[#allocation9 + $0x38] sm:$0xff] }
  0xde   :  { %2199 = vlog2.f32 %v453_v44  ;;  %v499_v13 = vmul.f32 %v2198_v2, %v494_v60  ;;  %v640_v17 = vadd.f32 0.1, %v639_v25  ;;  %v663_v61 = vadd.f32 0.1, %v662_v47  ;;  %v4898_v60 = vld [vmem:[#allocation47_spill] sm:$0xff]  ;;  %v3427_v25 = vld [vmem:[#allocation9 + $0x40] sm:$0xff] }
  0xdf   :  { %2201 = vlog2.f32 %v476_v48  ;;  %v686_v26 = vadd.f32 0.1, %v685_v18  ;;  %v774_v53 = vmul.f32 %v773_v24, %v768_v51  ;;  %v794_v4 = vadd.f32 %v3347_v3, %v3269_v15  ;;  %v4897_v3 = vld [vmem:[#allocation36_spill] sm:$0xff]  ;;  %v4900_v44 = vld [vmem:[#allocation35_spill] sm:$0xff]  ;;  %4901 = vst [vmem:[#allocation50_spill] sm:$0xff] %v3427_v25  ;;  %v3434_v18 = vld [vmem:[#allocation9 + $0x48] sm:$0xff] }
  0xe0   :  { %2203 = vlog2.f32 %v499_v13  ;;  %v795_v7 = vmul.f32 %v3166_v10, %v2939_v22  ;;  %v798_v62 = vmul.f32 %v785_v23, %v785_v23  ;;  %v802_v31 = vmul.f32 %v791_v6, %v4896_v46  ;;  %4903 = vst [vmem:[#allocation52_spill] sm:$0xff] %v3434_v18  ;;  %v4904_v48 = vld [vmem:[#allocation41_spill] sm:$0xff] }
  0xe1   :  { %2205 = vrcp.f32 %v640_v17  ;;  %v775_v35 = vmul.f32 %v774_v53, %v3258_v33  ;;  %v3400_v5 = vmul.f32 %v791_v6, %v3189_v52  ;;  %v813_v32 = vmul.f32 %v3382_v40, %v2850_v16  ;;  %v4899_v33 = vld [vmem:[#allocation48_spill] sm:$0xff]  ;;  %v4907_v53 = vld [vmem:[#allocation25_spill] sm:$0xff] }
  0xe2   :  { %2207 = vrcp.f32 %v663_v61  ;;  %v796_v55 = vadd.f32 %v795_v7, %v794_v4  ;;  %v799_v15 = vmul.f32 %v2967_v11, %v798_v62  ;;  %v803_v9 = vadd.f32 %v802_v31, %v4897_v3  ;;  %v4905_v17 = vld [vmem:[#allocation24_spill] sm:$0xff]  ;;  %v4906_v61 = vld [vmem:[#allocation57_spill] sm:$0xff] }
  0xe3   :  { %2209 = vrcp.f32 %v686_v26  ;;  %v776_v10 = vmul.f32 %v775_v35, %v3352_v28  ;;  %v3409_v20 = vmul.f32 %v4898_v60, %v4898_v60  ;;  %v3413_v52 = vmul.f32 %v4899_v33, %v4899_v33 }
  0xe4   :  { %v637_v12 = vadd.f32 0.1, %v636_v0  ;;  %v797_v59 = vmax.f32 %v796_v55, 0.001  ;;  %v800_v37 = vadd.f32 1.0, %v799_v15  ;;  %v836_v57 = vmul.f32 %v3382_v40, %v2855_v30  ;;  %v4910_v55 = vld [vmem:[#allocation58_spill] sm:$0xff] }
  0xe5   :  { %v660_v39 = vadd.f32 0.1, %v659_v21  ;;  %v683_v19 = vadd.f32 0.1, %v682_v50  ;;  %2211 = vrcp.f32 %v776_v10  ;;  %v859_v28 = vmul.f32 %v3382_v40, %v2869_v43  ;;  %v4902_v50 = vld [vmem:[#allocation37_spill] sm:$0xff] }
  0xe6   :  { %v801_v51 = vmax.f32 %v800_v37, 0.001  ;;  %v804_v29 = vmul.f32 %v797_v59, %v4896_v46  ;;  %v814_v45 = vadd.f32 %v3420_v42, %v813_v32  ;;  %v3425_v0 = vmul.f32 %v3382_v40, %v4900_v44  ;;  %v4909_v32 = vld [vmem:[#allocation31_spill] sm:$0xff] }
  0xe7   :  { %v837_v21 = vadd.f32 %v3427_v25, %v836_v57  ;;  %v3432_v47 = vmul.f32 %v3382_v40, %v4902_v50  ;;  %v860_v2 = vadd.f32 %v3434_v18, %v859_v28  ;;  %v3439_v24 = vmul.f32 %v3382_v40, %v4904_v48  ;;  %v4911_v57 = vld [vmem:[#allocation32_spill] sm:$0xff] }
  0xe8   :  { %v2200_v23 = vpop.eup %2199  ;;  %v805_v6 = vadd.f32 %v804_v29, %v4897_v3  ;;  %v806_v13 = vmul.f32 4.0, %v801_v51  ;;  %v894_v26 = vmul.f32 %v4906_v61, %v4905_v17  ;;  %v895_v4 = vmul.f32 %v4906_v61, %v4907_v53 }
  0xe9   :  { %v2202_v7 = vpop.eup %2201  ;;  %v455_v62 = vmul.f32 0.6931472, %v2200_v23  ;;  %v3448_v31 = vmul.f32 %v4906_v61, %v4906_v61  ;;  %v4908_v35 = vstv %s2862_s18  ;;  %v3455_v15 = vmul.f32 %v4910_v55, %v4909_v32  ;;  %s3976_s18 = sld [smem:[#allocation2 + $0x380]] }
  0xea   :  { %v897_v40 = vmul.f32 %v4906_v61, %v4908_v35  ;;  %v2204_v10 = vpop.eup %2203  ;;  %v478_v59 = vmul.f32 0.6931472, %v2202_v7  ;;  %v807_v37 = vmul.f32 %v806_v13, %v801_v51  ;;  %v3459_v28 = vmul.f32 %v4910_v55, %v4911_v57  ;;  %v4913_v35 = vld [vmem:[#allocation38_spill] sm:$0xff] }
  0xeb   :  { %v4912_v29 = vstv %s2876_s20  ;;  %v2206_v17 = vpop.eup %2205  ;;  %v456_v53 = vand.u32 2147483647, %v455_v62  ;;  %v501_v18 = vmul.f32 0.6931472, %v2204_v10  ;;  %v3467_v61 = vadd.f32 %v3455_v15, %v894_v26  ;;  %s3628_s20 = sld [smem:[#allocation2 + $0x280]] }
  0xec   :  { %v3464_v23 = vmul.f32 %v4910_v55, %v4912_v29  ;;  %v942_v32 = vmul.f32 %v894_v26, %v4913_v35  ;;  %v2208_v25 = vpop.eup %2207  ;;  %v479_v51 = vand.u32 2147483647, %v478_v59  ;;  %v642_v13 = vmul.f32 %v2206_v17, %v637_v12 }
  0xed   :  { %v808_v7 = vmul.f32 %v807_v37, %v803_v9  ;;  %v3473_v57 = vadd.f32 %v3459_v28, %v895_v4  ;;  %v2210_v48 = vpop.eup %2209  ;;  %v502_v55 = vand.u32 2147483647, %v501_v18  ;;  %v665_v29 = vmul.f32 %v2208_v25, %v660_v39  ;;  %v4914_v18 = vld [vmem:[#allocation39_spill] sm:$0xff] }
  0xee   :  { %v3476_v62 = vadd.f32 %v3464_v23, %v897_v40  ;;  %v916_v10 = vmul.f32 %v3467_v61, %v3467_v61  ;;  %v480_v43 = vadd.f32 %v479_v51, %v456_v53  ;;  %2213 = vlog2.f32 %v642_v13 }
  0xef   :  { %v688_v33 = vmul.f32 %v2210_v48, %v683_v19  ;;  %v809_v60 = vmul.f32 %v808_v7, %v805_v6  ;;  %v2212_v50 = vpop.eup %2211  ;;  %2215 = vlog2.f32 %v665_v29  ;;  %v917_v9 = vmul.f32 %v3473_v57, %v3473_v57 }
  0xf0   :  { %v919_v12 = vmul.f32 %v3476_v62, %v3476_v62  ;;  %v943_v39 = vmul.f32 %v895_v4, %v4914_v18  ;;  %v503_v25 = vadd.f32 %v502_v55, %v480_v43  ;;  %v778_v59 = vmul.f32 %v2212_v50, %v4870_v36 }
  0xf1   :  { %2217 = vlog2.f32 %v688_v33  ;;  %v945_v37 = vmul.f32 %v897_v40, %v2928_v27  ;;  %v918_v19 = vadd.f32 %v917_v9, %v916_v10  ;;  %v948_v6 = vmul.f32 %v3455_v15, %v4913_v35  ;;  %v4915_v9 = vld [vmem:[#allocation20_spill] sm:$0xff] }
  0xf2   :  { %2219 = vrcp.f32 %v809_v60  ;;  %v944_v48 = vadd.f32 %v943_v39, %v942_v32  ;;  %v817_v17 = vmul.f32 %v814_v45, %v778_v59  ;;  %v840_v53 = vmul.f32 %v837_v21, %v778_v59 }
  0xf3   :  { %v863_v51 = vmul.f32 %v860_v2, %v778_v59  ;;  %v949_v43 = vmul.f32 %v3459_v28, %v4914_v18  ;;  %v920_v33 = vadd.f32 %v919_v12, %v918_v19  ;;  %v951_v50 = vmul.f32 %v3464_v23, %v2928_v27 }
  0xf4   :  { %v946_v13 = vadd.f32 %v945_v37, %v944_v48  ;;  %v975_v60 = vmul.f32 %v894_v26, %v2933_v41  ;;  %v818_v32 = vadd.f32 %v817_v17, %v4874_v14  ;;  %v841_v7 = vadd.f32 %v840_v53, %v4875_v38  ;;  %v4916_v37 = vld [vmem:[#allocation33_spill] sm:$0xff] }
  0xf5   :  { %v864_v45 = vadd.f32 %v863_v51, %v4876_v63  ;;  %v950_v21 = vadd.f32 %v949_v43, %v948_v6  ;;  %v921_v2 = vadd.f32 1e-12, %v920_v33  ;;  %v976_v29 = vmul.f32 %v895_v4, %v2936_v34 }
  0xf6   :  { %v947_v55 = vmax.f32 %v946_v13, 0.001  ;;  %v978_v10 = vmul.f32 %v897_v40, %v2939_v22  ;;  %v819_v26 = vmul.f32 %v818_v32, %v4915_v9  ;;  %v842_v12 = vmul.f32 %v841_v7, %v4915_v9  ;;  %v3521_v13 = vld [vmem:[#allocation10 + $0x38] sm:$0xff] }
  0xf7   :  { %v865_v39 = vmul.f32 %v864_v45, %v4915_v9  ;;  %v952_v59 = vadd.f32 %v951_v50, %v950_v21  ;;  %2221 = vrsqrt.f32 %v921_v2  ;;  %v977_v6 = vadd.f32 %v976_v29, %v975_v60  ;;  %4918 = vst [vmem:[#allocation22_spill] sm:$0xff] %v3521_v13  ;;  %v3528_v21 = vld [vmem:[#allocation10 + $0x40] sm:$0xff]  ;;  %v3533_v2 = vld [vmem:[#allocation10 + $0x48] sm:$0xff] }
  0xf8   :  { %v958_v19 = vmul.f32 %v947_v55, %v4916_v37  ;;  %v3512_v48 = vmul.f32 %v947_v55, %v3448_v31  ;;  %v2214_v17 = vpop.eup %2213  ;;  %v823_v53 = vstv %s3485_s14  ;;  %v3517_v40 = vadd.f32 %v3413_v52, %v3409_v20  ;;  %s3852_s14 = sld [smem:[#allocation8 + $0x201]] }
  0xf9   :  { %v953_v4 = vmax.f32 %v952_v59, 0.001  ;;  %v3519_v51 = vstv %s1078_s24  ;;  %v2216_v43 = vpop.eup %2215  ;;  %v644_v33 = vmul.f32 0.6931472, %v2214_v17  ;;  %v816_v50 = vadd.f32 %v3521_v13, %v3425_v0 }
  0xfa   :  { %4917 = vst [vmem:[#allocation53_spill] sm:$0xff] %v3512_v48  ;;  %v3526_v32 = vadd.f32 %v958_v19, %v2847_v58  ;;  %v979_v60 = vadd.f32 %v978_v10, %v977_v6  ;;  %v667_v45 = vmul.f32 0.6931472, %v2216_v43  ;;  %v839_v20 = vadd.f32 %v3528_v21, %v3432_v47 }
  0xfb   :  { %v2218_v7 = vpop.eup %2217  ;;  %v846_v52 = vstv %s3491_s15  ;;  %v862_v55 = vadd.f32 %v3533_v2, %v3439_v24  ;;  %v645_v0 = vand.u32 2147483647, %v644_v33  ;;  %v960_v59 = vmul.f32 %v953_v4, %v4916_v37  ;;  %s3854_s15 = sld [smem:[#allocation8 + $0x202]] }
  0xfc   :  { %v2220_v29 = vpop.eup %2219  ;;  %v690_v9 = vmul.f32 0.6931472, %v2218_v7  ;;  %v980_v19 = vmax.f32 %v979_v60, 0.001  ;;  %v668_v10 = vand.u32 2147483647, %v667_v45  ;;  %v869_v17 = vstv %s3498_s16 }
  0xfd   :  { %v811_v6 = vmul.f32 %v2220_v29, %v4871_v54  ;;  %v981_v43 = vmul.f32 %v3455_v15, %v2933_v41  ;;  %v646_v47 = vadd.f32 %v645_v0, %v503_v25  ;;  %v3542_v63 = vmul.f32 %v823_v53, %v819_v26  ;;  %s3856_s16 = sld [smem:[#allocation8 + $0x280]] }
  0xfe   :  { %v691_v48 = vand.u32 2147483647, %v690_v9  ;;  %v3545_v38 = vadd.f32 %v960_v59, %v2847_v58  ;;  %v982_v4 = vmul.f32 %v3459_v28, %v2936_v34  ;;  %v984_v45 = vmul.f32 %v3464_v23, %v2939_v22 }
  0xff   :  { %v820_v24 = vmul.f32 %v816_v50, %v811_v6  ;;  %v843_v33 = vmul.f32 %v839_v20, %v811_v6  ;;  %v866_v7 = vmul.f32 %v862_v55, %v811_v6  ;;  %v669_v60 = vadd.f32 %v668_v10, %v646_v47 }
 0x100   :  { %v991_v29 = vmul.f32 %v980_v19, %v4896_v46  ;;  %v3553_v25 = vmul.f32 %v980_v19, %v3448_v31  ;;  %v983_v20 = vadd.f32 %v982_v4, %v981_v43  ;;  %v3560_v59 = vmul.f32 %v846_v52, %v842_v12 }
 0x101   :  { %v821_v26 = vadd.f32 %v820_v24, %v4877_v56  ;;  %v844_v0 = vadd.f32 %v843_v33, %v4878_v49  ;;  %v867_v50 = vadd.f32 %v866_v7, %v4879_v1  ;;  %v2222_v55 = vpop.eup %2221  ;;  %v3558_v9 = vadd.f32 %v691_v48, %v669_v60 }
 0x102   :  { %v3562_v10 = vmul.f32 %v869_v17, %v865_v39  ;;  %v3565_v6 = vadd.f32 %v991_v29, %v4897_v3  ;;  %v923_v43 = vmul.f32 %v2222_v55, %v3467_v61  ;;  %v825_v48 = vmax.f32 %v3542_v63, 0.0 }
 0x103   :  { %v822_v31 = vmul.f32 %v821_v26, %v3400_v5  ;;  %v845_v19 = vmul.f32 %v844_v0, %v3400_v5  ;;  %v868_v47 = vmul.f32 %v867_v50, %v3400_v5  ;;  %v924_v12 = vmul.f32 %v2222_v55, %v3473_v57 }
 0x104   :  { %v925_v39 = vmul.f32 %v2222_v55, %v3476_v62  ;;  %v985_v24 = vadd.f32 %v984_v45, %v983_v20  ;;  %v926_v60 = vmul.f32 %v923_v43, %v3455_v15  ;;  %v936_v61 = vmul.f32 %v923_v43, %v4913_v35 }
 0x105   :  { %v827_v33 = vmul.f32 %v823_v53, %v822_v31  ;;  %v850_v7 = vmul.f32 %v846_v52, %v845_v19  ;;  %v873_v4 = vmul.f32 %v869_v17, %v868_v47  ;;  %v927_v29 = vmul.f32 %v924_v12, %v3459_v28 }
 0x106   :  { %v929_v5 = vmul.f32 %v925_v39, %v3464_v23  ;;  %v937_v63 = vmul.f32 %v924_v12, %v4914_v18  ;;  %v939_v62 = vmul.f32 %v925_v39, %v2928_v27  ;;  %v969_v15 = vmul.f32 %v923_v43, %v2933_v41 }
 0x107   :  { %v828_v26 = vmax.f32 %v827_v33, 0.0  ;;  %v851_v57 = vmax.f32 %v850_v7, 0.0  ;;  %v874_v0 = vmax.f32 %v873_v4, 0.0  ;;  %v928_v53 = vadd.f32 %v927_v29, %v926_v60  ;;  %v3609_v4 = vld [vmem:[%s4717_s5] sm:$0xff] }
 0x108   :  { %v938_v52 = vadd.f32 %v937_v63, %v936_v61  ;;  %v970_v28 = vmul.f32 %v924_v12, %v2936_v34  ;;  %v972_v50 = vmul.f32 %v925_v39, %v2939_v22  ;;  %v986_v19 = vmax.f32 %v985_v24, 0.001  ;;  %4919 = vst [vmem:[#allocation21_spill] sm:$0xff] %v3609_v4  ;;  %v3622_v63 = vld [vmem:[%s4717_s5 + $0x8] sm:$0xff] }
 0x109   :  { %v829_v23 = vadd.f32 0.1, %v828_v26  ;;  %v852_v17 = vadd.f32 0.1, %v851_v57  ;;  %v875_v45 = vadd.f32 0.1, %v874_v0  ;;  %v930_v20 = vadd.f32 %v929_v5, %v928_v53 }
 0x10a   :  { %v940_v55 = vadd.f32 %v939_v62, %v938_v52  ;;  %v971_v31 = vadd.f32 %v970_v28, %v969_v15  ;;  %v848_v47 = vmax.f32 %v3560_v59, 0.0  ;;  %v1080_v43 = vadd.f32 %v3519_v51, %v3517_v40 }
 0x10b   :  { %2223 = vrcp.f32 %v829_v23  ;;  %v1087_v12 = vstv %s3567_s25  ;;  %v931_v39 = vmax.f32 %v930_v20, 0.001  ;;  %v993_v24 = vmul.f32 %v986_v19, %v4896_v46  ;;  %s3912_s25 = sld [smem:[#allocation2 + $0x300]] }
 0x10c   :  { %2225 = vrcp.f32 %v852_v17  ;;  %v941_v33 = vmax.f32 %v940_v55, 0.001  ;;  %v973_v7 = vadd.f32 %v972_v50, %v971_v31  ;;  %v3612_v59 = vsub.f32 %v1087_v12, %v3609_v4 }
 0x10d   :  { %2227 = vrcp.f32 %v875_v45  ;;  %v1089_v60 = vstv %s3576_s26  ;;  %v932_v40 = vsub.f32 1.0, %v931_v39  ;;  %v871_v5 = vmax.f32 %v3562_v10, 0.0  ;;  %s3914_s26 = sld [smem:[#allocation2 + $0x301]] }
 0x10e   :  { %v954_v51 = vmul.f32 %v941_v33, %v941_v33  ;;  %v974_v29 = vmax.f32 %v973_v7, 0.001  ;;  %2229 = vrsqrt.f32 %v1080_v43  ;;  %v3617_v61 = vadd.f32 %v993_v24, %v4897_v3 }
 0x10f   :  { %v3625_v26 = vsub.f32 %v1089_v60, %v3622_v63  ;;  %v933_v57 = vmul.f32 %v932_v40, %v932_v40  ;;  %v826_v62 = vadd.f32 0.1, %v825_v48  ;;  %v849_v53 = vadd.f32 0.1, %v848_v47 }
 0x110   :  { %v955_v0 = vmul.f32 %v2954_v8, %v954_v51  ;;  %v987_v10 = vmul.f32 %v974_v29, %v974_v29  ;;  %v1091_v52 = vmul.f32 %v3612_v59, %v3612_v59  ;;  %v1260_v45 = vstv %s3593_s4  ;;  %s3937_s4 = sld [smem:[#allocation6 + $0x380]] }
 0x111   :  { %v1092_v15 = vmul.f32 %v3625_v26, %v3625_v26  ;;  %v934_v28 = vmul.f32 %v933_v57, %v933_v57  ;;  %v872_v50 = vadd.f32 0.1, %v871_v5  ;;  %v1085_v47 = vstv %s3470_s13  ;;  %s3846_s13 = sld [smem:[#allocation6 + $0x302]] }
 0x112   :  { %v956_v23 = vadd.f32 1.0, %v955_v0  ;;  %v988_v17 = vmul.f32 %v2967_v11, %v987_v10  ;;  %v1262_v43 = vstv %s3603_s12  ;;  %v1095_v7 = vstv %s1094_s21  ;;  %s3951_s12 = sld [smem:[#allocation8 + $0x300]]  ;;  %s4053_s21 = sld [smem:[#allocation2 + $0x382]] }
 0x113   :  { %v935_v39 = vmul.f32 %v934_v28, %v932_v40  ;;  %v1093_v33 = vadd.f32 %v1092_v15, %v1091_v52  ;;  %v3646_v24 = vsub.f32 %v1260_v45, %v3609_v4  ;;  %v3653_v48 = vstv %s1267_s22 }
 0x114   :  { %v957_v31 = vmax.f32 %v956_v23, 0.001  ;;  %v989_v19 = vadd.f32 1.0, %v988_v17  ;;  %v3651_v17 = vsub.f32 %v1262_v43, %v3622_v63  ;;  %v1276_v45 = vstv %s3628_s20 }
 0x115   :  { %v2224_v12 = vpop.eup %2223  ;;  %v1002_v23 = vmul.f32 %v935_v39, %v2850_v16  ;;  %v1096_v28 = vadd.f32 %v1095_v7, %v1093_v33 }
 0x116   :  { %v2226_v60 = vpop.eup %2225  ;;  %v831_v51 = vmul.f32 %v2224_v12, %v826_v62  ;;  %v962_v29 = vmul.f32 4.0, %v957_v31  ;;  %v990_v5 = vmax.f32 %v989_v19, 0.001  ;;  %v1004_v12 = vmul.f32 %v935_v39, %v4900_v44 }
 0x117   :  { %v2228_v0 = vpop.eup %2227  ;;  %v854_v10 = vmul.f32 %v2226_v60, %v849_v53  ;;  %v1264_v53 = vmul.f32 %v3646_v24, %v3646_v24  ;;  %v3665_v60 = vadd.f32 %v3420_v42, %v1002_v23  ;;  %s1456_s24 = smul.f32 %s3846_s13, %s3846_s13 }
 0x118   :  { %v2230_v40 = vpop.eup %2229  ;;  %2231 = vlog2.f32 %v831_v51  ;;  %v877_v62 = vmul.f32 %v2228_v0, %v872_v50  ;;  %v963_v52 = vmul.f32 %v962_v29, %v957_v31  ;;  %v995_v15 = vmul.f32 4.0, %v990_v5  ;;  %v4920_v50 = vld [vmem:[#allocation37_spill] sm:$0xff]  ;;  %v4921_v29 = vld [vmem:[#allocation47_spill] sm:$0xff]  ;;  %s1661_s22 = smul.f32 %s4053_s21, %s4053_s21 }
 0x119   :  { %2233 = vlog2.f32 %v854_v10  ;;  %v1025_v51 = vmul.f32 %v935_v39, %v2855_v30  ;;  %v1027_v31 = vmul.f32 %v935_v39, %v4920_v50  ;;  %v3670_v0 = vmul.f32 %v2230_v40, %v4921_v29  ;;  %v4922_v10 = vld [vmem:[#allocation48_spill] sm:$0xff] }
 0x11a   :  { %2235 = vlog2.f32 %v877_v62  ;;  %v964_v19 = vmul.f32 %v963_v52, %v3526_v32  ;;  %v996_v43 = vmul.f32 %v995_v15, %v990_v5  ;;  %v1084_v62 = vmul.f32 %v2230_v40, %v4922_v10  ;;  %v4923_v5 = vld [vmem:[#allocation29_spill] sm:$0xff]  ;;  %v4925_v10 = vld [vmem:[#allocation50_spill] sm:$0xff] }
 0x11b   :  { %v1086_v32 = vmul.f32 %v2230_v40, %v1085_v47  ;;  %v1048_v52 = vmul.f32 %v935_v39, %v4923_v5  ;;  %v4924_v15 = vld [vmem:[#allocation41_spill] sm:$0xff]  ;;  %2237 = vrsqrt.f32 %v1096_v28  ;;  %v1131_v23 = vmul.f32 %v3670_v0, %v4913_v35 }
 0x11c   :  { %v965_v33 = vmul.f32 %v964_v19, %v3545_v38  ;;  %v997_v7 = vmul.f32 %v996_v43, %v3565_v6  ;;  %v1050_v42 = vmul.f32 %v935_v39, %v4924_v15  ;;  %v1132_v38 = vmul.f32 %v1084_v62, %v4914_v18 }
 0x11d   :  { %v1134_v6 = vmul.f32 %v1086_v32, %v2928_v27  ;;  %v1164_v47 = vmul.f32 %v3670_v0, %v2933_v41  ;;  %v1165_v19 = vmul.f32 %v1084_v62, %v2936_v34  ;;  %v1167_v43 = vmul.f32 %v1086_v32, %v2939_v22 }
 0x11e   :  { %2239 = vrcp.f32 %v965_v33  ;;  %v998_v29 = vmul.f32 %v997_v7, %v3617_v61  ;;  %v1265_v39 = vmul.f32 %v3651_v17, %v3651_v17  ;;  %v1133_v28 = vadd.f32 %v1132_v38, %v1131_v23  ;;  %v4926_v38 = vld [vmem:[#allocation52_spill] sm:$0xff] }
 0x11f   :  { %v3689_v33 = vsub.f32 %v1276_v45, %v3609_v4  ;;  %v1278_v61 = vstv %s3655_s23  ;;  %v1005_v7 = vadd.f32 %v3521_v13, %v1004_v12  ;;  %v1026_v55 = vadd.f32 %v4925_v10, %v1025_v51  ;;  %s4166_s23 = sld [smem:[#allocation6 + $0x400]] }
 0x120   :  { %2241 = vrcp.f32 %v998_v29  ;;  %v1166_v20 = vadd.f32 %v1165_v19, %v1164_v47  ;;  %v1266_v57 = vadd.f32 %v1265_v39, %v1264_v53  ;;  %v1028_v5 = vadd.f32 %v3528_v21, %v1027_v31 }
 0x121   :  { %v1082_v50 = vmul.f32 %v2230_v40, %v2230_v40  ;;  %v1135_v30 = vadd.f32 %v1134_v6, %v1133_v28  ;;  %v3698_v29 = vsub.f32 %v1278_v61, %v3622_v63  ;;  %v1049_v44 = vadd.f32 %v4926_v38, %v1048_v52 }
 0x122   :  { %v2232_v15 = vpop.eup %2231  ;;  %v1051_v16 = vadd.f32 %v3533_v2, %v1050_v42  ;;  %v1168_v4 = vadd.f32 %v1167_v43, %v1166_v20  ;;  %v1280_v53 = vmul.f32 %v3689_v33, %v3689_v33  ;;  %v3704_v47 = vstv %s1283_s7 }
 0x123   :  { %v2234_v23 = vpop.eup %2233  ;;  %v833_v45 = vmul.f32 0.6931472, %v2232_v15  ;;  %v1136_v51 = vmax.f32 %v1135_v30, 0.001  ;;  %v1269_v19 = vadd.f32 %v3653_v48, %v1266_v57  ;;  %v1281_v20 = vmul.f32 %v3698_v29, %v3698_v29 }
 0x124   :  { %v2236_v12 = vpop.eup %2235  ;;  %v856_v13 = vmul.f32 0.6931472, %v2234_v23  ;;  %v1169_v6 = vmax.f32 %v1168_v4, 0.001  ;;  %v4929_v48 = vstv %s3586_s28  ;;  %s3927_s28 = sld [smem:[#allocation8 + $0x281]] }
 0x125   :  { %v834_v40 = vand.u32 2147483647, %v833_v45  ;;  %v879_v31 = vmul.f32 0.6931472, %v2236_v12  ;;  %v1147_v52 = vmul.f32 %v1136_v51, %v4916_v37  ;;  %v3708_v39 = vmul.f32 %v1136_v51, %v1082_v50  ;;  %v2238_v30 = vpop.eup %2237 }
 0x126   :  { %v857_v15 = vand.u32 2147483647, %v856_v13  ;;  %v1180_v28 = vmul.f32 %v1169_v6, %v4896_v46  ;;  %v3714_v61 = vmul.f32 %v1169_v6, %v1082_v50  ;;  %v3717_v4 = vmul.f32 %v2238_v30, %v3612_v59 }
 0x127   :  { %4927 = vst [vmem:[#allocation23_spill] sm:$0xff] %v3708_v39  ;;  %v835_v42 = vadd.f32 %v834_v40, %v3558_v9  ;;  %v880_v43 = vand.u32 2147483647, %v879_v31  ;;  %v3720_v13 = vmul.f32 %v2238_v30, %v3625_v26  ;;  %v3724_v57 = vmul.f32 %v2238_v30, %v4929_v48 }
 0x128   :  { %4928 = vst [vmem:[#allocation18_spill] sm:$0xff] %v3714_v61  ;;  %v2240_v10 = vpop.eup %2239  ;;  %v3727_v23 = vadd.f32 %v1147_v52, %v2847_v58  ;;  %v3731_v38 = vadd.f32 %v1180_v28, %v4897_v3  ;;  %2243 = vrsqrt.f32 %v1269_v19  ;;  %v3735_v59 = vadd.f32 %v3717_v4, %v3670_v0 }
 0x129   :  { %v858_v45 = vadd.f32 %v857_v15, %v835_v42  ;;  %v967_v9 = vmul.f32 %v2240_v10, %v4870_v36  ;;  %v3738_v26 = vadd.f32 %v3720_v13, %v1084_v62  ;;  %v3741_v12 = vadd.f32 %v3724_v57, %v1086_v32  ;;  %v4930_v42 = vld [vmem:[#allocation30_spill] sm:$0xff] }
 0x12a   :  { %v2242_v50 = vpop.eup %2241  ;;  %v1137_v51 = vmul.f32 %v3717_v4, %v4913_v35  ;;  %v1105_v0 = vmul.f32 %v3735_v59, %v3735_v59  ;;  %v4931_v10 = vld [vmem:[#allocation34_spill] sm:$0xff]  ;;  %v1138_v48 = vmul.f32 %v3720_v13, %v4914_v18 }
 0x12b   :  { %v3745_v40 = vadd.f32 %v880_v43, %v858_v45  ;;  %v1000_v31 = vmul.f32 %v2242_v50, %v4871_v54  ;;  %v1006_v6 = vmul.f32 %v3665_v60, %v967_v9  ;;  %v1029_v19 = vmul.f32 %v1026_v55, %v967_v9  ;;  %v4932_v45 = vld [vmem:[#allocation53_spill] sm:$0xff] }
 0x12c   :  { %v1052_v15 = vmul.f32 %v1049_v44, %v967_v9  ;;  %v1106_v62 = vmul.f32 %v3738_v26, %v3738_v26  ;;  %v1108_v32 = vmul.f32 %v3741_v12, %v3741_v12 }
 0x12d   :  { %v1007_v52 = vadd.f32 %v1006_v6, %v4874_v14  ;;  %v1009_v30 = vmul.f32 %v1005_v7, %v1000_v31  ;;  %v1030_v43 = vadd.f32 %v1029_v19, %v4930_v42  ;;  %v1032_v28 = vmul.f32 %v1028_v5, %v1000_v31 }
 0x12e   :  { %v1053_v60 = vadd.f32 %v1052_v15, %v4931_v10  ;;  %v1055_v44 = vmul.f32 %v1051_v16, %v1000_v31  ;;  %v1107_v55 = vadd.f32 %v1106_v62, %v1105_v0  ;;  %v1139_v31 = vadd.f32 %v1138_v48, %v1137_v51 }
 0x12f   :  { %v1008_v9 = vmul.f32 %v1007_v52, %v4932_v45  ;;  %v1010_v50 = vadd.f32 %v1009_v30, %v4877_v56  ;;  %v1031_v61 = vmul.f32 %v1030_v43, %v4932_v45  ;;  %v1033_v7 = vadd.f32 %v1032_v28, %v4878_v49 }
 0x130   :  { %v1054_v5 = vmul.f32 %v1053_v60, %v4932_v45  ;;  %v1056_v6 = vadd.f32 %v1055_v44, %v4879_v1  ;;  %v1109_v16 = vadd.f32 %v1108_v32, %v1107_v55  ;;  %v4933_v15 = vstv %s3584_s27  ;;  %s3923_s27 = sld [smem:[#allocation2 + $0x302]] }
 0x131   :  { %v1011_v19 = vmul.f32 %v1010_v50, %v3553_v25  ;;  %v1013_v0 = vmul.f32 %v4933_v15, %v1008_v9  ;;  %v1034_v62 = vmul.f32 %v1033_v7, %v3553_v25  ;;  %v1282_v52 = vadd.f32 %v1281_v20, %v1280_v53 }
 0x132   :  { %v4934_v30 = vstv %s3591_s0  ;;  %v1057_v28 = vmul.f32 %v1056_v6, %v3553_v25  ;;  %v1110_v39 = vadd.f32 1e-12, %v1109_v16  ;;  %v1140_v60 = vmul.f32 %v3724_v57, %v2928_v27  ;;  %v2244_v44 = vpop.eup %2243  ;;  %s3929_s0 = sld [smem:[#allocation8 + $0x282]] }
 0x133   :  { %v1036_v43 = vmul.f32 %v4934_v30, %v1031_v61  ;;  %v4935_v32 = vmov %v4933_v15  ;;  %v4936_v55 = vmov %v4934_v30  ;;  %v1274_v45 = vstv %s3597_s11  ;;  %s3946_s11 = sld [smem:[#allocation6 + $0x381]] }
 0x134   :  { %v1016_v51 = vmul.f32 %v4935_v32, %v1011_v19  ;;  %v1039_v48 = vmul.f32 %v4936_v55, %v1034_v62  ;;  %v4937_v9 = vstv %s3595_s10  ;;  %2245 = vrsqrt.f32 %v1110_v39  ;;  %s3939_s10 = sld [smem:[#allocation6 + $0x382]] }
 0x135   :  { %v1059_v50 = vmul.f32 %v4937_v9, %v1054_v5  ;;  %v4938_v7 = vmov %v4937_v9  ;;  %v1141_v20 = vadd.f32 %v1140_v60, %v1139_v31  ;;  %v1014_v61 = vmax.f32 %v1013_v0, 0.0 }
 0x136   :  { %v1062_v53 = vmul.f32 %v4938_v7, %v1057_v28  ;;  %v1017_v25 = vmax.f32 %v1016_v51, 0.0  ;;  %v1040_v6 = vmax.f32 %v1039_v48, 0.0  ;;  %v1285_v16 = vadd.f32 %v3704_v47, %v1282_v52  ;;  %s1472_s17 = smul.f32 %s3923_s27, %s3923_s27 }
 0x137   :  { %v1037_v15 = vmax.f32 %v1036_v43, 0.0  ;;  %v1142_v1 = vmax.f32 %v1141_v20, 0.001  ;;  %v1170_v19 = vmul.f32 %v3717_v4, %v2933_v41  ;;  %v1171_v5 = vmul.f32 %v3720_v13, %v2936_v34 }
 0x138   :  { %v1063_v30 = vmax.f32 %v1062_v53, 0.0  ;;  %v1018_v62 = vadd.f32 0.1, %v1017_v25  ;;  %v1041_v32 = vadd.f32 0.1, %v1040_v6  ;;  %v1173_v39 = vmul.f32 %v3724_v57, %v2939_v22 }
 0x139   :  { %v1060_v47 = vmax.f32 %v1059_v50, 0.0  ;;  %v1149_v0 = vmul.f32 %v1142_v1, %v4916_v37  ;;  %v3799_v52 = vmul.f32 %v2244_v44, %v3646_v24  ;;  %v1172_v43 = vadd.f32 %v1171_v5, %v1170_v19 }
 0x13a   :  { %v1064_v31 = vadd.f32 0.1, %v1063_v30  ;;  %2247 = vrcp.f32 %v1018_v62  ;;  %v3802_v28 = vmul.f32 %v2244_v44, %v3651_v17  ;;  %v3804_v60 = vmul.f32 %v2244_v44, %v1274_v45  ;;  %s1645_s20 = smul.f32 %s3939_s10, %s3939_s10 }
 0x13b   :  { %2249 = vrcp.f32 %v1041_v32  ;;  %v3807_v51 = vadd.f32 %v1149_v0, %v2847_v58  ;;  %v1320_v55 = vmul.f32 %v3799_v52, %v4913_v35  ;;  %v1353_v1 = vmul.f32 %v3799_v52, %v2933_v41 }
 0x13c   :  { %2251 = vrcp.f32 %v1064_v31  ;;  %v1174_v24 = vadd.f32 %v1173_v39, %v1172_v43  ;;  %v1321_v17 = vmul.f32 %v3802_v28, %v4914_v18  ;;  %v1323_v45 = vmul.f32 %v3804_v60, %v2928_v27 }
 0x13d   :  { %2253 = vrsqrt.f32 %v1285_v16  ;;  %v1354_v9 = vmul.f32 %v3802_v28, %v2936_v34  ;;  %v1356_v50 = vmul.f32 %v3804_v60, %v2939_v22  ;;  %v1015_v7 = vadd.f32 0.1, %v1014_v61 }
 0x13e   :  { %v1175_v53 = vmax.f32 %v1174_v24, 0.001  ;;  %v1289_v20 = vstv %s3657_s1  ;;  %v1322_v25 = vadd.f32 %v1321_v17, %v1320_v55  ;;  %v2246_v6 = vpop.eup %2245  ;;  %v1038_v30 = vadd.f32 0.1, %v1037_v15  ;;  %s4203_s1 = sld [smem:[#allocation6 + $0x401]] }
 0x13f   :  { %v1061_v19 = vadd.f32 0.1, %v1060_v47  ;;  %v3823_v62 = vmul.f32 %v2244_v44, %v2244_v44  ;;  %v1355_v16 = vadd.f32 %v1354_v9, %v1353_v1  ;;  %v1112_v32 = vmul.f32 %v2246_v6, %v3735_v59 }
 0x140   :  { %v1113_v5 = vmul.f32 %v2246_v6, %v3738_v26  ;;  %v1114_v39 = vmul.f32 %v2246_v6, %v3741_v12  ;;  %v1182_v31 = vmul.f32 %v1175_v53, %v4896_v46  ;;  %v1324_v0 = vadd.f32 %v1323_v45, %v1322_v25 }
 0x141   :  { %v3829_v61 = vadd.f32 %v1356_v50, %v1355_v16  ;;  %v1449_v43 = vstv %s3789_s3  ;;  %v1451_v24 = vstv %s3795_s9  ;;  %v1115_v55 = vmul.f32 %v1112_v32, %v3717_v4 }
 0x142   :  { %v1116_v15 = vmul.f32 %v1113_v5, %v3720_v13  ;;  %v1118_v44 = vmul.f32 %v1114_v39, %v3724_v57  ;;  %v1125_v47 = vmul.f32 %v1112_v32, %v4913_v35  ;;  %v1126_v59 = vmul.f32 %v1113_v5, %v4914_v18 }
 0x143   :  { %v1128_v26 = vmul.f32 %v1114_v39, %v2928_v27  ;;  %v1158_v12 = vmul.f32 %v1112_v32, %v2933_v41  ;;  %v1159_v1 = vmul.f32 %v1113_v5, %v2936_v34  ;;  %v1161_v9 = vmul.f32 %v1114_v39, %v2939_v22 }
 0x144   :  { %v2248_v17 = vpop.eup %2247  ;;  %v1117_v45 = vadd.f32 %v1116_v15, %v1115_v55  ;;  %v3843_v4 = vadd.f32 %v1182_v31, %v4897_v3  ;;  %v1325_v13 = vmax.f32 %v1324_v0, 0.001  ;;  %v1127_v53 = vadd.f32 %v1126_v59, %v1125_v47 }
 0x145   :  { %v2250_v50 = vpop.eup %2249  ;;  %v1020_v57 = vmul.f32 %v2248_v17, %v1015_v7  ;;  %v1160_v25 = vadd.f32 %v1159_v1, %v1158_v12  ;;  %v4784_v6 = vmax.f32 %v3829_v61, 0.001 }
 0x146   :  { %v2252_v16 = vpop.eup %2251  ;;  %v1043_v32 = vmul.f32 %v2250_v50, %v1038_v30  ;;  %v1119_v48 = vadd.f32 %v1118_v44, %v1117_v45  ;;  %v1336_v5 = vmul.f32 %v1325_v13, %v4916_v37  ;;  %v3850_v55 = vmul.f32 %v1325_v13, %v3823_v62 }
 0x147   :  { %v2254_v39 = vpop.eup %2253  ;;  %2255 = vlog2.f32 %v1020_v57  ;;  %v1066_v31 = vmul.f32 %v2252_v16, %v1061_v19  ;;  %v1129_v7 = vadd.f32 %v1128_v26, %v1127_v53  ;;  %v1162_v0 = vadd.f32 %v1161_v9, %v1160_v25 }
 0x148   :  { %4939 = vst [vmem:[#allocation59_spill] sm:$0xff] %v3850_v55  ;;  %2257 = vlog2.f32 %v1043_v32  ;;  %v1120_v15 = vmax.f32 %v1119_v48, 0.001  ;;  %v3859_v30 = vmul.f32 %v2254_v39, %v3689_v33  ;;  %v3862_v44 = vmul.f32 %v2254_v39, %v3698_v29 }
 0x149   :  { %2259 = vlog2.f32 %v1066_v31  ;;  %v1130_v47 = vmax.f32 %v1129_v7, 0.001  ;;  %v1163_v59 = vmax.f32 %v1162_v0, 0.001  ;;  %v3864_v12 = vmul.f32 %v2254_v39, %v1289_v20 }
 0x14a   :  { %v1121_v19 = vsub.f32 1.0, %v1120_v15  ;;  %v3868_v26 = vadd.f32 %v3859_v30, %v3799_v52  ;;  %v3872_v1 = vadd.f32 %v3862_v44, %v3802_v28  ;;  %v1326_v33 = vmul.f32 %v3859_v30, %v4913_v35 }
 0x14b   :  { %v1143_v48 = vmul.f32 %v1130_v47, %v1130_v47  ;;  %v1176_v29 = vmul.f32 %v1163_v59, %v1163_v59  ;;  %v3878_v17 = vadd.f32 %v3864_v12, %v3804_v60  ;;  %v1327_v20 = vmul.f32 %v3862_v44, %v4914_v18 }
 0x14c   :  { %v1122_v45 = vmul.f32 %v1121_v19, %v1121_v19  ;;  %v1294_v52 = vmul.f32 %v3868_v26, %v3868_v26  ;;  %v1295_v28 = vmul.f32 %v3872_v1, %v3872_v1  ;;  %v1329_v9 = vmul.f32 %v3864_v12, %v2928_v27 }
 0x14d   :  { %v1144_v13 = vmul.f32 %v2954_v8, %v1143_v48  ;;  %v1177_v60 = vmul.f32 %v2967_v11, %v1176_v29  ;;  %v1297_v50 = vmul.f32 %v3878_v17, %v3878_v17  ;;  %v1328_v57 = vadd.f32 %v1327_v20, %v1326_v33 }
 0x14e   :  { %v1123_v53 = vmul.f32 %v1122_v45, %v1122_v45  ;;  %v1296_v25 = vadd.f32 %v1295_v28, %v1294_v52  ;;  %v3893_v16 = vadd.f32 %v1336_v5, %v2847_v58  ;;  %v1359_v32 = vmul.f32 %v3859_v30, %v2933_v41  ;;  %v4941_v45 = vld [vmem:[#allocation21_spill] sm:$0xff] }
 0x14f   :  { %v1145_v39 = vadd.f32 1.0, %v1144_v13  ;;  %v1178_v31 = vadd.f32 1.0, %v1177_v60  ;;  %v1330_v7 = vadd.f32 %v1329_v9, %v1328_v57  ;;  %v1360_v0 = vmul.f32 %v3862_v44, %v2936_v34 }
 0x150   :  { %4940 = vst [vmem:[#allocation56_spill] sm:$0xff] %v3893_v16  ;;  %v1369_v59 = vmul.f32 %v4784_v6, %v4896_v46  ;;  %v3910_v52 = vsub.f32 %v1449_v43, %v4941_v45  ;;  %v1124_v13 = vmul.f32 %v1123_v53, %v1121_v19  ;;  %v3919_v60 = vsub.f32 %v1451_v24, %v3622_v63 }
 0x151   :  { %v2256_v33 = vpop.eup %2255  ;;  %v1146_v48 = vmax.f32 %v1145_v39, 0.001  ;;  %v1179_v29 = vmax.f32 %v1178_v31, 0.001  ;;  %v1361_v20 = vadd.f32 %v1360_v0, %v1359_v32  ;;  %v3921_v57 = vstv %s1456_s24 }
 0x152   :  { %v2258_v28 = vpop.eup %2257  ;;  %v1022_v9 = vmul.f32 0.6931472, %v2256_v33  ;;  %4942 = vst [vmem:[#allocation28_spill] sm:$0xff] %v3919_v60  ;;  %v1298_v0 = vadd.f32 %v1297_v50, %v1296_v25  ;;  %v1331_v15 = vmax.f32 %v1330_v7, 0.001  ;;  %v1362_v33 = vmul.f32 %v3864_v12, %v2939_v22  ;;  %v4943_v50 = vld [vmem:[#allocation26_spill] sm:$0xff] }
 0x153   :  { %v2260_v39 = vpop.eup %2259  ;;  %v1045_v32 = vmul.f32 0.6931472, %v2258_v28  ;;  %v1151_v31 = vmul.f32 4.0, %v1146_v48  ;;  %v1184_v43 = vmul.f32 4.0, %v1179_v29  ;;  %v1453_v6 = vmul.f32 %v3910_v52, %v3910_v52 }
 0x154   :  { %v1023_v5 = vand.u32 2147483647, %v1022_v9  ;;  %v1068_v47 = vmul.f32 0.6931472, %v2260_v39  ;;  %v1191_v25 = vmul.f32 %v1124_v13, %v4943_v50  ;;  %v1454_v7 = vmul.f32 %v3919_v60, %v3919_v60  ;;  %v4946_v60 = vld [vmem:[#allocation37_spill] sm:$0xff] }
 0x155   :  { %v1046_v24 = vand.u32 2147483647, %v1045_v32  ;;  %v1152_v19 = vmul.f32 %v1151_v31, %v1146_v48  ;;  %v1185_v53 = vmul.f32 %v1184_v43, %v1179_v29  ;;  %v4944_v29 = vld [vmem:[#allocation35_spill] sm:$0xff]  ;;  %v1299_v32 = vadd.f32 1e-12, %v1298_v0 }
 0x156   :  { %v1024_v28 = vadd.f32 %v1023_v5, %v3745_v40  ;;  %v1069_v55 = vand.u32 2147483647, %v1068_v47  ;;  %v1193_v39 = vmul.f32 %v1124_v13, %v4944_v29  ;;  %v4945_v43 = vld [vmem:[#allocation27_spill] sm:$0xff]  ;;  %v1338_v47 = vmul.f32 %v1331_v15, %v4916_v37 }
 0x157   :  { %v1153_v9 = vmul.f32 %v1152_v19, %v3727_v23  ;;  %v1186_v48 = vmul.f32 %v1185_v53, %v3731_v38  ;;  %v1214_v40 = vmul.f32 %v1124_v13, %v4945_v43  ;;  %v1363_v5 = vadd.f32 %v1362_v33, %v1361_v20 }
 0x158   :  { %v1047_v31 = vadd.f32 %v1046_v24, %v1024_v28  ;;  %v1216_v23 = vmul.f32 %v1124_v13, %v4946_v60  ;;  %2261 = vrsqrt.f32 %v1299_v32  ;;  %v3958_v15 = vadd.f32 %v1338_v47, %v2847_v58  ;;  %v3993_v32 = vld [vmem:[#allocation9 + $0x38] sm:$0xff] }
 0x159   :  { %v1154_v11 = vmul.f32 %v1153_v9, %v3807_v51  ;;  %v1187_v16 = vmul.f32 %v1186_v48, %v3843_v4  ;;  %v1364_v20 = vmax.f32 %v1363_v5, 0.001  ;;  %v3961_v51 = vadd.f32 %v1369_v59, %v4897_v3  ;;  %v4951_v59 = vld [vmem:[#allocation41_spill] sm:$0xff]  ;;  %4952 = vst [vmem:[#allocation54_spill] sm:$0xff] %v3993_v32 }
 0x15a   :  { %v3955_v38 = vadd.f32 %v1069_v55, %v1047_v31  ;;  %v4948_v4 = vmax.f32 %v3829_v61, 0.001  ;;  %v1455_v33 = vadd.f32 %v1454_v7, %v1453_v6  ;;  %v1465_v24 = vstv %s3912_s25  ;;  %v4007_v6 = vld [vmem:[#allocation9 + $0x48] sm:$0xff] }
 0x15b   :  { %2263 = vrcp.f32 %v1154_v11  ;;  %v1371_v55 = vmul.f32 %v1364_v20, %v4896_v46  ;;  %v3971_v19 = vsub.f32 %v1465_v24, %v4941_v45  ;;  %v1467_v53 = vstv %s3914_s26  ;;  %v4950_v11 = vld [vmem:[#allocation29_spill] sm:$0xff]  ;;  %v4953_v20 = vld [vmem:[#allocation22_spill] sm:$0xff]  ;;  %s4594_s26 = sld [smem:[#allocation8 + $0x380]] }
 0x15c   :  { %4947 = vst [vmem:[#allocation49_spill] sm:$0xff] %v3955_v38  ;;  %v3966_v0 = vmul.f32 %v4948_v4, %v3823_v62  ;;  %2265 = vrcp.f32 %v1187_v16  ;;  %v1237_v62 = vmul.f32 %v1124_v13, %v4950_v11  ;;  %v3984_v16 = vsub.f32 %v1467_v53, %v3622_v63  ;;  %v4003_v24 = vld [vmem:[#allocation9 + $0x40] sm:$0xff] }
 0x15d   :  { %v1239_v28 = vmul.f32 %v1124_v13, %v4951_v59  ;;  %v3988_v7 = vadd.f32 %v1371_v55, %v4897_v3  ;;  %v1469_v48 = vmul.f32 %v3971_v19, %v3971_v19  ;;  %v1192_v31 = vadd.f32 %v3993_v32, %v1191_v25 }
 0x15e   :  { %4949 = vst [vmem:[#allocation51_spill] sm:$0xff] %v3966_v0  ;;  %v1458_v47 = vadd.f32 %v3921_v57, %v1455_v33  ;;  %v1470_v5 = vmul.f32 %v3984_v16, %v3984_v16  ;;  %v1638_v13 = vstv %s3937_s4  ;;  %v1194_v4 = vadd.f32 %v4953_v20, %v1193_v39  ;;  %s4667_s4 = sld [smem:[#allocation8 + $0x401]] }
 0x15f   :  { %v1215_v55 = vadd.f32 %v4003_v24, %v1214_v40  ;;  %v1217_v25 = vadd.f32 %v3528_v21, %v1216_v23  ;;  %v1473_v53 = vstv %s1472_s17  ;;  %v1238_v57 = vadd.f32 %v4007_v6, %v1237_v62 }
 0x160   :  { %v1471_v33 = vadd.f32 %v1470_v5, %v1469_v48  ;;  %v4011_v61 = vsub.f32 %v1638_v13, %v4941_v45  ;;  %v1640_v9 = vstv %s3946_s11  ;;  %v1240_v0 = vadd.f32 %v3533_v2, %v1239_v28  ;;  %s2499_s11 = smov [#allocation12]  }
 0x161   :  { %2267 = vrsqrt.f32 %v1458_v47  ;;  %v4018_v23 = vstv %s1645_s20  ;;  %v4031_v2 = vsub.f32 %v1640_v9, %v3622_v63  ;;  %v1654_v13 = vstv %s3976_s18 }
 0x162   :  { %4954 = vst [vmem:[#allocation55_spill] sm:$0xff] %v4011_v61  ;;  %v2262_v38 = vpop.eup %2261  ;;  %v1474_v21 = vadd.f32 %v1473_v53, %v1471_v33  ;;  %v4035_v47 = vmul.f32 %v4011_v61, %v4011_v61  ;;  %v1656_v53 = vstv %s3978_s19 }
 0x163   :  { %v4022_v62 = vmul.f32 %v2262_v38, %v3868_v26  ;;  %v4025_v48 = vmul.f32 %v2262_v38, %v3872_v1  ;;  %v4028_v5 = vmul.f32 %v2262_v38, %v3878_v17 }
 0x164   :  { %2269 = vrsqrt.f32 %v1474_v21 }
 0x165   :  { %v2264_v28 = vpop.eup %2263  ;;  %v1304_v1 = vmul.f32 %v4022_v62, %v3859_v30  ;;  %v1305_v17 = vmul.f32 %v4025_v48, %v3862_v44  ;;  %v1307_v38 = vmul.f32 %v4028_v5, %v3864_v12  ;;  %v1314_v21 = vmul.f32 %v4022_v62, %v4913_v35 }
 0x166   :  { %v2266_v33 = vpop.eup %2265  ;;  %v1156_v26 = vmul.f32 %v2264_v28, %v4870_v36  ;;  %v1315_v40 = vmul.f32 %v4025_v48, %v4914_v18  ;;  %v1317_v28 = vmul.f32 %v4028_v5, %v2928_v27 }
 0x167   :  { %v1189_v9 = vmul.f32 %v2266_v33, %v4871_v54  ;;  %v1306_v39 = vadd.f32 %v1305_v17, %v1304_v1 }
 0x168   :  { %v1195_v20 = vmul.f32 %v1192_v31, %v1156_v26  ;;  %v1218_v3 = vmul.f32 %v1215_v55, %v1156_v26  ;;  %v1241_v30 = vmul.f32 %v1238_v57, %v1156_v26  ;;  %v1316_v46 = vadd.f32 %v1315_v40, %v1314_v21  ;;  %v4955_v57 = vld [vmem:[#allocation46_spill] sm:$0xff] }
 0x169   :  { %v1198_v44 = vmul.f32 %v1194_v4, %v1189_v9  ;;  %v1221_v61 = vmul.f32 %v1217_v25, %v1189_v9  ;;  %v1244_v12 = vmul.f32 %v1240_v0, %v1189_v9  ;;  %v1308_v60 = vadd.f32 %v1307_v38, %v1306_v39  ;;  %v4956_v0 = vld [vmem:[#allocation23_spill] sm:$0xff]  ;;  %v4957_v39 = vld [vmem:[#allocation18_spill] sm:$0xff] }
 0x16a   :  { %v1196_v33 = vadd.f32 %v1195_v20, %v4874_v14  ;;  %v1219_v54 = vadd.f32 %v1218_v3, %v4930_v42  ;;  %v1242_v59 = vadd.f32 %v1241_v30, %v4931_v10  ;;  %v1318_v4 = vadd.f32 %v1317_v28, %v1316_v46 }
 0x16b   :  { %v1199_v31 = vadd.f32 %v1198_v44, %v4877_v56  ;;  %v1222_v55 = vadd.f32 %v1221_v61, %v4878_v49  ;;  %v1245_v26 = vadd.f32 %v1244_v12, %v4955_v57  ;;  %v1309_v40 = vmax.f32 %v1308_v60, 0.001  ;;  %v2268_v1 = vpop.eup %2267 }
 0x16c   :  { %v1197_v25 = vmul.f32 %v1196_v33, %v4956_v0  ;;  %v1220_v3 = vmul.f32 %v1219_v54, %v4956_v0  ;;  %v1243_v20 = vmul.f32 %v1242_v59, %v4956_v0  ;;  %v1319_v9 = vmax.f32 %v1318_v4, 0.001 }
 0x16d   :  { %v1200_v17 = vmul.f32 %v1199_v31, %v4957_v39  ;;  %v1223_v38 = vmul.f32 %v1222_v55, %v4957_v39  ;;  %v1246_v61 = vmul.f32 %v1245_v26, %v4957_v39  ;;  %v4958_v21 = vstv %s3775_s8 }
 0x16e   :  { %v1202_v30 = vmul.f32 %v4958_v21, %v1197_v25  ;;  %v4959_v46 = vstv %s3852_s14  ;;  %v4960_v44 = vstv %s3854_s15  ;;  %v1310_v33 = vsub.f32 1.0, %v1309_v40  ;;  %v2270_v54 = vpop.eup %2269  ;;  %s4382_s14 = sld [smem:[#allocation2 + $0x402]] }
 0x16f   :  { %v1225_v28 = vmul.f32 %v4959_v46, %v1220_v3  ;;  %v1248_v12 = vmul.f32 %v4960_v44, %v1243_v20  ;;  %v4961_v57 = vmov %v4958_v21  ;;  %v4962_v60 = vmov %v4959_v46  ;;  %s4389_s15 = sld [smem:[#allocation8 + $0x302]] }
 0x170   :  { %v1205_v59 = vmul.f32 %v4961_v57, %v1200_v17  ;;  %v1228_v0 = vmul.f32 %v4962_v60, %v1223_v38  ;;  %v4963_v49 = vmov %v4960_v44  ;;  %v1332_v56 = vmul.f32 %v1319_v9, %v1319_v9 }
 0x171   :  { %v1251_v31 = vmul.f32 %v4963_v49, %v1246_v61  ;;  %v1311_v55 = vmul.f32 %v1310_v33, %v1310_v33  ;;  %v1643_v26 = vmul.f32 %v4031_v2, %v4031_v2  ;;  %v4082_v4 = vsub.f32 %v1654_v13, %v4941_v45 }
 0x172   :  { %v4085_v25 = vsub.f32 %v1656_v53, %v3622_v63  ;;  %v1206_v3 = vmax.f32 %v1205_v59, 0.0  ;;  %v1229_v20 = vmax.f32 %v1228_v0, 0.0  ;;  %v1333_v57 = vmul.f32 %v2954_v8, %v1332_v56 }
 0x173   :  { %4964 = vst [vmem:[#allocation24_spill] sm:$0xff] %v4082_v4  ;;  %v1252_v40 = vmax.f32 %v1251_v31, 0.0  ;;  %v1203_v49 = vmax.f32 %v1202_v30, 0.0  ;;  %v1226_v39 = vmax.f32 %v1225_v28, 0.0  ;;  %v1249_v17 = vmax.f32 %v1248_v12, 0.0 }
 0x174   :  { %4965 = vst [vmem:[#allocation57_spill] sm:$0xff] %v4085_v25  ;;  %v1312_v38 = vmul.f32 %v1311_v55, %v1311_v55  ;;  %v1207_v61 = vadd.f32 0.1, %v1206_v3  ;;  %v1230_v9 = vadd.f32 0.1, %v1229_v20  ;;  %v1347_v45 = vmul.f32 %v4022_v62, %v2933_v41  ;;  %s1850_s25 = smul.f32 %s4382_s14, %s4382_s14 }
 0x175   :  { %v1253_v21 = vadd.f32 0.1, %v1252_v40  ;;  %v1334_v13 = vadd.f32 1.0, %v1333_v57  ;;  %v1348_v53 = vmul.f32 %v4025_v48, %v2936_v34  ;;  %v1350_v56 = vmul.f32 %v4028_v5, %v2939_v22  ;;  %v4966_v40 = vld [vmem:[#allocation28_spill] sm:$0xff] }
 0x176   :  { %v4092_v63 = vmul.f32 %v1312_v38, %v1310_v33  ;;  %2271 = vrcp.f32 %v1207_v61  ;;  %v4100_v30 = vmul.f32 %v4082_v4, %v4082_v4  ;;  %v4102_v46 = vstv %s1661_s22 }
 0x177   :  { %2273 = vrcp.f32 %v1230_v9  ;;  %v1335_v44 = vmax.f32 %v1334_v13, 0.001  ;;  %v1349_v62 = vadd.f32 %v1348_v53, %v1347_v45  ;;  %v1204_v33 = vadd.f32 0.1, %v1203_v49  ;;  %v4969_v45 = vld [vmem:[#allocation56_spill] sm:$0xff] }
 0x178   :  { %v1380_v12 = vmul.f32 %v4092_v63, %v4943_v50  ;;  %2275 = vrcp.f32 %v1253_v21  ;;  %v4108_v48 = vadd.f32 %v1643_v26, %v4035_v47  ;;  %v4112_v5 = vmul.f32 %v4085_v25, %v4085_v25 }
 0x179   :  { %v1227_v59 = vadd.f32 0.1, %v1226_v39  ;;  %v1250_v60 = vadd.f32 0.1, %v1249_v17  ;;  %v1340_v0 = vmul.f32 4.0, %v1335_v44  ;;  %v1351_v31 = vadd.f32 %v1350_v56, %v1349_v62 }
 0x17a   :  { %v4116_v55 = vmul.f32 %v4092_v63, %v4945_v43  ;;  %v4118_v3 = vmul.f32 %v2268_v1, %v2268_v1  ;;  %v1461_v20 = vmul.f32 %v2268_v1, %v3910_v52  ;;  %v1462_v47 = vmul.f32 %v2268_v1, %v4966_v40 }
 0x17b   :  { %v1341_v26 = vmul.f32 %v1340_v0, %v1335_v44  ;;  %v1352_v57 = vmax.f32 %v1351_v31, 0.001  ;;  %v4123_v49 = vadd.f32 %v3993_v32, %v1380_v12  ;;  %v4967_v38 = vstv %s3846_s13  ;;  %v4970_v12 = vld [vmem:[#allocation45_spill] sm:$0xff]  ;;  %s4380_s13 = sld [smem:[#allocation2 + $0x400]] }
 0x17c   :  { %v1464_v39 = vmul.f32 %v2268_v1, %v4967_v38  ;;  %v1426_v17 = vmul.f32 %v4092_v63, %v4950_v11  ;;  %v4130_v61 = vmul.f32 %v2270_v54, %v3971_v19  ;;  %v4133_v9 = vmul.f32 %v2270_v54, %v3984_v16 }
 0x17d   :  { %v4968_v21 = vstv %s3923_s27  ;;  %v1342_v13 = vmul.f32 %v1341_v26, %v4969_v45  ;;  %v1365_v53 = vmul.f32 %v1352_v57, %v1352_v57  ;;  %v1509_v56 = vmul.f32 %v1461_v20, %v4913_v35  ;;  %s4597_s27 = sld [smem:[#allocation8 + $0x381]] }
 0x17e   :  { %v4137_v52 = vmul.f32 %v2270_v54, %v4968_v21  ;;  %v1510_v44 = vmul.f32 %v1462_v47, %v4914_v18  ;;  %v4143_v1 = vadd.f32 %v4130_v61, %v1461_v20  ;;  %v4146_v62 = vadd.f32 %v4133_v9, %v1462_v47 }
 0x17f   :  { %v1512_v16 = vmul.f32 %v1464_v39, %v2928_v27  ;;  %v1343_v54 = vmul.f32 %v1342_v13, %v3958_v15  ;;  %v1366_v0 = vmul.f32 %v4970_v12, %v1365_v53  ;;  %v1515_v40 = vmul.f32 %v4130_v61, %v4913_v35 }
 0x180   :  { %v4149_v19 = vadd.f32 %v4137_v52, %v1464_v39  ;;  %v1511_v31 = vadd.f32 %v1510_v44, %v1509_v56  ;;  %v2272_v26 = vpop.eup %2271  ;;  %v1483_v57 = vmul.f32 %v4143_v1, %v4143_v1  ;;  %v1484_v38 = vmul.f32 %v4146_v62, %v4146_v62 }
 0x181   :  { %v1516_v45 = vmul.f32 %v4133_v9, %v4914_v18  ;;  %v2274_v15 = vpop.eup %2273  ;;  %v1209_v13 = vmul.f32 %v2272_v26, %v1204_v33  ;;  %2277 = vrcp.f32 %v1343_v54  ;;  %v1367_v53 = vadd.f32 1.0, %v1366_v0 }
 0x182   :  { %v1486_v21 = vmul.f32 %v4149_v19, %v4149_v19  ;;  %v1513_v56 = vadd.f32 %v1512_v16, %v1511_v31  ;;  %v2276_v44 = vpop.eup %2275  ;;  %v1232_v28 = vmul.f32 %v2274_v15, %v1227_v59  ;;  %v1485_v32 = vadd.f32 %v1484_v38, %v1483_v57 }
 0x183   :  { %v1517_v11 = vadd.f32 %v1516_v45, %v1515_v40  ;;  %v1518_v43 = vmul.f32 %v4137_v52, %v2928_v27  ;;  %2279 = vlog2.f32 %v1209_v13  ;;  %v1255_v50 = vmul.f32 %v2276_v44, %v1250_v60  ;;  %v4973_v13 = vld [vmem:[#allocation41_spill] sm:$0xff] }
 0x184   :  { %v1368_v12 = vmax.f32 %v1367_v53, 0.001  ;;  %v1514_v25 = vmax.f32 %v1513_v56, 0.001  ;;  %2281 = vlog2.f32 %v1232_v28  ;;  %v1487_v8 = vadd.f32 %v1486_v21, %v1485_v32 }
 0x185   :  { %v1519_v4 = vadd.f32 %v1518_v43, %v1517_v11  ;;  %v1542_v33 = vmul.f32 %v1461_v20, %v2933_v41  ;;  %2283 = vlog2.f32 %v1255_v50  ;;  %v1543_v40 = vmul.f32 %v1462_v47, %v2936_v34 }
 0x186   :  { %v1373_v16 = vmul.f32 4.0, %v1368_v12  ;;  %v1525_v59 = vmul.f32 %v1514_v25, %v4916_v37  ;;  %v4171_v54 = vmul.f32 %v1514_v25, %v4118_v3  ;;  %v1488_v0 = vadd.f32 1e-12, %v1487_v8 }
 0x187   :  { %v1520_v31 = vmax.f32 %v1519_v4, 0.001  ;;  %v1545_v60 = vmul.f32 %v1464_v39, %v2939_v22  ;;  %v1548_v43 = vmul.f32 %v4130_v61, %v2933_v41  ;;  %v1549_v50 = vmul.f32 %v4133_v9, %v2936_v34 }
 0x188   :  { %4971 = vst [vmem:[#allocation25_spill] sm:$0xff] %v4171_v54  ;;  %v1374_v26 = vmul.f32 %v1373_v16, %v1368_v12  ;;  %v4176_v28 = vadd.f32 %v1525_v59, %v2847_v58  ;;  %2285 = vrsqrt.f32 %v1488_v0  ;;  %v1544_v8 = vadd.f32 %v1543_v40, %v1542_v33 }
 0x189   :  { %v1527_v11 = vmul.f32 %v1520_v31, %v4916_v37  ;;  %v1551_v32 = vmul.f32 %v4137_v52, %v2939_v22  ;;  %v1550_v25 = vadd.f32 %v1549_v50, %v1548_v43  ;;  %v1647_v20 = vadd.f32 %v4018_v23, %v4108_v48 }
 0x18a   :  { %v1375_v4 = vmul.f32 %v1374_v26, %v3961_v51  ;;  %v1660_v47 = vadd.f32 %v4112_v5, %v4100_v30  ;;  %v1404_v39 = vadd.f32 %v4003_v24, %v4116_v55  ;;  %v1427_v12 = vadd.f32 %v4007_v6, %v1426_v17  ;;  %v4972_v30 = vld [vmem:[#allocation37_spill] sm:$0xff] }
 0x18b   :  { %v4194_v57 = vadd.f32 %v1527_v11, %v2847_v58  ;;  %v1546_v38 = vadd.f32 %v1545_v60, %v1544_v8  ;;  %v2278_v21 = vpop.eup %2277  ;;  %v1382_v51 = vmul.f32 %v4092_v63, %v4944_v29  ;;  %v1552_v15 = vadd.f32 %v1551_v32, %v1550_v25  ;;  %v4974_v60 = vld [vmem:[#allocation44_spill] sm:$0xff] }
 0x18c   :  { %v1376_v45 = vmul.f32 %v1375_v4, %v3988_v7  ;;  %v1827_v23 = vstv %s4166_s23  ;;  %v1345_v48 = vmul.f32 %v2278_v21, %v4870_v36  ;;  %v1405_v5 = vmul.f32 %v4092_v63, %v4972_v30  ;;  %v4976_v4 = vld [vmem:[#allocation36_spill] sm:$0xff] }
 0x18d   :  { %v1547_v55 = vmax.f32 %v1546_v38, 0.001  ;;  %2287 = vrsqrt.f32 %v1647_v20  ;;  %v2280_v17 = vpop.eup %2279  ;;  %v1428_v53 = vmul.f32 %v4092_v63, %v4973_v13  ;;  %v1553_v7 = vmax.f32 %v1552_v15, 0.001  ;;  %v4978_v38 = vld [vmem:[#allocation59_spill] sm:$0xff] }
 0x18e   :  { %2289 = vrcp.f32 %v1376_v45  ;;  %v1663_v56 = vadd.f32 %v4102_v46, %v1660_v47  ;;  %v2282_v44 = vpop.eup %2281  ;;  %v1211_v33 = vmul.f32 0.6931472, %v2280_v17  ;;  %v1384_v16 = vmul.f32 %v4123_v49, %v1345_v48 }
 0x18f   :  { %v1407_v59 = vmul.f32 %v1404_v39, %v1345_v48  ;;  %v1430_v0 = vmul.f32 %v1427_v12, %v1345_v48  ;;  %v2284_v31 = vpop.eup %2283  ;;  %v1234_v40 = vmul.f32 0.6931472, %v2282_v44  ;;  %v1558_v26 = vmul.f32 %v1547_v55, %v4974_v60  ;;  %v4977_v39 = vld [vmem:[#allocation49_spill] sm:$0xff]  ;;  %v4230_v44 = vld [vmem:[#allocation10 + $0x38] sm:$0xff] }
 0x190   :  { %v1560_v43 = vmul.f32 %v1553_v7, %v4974_v60  ;;  %v4212_v50 = vmul.f32 %v1547_v55, %v4118_v3  ;;  %v1212_v11 = vand.u32 2147483647, %v1211_v33  ;;  %v1257_v63 = vmul.f32 0.6931472, %v2284_v31 }
 0x191   :  { %v1385_v8 = vadd.f32 %v1384_v16, %v4874_v14  ;;  %v1408_v46 = vadd.f32 %v1407_v59, %v4930_v42  ;;  %v1235_v32 = vand.u32 2147483647, %v1234_v40  ;;  %v1431_v49 = vadd.f32 %v1430_v0, %v4931_v10  ;;  %v4236_v16 = vld [vmem:[%s4717_s5] sm:$0xff] }
 0x192   :  { %4975 = vst [vmem:[#allocation31_spill] sm:$0xff] %v4212_v50  ;;  %v4218_v25 = vadd.f32 %v1558_v26, %v4976_v4  ;;  %v4221_v20 = vadd.f32 %v1560_v43, %v4976_v4  ;;  %v2286_v47 = vpop.eup %2285  ;;  %v1213_v12 = vadd.f32 %v1212_v11, %v4977_v39  ;;  %v1258_v3 = vand.u32 2147483647, %v1257_v63  ;;  %v4252_v26 = vld [vmem:[#allocation10 + $0x48] sm:$0xff]  ;;  %v4985_v10 = vld [vmem:[#allocation43_spill] sm:$0xff] }
 0x193   :  { %v1386_v21 = vmul.f32 %v1385_v8, %v4978_v38  ;;  %v1409_v45 = vmul.f32 %v1408_v46, %v4978_v38  ;;  %v1432_v15 = vmul.f32 %v1431_v49, %v4978_v38  ;;  %v1490_v48 = vmul.f32 %v2286_v47, %v4143_v1  ;;  %v4981_v46 = vld [vmem:[#allocation19_spill] sm:$0xff] }
 0x194   :  { %v1491_v55 = vmul.f32 %v2286_v47, %v4146_v62  ;;  %v1492_v17 = vmul.f32 %v2286_v47, %v4149_v19  ;;  %v1236_v7 = vadd.f32 %v1235_v32, %v1213_v12  ;;  %v1383_v33 = vadd.f32 %v4230_v44, %v1382_v51 }
 0x195   :  { %2291 = vrsqrt.f32 %v1663_v56  ;;  %v4239_v59 = vsub.f32 %v1827_v23, %v4236_v16  ;;  %v1493_v1 = vmul.f32 %v1490_v48, %v4130_v61  ;;  %v1829_v0 = vstv %s4203_s1  ;;  %v4249_v56 = vld [vmem:[#allocation10 + $0x40] sm:$0xff] }
 0x196   :  { %v1494_v62 = vmul.f32 %v1491_v55, %v4133_v9  ;;  %v1496_v19 = vmul.f32 %v1492_v17, %v4137_v52  ;;  %v4247_v51 = vadd.f32 %v1258_v3, %v1236_v7  ;;  %v1406_v40 = vadd.f32 %v4249_v56, %v1405_v5 }
 0x197   :  { %v4245_v31 = vpop.eup %2287  ;;  %v1429_v23 = vadd.f32 %v4252_v26, %v1428_v53  ;;  %v1503_v61 = vmul.f32 %v1490_v48, %v4913_v35  ;;  %v4980_v43 = vstv %s3856_s16  ;;  %v1504_v63 = vmul.f32 %v1491_v55, %v4914_v18  ;;  %v4267_v53 = vld [vmem:[%s4717_s5 + $0x8] sm:$0xff]  ;;  %s4351_s5 = sld [smem:[#allocation6 + $0x402]] }
 0x198   :  { %4979 = vst [vmem:[#allocation58_spill] sm:$0xff] %v4247_v51  ;;  %v2290_v9 = vpop.eup %2289  ;;  %v1391_v11 = vmul.f32 %v4980_v43, %v1386_v21  ;;  %v1495_v52 = vadd.f32 %v1494_v62, %v1493_v1  ;;  %v1506_v8 = vmul.f32 %v1492_v17, %v2928_v27  ;;  %v4982_v49 = vstv %s3927_s28  ;;  %v4984_v51 = vld [vmem:[#allocation40_spill] sm:$0xff] }
 0x199   :  { %v1378_v32 = vmul.f32 %v2290_v9, %v4981_v46  ;;  %v1414_v47 = vmul.f32 %v4982_v49, %v1409_v45  ;;  %v1536_v5 = vmul.f32 %v1490_v48, %v2933_v41  ;;  %v4270_v39 = vsub.f32 %v1829_v0, %v4267_v53 }
 0x19a   :  { %v4983_v12 = vstv %s3929_s0  ;;  %v1497_v38 = vadd.f32 %v1496_v19, %v1495_v52  ;;  %v1505_v21 = vadd.f32 %v1504_v63, %v1503_v61  ;;  %v1537_v7 = vmul.f32 %v1491_v55, %v2936_v34  ;;  %v4986_v19 = vld [vmem:[#allocation46_spill] sm:$0xff]  ;;  %v4988_v52 = vld [vmem:[#allocation51_spill] sm:$0xff] }
 0x19b   :  { %v1437_v3 = vmul.f32 %v4983_v12, %v1432_v15  ;;  %v1387_v1 = vmul.f32 %v1383_v33, %v1378_v32  ;;  %v1410_v62 = vmul.f32 %v1406_v40, %v1378_v32  ;;  %v1433_v9 = vmul.f32 %v1429_v23, %v1378_v32  ;;  %v4987_v23 = vld [vmem:[#allocation55_spill] sm:$0xff] }
 0x19c   :  { %v1539_v45 = vmul.f32 %v1492_v17, %v2939_v22  ;;  %v1392_v48 = vmax.f32 %v1391_v11, 0.0  ;;  %v1498_v43 = vmax.f32 %v1497_v38, 0.001  ;;  %v1507_v49 = vadd.f32 %v1506_v8, %v1505_v21 }
 0x19d   :  { %v1538_v50 = vadd.f32 %v1537_v7, %v1536_v5  ;;  %v1388_v54 = vadd.f32 %v1387_v1, %v4984_v51  ;;  %v1411_v0 = vadd.f32 %v1410_v62, %v4985_v10  ;;  %v1415_v15 = vmax.f32 %v1414_v47, 0.0  ;;  %s1834_s24 = smul.f32 %s4351_s5, %s4351_s5 }
 0x19e   :  { %v1434_v61 = vadd.f32 %v1433_v9, %v4986_v19  ;;  %v1499_v55 = vsub.f32 1.0, %v1498_v43  ;;  %v1508_v33 = vmax.f32 %v1507_v49, 0.001  ;;  %v4281_v17 = vmul.f32 %v4245_v31, %v4987_v23  ;;  %v4993_v43 = vld [vmem:[#allocation24_spill] sm:$0xff] }
 0x19f   :  { %v1540_v40 = vadd.f32 %v1539_v45, %v1538_v50  ;;  %v2292_v11 = vpop.eup %2291  ;;  %v1389_v63 = vmul.f32 %v1388_v54, %v4988_v52  ;;  %v1412_v8 = vmul.f32 %v1411_v0, %v4988_v52  ;;  %v4288_v47 = vmul.f32 %v4245_v31, %v4031_v2  ;;  %v4994_v2 = vld [vmem:[#allocation42_spill] sm:$0xff] }
 0x1a0   :  { %v1435_v32 = vmul.f32 %v1434_v61, %v4988_v52  ;;  %v1500_v5 = vmul.f32 %v1499_v55, %v1499_v55  ;;  %v1521_v12 = vmul.f32 %v1508_v33, %v1508_v33  ;;  %v4989_v50 = vstv %s3939_s10  ;;  %v4995_v52 = vld [vmem:[#allocation57_spill] sm:$0xff]  ;;  %s4669_s10 = sld [smem:[#allocation8 + $0x402]] }
 0x1a1   :  { %v1541_v38 = vmax.f32 %v1540_v40, 0.001  ;;  %v4293_v21 = vmul.f32 %v4245_v31, %v4989_v50  ;;  %v4990_v7 = vstv %s3856_s16  ;;  %v4991_v62 = vstv %s3927_s28  ;;  %s4393_s16 = sld [smem:[#allocation2 + $0x401]]  ;;  %s4602_s28 = sld [smem:[#allocation8 + $0x382]] }
 0x1a2   :  { %v1394_v1 = vmul.f32 %v4990_v7, %v1389_v63  ;;  %v1417_v54 = vmul.f32 %v4991_v62, %v1412_v8  ;;  %v4992_v9 = vstv %s3929_s0  ;;  %v4302_v49 = vmul.f32 %v2292_v11, %v4993_v43  ;;  %s4665_s0 = sld [smem:[#allocation8 + $0x400]] }
 0x1a3   :  { %v1440_v45 = vmul.f32 %v4992_v9, %v1435_v32  ;;  %v1501_v0 = vmul.f32 %v1500_v5, %v1500_v5  ;;  %v1522_v61 = vmul.f32 %v4994_v2, %v1521_v12  ;;  %v1554_v23 = vmul.f32 %v1541_v38, %v1541_v38  ;;  %v4997_v32 = vld [vmem:[#allocation45_spill] sm:$0xff] }
 0x1a4   :  { %v4306_v33 = vmul.f32 %v2292_v11, %v4995_v52  ;;  %v1395_v40 = vmax.f32 %v1394_v1, 0.0  ;;  %v1418_v19 = vmax.f32 %v1417_v54, 0.0  ;;  %v4996_v10 = vstv %s4053_s21 }
 0x1a5   :  { %v1441_v50 = vmax.f32 %v1440_v45, 0.0  ;;  %v4310_v51 = vmul.f32 %v2292_v11, %v4996_v10  ;;  %v1393_v63 = vadd.f32 0.1, %v1392_v48  ;;  %v1438_v8 = vmax.f32 %v1437_v3, 0.0  ;;  %v4998_v11 = vld [vmem:[#allocation26_spill] sm:$0xff] }
 0x1a6   :  { %v1523_v7 = vadd.f32 1.0, %v1522_v61  ;;  %v1555_v62 = vmul.f32 %v4997_v32, %v1554_v23  ;;  %v1396_v9 = vadd.f32 0.1, %v1395_v40  ;;  %v1419_v43 = vadd.f32 0.1, %v1418_v19  ;;  %v4999_v40 = vld [vmem:[#allocation27_spill] sm:$0xff] }
 0x1a7   :  { %v1442_v5 = vadd.f32 0.1, %v1441_v50  ;;  %v4313_v42 = vmul.f32 %v1501_v0, %v1499_v55  ;;  %v1416_v12 = vadd.f32 0.1, %v1415_v15  ;;  %v4317_v1 = vmul.f32 %v4239_v59, %v4239_v59 }
 0x1a8   :  { %v1524_v38 = vmax.f32 %v1523_v7, 0.001  ;;  %v1556_v52 = vadd.f32 1.0, %v1555_v62  ;;  %2293 = vrcp.f32 %v1396_v9  ;;  %v4321_v10 = vadd.f32 %v4302_v49, %v4281_v17 }
 0x1a9   :  { %v4325_v3 = vadd.f32 %v4306_v33, %v4288_v47  ;;  %v4329_v48 = vadd.f32 %v4310_v51, %v4293_v21  ;;  %2295 = vrcp.f32 %v1419_v43  ;;  %v1439_v15 = vadd.f32 0.1, %v1438_v8 }
 0x1aa   :  { %v1529_v19 = vmul.f32 4.0, %v1524_v38  ;;  %v1557_v55 = vmax.f32 %v1556_v52, 0.001  ;;  %2297 = vrcp.f32 %v1442_v5  ;;  %v4333_v54 = vmul.f32 %v4313_v42, %v4998_v11 }
 0x1ab   :  { %v4337_v45 = vmul.f32 %v4313_v42, %v4944_v29  ;;  %v4341_v0 = vmul.f32 %v4245_v31, %v4245_v31  ;;  %v4345_v50 = vmul.f32 %v4313_v42, %v4999_v40  ;;  %v4349_v8 = vmul.f32 %v4313_v42, %v4972_v30 }
 0x1ac   :  { %v1530_v61 = vmul.f32 %v1529_v19, %v1524_v38  ;;  %v1562_v23 = vmul.f32 4.0, %v1557_v55  ;;  %v1672_v7 = vmul.f32 %v4321_v10, %v4321_v10  ;;  %v1673_v62 = vmul.f32 %v4325_v3, %v4325_v3  ;;  %v5000_v38 = vld [vmem:[#allocation29_spill] sm:$0xff] }
 0x1ad   :  { %v1675_v31 = vmul.f32 %v4329_v48, %v4329_v48  ;;  %v1698_v9 = vmul.f32 %v4281_v17, %v4913_v35  ;;  %v1615_v52 = vmul.f32 %v4313_v42, %v5000_v38  ;;  %v1699_v19 = vmul.f32 %v4288_v47, %v4914_v18 }
 0x1ae   :  { %v1531_v43 = vmul.f32 %v1530_v61, %v4176_v28  ;;  %v1563_v5 = vmul.f32 %v1562_v23, %v1557_v55  ;;  %v1674_v30 = vadd.f32 %v1673_v62, %v1672_v7  ;;  %v1701_v40 = vmul.f32 %v4293_v21, %v2928_v27 }
 0x1af   :  { %v1704_v29 = vmul.f32 %v4302_v49, %v4913_v35  ;;  %v1705_v11 = vmul.f32 %v4306_v33, %v4914_v18  ;;  %v1700_v55 = vadd.f32 %v1699_v19, %v1698_v9  ;;  %v1707_v61 = vmul.f32 %v4310_v51, %v2928_v27 }
 0x1b0   :  { %v1532_v32 = vmul.f32 %v1531_v43, %v4194_v57  ;;  %v1564_v28 = vmul.f32 %v1563_v5, %v4218_v25  ;;  %v1676_v23 = vadd.f32 %v1675_v31, %v1674_v30  ;;  %v1731_v7 = vmul.f32 %v4281_v17, %v2933_v41 }
 0x1b1   :  { %v1706_v38 = vadd.f32 %v1705_v11, %v1704_v29  ;;  %v1732_v62 = vmul.f32 %v4288_v47, %v2936_v34  ;;  %v1702_v25 = vadd.f32 %v1701_v40, %v1700_v55  ;;  %v1734_v9 = vmul.f32 %v4293_v21, %v2939_v22 }
 0x1b2   :  { %2299 = vrcp.f32 %v1532_v32  ;;  %v1565_v57 = vmul.f32 %v1564_v28, %v4221_v20  ;;  %v2294_v43 = vpop.eup %2293  ;;  %v1677_v30 = vadd.f32 1e-12, %v1676_v23  ;;  %v1737_v17 = vmul.f32 %v4302_v49, %v2933_v41 }
 0x1b3   :  { %v1708_v29 = vadd.f32 %v1707_v61, %v1706_v38  ;;  %v1733_v11 = vadd.f32 %v1732_v62, %v1731_v7  ;;  %v2296_v47 = vpop.eup %2295  ;;  %v1398_v31 = vmul.f32 %v2294_v43, %v1393_v63  ;;  %v1703_v32 = vmax.f32 %v1702_v25, 0.001 }
 0x1b4   :  { %2301 = vrcp.f32 %v1565_v57  ;;  %v1738_v20 = vmul.f32 %v4306_v33, %v2936_v34  ;;  %v2298_v40 = vpop.eup %2297  ;;  %v1421_v21 = vmul.f32 %v2296_v47, %v1416_v12  ;;  %v1740_v7 = vmul.f32 %v4310_v51, %v2939_v22 }
 0x1b5   :  { %2303 = vrsqrt.f32 %v1677_v30  ;;  %v1709_v5 = vmax.f32 %v1708_v29, 0.001  ;;  %v1735_v38 = vadd.f32 %v1734_v9, %v1733_v11  ;;  %v1444_v19 = vmul.f32 %v2298_v40, %v1439_v15 }
 0x1b6   :  { %2305 = vlog2.f32 %v1398_v31  ;;  %v1714_v28 = vmul.f32 %v1703_v32, %v4916_v37  ;;  %v4399_v63 = vmul.f32 %v1703_v32, %v4341_v0  ;;  %v1739_v23 = vadd.f32 %v1738_v20, %v1737_v17  ;;  %v5003_v17 = vld [vmem:[#allocation54_spill] sm:$0xff] }
 0x1b7   :  { %2307 = vlog2.f32 %v1421_v21  ;;  %v1716_v55 = vmul.f32 %v1709_v5, %v4916_v37  ;;  %v1736_v61 = vmax.f32 %v1735_v38, 0.001  ;;  %v1832_v15 = vmul.f32 %v4270_v39, %v4270_v39 }
 0x1b8   :  { %5001 = vst [vmem:[#allocation32_spill] sm:$0xff] %v4399_v63  ;;  %2309 = vlog2.f32 %v1444_v19  ;;  %v4403_v12 = vadd.f32 %v1714_v28, %v2847_v58  ;;  %v1835_v9 = vstv %s1834_s24  ;;  %v1617_v43 = vmul.f32 %v4313_v42, %v4973_v13  ;;  %v5013_v63 = vld [vmem:[#allocation46_spill] sm:$0xff] }
 0x1b9   :  { %v4410_v62 = vadd.f32 %v1716_v55, %v2847_v58  ;;  %v1747_v57 = vmul.f32 %v1736_v61, %v4974_v60  ;;  %v4414_v25 = vmul.f32 %v1736_v61, %v4341_v0  ;;  %v1741_v30 = vadd.f32 %v1740_v7, %v1739_v23 }
 0x1ba   :  { %v1833_v29 = vadd.f32 %v1832_v15, %v4317_v1  ;;  %v1843_v11 = vstv %s4380_s13  ;;  %v1570_v47 = vadd.f32 %v5003_v17, %v4333_v54  ;;  %v1593_v31 = vadd.f32 %v4003_v24, %v4345_v50 }
 0x1bb   :  { %5002 = vst [vmem:[#allocation38_spill] sm:$0xff] %v4414_v25  ;;  %v1616_v0 = vadd.f32 %v4007_v6, %v1615_v52  ;;  %v4428_v32 = vadd.f32 %v1747_v57, %v4976_v4  ;;  %v1742_v40 = vmax.f32 %v1741_v30, 0.001  ;;  %v4432_v1 = vsub.f32 %v1843_v11, %v4236_v16  ;;  %v5004_v11 = vld [vmem:[#allocation30_spill] sm:$0xff]  ;;  %v5010_v25 = vld [vmem:[#allocation31_spill] sm:$0xff] }
 0x1bc   :  { %v2300_v42 = vpop.eup %2299  ;;  %v1836_v21 = vadd.f32 %v1835_v9, %v1833_v29  ;;  %v1572_v54 = vadd.f32 %v4230_v44, %v4337_v45  ;;  %v1595_v24 = vadd.f32 %v4249_v56, %v4349_v8  ;;  %v1845_v50 = vstv %s4393_s16 }
 0x1bd   :  { %v1534_v5 = vmul.f32 %v2300_v42, %v4870_v36  ;;  %v1618_v52 = vadd.f32 %v4252_v26, %v1617_v43  ;;  %v1749_v38 = vmul.f32 %v1742_v40, %v4974_v60  ;;  %v4443_v28 = vstv %s1850_s25  ;;  %v5005_v42 = vld [vmem:[#allocation34_spill] sm:$0xff] }
 0x1be   :  { %v2302_v6 = vpop.eup %2301  ;;  %2311 = vrsqrt.f32 %v1836_v21  ;;  %v4450_v8 = vsub.f32 %v1845_v50, %v4267_v53  ;;  %v4454_v57 = vmul.f32 %v4432_v1, %v4432_v1  ;;  %v5006_v50 = vld [vmem:[#allocation25_spill] sm:$0xff] }
 0x1bf   :  { %v2304_v55 = vpop.eup %2303  ;;  %v1567_v16 = vmul.f32 %v2302_v6, %v4981_v46  ;;  %v1573_v61 = vmul.f32 %v1570_v47, %v1534_v5  ;;  %v1596_v23 = vmul.f32 %v1593_v31, %v1534_v5  ;;  %v1619_v7 = vmul.f32 %v1616_v0, %v1534_v5 }
 0x1c0   :  { %v2306_v15 = vpop.eup %2305  ;;  %v4447_v45 = vadd.f32 %v1749_v38, %v4976_v4  ;;  %v5007_v38 = vld [vmem:[#allocation40_spill] sm:$0xff] }
 0x1c1   :  { %v2308_v9 = vpop.eup %2307  ;;  %v1400_v43 = vmul.f32 0.6931472, %v2306_v15  ;;  %v1574_v30 = vadd.f32 %v1573_v61, %v4874_v14  ;;  %v1576_v29 = vmul.f32 %v1572_v54, %v1567_v16  ;;  %v1597_v17 = vadd.f32 %v1596_v23, %v5004_v11  ;;  %v5008_v61 = vld [vmem:[#allocation43_spill] sm:$0xff] }
 0x1c2   :  { %v2310_v47 = vpop.eup %2309  ;;  %v1423_v31 = vmul.f32 0.6931472, %v2308_v9  ;;  %v1599_v0 = vmul.f32 %v1595_v24, %v1567_v16  ;;  %v1620_v40 = vadd.f32 %v1619_v7, %v5005_v42  ;;  %v1622_v53 = vmul.f32 %v1618_v52, %v1567_v16  ;;  %v5009_v24 = vld [vmem:[#allocation58_spill] sm:$0xff] }
 0x1c3   :  { %v1401_v21 = vand.u32 2147483647, %v1400_v43  ;;  %v1446_v5 = vmul.f32 0.6931472, %v2310_v47  ;;  %v1575_v6 = vmul.f32 %v1574_v30, %v5006_v50  ;;  %v1577_v15 = vadd.f32 %v1576_v29, %v5007_v38 }
 0x1c4   :  { %v1424_v19 = vand.u32 2147483647, %v1423_v31  ;;  %v1598_v54 = vmul.f32 %v1597_v17, %v5006_v50  ;;  %v1600_v23 = vadd.f32 %v1599_v0, %v5008_v61  ;;  %v1621_v9 = vmul.f32 %v1620_v40, %v5006_v50 }
 0x1c5   :  { %v1402_v20 = vadd.f32 %v1401_v21, %v5009_v24  ;;  %v1447_v7 = vand.u32 2147483647, %v1446_v5  ;;  %v1578_v52 = vmul.f32 %v1577_v15, %v5010_v25  ;;  %v1679_v16 = vmul.f32 %v2304_v55, %v4321_v10 }
 0x1c6   :  { %v5011_v43 = vstv %s3951_s12  ;;  %v1601_v29 = vmul.f32 %v1600_v23, %v5010_v25  ;;  %v5012_v47 = vstv %s3953_s2  ;;  %v1623_v17 = vadd.f32 %v1622_v53, %v5013_v63  ;;  %s2030_s12 = sshll.u32 %s2499_s11, 4  ;;  %s2031_s12 = int_to_ptr.vmem [resolvable:$true] %s2030_s12 }
 0x1c7   :  { %v1580_v30 = vmul.f32 %v5011_v43, %v1575_v6  ;;  %v1603_v31 = vmul.f32 %v5012_v47, %v1598_v54  ;;  %v1425_v38 = vadd.f32 %v1424_v19, %v1402_v20  ;;  %v5014_v0 = vmov %v5011_v43  ;;  %s2460_s2 = scalar_lea.vmem %s2031_s12, 640  ;;  %p2465_p4 = scmp.lt.s32.totalorder %s2031_s12, %s2031_s12 }
 0x1c8   :  { %v1583_v40 = vmul.f32 %v5014_v0, %v1578_v52  ;;  %v1680_v21 = vmul.f32 %v2304_v55, %v4325_v3  ;;  %v1682_v5 = vmul.f32 %v1679_v16, %v4302_v49  ;;  %v5015_v50 = vmov %v5012_v47  ;;  %v4488_v52 = vpop.eup %2311  ;;  %p2461_p3 = scmp.ne.s32.totalorder %s2031_s12, %s2460_s2  ;;  %p2466_p5 = scmp.lt.s32.totalorder %s2460_s2, %s2460_s2 }
 0x1c9   :  { %v1606_v15 = vmul.f32 %v5015_v50, %v1601_v29  ;;  %v1624_v10 = vmul.f32 %v1623_v17, %v5010_v25  ;;  %v1681_v6 = vmul.f32 %v2304_v55, %v4329_v48  ;;  %v1848_v23 = vmul.f32 %v4450_v8, %v4450_v8 }
 0x1ca   :  { %v4483_v54 = vadd.f32 %v1447_v7, %v1425_v38  ;;  %v1584_v53 = vmax.f32 %v1583_v40, 0.0  ;;  %v5016_v20 = vstv %s4389_s15  ;;  %v1683_v24 = vmul.f32 %v1680_v21, %v4306_v33  ;;  %p2467_p6 = por %p2466_p5, %p2465_p4 }
 0x1cb   :  { %v1626_v19 = vmul.f32 %v5016_v20, %v1621_v9  ;;  %v1581_v3 = vmax.f32 %v1580_v30, 0.0  ;;  %v1604_v49 = vmax.f32 %v1603_v31, 0.0  ;;  %v1607_v43 = vmax.f32 %v1606_v15, 0.0 }
 0x1cc   :  { %v5017_v29 = vmov %v5016_v20  ;;  %v1585_v25 = vadd.f32 0.1, %v1584_v53  ;;  %v1684_v17 = vadd.f32 %v1683_v24, %v1682_v5  ;;  %v1685_v48 = vmul.f32 %v1681_v6, %v4310_v51  ;;  %p2468_p7 = pnand %p2467_p6, %p2461_p3 }
 0x1cd   :  { %v1629_v47 = vmul.f32 %v5017_v29, %v1624_v10  ;;  %v1692_v55 = vmul.f32 %v1679_v16, %v4913_v35  ;;  %v1608_v38 = vadd.f32 0.1, %v1607_v43  ;;  %v1693_v0 = vmul.f32 %v1680_v21, %v4914_v18 }
 0x1ce   :  { %v1695_v9 = vmul.f32 %v1681_v6, %v2928_v27  ;;  %2313 = vrcp.f32 %v1585_v25  ;;  %v1686_v33 = vadd.f32 %v1685_v48, %v1684_v17  ;;  %v1725_v30 = vmul.f32 %v1679_v16, %v2933_v41 }
 0x1cf   :  { %v1630_v7 = vmax.f32 %v1629_v47, 0.0  ;;  %v1726_v31 = vmul.f32 %v1680_v21, %v2936_v34  ;;  %2315 = vrcp.f32 %v1608_v38  ;;  %v1694_v5 = vadd.f32 %v1693_v0, %v1692_v55 }
 0x1d0   :  { %v1728_v51 = vmul.f32 %v1681_v6, %v2939_v22  ;;  %v1627_v50 = vmax.f32 %v1626_v19, 0.0  ;;  %v1687_v15 = vmax.f32 %v1686_v33, 0.001  ;;  %v4501_v53 = vmul.f32 %v4488_v52, %v4239_v59 }
 0x1d1   :  { %v1631_v40 = vadd.f32 0.1, %v1630_v7  ;;  %v1727_v10 = vadd.f32 %v1726_v31, %v1725_v30  ;;  %v1696_v20 = vadd.f32 %v1695_v9, %v1694_v5  ;;  %v4505_v24 = vmul.f32 %v4488_v52, %v4270_v39 }
 0x1d2   :  { %v5018_v16 = vstv %s4351_s5  ;;  %v1688_v43 = vsub.f32 1.0, %v1687_v15  ;;  %v1849_v6 = vadd.f32 %v1848_v23, %v4454_v57  ;;  %v1887_v19 = vmul.f32 %v4501_v53, %v4913_v35 }
 0x1d3   :  { %2317 = vrcp.f32 %v1631_v40  ;;  %v4510_v21 = vmul.f32 %v4488_v52, %v5018_v16  ;;  %v1729_v29 = vadd.f32 %v1728_v51, %v1727_v10  ;;  %v1697_v47 = vmax.f32 %v1696_v20, 0.001 }
 0x1d4   :  { %v1888_v59 = vmul.f32 %v4505_v24, %v4914_v18  ;;  %v1920_v39 = vmul.f32 %v4501_v53, %v2933_v41  ;;  %v1689_v17 = vmul.f32 %v1688_v43, %v1688_v43  ;;  %v1852_v55 = vadd.f32 %v4443_v28, %v1849_v6  ;;  %v5019_v28 = vld [vmem:[#allocation45_spill] sm:$0xff] }
 0x1d5   :  { %v1890_v25 = vmul.f32 %v4510_v21, %v2928_v27  ;;  %v1730_v48 = vmax.f32 %v1729_v29, 0.001  ;;  %v1921_v57 = vmul.f32 %v4505_v24, %v2936_v34  ;;  %v1582_v23 = vadd.f32 0.1, %v1581_v3 }
 0x1d6   :  { %v1710_v38 = vmul.f32 %v1697_v47, %v1697_v47  ;;  %v1889_v7 = vadd.f32 %v1888_v59, %v1887_v19  ;;  %v1923_v0 = vmul.f32 %v4510_v21, %v2939_v22  ;;  %v1605_v9 = vadd.f32 0.1, %v1604_v49 }
 0x1d7   :  { %v1743_v33 = vmul.f32 %v1730_v48, %v1730_v48  ;;  %2319 = vrsqrt.f32 %v1852_v55  ;;  %v1922_v30 = vadd.f32 %v1921_v57, %v1920_v39  ;;  %v1628_v51 = vadd.f32 0.1, %v1627_v50 }
 0x1d8   :  { %v1711_v31 = vmul.f32 %v4994_v2, %v1710_v38  ;;  %v1891_v40 = vadd.f32 %v1890_v25, %v1889_v7  ;;  %v2314_v5 = vpop.eup %2313  ;;  %v1690_v15 = vmul.f32 %v1689_v17, %v1689_v17  ;;  %v1838_v50 = vmul.f32 %v4488_v52, %v4488_v52 }
 0x1d9   :  { %v1744_v10 = vmul.f32 %v5019_v28, %v1743_v33  ;;  %v1924_v20 = vadd.f32 %v1923_v0, %v1922_v30  ;;  %v2316_v16 = vpop.eup %2315  ;;  %v1587_v3 = vmul.f32 %v2314_v5, %v1582_v23  ;;  %v1856_v57 = vstv %s4382_s14  ;;  %v5021_v30 = vld [vmem:[#allocation26_spill] sm:$0xff] }
 0x1da   :  { %v1712_v29 = vadd.f32 1.0, %v1711_v31  ;;  %v1610_v6 = vmul.f32 %v2316_v16, %v1605_v9  ;;  %v1892_v59 = vmax.f32 %v1891_v40, 0.001  ;;  %v1691_v48 = vmul.f32 %v1690_v15, %v1688_v43  ;;  %v5022_v40 = vld [vmem:[#allocation35_spill] sm:$0xff] }
 0x1db   :  { %v1745_v19 = vadd.f32 1.0, %v1744_v10  ;;  %2321 = vlog2.f32 %v1587_v3  ;;  %v1925_v0 = vmax.f32 %v1924_v20, 0.001 }
 0x1dc   :  { %v1713_v49 = vmax.f32 %v1712_v29, 0.001  ;;  %2323 = vlog2.f32 %v1610_v6  ;;  %v1903_v38 = vmul.f32 %v1892_v59, %v4916_v37  ;;  %v4532_v7 = vmul.f32 %v1892_v59, %v1838_v50 }
 0x1dd   :  { %v2318_v47 = vpop.eup %2317  ;;  %v1746_v25 = vmax.f32 %v1745_v19, 0.001  ;;  %v1758_v31 = vmul.f32 %v1691_v48, %v5021_v30  ;;  %v4536_v43 = vmul.f32 %v1691_v48, %v5022_v40  ;;  %v1936_v16 = vmul.f32 %v1925_v0, %v4974_v60 }
 0x1de   :  { %v1633_v39 = vmul.f32 %v2318_v47, %v1628_v51  ;;  %v1718_v55 = vmul.f32 4.0, %v1713_v49  ;;  %5020 = vst [vmem:[#allocation39_spill] sm:$0xff] %v4532_v7  ;;  %v4549_v20 = vadd.f32 %v1903_v38, %v2847_v58  ;;  %v4552_v3 = vmul.f32 %v1925_v0, %v1838_v50  ;;  %v5024_v38 = vld [vmem:[#allocation27_spill] sm:$0xff] }
 0x1df   :  { %v1751_v17 = vmul.f32 4.0, %v1746_v25  ;;  %v1781_v0 = vmul.f32 %v1691_v48, %v5024_v38 }
 0x1e0   :  { %2325 = vlog2.f32 %v1633_v39  ;;  %v1719_v23 = vmul.f32 %v1718_v55, %v1713_v49  ;;  %5023 = vst [vmem:[#allocation20_spill] sm:$0xff] %v4552_v3 }
 0x1e1   :  { %v2320_v9 = vpop.eup %2319  ;;  %v1752_v33 = vmul.f32 %v1751_v17, %v1746_v25 }
 0x1e2   :  { %v1720_v5 = vmul.f32 %v1719_v23, %v4403_v12  ;;  %v4540_v52 = vmul.f32 %v2320_v9, %v4432_v1  ;;  %v4543_v51 = vmul.f32 %v2320_v9, %v4450_v8  ;;  %v4545_v15 = vmul.f32 %v2320_v9, %v1856_v57 }
 0x1e3   :  { %v1753_v10 = vmul.f32 %v1752_v33, %v4428_v32  ;;  %v4588_v33 = vadd.f32 %v1936_v16, %v4976_v4 }
 0x1e4   :  { %v1721_v29 = vmul.f32 %v1720_v5, %v4410_v62  ;;  %v4557_v12 = vadd.f32 %v4540_v52, %v4501_v53  ;;  %v4561_v1 = vadd.f32 %v4543_v51, %v4505_v24  ;;  %v4565_v32 = vadd.f32 %v4545_v15, %v4510_v21 }
 0x1e5   :  { %v1754_v8 = vmul.f32 %v1753_v10, %v4447_v45  ;;  %v1893_v6 = vmul.f32 %v4540_v52, %v4913_v35  ;;  %v1894_v62 = vmul.f32 %v4543_v51, %v4914_v18  ;;  %v1896_v53 = vmul.f32 %v4545_v15, %v2928_v27  ;;  %v2322_v19 = vpop.eup %2321 }
 0x1e6   :  { %2327 = vrcp.f32 %v1721_v29  ;;  %v1861_v24 = vmul.f32 %v4557_v12, %v4557_v12  ;;  %v1862_v21 = vmul.f32 %v4561_v1, %v4561_v1  ;;  %v1864_v45 = vmul.f32 %v4565_v32, %v4565_v32  ;;  %v2324_v47 = vpop.eup %2323 }
 0x1e7   :  { %v1589_v49 = vmul.f32 0.6931472, %v2322_v19  ;;  %2329 = vrcp.f32 %v1754_v8  ;;  %v1895_v59 = vadd.f32 %v1894_v62, %v1893_v6  ;;  %v1926_v39 = vmul.f32 %v4540_v52, %v2933_v41  ;;  %v5025_v62 = vld [vmem:[#allocation37_spill] sm:$0xff] }
 0x1e8   :  { %v1612_v25 = vmul.f32 0.6931472, %v2324_v47  ;;  %v1863_v55 = vadd.f32 %v1862_v21, %v1861_v24  ;;  %v1927_v50 = vmul.f32 %v4543_v51, %v2936_v34  ;;  %v1929_v17 = vmul.f32 %v4545_v15, %v2939_v22  ;;  %v5026_v24 = vld [vmem:[#allocation29_spill] sm:$0xff] }
 0x1e9   :  { %v1590_v23 = vand.u32 2147483647, %v1589_v49  ;;  %v1897_v9 = vadd.f32 %v1896_v53, %v1895_v59  ;;  %v1783_v19 = vmul.f32 %v1691_v48, %v5025_v62  ;;  %v1804_v21 = vmul.f32 %v1691_v48, %v5026_v24 }
 0x1ea   :  { %v2326_v57 = vpop.eup %2325  ;;  %v1613_v5 = vand.u32 2147483647, %v1612_v25  ;;  %v1865_v29 = vadd.f32 %v1864_v45, %v1863_v55  ;;  %v1928_v8 = vadd.f32 %v1927_v50, %v1926_v39  ;;  %v1806_v49 = vmul.f32 %v1691_v48, %v4973_v13  ;;  %v4599_v45 = vld [vmem:[#allocation9 + $0x38] sm:$0xff]  ;;  %v4606_v48 = vld [vmem:[#allocation9 + $0x40] sm:$0xff]  ;;  %v4609_v55 = vld [vmem:[#allocation9 + $0x48] sm:$0xff] }
 0x1eb   :  { %v1635_v10 = vmul.f32 0.6931472, %v2326_v57  ;;  %v1591_v6 = vadd.f32 %v1590_v23, %v4483_v54  ;;  %v1898_v47 = vmax.f32 %v1897_v9, 0.001  ;;  %v1759_v54 = vadd.f32 %v4599_v45, %v1758_v31 }
 0x1ec   :  { %v1866_v7 = vadd.f32 1e-12, %v1865_v29  ;;  %v1930_v40 = vadd.f32 %v1929_v17, %v1928_v8  ;;  %v1782_v25 = vadd.f32 %v4606_v48, %v1781_v0  ;;  %v1784_v31 = vadd.f32 %v4249_v56, %v1783_v19 }
 0x1ed   :  { %v1636_v3 = vand.u32 2147483647, %v1635_v10  ;;  %v1614_v16 = vadd.f32 %v1613_v5, %v1591_v6  ;;  %v1905_v53 = vmul.f32 %v1898_v47, %v4916_v37  ;;  %v1805_v37 = vadd.f32 %v4609_v55, %v1804_v21  ;;  %v5027_v47 = vld [vmem:[#allocation40_spill] sm:$0xff] }
 0x1ee   :  { %2331 = vrsqrt.f32 %v1866_v7  ;;  %v1931_v59 = vmax.f32 %v1930_v40, 0.001  ;;  %v1761_v7 = vadd.f32 %v4230_v44, %v4536_v43  ;;  %v1807_v40 = vadd.f32 %v4252_v26, %v1806_v49 }
 0x1ef   :  { %v4604_v39 = vadd.f32 %v1636_v3, %v1614_v16  ;;  %v4613_v50 = vadd.f32 %v1905_v53, %v2847_v58  ;;  %v1768_v19 = vstv %s4594_s26 }
 0x1f0   :  { %v2328_v17 = vpop.eup %2327  ;;  %v1938_v3 = vmul.f32 %v1931_v59, %v4974_v60 }
 0x1f1   :  { %v2330_v57 = vpop.eup %2329  ;;  %v1723_v23 = vmul.f32 %v2328_v17, %v4870_v36  ;;  %v1814_v17 = vstv %s4602_s28 }
 0x1f2   :  { %v1756_v0 = vmul.f32 %v2330_v57, %v4981_v46  ;;  %v4623_v58 = vadd.f32 %v1938_v3, %v4976_v4  ;;  %v1791_v4 = vstv %s4597_s27 }
 0x1f3   :  { %v1762_v9 = vmul.f32 %v1759_v54, %v1723_v23  ;;  %v1785_v5 = vmul.f32 %v1782_v25, %v1723_v23  ;;  %v1808_v10 = vmul.f32 %v1805_v37, %v1723_v23  ;;  %v5028_v54 = vld [vmem:[#allocation32_spill] sm:$0xff] }
 0x1f4   :  { %v1765_v43 = vmul.f32 %v1761_v7, %v1756_v0  ;;  %v1788_v29 = vmul.f32 %v1784_v31, %v1756_v0  ;;  %v1811_v8 = vmul.f32 %v1807_v40, %v1756_v0  ;;  %v5029_v31 = vld [vmem:[#allocation38_spill] sm:$0xff] }
 0x1f5   :  { %v1763_v6 = vadd.f32 %v1762_v9, %v4874_v14  ;;  %v1786_v60 = vadd.f32 %v1785_v5, %v5004_v11  ;;  %v1809_v21 = vadd.f32 %v1808_v10, %v5005_v42 }
 0x1f6   :  { %v1766_v49 = vadd.f32 %v1765_v43, %v5027_v47  ;;  %v1789_v16 = vadd.f32 %v1788_v29, %v5008_v61  ;;  %v1812_v53 = vadd.f32 %v1811_v8, %v5013_v63 }
 0x1f7   :  { %v1764_v59 = vmul.f32 %v1763_v6, %v5028_v54  ;;  %v1787_v25 = vmul.f32 %v1786_v60, %v5028_v54  ;;  %v1810_v37 = vmul.f32 %v1809_v21, %v5028_v54 }
 0x1f8   :  { %v2332_v7 = vpop.eup %2331  ;;  %v1767_v40 = vmul.f32 %v1766_v49, %v5029_v31  ;;  %v1790_v3 = vmul.f32 %v1789_v16, %v5029_v31  ;;  %v1813_v57 = vmul.f32 %v1812_v53, %v5029_v31 }
 0x1f9   :  { %v1868_v5 = vmul.f32 %v2332_v7, %v4557_v12  ;;  %v1869_v10 = vmul.f32 %v2332_v7, %v4561_v1  ;;  %v1870_v6 = vmul.f32 %v2332_v7, %v4565_v32  ;;  %v1769_v60 = vmul.f32 %v1768_v19, %v1764_v59 }
 0x1fa   :  { %v1772_v23 = vmul.f32 %v1768_v19, %v1767_v40  ;;  %v1795_v0 = vmul.f32 %v1791_v4, %v1790_v3  ;;  %v1818_v9 = vmul.f32 %v1814_v17, %v1813_v57  ;;  %v1792_v54 = vmul.f32 %v1791_v4, %v1787_v25 }
 0x1fb   :  { %v1871_v21 = vmul.f32 %v1868_v5, %v4540_v52  ;;  %v1872_v49 = vmul.f32 %v1869_v10, %v4543_v51  ;;  %v1815_v40 = vmul.f32 %v1814_v17, %v1810_v37  ;;  %v1881_v3 = vmul.f32 %v1868_v5, %v4913_v35 }
 0x1fc   :  { %v1773_v43 = vmax.f32 %v1772_v23, 0.0  ;;  %v1796_v29 = vmax.f32 %v1795_v0, 0.0  ;;  %v1819_v8 = vmax.f32 %v1818_v9, 0.0  ;;  %v1882_v12 = vmul.f32 %v1869_v10, %v4914_v18 }
 0x1fd   :  { %v1884_v1 = vmul.f32 %v1870_v6, %v2928_v27  ;;  %v1914_v57 = vmul.f32 %v1868_v5, %v2933_v41  ;;  %v1915_v32 = vmul.f32 %v1869_v10, %v2936_v34  ;;  %v1917_v52 = vmul.f32 %v1870_v6, %v2939_v22 }
 0x1fe   :  { %v1774_v16 = vadd.f32 0.1, %v1773_v43  ;;  %v1797_v53 = vadd.f32 0.1, %v1796_v29  ;;  %v1820_v31 = vadd.f32 0.1, %v1819_v8  ;;  %v1873_v51 = vadd.f32 %v1872_v49, %v1871_v21 }
 0x1ff   :  { %v1874_v19 = vmul.f32 %v1870_v6, %v4545_v15  ;;  %v1883_v4 = vadd.f32 %v1882_v12, %v1881_v3  ;;  %v1916_v59 = vadd.f32 %v1915_v32, %v1914_v57  ;;  %v1770_v25 = vmax.f32 %v1769_v60, 0.0 }
 0x200   :  { %2333 = vrcp.f32 %v1774_v16  ;;  %v1793_v37 = vmax.f32 %v1792_v54, 0.0  ;;  %v1816_v17 = vmax.f32 %v1815_v40, 0.0 }
 0x201   :  { %2335 = vrcp.f32 %v1797_v53  ;;  %v1885_v35 = vadd.f32 %v1884_v1, %v1883_v4  ;;  %v1918_v18 = vadd.f32 %v1917_v52, %v1916_v59  ;;  %v1875_v27 = vadd.f32 %v1874_v19, %v1873_v51 }
 0x202   :  { %2337 = vrcp.f32 %v1820_v31  ;;  %v1771_v41 = vadd.f32 0.1, %v1770_v25  ;;  %v1794_v34 = vadd.f32 0.1, %v1793_v37  ;;  %v1817_v22 = vadd.f32 0.1, %v1816_v17 }
 0x203   :  { %v1886_v7 = vmax.f32 %v1885_v35, 0.001  ;;  %v1919_v23 = vmax.f32 %v1918_v18, 0.001  ;;  %v1876_v5 = vmax.f32 %v1875_v27, 0.001 }
 0x205   :  { %v1899_v0 = vmul.f32 %v1886_v7, %v1886_v7  ;;  %v1932_v9 = vmul.f32 %v1919_v23, %v1919_v23  ;;  %v1877_v54 = vsub.f32 1.0, %v1876_v5  ;;  %v5030_v23 = vld [vmem:[#allocation35_spill] sm:$0xff] }
 0x207   :  { %v1900_v10 = vmul.f32 %v4994_v2, %v1899_v0  ;;  %v1933_v43 = vmul.f32 %v5019_v28, %v1932_v9  ;;  %v1878_v12 = vmul.f32 %v1877_v54, %v1877_v54 }
 0x209   :  { %v1901_v6 = vadd.f32 1.0, %v1900_v10  ;;  %v1934_v49 = vadd.f32 1.0, %v1933_v43  ;;  %v1879_v32 = vmul.f32 %v1878_v12, %v1878_v12 }
 0x20a   :  { %v2334_v15 = vpop.eup %2333 }
 0x20b   :  { %v2336_v29 = vpop.eup %2335  ;;  %v1776_v8 = vmul.f32 %v2334_v15, %v1771_v41  ;;  %v1902_v53 = vmax.f32 %v1901_v6, 0.001  ;;  %v1935_v31 = vmax.f32 %v1934_v49, 0.001  ;;  %v1880_v37 = vmul.f32 %v1879_v32, %v1877_v54 }
 0x20c   :  { %v2338_v60 = vpop.eup %2337  ;;  %v1799_v21 = vmul.f32 %v2336_v29, %v1794_v34  ;;  %v1980_v49 = vstv %s4667_s4 }
 0x20d   :  { %2339 = vlog2.f32 %v1776_v8  ;;  %v1822_v16 = vmul.f32 %v2338_v60, %v1817_v22  ;;  %v1907_v40 = vmul.f32 4.0, %v1902_v53  ;;  %v1940_v3 = vmul.f32 4.0, %v1935_v31 }
 0x20e   :  { %2341 = vlog2.f32 %v1799_v21  ;;  %v1949_v41 = vmul.f32 %v1880_v37, %v5030_v23  ;;  %v1972_v0 = vmul.f32 %v1880_v37, %v5025_v62  ;;  %v1995_v34 = vmul.f32 %v1880_v37, %v4973_v13 }
 0x20f   :  { %2343 = vlog2.f32 %v1822_v16  ;;  %v1908_v2 = vmul.f32 %v1907_v40, %v1902_v53  ;;  %v1941_v1 = vmul.f32 %v1940_v3, %v1935_v31  ;;  %v5031_v16 = vld [vmem:[#allocation39_spill] sm:$0xff]  ;;  %v2003_v40 = vstv %s4669_s10 }
 0x210   :  { %v1950_v62 = vadd.f32 %v4230_v44, %v1949_v41  ;;  %v1973_v13 = vadd.f32 %v4249_v56, %v1972_v0  ;;  %v1996_v5 = vadd.f32 %v4252_v26, %v1995_v34  ;;  %v1957_v44 = vstv %s4665_s0 }
 0x211   :  { %v1909_v28 = vmul.f32 %v1908_v2, %v4549_v20  ;;  %v1942_v57 = vmul.f32 %v1941_v1, %v4588_v33  ;;  %v1947_v20 = vmul.f32 %v1880_v37, %v5021_v30 }
 0x213   :  { %v1910_v52 = vmul.f32 %v1909_v28, %v4613_v50  ;;  %v1943_v51 = vmul.f32 %v1942_v57, %v4623_v58  ;;  %v1970_v50 = vmul.f32 %v1880_v37, %v5024_v38  ;;  %v1993_v58 = vmul.f32 %v1880_v37, %v5026_v24 }
 0x215   :  { %2345 = vrcp.f32 %v1910_v52  ;;  %v1971_v38 = vadd.f32 %v4606_v48, %v1970_v50  ;;  %v1994_v24 = vadd.f32 %v4609_v55, %v1993_v58 }
 0x216   :  { %2347 = vrcp.f32 %v1943_v51 }
 0x217   :  { %v2340_v19 = vpop.eup %2339 }
 0x218   :  { %v2342_v4 = vpop.eup %2341  ;;  %v1778_v59 = vmul.f32 0.6931472, %v2340_v19 }
 0x219   :  { %v2344_v25 = vpop.eup %2343  ;;  %v1801_v35 = vmul.f32 0.6931472, %v2342_v4 }
 0x21a   :  { %v1779_v18 = vand.u32 2147483647, %v1778_v59  ;;  %v1824_v17 = vmul.f32 0.6931472, %v2344_v25 }
 0x21b   :  { %v1802_v27 = vand.u32 2147483647, %v1801_v35 }
 0x21c   :  { %v1780_v33 = vadd.f32 %v1779_v18, %v4604_v39  ;;  %v1825_v7 = vand.u32 2147483647, %v1824_v17  ;;  %v1948_v39 = vadd.f32 %v4599_v45, %v1947_v20 }
 0x21e   :  { %v1803_v9 = vadd.f32 %v1802_v27, %v1780_v33 }
 0x21f   :  { %v2346_v22 = vpop.eup %2345 }
 0x220   :  { %v4671_v30 = vadd.f32 %v1825_v7, %v1803_v9  ;;  %v2348_v10 = vpop.eup %2347  ;;  %v1912_v15 = vmul.f32 %v2346_v22, %v4870_v36 }
 0x221   :  { %v1945_v43 = vmul.f32 %v2348_v10, %v4981_v46 }
 0x222   :  { %v1951_v29 = vmul.f32 %v1948_v39, %v1912_v15  ;;  %v1974_v45 = vmul.f32 %v1971_v38, %v1912_v15  ;;  %v1997_v48 = vmul.f32 %v1994_v24, %v1912_v15 }
 0x223   :  { %v1954_v8 = vmul.f32 %v1950_v62, %v1945_v43  ;;  %v1977_v6 = vmul.f32 %v1973_v13, %v1945_v43  ;;  %v2000_v55 = vmul.f32 %v1996_v5, %v1945_v43 }
 0x224   :  { %v1952_v60 = vadd.f32 %v1951_v29, %v4874_v14  ;;  %v1975_v56 = vadd.f32 %v1974_v45, %v5004_v11  ;;  %v1998_v26 = vadd.f32 %v1997_v48, %v5005_v42  ;;  %v5032_v14 = vld [vmem:[#allocation20_spill] sm:$0xff] }
 0x225   :  { %v1955_v21 = vadd.f32 %v1954_v8, %v5027_v47  ;;  %v1978_v36 = vadd.f32 %v1977_v6, %v5008_v61  ;;  %v2001_v46 = vadd.f32 %v2000_v55, %v5013_v63 }
 0x226   :  { %v1953_v54 = vmul.f32 %v1952_v60, %v5031_v16  ;;  %v1976_v53 = vmul.f32 %v1975_v56, %v5031_v16  ;;  %v1999_v31 = vmul.f32 %v1998_v26, %v5031_v16 }
 0x227   :  { %v1956_v3 = vmul.f32 %v1955_v21, %v5032_v14  ;;  %v1979_v11 = vmul.f32 %v1978_v36, %v5032_v14  ;;  %v2002_v42 = vmul.f32 %v2001_v46, %v5032_v14 }
 0x228   :  { %v1958_v52 = vmul.f32 %v1957_v44, %v1953_v54  ;;  %v1981_v51 = vmul.f32 %v1980_v49, %v1976_v53  ;;  %v2004_v19 = vmul.f32 %v2003_v40, %v1999_v31 }
 0x229   :  { %v1961_v12 = vmul.f32 %v1957_v44, %v1956_v3  ;;  %v1984_v47 = vmul.f32 %v1980_v49, %v1979_v11  ;;  %v2007_v2 = vmul.f32 %v2003_v40, %v2002_v42 }
 0x22a   :  { %v1959_v4 = vmax.f32 %v1958_v52, 0.0  ;;  %v1982_v59 = vmax.f32 %v1981_v51, 0.0  ;;  %v2005_v25 = vmax.f32 %v2004_v19, 0.0 }
 0x22b   :  { %v1962_v61 = vmax.f32 %v1961_v12, 0.0  ;;  %v1985_v1 = vmax.f32 %v1984_v47, 0.0  ;;  %v2008_v28 = vmax.f32 %v2007_v2, 0.0 }
 0x22c   :  { %v1960_v35 = vadd.f32 0.1, %v1959_v4  ;;  %v1983_v37 = vadd.f32 0.1, %v1982_v59  ;;  %v2006_v18 = vadd.f32 0.1, %v2005_v25 }
 0x22d   :  { %v1963_v63 = vadd.f32 0.1, %v1962_v61  ;;  %v1986_v57 = vadd.f32 0.1, %v1985_v1  ;;  %v2009_v32 = vadd.f32 0.1, %v2008_v28 }
 0x22f   :  { %2349 = vrcp.f32 %v1963_v63 }
 0x230   :  { %2351 = vrcp.f32 %v1986_v57 }
 0x231   :  { %2353 = vrcp.f32 %v2009_v32 }
 0x239   :  { %v2350_v17 = vpop.eup %2349 }
 0x23a   :  { %v2352_v27 = vpop.eup %2351  ;;  %v1965_v20 = vmul.f32 %v2350_v17, %v1960_v35 }
 0x23b   :  { %v2354_v33 = vpop.eup %2353  ;;  %v1988_v7 = vmul.f32 %v2352_v27, %v1983_v37 }
 0x23c   :  { %2355 = vlog2.f32 %v1965_v20  ;;  %v2011_v50 = vmul.f32 %v2354_v33, %v2006_v18 }
 0x23d   :  { %2357 = vlog2.f32 %v1988_v7 }
 0x23e   :  { %2359 = vlog2.f32 %v2011_v50 }
 0x246   :  { %v2356_v58 = vpop.eup %2355 }
 0x247   :  { %v2358_v23 = vpop.eup %2357  ;;  %v1967_v41 = vmul.f32 0.6931472, %v2356_v58 }
 0x248   :  { %v2360_v0 = vpop.eup %2359  ;;  %v1990_v34 = vmul.f32 0.6931472, %v2358_v23 }
 0x249   :  { %v1968_v9 = vand.u32 2147483647, %v1967_v41  ;;  %v2013_v39 = vmul.f32 0.6931472, %v2360_v0 }
 0x24a   :  { %v1991_v38 = vand.u32 2147483647, %v1990_v34 }
 0x24b   :  { %v1969_v24 = vadd.f32 %v1968_v9, %v4671_v30  ;;  %v2014_v22 = vand.u32 2147483647, %v2013_v39 }
 0x24d   :  { %v1992_v62 = vadd.f32 %v1991_v38, %v1969_v24 }
 0x24f   :  { %v2015_v13 = vadd.f32 %v2014_v22, %v1992_v62 }
 0x251   :  { %2024 = vst [vmem:[#allocation12 + $0x20] sm:$0xff] %v2015_v13 }
 0x252   :  { %2471 = shalt.err (!%p2468_p7)
}
 0x253   :  { %s2472_s19 = scalar_lea.hbm %s4718_s6, 640 }
 0x254   :  { %p2473_p8 = scmp.ne.s32.totalorder %s4718_s6, %s2472_s19  ;;  %p2476_p9 = scmp.lt.u32.totalorder %s2472_s19, %s4718_s6 }
 0x256   :  { %p2478_p10 = pnand %p2476_p9, %p2473_p8 }
 0x258   :  { %2481 = shalt.err (!%p2478_p10)
}
 0x259   :  { %2036 = dma.vmem_to_hbm [thread:$0]  %s2031_s12, 640, %s4718_s6, [#allocation4], %s2493_s29, %s2493_s29, %s2494_s30  }
 0x25a   :  { %2490 = dma.done.wait [#allocation4], 640  }
 0x25b   :  { %2491 = vsyncadd [#allocation4], 4294966656 }
 0x25c   :  { %2040 = vsyncpa [#allocation3], 1 }
 0x25d   :  { %2041 = vsyncpa [#allocation11], 1 }
 0x25e   :  { %2042 = vsyncpa [#allocation4], 1 }
 0x25f   :  { %2043 = vsyncpa [#allocation5], 1 }
 0x260   :  { %2044 = vsyncpa [#allocation7], 1 }

</bundles_post_ra>
